<compile_context>
chip_gen: v5e
topology: v5e:2x2
jax: 0.10.0
libtpu: 0.0.40
codegen_flags: <defaults>
</compile_context>

<pallas_src>
import jax
import jax.numpy as jnp
from jax.experimental import pallas as pl
from jax.experimental.pallas import tpu as pltpu


def _round_up(x, m):
    return (x + m - 1) // m * m


def _pick_tile_m(M, cap=512):
    """M-tile: multiple of 16 (bf16 sublane pack), <= cap, and < M so the grid
    has >= 2 steps when possible (both v7x TensorCores get work).  Falls back
    to the full dim (always a legal block) for tiny M."""
    tm = min(cap, _round_up(-(-M // 2), 16))
    return tm if tm < M else M


# ----------------------------------------------------------------------------
# Pallas kernel: out = relu(x @ w + b), bf16 operands, f32 accumulation
# ----------------------------------------------------------------------------
def _matmul_bias_relu_kernel(x_ref, w_ref, b_ref, o_ref):
    acc = jnp.dot(x_ref[...], w_ref[...], preferred_element_type=jnp.float32)
    acc = acc + b_ref[...]
    o_ref[...] = jnp.maximum(acc, 0.0).astype(o_ref.dtype)


def matmul_bias_relu(x, w, b, *, out_dtype=jnp.bfloat16, block_m=512):
    """relu(x @ w + b).  x: (M, K) bf16, w: (K, N) bf16, b: (1, N) f32."""
    M, K = x.shape
    K2, N = w.shape
    assert K == K2, (K, K2)
    tm = _pick_tile_m(M, cap=block_m)
    grid_m = pl.cdiv(M, tm)   # ragged last block: OOB rows are discarded on write
    return pl.pallas_call(
        _matmul_bias_relu_kernel,
        out_shape=jax.ShapeDtypeStruct((M, N), out_dtype),
        grid=(grid_m,),
        in_specs=[
            pl.BlockSpec((tm, K), lambda i: (i, 0)),   # M-tiled activations
            pl.BlockSpec((K, N), lambda i: (0, 0)),    # weight resident per call
            pl.BlockSpec((1, N), lambda i: (0, 0)),    # bias (f32)
        ],
        out_specs=pl.BlockSpec((tm, N), lambda i: (i, 0)),
        compiler_params=pltpu.CompilerParams(
            dimension_semantics=("parallel",)),
        cost_estimate=pl.CostEstimate(
            flops=int(2 * M * K * N),
            transcendentals=0,
            bytes_accessed=int(M * K * 2 + K * N * 2 + N * 4
                               + M * N * jnp.dtype(out_dtype).itemsize)),
    )(x, w, b)


# ----------------------------------------------------------------------------
# Fused FC head kernel: A = ( relu(x @ w1 + b1) . w2_row ) + b2
# (the 512->1 projection is a lane reduction, not a degenerate MXU matmul)
# ----------------------------------------------------------------------------
def _fc_head_kernel(x_ref, w1_ref, b1_ref, w2_ref, b2_ref, o_ref):
    h = jnp.dot(x_ref[...], w1_ref[...], preferred_element_type=jnp.float32)
    h = jnp.maximum(h + b1_ref[...], 0.0)                      # (tm, 512) f32
    a = jnp.sum(h * w2_ref[...], axis=-1, keepdims=True)       # XLU lane reduce
    o_ref[...] = (a + b2_ref[...]).astype(o_ref.dtype)


def fc_head(x, w1, b1, w2_row, b2, *, block_m=256):
    """x: (M, 3136) bf16, w1: (3136, 512) bf16, b1/w2_row: (1,512) f32, b2: (1,1) f32."""
    M, K = x.shape
    _, N = w1.shape
    tm = _pick_tile_m(M, cap=block_m)
    grid_m = pl.cdiv(M, tm)
    return pl.pallas_call(
        _fc_head_kernel,
        out_shape=jax.ShapeDtypeStruct((M, 1), jnp.float32),
        grid=(grid_m,),
        in_specs=[
            pl.BlockSpec((tm, K), lambda i: (i, 0)),
            pl.BlockSpec((K, N), lambda i: (0, 0)),
            pl.BlockSpec((1, N), lambda i: (0, 0)),
            pl.BlockSpec((1, N), lambda i: (0, 0)),
            pl.BlockSpec((1, 1), lambda i: (0, 0)),
        ],
        out_specs=pl.BlockSpec((tm, 1), lambda i: (i, 0)),
        compiler_params=pltpu.CompilerParams(
            dimension_semantics=("parallel",)),
        cost_estimate=pl.CostEstimate(
            flops=int(2 * M * K * N + 3 * M * N),
            transcendentals=0,
            bytes_accessed=int(M * K * 2 + K * N * 2 + (2 * N + 1) * 4 + M * 4)),
    )(x, w1, b1, w2_row, b2)


# ----------------------------------------------------------------------------
# Conv2d (NHWC activations, flattened HWIO weights) via im2col + Pallas matmul
# ----------------------------------------------------------------------------
def _im2col_nhwc(x, kh, kw, stride, padding):
    # TODO(synk): build patches in VMEM inside the Pallas kernel instead of via
    # XLA glue, to remove the kh*kw HBM read amplification (activations here
    # are tiny, <= ~200 KB per image, so this is the current lesser evil).
    B, H, W, C = x.shape
    if padding:
        x = jnp.pad(x, ((0, 0), (padding, padding), (padding, padding), (0, 0)))
    H_out = (H + 2 * padding - kh) // stride + 1
    W_out = (W + 2 * padding - kw) // stride + 1
    cols = []
    for i in range(kh):
        for j in range(kw):
            cols.append(x[:, i:i + stride * H_out:stride,
                          j:j + stride * W_out:stride, :])
    p = jnp.stack(cols, axis=3)                    # (B, H_out, W_out, kh*kw, C)
    p = p.reshape(B * H_out * W_out, kh * kw * C)  # patch index = (i*kw+j)*C + c
    return p, H_out, W_out


def conv2d_nhwc(x, w_flat, b, *, kh, kw, stride, padding, block_m=512):
    """x: (B,H,W,C) bf16; w_flat: (kh*kw*C, C_out) bf16; b: (1, C_out) f32."""
    B = x.shape[0]
    p, H_out, W_out = _im2col_nhwc(x, kh, kw, stride, padding)
    y = matmul_bias_relu(p, w_flat, b, out_dtype=jnp.bfloat16, block_m=block_m)
    return y.reshape(B, H_out, W_out, w_flat.shape[1])


# ----------------------------------------------------------------------------
# Parameters: PyTorch-layout init, then one-time conversion to kernel layout
# ----------------------------------------------------------------------------
def init_params(key):
    """PyTorch-layout params (OIHW convs, (out,in) linears), f32, U(-1/sqrt(fan_in), ...)."""
    def uniform(k, shape, fan_in):
        bound = 1.0 / (fan_in ** 0.5)
        return jax.random.uniform(k, shape, jnp.float32, -bound, bound)

    ks = jax.random.split(key, 10)
    return {
        "conv1_w": uniform(ks[0], (32, 4, 8, 8), 4 * 8 * 8),
        "conv1_b": uniform(ks[1], (32,), 4 * 8 * 8),
        "conv2_w": uniform(ks[2], (64, 32, 4, 4), 32 * 4 * 4),
        "conv2_b": uniform(ks[3], (64,), 32 * 4 * 4),
        "conv3_w": uniform(ks[4], (64, 64, 3, 3), 64 * 3 * 3),
        "conv3_b": uniform(ks[5], (64,), 64 * 3 * 3),
        "fc1_w": uniform(ks[6], (512, 64 * 7 * 7), 64 * 7 * 7),
        "fc1_b": uniform(ks[7], (512,), 64 * 7 * 7),
        "A_w": uniform(ks[8], (1, 512), 512),
        "A_b": uniform(ks[9], (1,), 512),
    }


def _conv_weight_hwio_flat(w_oihw, scale=1.0):
    """OIHW -> flattened HWIO (kh*kw*I, O) bf16 (matches im2col patch order)."""
    o, i, kh, kw = w_oihw.shape
    w = jnp.transpose(w_oihw, (2, 3, 1, 0)).reshape(kh * kw * i, o)
    if scale != 1.0:
        w = w * jnp.float32(scale)
    return w.astype(jnp.bfloat16)


def prepare_params(p):
    """One-time conversion to the kernel-friendly layout (outside the hot path)."""
    # PyTorch's view(-1, 64*7*7) flattens NCHW; our activations flatten as NHWC,
    # so permute the fc1 weight rows accordingly (pure relabeling, same function).
    fc1_w = p["fc1_w"].reshape(512, 64, 7, 7).transpose(0, 2, 3, 1)
    fc1_w = fc1_w.reshape(512, 64 * 7 * 7).T              # (3136, 512), HWC row order
    return {
        # /255 input scaling folded into conv1's weights: (x/255) @ W == x @ (W/255).
        "conv1_w": _conv_weight_hwio_flat(p["conv1_w"], scale=1.0 / 255.0),
        "conv1_b": p["conv1_b"].reshape(1, 32).astype(jnp.float32),
        "conv2_w": _conv_weight_hwio_flat(p["conv2_w"]),
        "conv2_b": p["conv2_b"].reshape(1, 64).astype(jnp.float32),
        "conv3_w": _conv_weight_hwio_flat(p["conv3_w"]),
        "conv3_b": p["conv3_b"].reshape(1, 64).astype(jnp.float32),
        "fc1_w": fc1_w.astype(jnp.bfloat16),
        "fc1_b": p["fc1_b"].reshape(1, 512).astype(jnp.float32),
        "A_w": p["A_w"].reshape(1, 512).astype(jnp.float32),
        "A_b": p["A_b"].reshape(1, 1).astype(jnp.float32),
    }


# ----------------------------------------------------------------------------
# Forward pass (mirrors ActionNetwork.forward)
# ----------------------------------------------------------------------------
def action_network_forward(kparams, observation):
    obs = observation.reshape(-1, 4, 84, 84)
    # Single NCHW -> NHWC transpose of the raw (smallest) tensor; everything
    # downstream stays NHWC.  uint8 values are exact in bf16; /255 is folded
    # into conv1's weights.
    obs = jnp.transpose(obs, (0, 2, 3, 1)).astype(jnp.bfloat16)
    h = conv2d_nhwc(obs, kparams["conv1_w"], kparams["conv1_b"],
                    kh=8, kw=8, stride=4, padding=1)          # (B, 20, 20, 32)
    h = conv2d_nhwc(h, kparams["conv2_w"], kparams["conv2_b"],
                    kh=4, kw=4, stride=2, padding=0)          # (B, 9, 9, 64)
    h = conv2d_nhwc(h, kparams["conv3_w"], kparams["conv3_b"],
                    kh=3, kw=3, stride=1, padding=0)          # (B, 7, 7, 64)
    h = h.reshape(h.shape[0], 64 * 7 * 7)                     # free flatten (HWC order)
    A = fc_head(h, kparams["fc1_w"], kparams["fc1_b"],
                kparams["A_w"], kparams["A_b"])                # fused fc1 + A head
    return A                                                   # (B, 1) f32


if __name__ == "__main__":
    key = jax.random.PRNGKey(0)
    pkey, xkey = jax.random.split(key)
    kparams = prepare_params(init_params(pkey))

    # Spatial size is fixed by the module (view(-1, 4, 84, 84)); keep batch small.
    x = jax.random.randint(xkey, (2, 4, 84, 84), 0, 256,
                           dtype=jnp.int32).astype(jnp.uint8)

    fwd = jax.jit(action_network_forward)
    out = jax.block_until_ready(fwd(kparams, x))

    assert out.shape == (2, 1), out.shape
    assert bool(jnp.all(jnp.isfinite(out)))
    print("KERNEL_OK")
</pallas_src>

<mosaic_0001>
module attributes {stable_mosaic.version = 11 : i64} {
  func.func @_matmul_bias_relu_kernel(%arg0: i32, %arg1: memref<400x256xbf16, #tpu.memory_space<vmem>>, %arg2: memref<256x32xbf16, #tpu.memory_space<vmem>>, %arg3: memref<1x32xf32, #tpu.memory_space<vmem>>, %arg4: memref<400x32xbf16, #tpu.memory_space<vmem>>) attributes {dimension_semantics = [#tpu.dimension_semantics<parallel>], iteration_bounds = array<i64: 2>, scalar_prefetch = 0 : i64, scratch_operands = 0 : i64, tpu.core_type = #tpu.core_type<tc>, window_params = [{transform_indices = @transform_0, window_bounds = array<i64: 400, 256>}, {pipeline_mode = #tpu.pipeline_mode<synchronous>, transform_indices = @transform_1, window_bounds = array<i64: 256, 32>}, {pipeline_mode = #tpu.pipeline_mode<synchronous>, transform_indices = @transform_2, window_bounds = array<i64: 1, 32>}, {transform_indices = @transform_3, window_bounds = array<i64: 400, 32>}]} {
    %c0 = arith.constant 0 : index
    %c0_0 = arith.constant 0 : index
    %0 = vector.load %arg1[%c0, %c0_0] : memref<400x256xbf16, #tpu.memory_space<vmem>>, vector<400x256xbf16>
    %c0_1 = arith.constant 0 : index
    %c0_2 = arith.constant 0 : index
    %1 = vector.load %arg2[%c0_1, %c0_2] : memref<256x32xbf16, #tpu.memory_space<vmem>>, vector<256x32xbf16>
    %cst = arith.constant dense<0.000000e+00> : vector<400x32xf32>
    %2 = tpu.matmul %0, %1, %cst {dimension_numbers = #tpu.dot_dimension_numbers<[1], [0], [0], [1], [0, 0, 1, 1], [], []>} : vector<400x256xbf16>, vector<256x32xbf16>, vector<400x32xf32> -> vector<400x32xf32>
    %c0_3 = arith.constant 0 : index
    %c0_4 = arith.constant 0 : index
    %3 = vector.load %arg3[%c0_3, %c0_4] : memref<1x32xf32, #tpu.memory_space<vmem>>, vector<1x32xf32>
    %4 = vector.broadcast %3 : vector<1x32xf32> to vector<400x32xf32>
    %5 = arith.addf %2, %4 : vector<400x32xf32>
    %cst_5 = arith.constant 0.000000e+00 : f32
    %6 = vector.broadcast %cst_5 : f32 to vector<400x32xf32>
    %7 = arith.maximumf %5, %6 : vector<400x32xf32>
    %8 = arith.truncf %7 : vector<400x32xf32> to vector<400x32xbf16>
    %c0_6 = arith.constant 0 : index
    %c0_7 = arith.constant 0 : index
    %9 = vector.load %arg4[%c0_6, %c0_7] : memref<400x32xbf16, #tpu.memory_space<vmem>>, vector<400x32xbf16>
    tpu.vector_store %arg4[%c0_6, %c0_7], %8 {strides = array<i32>} : memref<400x32xbf16, #tpu.memory_space<vmem>>, vector<400x32xbf16>,
    return
  }
  func.func @transform_0(%arg0: i32) -> (i32, i32) {
    %c0_i32 = arith.constant 0 : i32
    %c0_i32_0 = arith.constant 0 : i32
    return %arg0, %c0_i32 : i32, i32
  }
  func.func @transform_1(%arg0: i32) -> (i32, i32) {
    %c0_i32 = arith.constant 0 : i32
    %c0_i32_0 = arith.constant 0 : i32
    %c0_i32_1 = arith.constant 0 : i32
    return %c0_i32, %c0_i32_0 : i32, i32
  }
  func.func @transform_2(%arg0: i32) -> (i32, i32) {
    %c0_i32 = arith.constant 0 : i32
    %c0_i32_0 = arith.constant 0 : i32
    %c0_i32_1 = arith.constant 0 : i32
    return %c0_i32, %c0_i32_0 : i32, i32
  }
  func.func @transform_3(%arg0: i32) -> (i32, i32) {
    %c0_i32 = arith.constant 0 : i32
    %c0_i32_0 = arith.constant 0 : i32
    return %arg0, %c0_i32 : i32, i32
  }
}

module attributes {stable_mosaic.version = 11 : i64} {
  func.func @_matmul_bias_relu_kernel(%arg0: i32, %arg1: memref<96x512xbf16, #tpu.memory_space<vmem>>, %arg2: memref<512x64xbf16, #tpu.memory_space<vmem>>, %arg3: memref<1x64xf32, #tpu.memory_space<vmem>>, %arg4: memref<96x64xbf16, #tpu.memory_space<vmem>>) attributes {dimension_semantics = [#tpu.dimension_semantics<parallel>], iteration_bounds = array<i64: 2>, scalar_prefetch = 0 : i64, scratch_operands = 0 : i64, tpu.core_type = #tpu.core_type<tc>, window_params = [{transform_indices = @transform_0, window_bounds = array<i64: 96, 512>}, {pipeline_mode = #tpu.pipeline_mode<synchronous>, transform_indices = @transform_1, window_bounds = array<i64: 512, 64>}, {pipeline_mode = #tpu.pipeline_mode<synchronous>, transform_indices = @transform_2, window_bounds = array<i64: 1, 64>}, {transform_indices = @transform_3, window_bounds = array<i64: 96, 64>}]} {
    %c0 = arith.constant 0 : index
    %c0_0 = arith.constant 0 : index
    %0 = vector.load %arg1[%c0, %c0_0] : memref<96x512xbf16, #tpu.memory_space<vmem>>, vector<96x512xbf16>
    %c0_1 = arith.constant 0 : index
    %c0_2 = arith.constant 0 : index
    %1 = vector.load %arg2[%c0_1, %c0_2] : memref<512x64xbf16, #tpu.memory_space<vmem>>, vector<512x64xbf16>
    %cst = arith.constant dense<0.000000e+00> : vector<96x64xf32>
    %2 = tpu.matmul %0, %1, %cst {dimension_numbers = #tpu.dot_dimension_numbers<[1], [0], [0], [1], [0, 0, 1, 1], [], []>} : vector<96x512xbf16>, vector<512x64xbf16>, vector<96x64xf32> -> vector<96x64xf32>
    %c0_3 = arith.constant 0 : index
    %c0_4 = arith.constant 0 : index
    %3 = vector.load %arg3[%c0_3, %c0_4] : memref<1x64xf32, #tpu.memory_space<vmem>>, vector<1x64xf32>
    %4 = vector.broadcast %3 : vector<1x64xf32> to vector<96x64xf32>
    %5 = arith.addf %2, %4 : vector<96x64xf32>
    %cst_5 = arith.constant 0.000000e+00 : f32
    %6 = vector.broadcast %cst_5 : f32 to vector<96x64xf32>
    %7 = arith.maximumf %5, %6 : vector<96x64xf32>
    %8 = arith.truncf %7 : vector<96x64xf32> to vector<96x64xbf16>
    %c0_6 = arith.constant 0 : index
    %c0_7 = arith.constant 0 : index
    %9 = vector.load %arg4[%c0_6, %c0_7] : memref<96x64xbf16, #tpu.memory_space<vmem>>, vector<96x64xbf16>
    tpu.vector_store %arg4[%c0_6, %c0_7], %8 {strides = array<i32>} : memref<96x64xbf16, #tpu.memory_space<vmem>>, vector<96x64xbf16>,
    return
  }
  func.func @transform_0(%arg0: i32) -> (i32, i32) {
    %c0_i32 = arith.constant 0 : i32
    %c0_i32_0 = arith.constant 0 : i32
    return %arg0, %c0_i32 : i32, i32
  }
  func.func @transform_1(%arg0: i32) -> (i32, i32) {
    %c0_i32 = arith.constant 0 : i32
    %c0_i32_0 = arith.constant 0 : i32
    %c0_i32_1 = arith.constant 0 : i32
    return %c0_i32, %c0_i32_0 : i32, i32
  }
  func.func @transform_2(%arg0: i32) -> (i32, i32) {
    %c0_i32 = arith.constant 0 : i32
    %c0_i32_0 = arith.constant 0 : i32
    %c0_i32_1 = arith.constant 0 : i32
    return %c0_i32, %c0_i32_0 : i32, i32
  }
  func.func @transform_3(%arg0: i32) -> (i32, i32) {
    %c0_i32 = arith.constant 0 : i32
    %c0_i32_0 = arith.constant 0 : i32
    return %arg0, %c0_i32 : i32, i32
  }
}

module attributes {stable_mosaic.version = 11 : i64} {
  func.func @_matmul_bias_relu_kernel(%arg0: i32, %arg1: memref<64x576xbf16, #tpu.memory_space<vmem>>, %arg2: memref<576x64xbf16, #tpu.memory_space<vmem>>, %arg3: memref<1x64xf32, #tpu.memory_space<vmem>>, %arg4: memref<64x64xbf16, #tpu.memory_space<vmem>>) attributes {dimension_semantics = [#tpu.dimension_semantics<parallel>], iteration_bounds = array<i64: 2>, scalar_prefetch = 0 : i64, scratch_operands = 0 : i64, tpu.core_type = #tpu.core_type<tc>, window_params = [{transform_indices = @transform_0, window_bounds = array<i64: 64, 576>}, {pipeline_mode = #tpu.pipeline_mode<synchronous>, transform_indices = @transform_1, window_bounds = array<i64: 576, 64>}, {pipeline_mode = #tpu.pipeline_mode<synchronous>, transform_indices = @transform_2, window_bounds = array<i64: 1, 64>}, {transform_indices = @transform_3, window_bounds = array<i64: 64, 64>}]} {
    %c0 = arith.constant 0 : index
    %c0_0 = arith.constant 0 : index
    %0 = vector.load %arg1[%c0, %c0_0] : memref<64x576xbf16, #tpu.memory_space<vmem>>, vector<64x576xbf16>
    %c0_1 = arith.constant 0 : index
    %c0_2 = arith.constant 0 : index
    %1 = vector.load %arg2[%c0_1, %c0_2] : memref<576x64xbf16, #tpu.memory_space<vmem>>, vector<576x64xbf16>
    %cst = arith.constant dense<0.000000e+00> : vector<64x64xf32>
    %2 = tpu.matmul %0, %1, %cst {dimension_numbers = #tpu.dot_dimension_numbers<[1], [0], [0], [1], [0, 0, 1, 1], [], []>} : vector<64x576xbf16>, vector<576x64xbf16>, vector<64x64xf32> -> vector<64x64xf32>
    %c0_3 = arith.constant 0 : index
    %c0_4 = arith.constant 0 : index
    %3 = vector.load %arg3[%c0_3, %c0_4] : memref<1x64xf32, #tpu.memory_space<vmem>>, vector<1x64xf32>
    %4 = vector.broadcast %3 : vector<1x64xf32> to vector<64x64xf32>
    %5 = arith.addf %2, %4 : vector<64x64xf32>
    %cst_5 = arith.constant 0.000000e+00 : f32
    %6 = vector.broadcast %cst_5 : f32 to vector<64x64xf32>
    %7 = arith.maximumf %5, %6 : vector<64x64xf32>
    %8 = arith.truncf %7 : vector<64x64xf32> to vector<64x64xbf16>
    %c0_6 = arith.constant 0 : index
    %c0_7 = arith.constant 0 : index
    %9 = vector.load %arg4[%c0_6, %c0_7] : memref<64x64xbf16, #tpu.memory_space<vmem>>, vector<64x64xbf16>
    tpu.vector_store %arg4[%c0_6, %c0_7], %8 {strides = array<i32>} : memref<64x64xbf16, #tpu.memory_space<vmem>>, vector<64x64xbf16>,
    return
  }
  func.func @transform_0(%arg0: i32) -> (i32, i32) {
    %c0_i32 = arith.constant 0 : i32
    %c0_i32_0 = arith.constant 0 : i32
    return %arg0, %c0_i32 : i32, i32
  }
  func.func @transform_1(%arg0: i32) -> (i32, i32) {
    %c0_i32 = arith.constant 0 : i32
    %c0_i32_0 = arith.constant 0 : i32
    %c0_i32_1 = arith.constant 0 : i32
    return %c0_i32, %c0_i32_0 : i32, i32
  }
  func.func @transform_2(%arg0: i32) -> (i32, i32) {
    %c0_i32 = arith.constant 0 : i32
    %c0_i32_0 = arith.constant 0 : i32
    %c0_i32_1 = arith.constant 0 : i32
    return %c0_i32, %c0_i32_0 : i32, i32
  }
  func.func @transform_3(%arg0: i32) -> (i32, i32) {
    %c0_i32 = arith.constant 0 : i32
    %c0_i32_0 = arith.constant 0 : i32
    return %arg0, %c0_i32 : i32, i32
  }
}

module attributes {stable_mosaic.version = 11 : i64} {
  func.func @_fc_head_kernel(%arg0: i32, %arg1: memref<2x3136xbf16, #tpu.memory_space<vmem>>, %arg2: memref<3136x512xbf16, #tpu.memory_space<vmem>>, %arg3: memref<1x512xf32, #tpu.memory_space<vmem>>, %arg4: memref<1x512xf32, #tpu.memory_space<vmem>>, %arg5: memref<1x1xf32, #tpu.memory_space<vmem>>, %arg6: memref<2x1xf32, #tpu.memory_space<vmem>>) attributes {dimension_semantics = [#tpu.dimension_semantics<parallel>], iteration_bounds = array<i64: 1>, scalar_prefetch = 0 : i64, scratch_operands = 0 : i64, tpu.core_type = #tpu.core_type<tc>, window_params = [{transform_indices = @transform_0, window_bounds = array<i64: 2, 3136>}, {pipeline_mode = #tpu.pipeline_mode<synchronous>, transform_indices = @transform_1, window_bounds = array<i64: 3136, 512>}, {pipeline_mode = #tpu.pipeline_mode<synchronous>, transform_indices = @transform_2, window_bounds = array<i64: 1, 512>}, {pipeline_mode = #tpu.pipeline_mode<synchronous>, transform_indices = @transform_3, window_bounds = array<i64: 1, 512>}, {pipeline_mode = #tpu.pipeline_mode<synchronous>, transform_indices = @transform_4, window_bounds = array<i64: 1, 1>}, {transform_indices = @transform_5, window_bounds = array<i64: 2, 1>}]} {
    %c0 = arith.constant 0 : index
    %c0_0 = arith.constant 0 : index
    %0 = vector.load %arg1[%c0, %c0_0] : memref<2x3136xbf16, #tpu.memory_space<vmem>>, vector<2x3136xbf16>
    %c0_1 = arith.constant 0 : index
    %c0_2 = arith.constant 0 : index
    %1 = vector.load %arg2[%c0_1, %c0_2] : memref<3136x512xbf16, #tpu.memory_space<vmem>>, vector<3136x512xbf16>
    %cst = arith.constant dense<0.000000e+00> : vector<2x512xf32>
    %2 = tpu.matmul %0, %1, %cst {dimension_numbers = #tpu.dot_dimension_numbers<[1], [0], [0], [1], [0, 0, 1, 1], [], []>} : vector<2x3136xbf16>, vector<3136x512xbf16>, vector<2x512xf32> -> vector<2x512xf32>
    %c0_3 = arith.constant 0 : index
    %c0_4 = arith.constant 0 : index
    %3 = vector.load %arg3[%c0_3, %c0_4] : memref<1x512xf32, #tpu.memory_space<vmem>>, vector<1x512xf32>
    %4 = vector.broadcast %3 : vector<1x512xf32> to vector<2x512xf32>
    %5 = arith.addf %2, %4 : vector<2x512xf32>
    %cst_5 = arith.constant 0.000000e+00 : f32
    %6 = vector.broadcast %cst_5 : f32 to vector<2x512xf32>
    %7 = arith.maximumf %5, %6 : vector<2x512xf32>
    %c0_6 = arith.constant 0 : index
    %c0_7 = arith.constant 0 : index
    %8 = vector.load %arg4[%c0_6, %c0_7] : memref<1x512xf32, #tpu.memory_space<vmem>>, vector<1x512xf32>
    %9 = vector.broadcast %8 : vector<1x512xf32> to vector<2x512xf32>
    %10 = arith.mulf %7, %9 : vector<2x512xf32>
    %cst_8 = arith.constant dense<0.000000e+00> : vector<2xf32>
    %11 = vector.multi_reduction <add>, %10, %cst_8 [1] : vector<2x512xf32> to vector<2xf32>
    %12 = vector.shape_cast %11 : vector<2xf32> to vector<2x1xf32>
    %c0_9 = arith.constant 0 : index
    %c0_10 = arith.constant 0 : index
    %13 = vector.load %arg5[%c0_9, %c0_10] : memref<1x1xf32, #tpu.memory_space<vmem>>, vector<1x1xf32>
    %14 = vector.broadcast %13 : vector<1x1xf32> to vector<2x1xf32>
    %15 = arith.addf %12, %14 : vector<2x1xf32>
    %c0_11 = arith.constant 0 : index
    %c0_12 = arith.constant 0 : index
    %16 = vector.load %arg6[%c0_11, %c0_12] : memref<2x1xf32, #tpu.memory_space<vmem>>, vector<2x1xf32>
    tpu.vector_store %arg6[%c0_11, %c0_12], %15 {strides = array<i32>} : memref<2x1xf32, #tpu.memory_space<vmem>>, vector<2x1xf32>,
    return
  }
  func.func @transform_0(%arg0: i32) -> (i32, i32) {
    %c0_i32 = arith.constant 0 : i32
    %c0_i32_0 = arith.constant 0 : i32
    return %arg0, %c0_i32 : i32, i32
  }
  func.func @transform_1(%arg0: i32) -> (i32, i32) {
    %c0_i32 = arith.constant 0 : i32
    %c0_i32_0 = arith.constant 0 : i32
    %c0_i32_1 = arith.constant 0 : i32
    return %c0_i32, %c0_i32_0 : i32, i32
  }
  func.func @transform_2(%arg0: i32) -> (i32, i32) {
    %c0_i32 = arith.constant 0 : i32
    %c0_i32_0 = arith.constant 0 : i32
    %c0_i32_1 = arith.constant 0 : i32
    return %c0_i32, %c0_i32_0 : i32, i32
  }
  func.func @transform_3(%arg0: i32) -> (i32, i32) {
    %c0_i32 = arith.constant 0 : i32
    %c0_i32_0 = arith.constant 0 : i32
    %c0_i32_1 = arith.constant 0 : i32
    return %c0_i32, %c0_i32_0 : i32, i32
  }
  func.func @transform_4(%arg0: i32) -> (i32, i32) {
    %c0_i32 = arith.constant 0 : i32
    %c0_i32_0 = arith.constant 0 : i32
    %c0_i32_1 = arith.constant 0 : i32
    return %c0_i32, %c0_i32_0 : i32, i32
  }
  func.func @transform_5(%arg0: i32) -> (i32, i32) {
    %c0_i32 = arith.constant 0 : i32
    %c0_i32_0 = arith.constant 0 : i32
    return %arg0, %c0_i32 : i32, i32
  }
}

</mosaic_0001>

<bundles_post_ra>
// kernel: action_network_forward.4
= control target key start
LH: loop header
LB: loop body
LE: loop exit
PB: predicated region body
PF: predicated region fallthrough
CT: control target
= control target key end

     0   :  { %s1478_s12 = smov 0   ;;  %s1812_s0 = inlined_call_operand.vmem [shape: bf16[800,256], index: 0, kind: input, shape index: {}]   ;;  %s1813_s1 = inlined_call_operand.vmem [shape: bf16[256,32], index: 1, kind: input, shape index: {}]   ;;  %s1814_s2 = inlined_call_operand.vmem [shape: f32[1,32], index: 2, kind: input, shape index: {}]   ;;  %s1815_s3 = inlined_call_operand.vmem [shape: bf16[800,32], index: 3, kind: output, shape index: {}]  }
   0x1 LB: > { %s1084_s13 = sadd.s32 4294967295, %s1456_s12   ;;  %p1088_p0 = scmp.ge.s32.totalorder %s1456_s12, 1  ;;  %s1456_s12 = sphi %s1478_s12, %s13_s12  }
   0x2   : > { %p139_p1 = scmp.lt.s32.totalorder %s1456_s12, 3 }
   0x4   : > { %p140_p2 = pnand %p1088_p0, %p139_p1 }
   0x5   : > { %s164_s26 = smul.u32 (!%p140_p2), 50, %s1084_s13 }
   0x6   : > { %143 = sbr.rel (%p140_p2) target bundleno = 384 (0x180), region = 32 }
   0x7   : > { %p165_p3 = scmp.lt.s32.totalorder (!%p140_p2), %s164_s26, 99 }
   0xb   : > { %v1416_v0 = vld [vmem:[%s1813_s1 + $0x38] sm:$0xff]  ;;  %v1415_v2 = vld [vmem:[%s1813_s1 + $0x30] sm:$0xff]  ;;  %v1414_v4 = vld [vmem:[%s1813_s1 + $0x28] sm:$0xff]  ;;  %s1817_s26 = smov (!%p165_p3, %s164_s26), 99  ;;  %vm977_vm0 = vcmask 257024  }
   0xc   : > { %v1424_v1 = vld [vmem:[%s1813_s1 + $0x78] sm:$0xff]  ;;  %609 = vmatpush.bf16.msra.mxu0 %v1416_v0  ;;  %1425 = vmatpush.bf16.msra.mxu2 %v1416_v0  ;;  %v1423_v3 = vld [vmem:[%s1813_s1 + $0x70] sm:$0xff]  ;;  %v1422_v5 = vld [vmem:[%s1813_s1 + $0x68] sm:$0xff]  ;;  %s1358_s13 = sshll.u32 %s1817_s26, 3  ;;  %s1091_s28 = sshll.u32 %s1817_s26, 2 }
   0xd   : > { %743 = vmatpush.bf16.msra.mxu1 %v1424_v1  ;;  %1433 = vmatpush.bf16.msra.mxu3 %v1424_v1  ;;  %v1413_v6 = vld [vmem:[%s1813_s1 + $0x20] sm:$0xff]  ;;  %v1412_v8 = vld [vmem:[%s1813_s1 + $0x18] sm:$0xff]  ;;  %v1411_v10 = vld [vmem:[%s1813_s1 + $0x10] sm:$0xff]  ;;  %s1531_s18 = scalar_lea.vmem %s1812_s0, %s1358_s13  ;;  %s1624_s4 = scalar_lea.vmem %s1815_s3, %s1091_s28 }
   0xe   : > { %v1421_v7 = vld [vmem:[%s1813_s1 + $0x60] sm:$0xff]  ;;  %v1420_v9 = vld [vmem:[%s1813_s1 + $0x58] sm:$0xff]  ;;  %v1419_v11 = vld [vmem:[%s1813_s1 + $0x50] sm:$0xff] }
   0xf   : > { %v1410_v12 = vld [vmem:[%s1813_s1 + $0x8] sm:$0xff]  ;;  %v1409_v14 = vld [vmem:[%s1813_s1] sm:$0xff]  ;;  %v1385_v22 = vld [vmem:[%s1531_s18 + $0xd4] sm:$0xf] }
  0x10   : > { %610 = vmatpush.bf16.msra.mxu0 %v1415_v2  ;;  %1426 = vmatpush.bf16.msra.mxu2 %v1415_v2  ;;  %v1418_v13 = vld [vmem:[%s1813_s1 + $0x48] sm:$0xff]  ;;  %v1417_v15 = vld [vmem:[%s1813_s1 + $0x40] sm:$0xff]  ;;  %v1200_v23 = vld [vmem:[%s1531_s18 + $0xd8] sm:$0xf0] }
  0x11   : > { %744 = vmatpush.bf16.msra.mxu1 %v1423_v3  ;;  %1434 = vmatpush.bf16.msra.mxu3 %v1423_v3  ;;  %v1094_v16 = vld [vmem:[%s1531_s18] sm:$0xf]  ;;  %v1360_v17 = vld [vmem:[%s1531_s18 + $0x4] sm:$0xf0]  ;;  %v1359_v20 = vld [vmem:[%s1531_s18 + $0x4] sm:$0xf]  ;;  %v1203_v27 = vor.u32 %v1385_v22, %v1200_v23 }
  0x12   : > { %v1190_v18 = vld [vmem:[%s1531_s18 + $0xc0] sm:$0xf]  ;;  %v1384_v19 = vld [vmem:[%s1531_s18 + $0xc4] sm:$0xf0]  ;;  %v1096_v21 = vld [vmem:[%s1531_s18 + $0x8] sm:$0xf0]  ;;  %v1095_v24 = vor.u32 %v1360_v17, %v1094_v16 }
  0x13   : > { %v1191_v25 = vor.u32 %v1384_v19, %v1190_v18  ;;  %v1099_v26 = vor.u32 %v1359_v20, %v1096_v21  ;;  %v1102_v28 = vld [vmem:[%s1531_s18 + $0x10] sm:$0xf]  ;;  %v1362_v29 = vld [vmem:[%s1531_s18 + $0x14] sm:$0xf0]  ;;  %v1361_v32 = vld [vmem:[%s1531_s18 + $0x14] sm:$0xf] }
  0x14   : > { %611 = vmatpush.bf16.msra.mxu0 %v1414_v4  ;;  %1427 = vmatpush.bf16.msra.mxu2 %v1414_v4  ;;  %v1198_v30 = vld [vmem:[%s1531_s18 + $0xd0] sm:$0xf]  ;;  %v1386_v31 = vld [vmem:[%s1531_s18 + $0xd4] sm:$0xf0]  ;;  %v1104_v33 = vld [vmem:[%s1531_s18 + $0x18] sm:$0xf0]  ;;  %v1103_v36 = vor.u32 %v1362_v29, %v1102_v28 }
  0x15   : > { %745 = vmatpush.bf16.msra.mxu1 %v1422_v5  ;;  %1435 = vmatpush.bf16.msra.mxu3 %v1422_v5  ;;  %v1387_v34 = vld [vmem:[%s1531_s18 + $0xe4] sm:$0xf]  ;;  %v1208_v35 = vld [vmem:[%s1531_s18 + $0xe8] sm:$0xf0]  ;;  %v1199_v37 = vor.u32 %v1386_v31, %v1198_v30  ;;  %v1107_v38 = vor.u32 %v1361_v32, %v1104_v33  ;;  %v1110_v40 = vld [vmem:[%s1531_s18 + $0x20] sm:$0xf] }
  0x16   : > { %v1211_v39 = vor.u32 %v1387_v34, %v1208_v35  ;;  %v1364_v41 = vld [vmem:[%s1531_s18 + $0x24] sm:$0xf0]  ;;  %v1206_v42 = vld [vmem:[%s1531_s18 + $0xe0] sm:$0xf]  ;;  %v1363_v44 = vld [vmem:[%s1531_s18 + $0x24] sm:$0xf] }
  0x17   : > { %v1388_v43 = vld [vmem:[%s1531_s18 + $0xe4] sm:$0xf0]  ;;  %v1112_v45 = vld [vmem:[%s1531_s18 + $0x28] sm:$0xf0]  ;;  %v1389_v46 = vld [vmem:[%s1531_s18 + $0xf4] sm:$0xf]  ;;  %v1111_v48 = vor.u32 %v1364_v41, %v1110_v40 }
  0x18   : > { %612 = vmatpush.bf16.msra.mxu0 %v1413_v6  ;;  %1428 = vmatpush.bf16.msra.mxu2 %v1413_v6  ;;  %v1216_v47 = vld [vmem:[%s1531_s18 + $0xf8] sm:$0xf0]  ;;  %v1207_v49 = vor.u32 %v1388_v43, %v1206_v42  ;;  %v1115_v50 = vor.u32 %v1363_v44, %v1112_v45  ;;  %v1118_v52 = vld [vmem:[%s1531_s18 + $0x30] sm:$0xf]  ;;  %v1366_v53 = vld [vmem:[%s1531_s18 + $0x34] sm:$0xf0] }
  0x19   : > { %746 = vmatpush.bf16.msra.mxu1 %v1421_v7  ;;  %1436 = vmatpush.bf16.msra.mxu3 %v1421_v7  ;;  %v1219_v51 = vor.u32 %v1389_v46, %v1216_v47  ;;  %v1214_v54 = vld [vmem:[%s1531_s18 + $0xf0] sm:$0xf]  ;;  %v1390_v55 = vld [vmem:[%s1531_s18 + $0xf4] sm:$0xf0]  ;;  %v1365_v56 = vld [vmem:[%s1531_s18 + $0x34] sm:$0xf]  ;;  %v1119_v60 = vor.u32 %v1366_v53, %v1118_v52 }
  0x1a   : > { %v1120_v57 = vld [vmem:[%s1531_s18 + $0x38] sm:$0xf0]  ;;  %v1391_v58 = vld [vmem:[%s1531_s18 + $0x104] sm:$0xf]  ;;  %v1224_v59 = vld [vmem:[%s1531_s18 + $0x108] sm:$0xf0]  ;;  %v1215_v61 = vor.u32 %v1390_v55, %v1214_v54 }
  0x1b   : > { %v1123_v62 = vor.u32 %v1365_v56, %v1120_v57  ;;  %v1227_v63 = vor.u32 %v1391_v58, %v1224_v59  ;;  %v1126_v0 = vld [vmem:[%s1531_s18 + $0x40] sm:$0xf]  ;;  %v1368_v1 = vld [vmem:[%s1531_s18 + $0x44] sm:$0xf0]  ;;  %v1367_v4 = vld [vmem:[%s1531_s18 + $0x44] sm:$0xf] }
  0x1c   : > { %613 = vmatpush.bf16.msra.mxu0 %v1412_v8  ;;  %1429 = vmatpush.bf16.msra.mxu2 %v1412_v8  ;;  %v1222_v2 = vld [vmem:[%s1531_s18 + $0x100] sm:$0xf]  ;;  %v1392_v3 = vld [vmem:[%s1531_s18 + $0x104] sm:$0xf0]  ;;  %v1128_v5 = vld [vmem:[%s1531_s18 + $0x48] sm:$0xf0]  ;;  %v1127_v8 = vor.u32 %v1368_v1, %v1126_v0 }
  0x1d   : > { %747 = vmatpush.bf16.msra.mxu1 %v1420_v9  ;;  %1437 = vmatpush.bf16.msra.mxu3 %v1420_v9  ;;  %v1393_v6 = vld [vmem:[%s1531_s18 + $0x114] sm:$0xf]  ;;  %v1232_v7 = vld [vmem:[%s1531_s18 + $0x118] sm:$0xf0]  ;;  %v1223_v9 = vor.u32 %v1392_v3, %v1222_v2  ;;  %v1395_v18 = vld [vmem:[%s1531_s18 + $0x124] sm:$0xf] }
  0x1e   : > { %v1369_v16 = vld [vmem:[%s1531_s18 + $0x54] sm:$0xf]  ;;  %v1136_v17 = vld [vmem:[%s1531_s18 + $0x58] sm:$0xf0]  ;;  %v1240_v19 = vld [vmem:[%s1531_s18 + $0x128] sm:$0xf0] }
  0x1f   : > { %v1139_v22 = vor.u32 %v1369_v16, %v1136_v17  ;;  %v1243_v23 = vor.u32 %v1395_v18, %v1240_v19  ;;  %v1371_v28 = vld [vmem:[%s1531_s18 + $0x64] sm:$0xf]  ;;  %v1144_v29 = vld [vmem:[%s1531_s18 + $0x68] sm:$0xf0]  ;;  %v1397_v30 = vld [vmem:[%s1531_s18 + $0x134] sm:$0xf] }
  0x20   : > { %614 = vmatpush.bf16.msra.mxu0 %v1411_v10  ;;  %1430 = vmatpush.bf16.msra.mxu2 %v1411_v10  ;;  %v1131_v10 = vor.u32 %v1367_v4, %v1128_v5  ;;  %v1248_v31 = vld [vmem:[%s1531_s18 + $0x138] sm:$0xf0]  ;;  %v1147_v34 = vor.u32 %v1371_v28, %v1144_v29  ;;  %v1373_v40 = vld [vmem:[%s1531_s18 + $0x74] sm:$0xf]  ;;  %v1399_v42 = vld [vmem:[%s1531_s18 + $0x144] sm:$0xf] }
  0x21   : > { %748 = vmatpush.bf16.msra.mxu1 %v1419_v11  ;;  %1438 = vmatpush.bf16.msra.mxu3 %v1419_v11  ;;  %v1235_v11 = vor.u32 %v1393_v6, %v1232_v7  ;;  %v1251_v35 = vor.u32 %v1397_v30, %v1248_v31  ;;  %v1152_v41 = vld [vmem:[%s1531_s18 + $0x78] sm:$0xf0]  ;;  %v1256_v43 = vld [vmem:[%s1531_s18 + $0x148] sm:$0xf0]  ;;  %v1400_v52 = vld [vmem:[%s1531_s18 + $0x144] sm:$0xf0] }
  0x22   : > { %v1155_v46 = vor.u32 %v1373_v40, %v1152_v41  ;;  %v1259_v47 = vor.u32 %v1399_v42, %v1256_v43  ;;  %v1375_v53 = vld [vmem:[%s1531_s18 + $0x84] sm:$0xf]  ;;  %v1160_v54 = vld [vmem:[%s1531_s18 + $0x88] sm:$0xf0]  ;;  %v1401_v55 = vld [vmem:[%s1531_s18 + $0x154] sm:$0xf] }
  0x23   : > { %v1264_v56 = vld [vmem:[%s1531_s18 + $0x158] sm:$0xf0]  ;;  %v1403_v16 = vld [vmem:[%s1531_s18 + $0x164] sm:$0xf]  ;;  %v1272_v17 = vld [vmem:[%s1531_s18 + $0x168] sm:$0xf0] }
  0x24   : > { %615 = vmatpush.bf16.msra.mxu0 %v1410_v12  ;;  %1431 = vmatpush.bf16.msra.mxu2 %v1410_v12  ;;  %v1134_v12 = vld [vmem:[%s1531_s18 + $0x50] sm:$0xf]  ;;  %v1380_v41 = vld [vmem:[%s1531_s18 + $0xa4] sm:$0xf0]  ;;  %v1270_v42 = vld [vmem:[%s1531_s18 + $0x160] sm:$0xf] }
  0x25   : > { %749 = vmatpush.bf16.msra.mxu1 %v1418_v13  ;;  %1439 = vmatpush.bf16.msra.mxu3 %v1418_v13  ;;  %v1370_v13 = vld [vmem:[%s1531_s18 + $0x54] sm:$0xf0]  ;;  %v1404_v43 = vld [vmem:[%s1531_s18 + $0x164] sm:$0xf0] }
  0x26   : > { %v1135_v20 = vor.u32 %v1370_v13, %v1134_v12  ;;  %v1402_v12 = vld [vmem:[%s1531_s18 + $0x154] sm:$0xf0]  ;;  %v1377_v13 = vld [vmem:[%s1531_s18 + $0x94] sm:$0xf] }
  0x28   : > { %616 = vmatpush.bf16.msra.mxu0 %v1409_v14  ;;  %1432 = vmatpush.bf16.msra.mxu2 %v1409_v14  ;;  %v1230_v14 = vld [vmem:[%s1531_s18 + $0x110] sm:$0xf] }
  0x29   : > { %750 = vmatpush.bf16.msra.mxu1 %v1417_v15  ;;  %1440 = vmatpush.bf16.msra.mxu3 %v1417_v15  ;;  %v1394_v15 = vld [vmem:[%s1531_s18 + $0x114] sm:$0xf0] }
  0x2a   : > { %v1231_v21 = vor.u32 %v1394_v15, %v1230_v14  ;;  %v1168_v14 = vld [vmem:[%s1531_s18 + $0x98] sm:$0xf0] }
  0x2b   : > { %617 = vmatmul.bf16.vlgmr.msra.gmra.mxu0 %v1095_v24  ;;  %677 = vmatmul.bf16.vlgmr.msra.gmra.mxu2 %v1191_v25  ;;  %v1142_v24 = vld [vmem:[%s1531_s18 + $0x60] sm:$0xf]  ;;  %v1372_v25 = vld [vmem:[%s1531_s18 + $0x64] sm:$0xf0] }
  0x2c   : > { %751 = vmatmul.bf16.vlgmr.msra.gmra.mxu1 %v1099_v26  ;;  %816 = vmatmul.bf16.vlgmr.msra.gmra.mxu3 %v1203_v27  ;;  %v1238_v26 = vld [vmem:[%s1531_s18 + $0x120] sm:$0xf]  ;;  %v1396_v27 = vld [vmem:[%s1531_s18 + $0x124] sm:$0xf0]  ;;  %v1143_v32 = vor.u32 %v1372_v25, %v1142_v24  ;;  %v1171_v24 = vor.u32 %v1377_v13, %v1168_v14  ;;  %v1275_v25 = vor.u32 %v1403_v16, %v1272_v17  ;;  %v1278_v16 = vld [vmem:[%s1531_s18 + $0x170] sm:$0xf] }
  0x2d   : > { %v1239_v33 = vor.u32 %v1396_v27, %v1238_v26  ;;  %v1406_v17 = vld [vmem:[%s1531_s18 + $0x174] sm:$0xf0] }
  0x3b   : > { %622 = vmatmul.bf16.gmra.mxu0 %v1103_v36  ;;  %682 = vmatmul.bf16.gmra.mxu2 %v1199_v37  ;;  %v1150_v36 = vld [vmem:[%s1531_s18 + $0x70] sm:$0xf]  ;;  %v1374_v37 = vld [vmem:[%s1531_s18 + $0x74] sm:$0xf0] }
  0x3c   : > { %756 = vmatmul.bf16.gmra.mxu1 %v1107_v38  ;;  %821 = vmatmul.bf16.gmra.mxu3 %v1211_v39  ;;  %v1246_v38 = vld [vmem:[%s1531_s18 + $0x130] sm:$0xf]  ;;  %v1398_v39 = vld [vmem:[%s1531_s18 + $0x134] sm:$0xf0]  ;;  %v1151_v44 = vor.u32 %v1374_v37, %v1150_v36 }
  0x3d   : > { %v1247_v45 = vor.u32 %v1398_v39, %v1246_v38  ;;  %v1174_v38 = vld [vmem:[%s1531_s18 + $0xa0] sm:$0xf] }
  0x4b   : > { %627 = vmatmul.bf16.gmra.mxu0 %v1111_v48  ;;  %687 = vmatmul.bf16.gmra.mxu2 %v1207_v49  ;;  %v1609_v48 = vld [vmem:[%s1814_s2] ss:$0 sm:$0xff] }
  0x4c   : > { %761 = vmatmul.bf16.gmra.mxu1 %v1115_v50  ;;  %826 = vmatmul.bf16.gmra.mxu3 %v1219_v51  ;;  %v1158_v49 = vld [vmem:[%s1531_s18 + $0x80] sm:$0xf]  ;;  %v1376_v50 = vld [vmem:[%s1531_s18 + $0x84] sm:$0xf0] }
  0x4d   : > { %v1254_v51 = vld [vmem:[%s1531_s18 + $0x140] sm:$0xf]  ;;  %v1159_v57 = vor.u32 %v1376_v50, %v1158_v49  ;;  %v1405_v49 = vld [vmem:[%s1531_s18 + $0x174] sm:$0xf]  ;;  %v1280_v50 = vld [vmem:[%s1531_s18 + $0x178] sm:$0xf0] }
  0x4e   : > { %v1255_v58 = vor.u32 %v1400_v52, %v1254_v51 }
  0x5b   : > { %632 = vmatmul.bf16.gmra.mxu0 %v1119_v60  ;;  %692 = vmatmul.bf16.gmra.mxu2 %v1215_v61  ;;  %v1163_v60 = vor.u32 %v1375_v53, %v1160_v54  ;;  %v1267_v61 = vor.u32 %v1401_v55, %v1264_v56  ;;  %v1175_v54 = vor.u32 %v1380_v41, %v1174_v38 }
  0x5c   : > { %766 = vmatmul.bf16.gmra.mxu1 %v1123_v62  ;;  %831 = vmatmul.bf16.gmra.mxu3 %v1227_v63  ;;  %v1271_v55 = vor.u32 %v1404_v43, %v1270_v42 }
  0x6b   : > { %637 = vmatmul.bf16.gmra.mxu0 %v1127_v8  ;;  %697 = vmatmul.bf16.gmra.mxu2 %v1223_v9  ;;  %v1166_v9 = vld [vmem:[%s1531_s18 + $0x90] sm:$0xf] }
  0x6c   : > { %771 = vmatmul.bf16.gmra.mxu1 %v1131_v10  ;;  %836 = vmatmul.bf16.gmra.mxu3 %v1235_v11  ;;  %v1378_v10 = vld [vmem:[%s1531_s18 + $0x94] sm:$0xf0]  ;;  %v1262_v11 = vld [vmem:[%s1531_s18 + $0x150] sm:$0xf] }
  0x7b   : > { %642 = vmatmul.bf16.gmra.mxu0 %v1135_v20  ;;  %702 = vmatmul.bf16.gmra.mxu2 %v1231_v21  ;;  %v1167_v20 = vor.u32 %v1378_v10, %v1166_v9  ;;  %v1263_v21 = vor.u32 %v1402_v12, %v1262_v11  ;;  %v1182_v12 = vld [vmem:[%s1531_s18 + $0xb0] sm:$0xf] }
  0x7c   : > { %776 = vmatmul.bf16.gmra.mxu1 %v1139_v22  ;;  %841 = vmatmul.bf16.gmra.mxu3 %v1243_v23 }
  0x8b   : > { %647 = vmatmul.bf16.gmra.mxu0 %v1143_v32  ;;  %707 = vmatmul.bf16.gmra.mxu2 %v1239_v33 }
  0x8c   : > { %781 = vmatmul.bf16.gmra.mxu1 %v1147_v34  ;;  %846 = vmatmul.bf16.gmra.mxu3 %v1251_v35 }
  0x9b   : > { %652 = vmatmul.bf16.gmra.mxu0 %v1151_v44  ;;  %712 = vmatmul.bf16.gmra.mxu2 %v1247_v45  ;;  %v1379_v44 = vld [vmem:[%s1531_s18 + $0xa4] sm:$0xf]  ;;  %v1176_v45 = vld [vmem:[%s1531_s18 + $0xa8] sm:$0xf0] }
  0x9c   : > { %786 = vmatmul.bf16.gmra.mxu1 %v1155_v46  ;;  %851 = vmatmul.bf16.gmra.mxu3 %v1259_v47 }
  0xa8   : > { %v618_v59 = vpop.f32.mrf.mxu0 }
  0xa9   : > { %v619_v62 = vadd.f32 %v1609_v48, %v618_v59  ;;  %v752_v63 = vpop.f32.mrf.mxu1  ;;  %v1283_v59 = vor.u32 %v1405_v49, %v1280_v50 }
  0xab   : > { %v753_v0 = vadd.f32 %v752_v63, %v619_v62  ;;  %657 = vmatmul.bf16.gmra.mxu0 %v1159_v57  ;;  %717 = vmatmul.bf16.gmra.mxu2 %v1255_v58  ;;  %v1179_v58 = vor.u32 %v1379_v44, %v1176_v45 }
  0xac   : > { %791 = vmatmul.bf16.gmra.mxu1 %v1163_v60  ;;  %856 = vmatmul.bf16.gmra.mxu3 %v1267_v61 }
  0xad   : > { %v877_v1 = vmax.f32 %v753_v0, 0.0 }
  0xae   : > { %v1626_v2 = vpop.f32.mrf.mxu2 }
  0xaf   : > { %v927_v3 = vpack.c.bf16 %v877_v1, %v877_v1  ;;  %v817_v4 = vpop.f32.mrf.mxu3 }
  0xb0   : > { %v620_v5 = vpop.f32.mrf.mxu0 }
  0xb1   : > { %978 = vst.msk [vmem:[%s1624_s4] sm:$0xf] %vm977_vm0, %v927_v3  ;;  %v621_v6 = vadd.f32 %v1609_v48, %v620_v5  ;;  %v754_v7 = vpop.f32.mrf.mxu1 }
  0xb3   : > { %v755_v8 = vadd.f32 %v754_v7, %v621_v6 }
  0xb5   : > { %v878_v15 = vmax.f32 %v755_v8, 0.0 }
  0xb6   : > { %v1639_v18 = vpop.f32.mrf.mxu2 }
  0xb7   : > { %v928_v19 = vpack.c.bf16 %v878_v15, %v878_v15  ;;  %v819_v22 = vpop.f32.mrf.mxu3  ;;  %v1382_v15 = vld [vmem:[%s1531_s18 + $0xb4] sm:$0xf0] }
  0xb8   : > { %v623_v23 = vpop.f32.mrf.mxu0 }
  0xb9   : > { %979 = vst.msk [vmem:[%s1624_s4 + $0x4] sm:$0xf] %vm977_vm0, %v928_v19  ;;  %v624_v26 = vadd.f32 %v1609_v48, %v623_v23  ;;  %v757_v27 = vpop.f32.mrf.mxu1  ;;  %v1381_v19 = vld [vmem:[%s1531_s18 + $0xb4] sm:$0xf]  ;;  %v1407_v23 = vld [vmem:[%s1531_s18 + $0x184] sm:$0xf] }
  0xbb   : > { %v758_v28 = vadd.f32 %v757_v27, %v624_v26  ;;  %662 = vmatmul.bf16.gmra.mxu0 %v1167_v20  ;;  %722 = vmatmul.bf16.gmra.mxu2 %v1263_v21  ;;  %v1184_v20 = vld [vmem:[%s1531_s18 + $0xb8] sm:$0xf0] }
  0xbc   : > { %796 = vmatmul.bf16.gmra.mxu1 %v1171_v24  ;;  %861 = vmatmul.bf16.gmra.mxu3 %v1275_v25  ;;  %v1288_v24 = vld [vmem:[%s1531_s18 + $0x188] sm:$0xf0] }
  0xbd   : > { %v879_v29 = vmax.f32 %v758_v28, 0.0  ;;  %v1183_v28 = vor.u32 %v1382_v15, %v1182_v12 }
  0xbe   : > { %v683_v30 = vpop.f32.mrf.mxu2 }
  0xbf   : > { %v929_v31 = vpack.c.bf16 %v879_v29, %v879_v29  ;;  %v684_v32 = vadd.f32 %v1609_v48, %v683_v30  ;;  %v822_v33 = vpop.f32.mrf.mxu3  ;;  %v1279_v29 = vor.u32 %v1406_v17, %v1278_v16 }
  0xc0   : > { %v625_v34 = vpop.f32.mrf.mxu0 }
  0xc1   : > { %980 = vst.msk [vmem:[%s1624_s4 + $0x8] sm:$0xf] %vm977_vm0, %v929_v31  ;;  %v818_v35 = vadd.f32 %v817_v4, %v684_v32  ;;  %v626_v36 = vadd.f32 %v1609_v48, %v625_v34  ;;  %v759_v37 = vpop.f32.mrf.mxu1  ;;  %v1187_v32 = vor.u32 %v1381_v19, %v1184_v20 }
  0xc3   : > { %v903_v39 = vmax.f32 %v818_v35, 0.0  ;;  %v760_v40 = vadd.f32 %v759_v37, %v626_v36 }
  0xc5   : > { %v953_v46 = vpack.c.bf16 %v903_v39, %v903_v39  ;;  %v880_v47 = vmax.f32 %v760_v40, 0.0 }
  0xc6   : > { %v685_v51 = vpop.f32.mrf.mxu2 }
  0xc7   : > { %1004 = vst.msk [vmem:[%s1624_s4 + $0x68] sm:$0xf] %vm977_vm0, %v953_v46  ;;  %v930_v52 = vpack.c.bf16 %v880_v47, %v880_v47  ;;  %v686_v53 = vadd.f32 %v1609_v48, %v685_v51  ;;  %v824_v56 = vpop.f32.mrf.mxu3 }
  0xc8   : > { %v628_v57 = vpop.f32.mrf.mxu0 }
  0xc9   : > { %981 = vst.msk [vmem:[%s1624_s4 + $0xc] sm:$0xf] %vm977_vm0, %v930_v52  ;;  %v820_v60 = vadd.f32 %v819_v22, %v686_v53  ;;  %v629_v61 = vadd.f32 %v1609_v48, %v628_v57  ;;  %v762_v62 = vpop.f32.mrf.mxu1  ;;  %v1286_v52 = vld [vmem:[%s1531_s18 + $0x180] sm:$0xf]  ;;  %v1408_v53 = vld [vmem:[%s1531_s18 + $0x184] sm:$0xf0] }
  0xca   : > { %v1192_v57 = vld [vmem:[%s1531_s18 + $0xc8] sm:$0xf0] }
  0xcb   : > { %v904_v63 = vmax.f32 %v820_v60, 0.0  ;;  %v763_v0 = vadd.f32 %v762_v62, %v629_v61  ;;  %667 = vmatmul.bf16.gmra.mxu0 %v1175_v54  ;;  %727 = vmatmul.bf16.gmra.mxu2 %v1271_v55  ;;  %v1287_v61 = vor.u32 %v1408_v53, %v1286_v52 }
  0xcc   : > { %801 = vmatmul.bf16.gmra.mxu1 %v1179_v58  ;;  %866 = vmatmul.bf16.gmra.mxu3 %v1283_v59 }
  0xcd   : > { %v954_v1 = vpack.c.bf16 %v904_v63, %v904_v63  ;;  %v881_v3 = vmax.f32 %v763_v0, 0.0 }
  0xce   : > { %v688_v4 = vpop.f32.mrf.mxu2 }
  0xcf   : > { %1005 = vst.msk [vmem:[%s1624_s4 + $0x6c] sm:$0xf] %vm977_vm0, %v954_v1  ;;  %v931_v5 = vpack.c.bf16 %v881_v3, %v881_v3  ;;  %v689_v6 = vadd.f32 %v1609_v48, %v688_v4  ;;  %v827_v7 = vpop.f32.mrf.mxu3 }
  0xd0   : > { %v630_v8 = vpop.f32.mrf.mxu0 }
  0xd1   : > { %982 = vst.msk [vmem:[%s1624_s4 + $0x10] sm:$0xf] %vm977_vm0, %v931_v5  ;;  %v823_v9 = vadd.f32 %v822_v33, %v689_v6  ;;  %v631_v10 = vadd.f32 %v1609_v48, %v630_v8  ;;  %v764_v11 = vpop.f32.mrf.mxu1  ;;  %v1291_v33 = vor.u32 %v1407_v23, %v1288_v24 }
  0xd3   : > { %v905_v13 = vmax.f32 %v823_v9, 0.0  ;;  %v765_v14 = vadd.f32 %v764_v11, %v631_v10 }
  0xd5   : > { %v955_v21 = vpack.c.bf16 %v905_v13, %v905_v13  ;;  %v882_v22 = vmax.f32 %v765_v14, 0.0 }
  0xd6   : > { %v690_v25 = vpop.f32.mrf.mxu2 }
  0xd7   : > { %1006 = vst.msk [vmem:[%s1624_s4 + $0x70] sm:$0xf] %vm977_vm0, %v955_v21  ;;  %v932_v26 = vpack.c.bf16 %v882_v22, %v882_v22  ;;  %v691_v27 = vadd.f32 %v1609_v48, %v690_v25  ;;  %v829_v30 = vpop.f32.mrf.mxu3 }
  0xd8   : > { %v633_v31 = vpop.f32.mrf.mxu0 }
  0xd9   : > { %983 = vst.msk [vmem:[%s1624_s4 + $0x14] sm:$0xf] %vm977_vm0, %v932_v26  ;;  %v825_v34 = vadd.f32 %v824_v56, %v691_v27  ;;  %v634_v35 = vadd.f32 %v1609_v48, %v633_v31  ;;  %v767_v36 = vpop.f32.mrf.mxu1  ;;  %v1383_v56 = vld [vmem:[%s1531_s18 + $0xc4] sm:$0xf] }
  0xda   : > { %v1195_v0 = vor.u32 %v1383_v56, %v1192_v57 }
  0xdb   : > { %v906_v37 = vmax.f32 %v825_v34, 0.0  ;;  %v768_v38 = vadd.f32 %v767_v36, %v634_v35  ;;  %672 = vmatmul.bf16.gmra.mxu0 %v1183_v28  ;;  %732 = vmatmul.bf16.gmra.mxu2 %v1279_v29 }
  0xdc   : > { %806 = vmatmul.bf16.gmra.mxu1 %v1187_v32  ;;  %871 = vmatmul.bf16.gmra.mxu3 %v1291_v33 }
  0xdd   : > { %v956_v39 = vpack.c.bf16 %v906_v37, %v906_v37  ;;  %v883_v40 = vmax.f32 %v768_v38, 0.0 }
  0xde   : > { %v693_v41 = vpop.f32.mrf.mxu2 }
  0xdf   : > { %1007 = vst.msk [vmem:[%s1624_s4 + $0x74] sm:$0xf] %vm977_vm0, %v956_v39  ;;  %v933_v42 = vpack.c.bf16 %v883_v40, %v883_v40  ;;  %v694_v43 = vadd.f32 %v1609_v48, %v693_v41  ;;  %v832_v44 = vpop.f32.mrf.mxu3 }
  0xe0   : > { %v635_v45 = vpop.f32.mrf.mxu0 }
  0xe1   : > { %984 = vst.msk [vmem:[%s1624_s4 + $0x18] sm:$0xf] %vm977_vm0, %v933_v42  ;;  %v828_v46 = vadd.f32 %v827_v7, %v694_v43  ;;  %v636_v47 = vadd.f32 %v1609_v48, %v635_v45  ;;  %v769_v49 = vpop.f32.mrf.mxu1 }
  0xe3   : > { %v907_v50 = vmax.f32 %v828_v46, 0.0  ;;  %v770_v51 = vadd.f32 %v769_v49, %v636_v47 }
  0xe5   : > { %v957_v54 = vpack.c.bf16 %v907_v50, %v907_v50  ;;  %v884_v55 = vmax.f32 %v770_v51, 0.0 }
  0xe6   : > { %v695_v58 = vpop.f32.mrf.mxu2 }
  0xe7   : > { %1008 = vst.msk [vmem:[%s1624_s4 + $0x78] sm:$0xf] %vm977_vm0, %v957_v54  ;;  %v934_v59 = vpack.c.bf16 %v884_v55, %v884_v55  ;;  %v696_v60 = vadd.f32 %v1609_v48, %v695_v58  ;;  %v834_v62 = vpop.f32.mrf.mxu3 }
  0xe8   : > { %v638_v63 = vpop.f32.mrf.mxu0 }
  0xe9   : > { %985 = vst.msk [vmem:[%s1624_s4 + $0x1c] sm:$0xf] %vm977_vm0, %v934_v59  ;;  %v830_v1 = vadd.f32 %v829_v30, %v696_v60  ;;  %v639_v3 = vadd.f32 %v1609_v48, %v638_v63  ;;  %v772_v4 = vpop.f32.mrf.mxu1 }
  0xeb   : > { %v908_v5 = vmax.f32 %v830_v1, 0.0  ;;  %v773_v6 = vadd.f32 %v772_v4, %v639_v3  ;;  %737 = vmatmul.bf16.gmra.mxu2 %v1287_v61 }
  0xec   : > { %811 = vmatmul.bf16.gmra.mxu1 %v1195_v0 }
  0xed   : > { %v958_v7 = vpack.c.bf16 %v908_v5, %v908_v5  ;;  %v885_v8 = vmax.f32 %v773_v6, 0.0 }
  0xee   : > { %v698_v9 = vpop.f32.mrf.mxu2 }
  0xef   : > { %1009 = vst.msk [vmem:[%s1624_s4 + $0x7c] sm:$0xf] %vm977_vm0, %v958_v7  ;;  %v935_v10 = vpack.c.bf16 %v885_v8, %v885_v8  ;;  %v699_v11 = vadd.f32 %v1609_v48, %v698_v9  ;;  %v837_v12 = vpop.f32.mrf.mxu3 }
  0xf0   : > { %v640_v13 = vpop.f32.mrf.mxu0 }
  0xf1   : > { %986 = vst.msk [vmem:[%s1624_s4 + $0x20] sm:$0xf] %vm977_vm0, %v935_v10  ;;  %v833_v14 = vadd.f32 %v832_v44, %v699_v11  ;;  %v641_v15 = vadd.f32 %v1609_v48, %v640_v13  ;;  %v774_v16 = vpop.f32.mrf.mxu1 }
  0xf3   : > { %v909_v17 = vmax.f32 %v833_v14, 0.0  ;;  %v775_v19 = vadd.f32 %v774_v16, %v641_v15 }
  0xf5   : > { %v959_v20 = vpack.c.bf16 %v909_v17, %v909_v17  ;;  %v886_v21 = vmax.f32 %v775_v19, 0.0 }
  0xf6   : > { %v700_v22 = vpop.f32.mrf.mxu2 }
  0xf7   : > { %1010 = vst.msk [vmem:[%s1624_s4 + $0x80] sm:$0xf] %vm977_vm0, %v959_v20  ;;  %v936_v23 = vpack.c.bf16 %v886_v21, %v886_v21  ;;  %v701_v24 = vadd.f32 %v1609_v48, %v700_v22  ;;  %v839_v25 = vpop.f32.mrf.mxu3 }
  0xf8   : > { %v643_v26 = vpop.f32.mrf.mxu0 }
  0xf9   : > { %987 = vst.msk [vmem:[%s1624_s4 + $0x24] sm:$0xf] %vm977_vm0, %v936_v23  ;;  %v835_v27 = vadd.f32 %v834_v62, %v701_v24  ;;  %v644_v28 = vadd.f32 %v1609_v48, %v643_v26  ;;  %v777_v29 = vpop.f32.mrf.mxu1 }
  0xfb   : > { %v910_v30 = vmax.f32 %v835_v27, 0.0  ;;  %v778_v31 = vadd.f32 %v777_v29, %v644_v28 }
  0xfd   : > { %v960_v32 = vpack.c.bf16 %v910_v30, %v910_v30  ;;  %v887_v33 = vmax.f32 %v778_v31, 0.0 }
  0xfe   : > { %v703_v34 = vpop.f32.mrf.mxu2 }
  0xff   : > { %1011 = vst.msk [vmem:[%s1624_s4 + $0x84] sm:$0xf] %vm977_vm0, %v960_v32  ;;  %v937_v35 = vpack.c.bf16 %v887_v33, %v887_v33  ;;  %v704_v36 = vadd.f32 %v1609_v48, %v703_v34  ;;  %v842_v37 = vpop.f32.mrf.mxu3 }
 0x100   : > { %v645_v38 = vpop.f32.mrf.mxu0 }
 0x101   : > { %988 = vst.msk [vmem:[%s1624_s4 + $0x28] sm:$0xf] %vm977_vm0, %v937_v35  ;;  %v838_v39 = vadd.f32 %v837_v12, %v704_v36  ;;  %v646_v40 = vadd.f32 %v1609_v48, %v645_v38  ;;  %v779_v41 = vpop.f32.mrf.mxu1 }
 0x103   : > { %v911_v42 = vmax.f32 %v838_v39, 0.0  ;;  %v780_v43 = vadd.f32 %v779_v41, %v646_v40 }
 0x105   : > { %v961_v44 = vpack.c.bf16 %v911_v42, %v911_v42  ;;  %v888_v45 = vmax.f32 %v780_v43, 0.0 }
 0x106   : > { %v705_v46 = vpop.f32.mrf.mxu2 }
 0x107   : > { %1012 = vst.msk [vmem:[%s1624_s4 + $0x88] sm:$0xf] %vm977_vm0, %v961_v44  ;;  %v938_v47 = vpack.c.bf16 %v888_v45, %v888_v45  ;;  %v706_v49 = vadd.f32 %v1609_v48, %v705_v46  ;;  %v844_v50 = vpop.f32.mrf.mxu3 }
 0x108   : > { %v648_v51 = vpop.f32.mrf.mxu0 }
 0x109   : > { %989 = vst.msk [vmem:[%s1624_s4 + $0x2c] sm:$0xf] %vm977_vm0, %v938_v47  ;;  %v840_v52 = vadd.f32 %v839_v25, %v706_v49  ;;  %v649_v53 = vadd.f32 %v1609_v48, %v648_v51  ;;  %v782_v54 = vpop.f32.mrf.mxu1 }
 0x10b   : > { %v912_v55 = vmax.f32 %v840_v52, 0.0  ;;  %v783_v56 = vadd.f32 %v782_v54, %v649_v53 }
 0x10d   : > { %v962_v57 = vpack.c.bf16 %v912_v55, %v912_v55  ;;  %v889_v58 = vmax.f32 %v783_v56, 0.0 }
 0x10e   : > { %v708_v59 = vpop.f32.mrf.mxu2 }
 0x10f   : > { %1013 = vst.msk [vmem:[%s1624_s4 + $0x8c] sm:$0xf] %vm977_vm0, %v962_v57  ;;  %v939_v60 = vpack.c.bf16 %v889_v58, %v889_v58  ;;  %v709_v61 = vadd.f32 %v1609_v48, %v708_v59  ;;  %v847_v62 = vpop.f32.mrf.mxu3 }
 0x110   : > { %v650_v63 = vpop.f32.mrf.mxu0 }
 0x111   : > { %990 = vst.msk [vmem:[%s1624_s4 + $0x30] sm:$0xf] %vm977_vm0, %v939_v60  ;;  %v843_v0 = vadd.f32 %v842_v37, %v709_v61  ;;  %v651_v1 = vadd.f32 %v1609_v48, %v650_v63  ;;  %v784_v3 = vpop.f32.mrf.mxu1 }
 0x113   : > { %v913_v4 = vmax.f32 %v843_v0, 0.0  ;;  %v785_v5 = vadd.f32 %v784_v3, %v651_v1 }
 0x115   : > { %v963_v6 = vpack.c.bf16 %v913_v4, %v913_v4  ;;  %v890_v7 = vmax.f32 %v785_v5, 0.0 }
 0x116   : > { %v710_v8 = vpop.f32.mrf.mxu2 }
 0x117   : > { %1014 = vst.msk [vmem:[%s1624_s4 + $0x90] sm:$0xf] %vm977_vm0, %v963_v6  ;;  %v940_v9 = vpack.c.bf16 %v890_v7, %v890_v7  ;;  %v711_v10 = vadd.f32 %v1609_v48, %v710_v8  ;;  %v849_v11 = vpop.f32.mrf.mxu3 }
 0x118   : > { %v653_v12 = vpop.f32.mrf.mxu0 }
 0x119   : > { %991 = vst.msk [vmem:[%s1624_s4 + $0x34] sm:$0xf] %vm977_vm0, %v940_v9  ;;  %v845_v13 = vadd.f32 %v844_v50, %v711_v10  ;;  %v654_v14 = vadd.f32 %v1609_v48, %v653_v12  ;;  %v787_v15 = vpop.f32.mrf.mxu1 }
 0x11b   : > { %v914_v16 = vmax.f32 %v845_v13, 0.0  ;;  %v788_v17 = vadd.f32 %v787_v15, %v654_v14 }
 0x11d   : > { %v964_v19 = vpack.c.bf16 %v914_v16, %v914_v16  ;;  %v891_v20 = vmax.f32 %v788_v17, 0.0 }
 0x11e   : > { %v713_v21 = vpop.f32.mrf.mxu2 }
 0x11f   : > { %1015 = vst.msk [vmem:[%s1624_s4 + $0x94] sm:$0xf] %vm977_vm0, %v964_v19  ;;  %v941_v22 = vpack.c.bf16 %v891_v20, %v891_v20  ;;  %v714_v23 = vadd.f32 %v1609_v48, %v713_v21  ;;  %v852_v24 = vpop.f32.mrf.mxu3 }
 0x120   : > { %v655_v25 = vpop.f32.mrf.mxu0 }
 0x121   : > { %992 = vst.msk [vmem:[%s1624_s4 + $0x38] sm:$0xf] %vm977_vm0, %v941_v22  ;;  %v848_v26 = vadd.f32 %v847_v62, %v714_v23  ;;  %v656_v27 = vadd.f32 %v1609_v48, %v655_v25  ;;  %v789_v28 = vpop.f32.mrf.mxu1 }
 0x123   : > { %v915_v29 = vmax.f32 %v848_v26, 0.0  ;;  %v790_v30 = vadd.f32 %v789_v28, %v656_v27 }
 0x125   : > { %v965_v31 = vpack.c.bf16 %v915_v29, %v915_v29  ;;  %v892_v32 = vmax.f32 %v790_v30, 0.0 }
 0x126   : > { %v715_v33 = vpop.f32.mrf.mxu2 }
 0x127   : > { %1016 = vst.msk [vmem:[%s1624_s4 + $0x98] sm:$0xf] %vm977_vm0, %v965_v31  ;;  %v942_v34 = vpack.c.bf16 %v892_v32, %v892_v32  ;;  %v716_v35 = vadd.f32 %v1609_v48, %v715_v33  ;;  %v854_v37 = vpop.f32.mrf.mxu3 }
 0x128   : > { %v658_v36 = vpop.f32.mrf.mxu0 }
 0x129   : > { %993 = vst.msk [vmem:[%s1624_s4 + $0x3c] sm:$0xf] %vm977_vm0, %v942_v34  ;;  %v850_v38 = vadd.f32 %v849_v11, %v716_v35  ;;  %v659_v39 = vadd.f32 %v1609_v48, %v658_v36  ;;  %v792_v40 = vpop.f32.mrf.mxu1 }
 0x12b   : > { %v916_v41 = vmax.f32 %v850_v38, 0.0  ;;  %v793_v42 = vadd.f32 %v792_v40, %v659_v39 }
 0x12d   : > { %v966_v43 = vpack.c.bf16 %v916_v41, %v916_v41  ;;  %v893_v44 = vmax.f32 %v793_v42, 0.0 }
 0x12e   : > { %v718_v45 = vpop.f32.mrf.mxu2 }
 0x12f   : > { %1017 = vst.msk [vmem:[%s1624_s4 + $0x9c] sm:$0xf] %vm977_vm0, %v966_v43  ;;  %v943_v46 = vpack.c.bf16 %v893_v44, %v893_v44  ;;  %v719_v47 = vadd.f32 %v1609_v48, %v718_v45  ;;  %v857_v53 = vpop.f32.mrf.mxu3 }
 0x130   : > { %v660_v49 = vpop.f32.mrf.mxu0 }
 0x131   : > { %994 = vst.msk [vmem:[%s1624_s4 + $0x40] sm:$0xf] %vm977_vm0, %v943_v46  ;;  %v853_v50 = vadd.f32 %v852_v24, %v719_v47  ;;  %v661_v51 = vadd.f32 %v1609_v48, %v660_v49  ;;  %v794_v52 = vpop.f32.mrf.mxu1 }
 0x133   : > { %v917_v54 = vmax.f32 %v853_v50, 0.0  ;;  %v795_v55 = vadd.f32 %v794_v52, %v661_v51 }
 0x135   : > { %v967_v56 = vpack.c.bf16 %v917_v54, %v917_v54  ;;  %v894_v57 = vmax.f32 %v795_v55, 0.0 }
 0x136   : > { %v720_v58 = vpop.f32.mrf.mxu2 }
 0x137   : > { %1018 = vst.msk [vmem:[%s1624_s4 + $0xa0] sm:$0xf] %vm977_vm0, %v967_v56  ;;  %v944_v59 = vpack.c.bf16 %v894_v57, %v894_v57  ;;  %v721_v60 = vadd.f32 %v1609_v48, %v720_v58  ;;  %v859_v4 = vpop.f32.mrf.mxu3 }
 0x138   : > { %v663_v61 = vpop.f32.mrf.mxu0 }
 0x139   : > { %995 = vst.msk [vmem:[%s1624_s4 + $0x44] sm:$0xf] %vm977_vm0, %v944_v59  ;;  %v855_v62 = vadd.f32 %v854_v37, %v721_v60  ;;  %v664_v63 = vadd.f32 %v1609_v48, %v663_v61  ;;  %v797_v0 = vpop.f32.mrf.mxu1 }
 0x13b   : > { %v918_v1 = vmax.f32 %v855_v62, 0.0  ;;  %v798_v3 = vadd.f32 %v797_v0, %v664_v63 }
 0x13d   : > { %v968_v5 = vpack.c.bf16 %v918_v1, %v918_v1  ;;  %v895_v6 = vmax.f32 %v798_v3, 0.0 }
 0x13e   : > { %v723_v7 = vpop.f32.mrf.mxu2 }
 0x13f   : > { %1019 = vst.msk [vmem:[%s1624_s4 + $0xa4] sm:$0xf] %vm977_vm0, %v968_v5  ;;  %v945_v8 = vpack.c.bf16 %v895_v6, %v895_v6  ;;  %v724_v9 = vadd.f32 %v1609_v48, %v723_v7  ;;  %v862_v20 = vpop.f32.mrf.mxu3 }
 0x140   : > { %v665_v10 = vpop.f32.mrf.mxu0 }
 0x141   : > { %996 = vst.msk [vmem:[%s1624_s4 + $0x48] sm:$0xf] %vm977_vm0, %v945_v8  ;;  %v858_v11 = vadd.f32 %v857_v53, %v724_v9  ;;  %v666_v12 = vadd.f32 %v1609_v48, %v665_v10  ;;  %v799_v13 = vpop.f32.mrf.mxu1  ;;  %v679_v8 = vadd.f32 %v1609_v48, %v1626_v2  ;;  %v681_v2 = vadd.f32 %v1609_v48, %v1639_v18 }
 0x143   : > { %v919_v14 = vmax.f32 %v858_v11, 0.0  ;;  %v800_v15 = vadd.f32 %v799_v13, %v666_v12 }
 0x145   : > { %v969_v16 = vpack.c.bf16 %v919_v14, %v919_v14  ;;  %v896_v17 = vmax.f32 %v800_v15, 0.0 }
 0x146   : > { %v725_v19 = vpop.f32.mrf.mxu2 }
 0x147   : > { %1020 = vst.msk [vmem:[%s1624_s4 + $0xa8] sm:$0xf] %vm977_vm0, %v969_v16  ;;  %v946_v21 = vpack.c.bf16 %v896_v17, %v896_v17  ;;  %v726_v22 = vadd.f32 %v1609_v48, %v725_v19  ;;  %v864_v35 = vpop.f32.mrf.mxu3 }
 0x148   : > { %v668_v23 = vpop.f32.mrf.mxu0 }
 0x149   : > { %997 = vst.msk [vmem:[%s1624_s4 + $0x4c] sm:$0xf] %vm977_vm0, %v946_v21  ;;  %v860_v24 = vadd.f32 %v859_v4, %v726_v22  ;;  %v669_v25 = vadd.f32 %v1609_v48, %v668_v23  ;;  %v802_v26 = vpop.f32.mrf.mxu1 }
 0x14b   : > { %v920_v27 = vmax.f32 %v860_v24, 0.0  ;;  %v803_v28 = vadd.f32 %v802_v26, %v669_v25 }
 0x14d   : > { %v970_v29 = vpack.c.bf16 %v920_v27, %v920_v27  ;;  %v897_v30 = vmax.f32 %v803_v28, 0.0 }
 0x14e   : > { %v728_v31 = vpop.f32.mrf.mxu2 }
 0x14f   : > { %1021 = vst.msk [vmem:[%s1624_s4 + $0xac] sm:$0xf] %vm977_vm0, %v970_v29  ;;  %v947_v32 = vpack.c.bf16 %v897_v30, %v897_v30  ;;  %v729_v33 = vadd.f32 %v1609_v48, %v728_v31  ;;  %v867_v51 = vpop.f32.mrf.mxu3 }
 0x150   : > { %v670_v34 = vpop.f32.mrf.mxu0 }
 0x151   : > { %998 = vst.msk [vmem:[%s1624_s4 + $0x50] sm:$0xf] %vm977_vm0, %v947_v32  ;;  %v863_v36 = vadd.f32 %v862_v20, %v729_v33  ;;  %v671_v37 = vadd.f32 %v1609_v48, %v670_v34  ;;  %v804_v38 = vpop.f32.mrf.mxu1 }
 0x153   : > { %v921_v39 = vmax.f32 %v863_v36, 0.0  ;;  %v805_v40 = vadd.f32 %v804_v38, %v671_v37 }
 0x155   : > { %v971_v41 = vpack.c.bf16 %v921_v39, %v921_v39  ;;  %v898_v42 = vmax.f32 %v805_v40, 0.0 }
 0x156   : > { %v730_v43 = vpop.f32.mrf.mxu2 }
 0x157   : > { %1022 = vst.msk [vmem:[%s1624_s4 + $0xb0] sm:$0xf] %vm977_vm0, %v971_v41  ;;  %v948_v44 = vpack.c.bf16 %v898_v42, %v898_v42  ;;  %v731_v45 = vadd.f32 %v1609_v48, %v730_v43  ;;  %v869_v1 = vpop.f32.mrf.mxu3 }
 0x158   : > { %v673_v46 = vpop.f32.mrf.mxu0 }
 0x159   : > { %999 = vst.msk [vmem:[%s1624_s4 + $0x54] sm:$0xf] %vm977_vm0, %v948_v44  ;;  %v865_v47 = vadd.f32 %v864_v35, %v731_v45  ;;  %v674_v49 = vadd.f32 %v1609_v48, %v673_v46  ;;  %v807_v50 = vpop.f32.mrf.mxu1 }
 0x15b   : > { %v922_v52 = vmax.f32 %v865_v47, 0.0  ;;  %v808_v53 = vadd.f32 %v807_v50, %v674_v49 }
 0x15d   : > { %v972_v54 = vpack.c.bf16 %v922_v52, %v922_v52  ;;  %v899_v55 = vmax.f32 %v808_v53, 0.0 }
 0x15e   : > { %v733_v56 = vpop.f32.mrf.mxu2 }
 0x15f   : > { %1023 = vst.msk [vmem:[%s1624_s4 + $0xb4] sm:$0xf] %vm977_vm0, %v972_v54  ;;  %v949_v57 = vpack.c.bf16 %v899_v55, %v899_v55  ;;  %v734_v58 = vadd.f32 %v1609_v48, %v733_v56  ;;  %v872_v16 = vpop.f32.mrf.mxu3 }
 0x160   : > { %v675_v59 = vpop.f32.mrf.mxu0 }
 0x161   : > { %1000 = vst.msk [vmem:[%s1624_s4 + $0x58] sm:$0xf] %vm977_vm0, %v949_v57  ;;  %v868_v60 = vadd.f32 %v867_v51, %v734_v58  ;;  %v676_v61 = vadd.f32 %v1609_v48, %v675_v59  ;;  %v809_v62 = vpop.f32.mrf.mxu1 }
 0x163   : > { %v923_v63 = vmax.f32 %v868_v60, 0.0  ;;  %v810_v0 = vadd.f32 %v809_v62, %v676_v61 }
 0x165   : > { %v973_v3 = vpack.c.bf16 %v923_v63, %v923_v63  ;;  %v900_v4 = vmax.f32 %v810_v0, 0.0 }
 0x166   : > { %v735_v5 = vpop.f32.mrf.mxu2 }
 0x167   : > { %1024 = vst.msk [vmem:[%s1624_s4 + $0xb8] sm:$0xf] %vm977_vm0, %v973_v3  ;;  %v950_v6 = vpack.c.bf16 %v900_v4, %v900_v4  ;;  %v736_v7 = vadd.f32 %v1609_v48, %v735_v5  ;;  %v874_v29 = vpop.f32.mrf.mxu3 }
 0x169   : > { %1001 = vst.msk [vmem:[%s1624_s4 + $0x5c] sm:$0xf] %vm977_vm0, %v950_v6  ;;  %v870_v9 = vadd.f32 %v869_v1, %v736_v7  ;;  %v812_v10 = vpop.f32.mrf.mxu1 }
 0x16a   : > { %v813_v11 = vadd.f32 %v812_v10, %v679_v8 }
 0x16b   : > { %v924_v12 = vmax.f32 %v870_v9, 0.0 }
 0x16c   : > { %v901_v13 = vmax.f32 %v813_v11, 0.0 }
 0x16d   : > { %v974_v14 = vpack.c.bf16 %v924_v12, %v924_v12 }
 0x16e   : > { %v951_v15 = vpack.c.bf16 %v901_v13, %v901_v13  ;;  %v738_v17 = vpop.f32.mrf.mxu2 }
 0x16f   : > { %1025 = vst.msk [vmem:[%s1624_s4 + $0xbc] sm:$0xf] %vm977_vm0, %v974_v14  ;;  %v739_v19 = vadd.f32 %v1609_v48, %v738_v17 }
 0x170   : > { %1002 = vst.msk [vmem:[%s1624_s4 + $0x60] sm:$0xf] %vm977_vm0, %v951_v15 }
 0x171   : > { %v873_v20 = vadd.f32 %v872_v16, %v739_v19  ;;  %v814_v21 = vpop.f32.mrf.mxu1 }
 0x172   : > { %v815_v22 = vadd.f32 %v814_v21, %v681_v2 }
 0x173   : > { %v925_v23 = vmax.f32 %v873_v20, 0.0 }
 0x174   : > { %v902_v24 = vmax.f32 %v815_v22, 0.0 }
 0x175   : > { %v975_v25 = vpack.c.bf16 %v925_v23, %v925_v23 }
 0x176   : > { %v952_v26 = vpack.c.bf16 %v902_v24, %v902_v24  ;;  %v740_v27 = vpop.f32.mrf.mxu2 }
 0x177   : > { %1026 = vst.msk [vmem:[%s1624_s4 + $0xc0] sm:$0xf] %vm977_vm0, %v975_v25  ;;  %v741_v28 = vadd.f32 %v1609_v48, %v740_v27 }
 0x178   : > { %1003 = vst.msk [vmem:[%s1624_s4 + $0x64] sm:$0xf] %vm977_vm0, %v952_v26 }
 0x179   : > { %v875_v30 = vadd.f32 %v874_v29, %v741_v28 }
 0x17b   : > { %v926_v18 = vmax.f32 %v875_v30, 0.0 }
 0x17d   : > { %v976_v31 = vpack.c.bf16 %v926_v18, %v926_v18 }
 0x17f   : > { %1027 = vst.msk [vmem:[%s1624_s4 + $0xc4] sm:$0xf] %vm977_vm0, %v976_v31 }
 0x180 PF: > { %s13_s12 = sadd.s32 1, %s1456_s12  }
 0x181   : > { %p10_p4 = scmp.ge.s32.totalorder %s13_s12, 4  }
 0x183   :  { %12 = sbr.rel (!%p10_p4) target bundleno = 1 (0x1), region = 62 }

// kernel: action_network_forward.5
= control target key start
LH: loop header
LB: loop body
LE: loop exit
PB: predicated region body
PF: predicated region fallthrough
CT: control target
= control target key end

     0   :  { %s1564_s12 = smov 0   ;;  %s1566_s13 = smov 0   ;;  %s1868_s0 = inlined_call_operand.vmem [shape: bf16[162,512], index: 0, kind: input, shape index: {}]   ;;  %s1869_s1 = inlined_call_operand.vmem [shape: bf16[512,64], index: 1, kind: input, shape index: {}]   ;;  %s1870_s2 = inlined_call_operand.vmem [shape: f32[1,64], index: 2, kind: input, shape index: {}]   ;;  %s1871_s3 = inlined_call_operand.vmem [shape: bf16[162,64], index: 3, kind: output, shape index: {}]  }
   0x1   :  { %s1568_s14 = smov 0  }
   0x2 LB: > { %s1577_s15 = sadd.s32 4294967295, %s1510_s14   ;;  %s1579_s16 = sadd.s32 1, %s1510_s14   ;;  %s1510_s14 = sphi %s1568_s14, %s1879_s14   ;;  %s1506_s13 = sphi %s1566_s13, %s1878_s13   ;;  %s1502_s12 = sphi %s1564_s12, %s1877_s12  }
   0x3   : > { %s85_s17 = ssub.s32 %s1510_s14, %s1579_s16  ;;  %s88_s18 = sadd.s32 1, %s1506_s13 }
   0x4   : > { %p86_p0 = scmp.eq.s32.totalorder %s85_s17, 0  ;;  %p98_p1 = scmp.ne.s32.totalorder %s1506_s13, %s1502_s12 }
   0x5   : > { %p99_p2 = scmp.eq.s32.totalorder %s1577_s15, 1  ;;  %p1062_p3 = scmp.ge.s32.totalorder %s1510_s14, 1 }
   0x6   : > { %s1587_s19 = scalar_select %p86_p0, %s1506_s13, %s88_s18  }
   0x7   : > { %p1589_p4 = por %p99_p2, %p98_p1  ;;  %p149_p5 = scmp.lt.s32.totalorder %s1510_s14, 3 }
   0x9   : > { %p150_p6 = pnand %p1062_p3, %p149_p5 }
   0xa   : > { %s1630_s24 = smul.u32 (!%p150_p6), 12, %s1577_s15  ;;  %s175_s5 = sand.u32 (!%p150_p6), 1, %s1502_s12  }
   0xb   : > { %153 = sbr.rel (%p150_p6) target bundleno = 338 (0x152), region = 32 }
   0xc   : > { %p184_p7 = scmp.lt.s32.totalorder (!%p150_p6), %s1630_s24, 20  ;;  %s1359_s6 = smul.u32 (!%p150_p6), 48, %s175_s5 }
   0xe   : > { %s1755_s7 = scalar_lea.vmem (!%p150_p6), [#allocation2], %s1359_s6  }
  0x10   : > { %v1333_v0 = vld [vmem:[%s1869_s1 + $0x38] sm:$0xff]  ;;  %v1332_v4 = vld [vmem:[%s1869_s1 + $0x30] sm:$0xff]  ;;  %v1331_v8 = vld [vmem:[%s1869_s1 + $0x28] sm:$0xff]  ;;  %s185_s18 = scalar_select %p184_p7, %s1630_s24, 20  ;;  %vm784_vm0 = vcmask 519168  }
  0x11   : > { %v1341_v1 = vld [vmem:[%s1869_s1 + $0x78] sm:$0xff]  ;;  %604 = vmatpush.bf16.msra.mxu0 %v1333_v0  ;;  %v1340_v5 = vld [vmem:[%s1869_s1 + $0x70] sm:$0xff]  ;;  %v1339_v9 = vld [vmem:[%s1869_s1 + $0x68] sm:$0xff]  ;;  %s805_s12 = ssub.s32 (%p1589_p4), 21, %s1630_s24  ;;  %s1358_s8 = smul.u32 (%p1589_p4), 48, %s1577_s15 }
  0x12   : > { %v1349_v2 = vld [vmem:[%s1869_s1 + $0xb8] sm:$0xff]  ;;  %643 = vmatpush.bf16.msra.mxu1 %v1341_v1  ;;  %v1348_v6 = vld [vmem:[%s1869_s1 + $0xb0] sm:$0xff]  ;;  %v1347_v10 = vld [vmem:[%s1869_s1 + $0xa8] sm:$0xff]  ;;  %s1301_s30 = sshll.u32 %s185_s18, 4  ;;  %p806_p8 = scmp.lt.s32.totalorder (%p1589_p4), %s805_s12, 12 }
  0x13   : > { %v1357_v3 = vld [vmem:[%s1869_s1 + $0xf8] sm:$0xff]  ;;  %682 = vmatpush.bf16.msra.mxu2 %v1349_v2  ;;  %v1356_v7 = vld [vmem:[%s1869_s1 + $0xf0] sm:$0xff]  ;;  %v1355_v11 = vld [vmem:[%s1869_s1 + $0xe8] sm:$0xff]  ;;  %s1679_s10 = scalar_lea.vmem %s1868_s0, %s1301_s30  ;;  %s1798_s11 = scalar_lea.vmem (%p1589_p4), %s1871_s3, %s1358_s8  }
  0x14   : > { %721 = vmatpush.bf16.msra.mxu3 %v1357_v3  ;;  %v1330_v12 = vld [vmem:[%s1869_s1 + $0x20] sm:$0xff]  ;;  %v1329_v16 = vld [vmem:[%s1869_s1 + $0x18] sm:$0xff]  ;;  %v1328_v20 = vld [vmem:[%s1869_s1 + $0x10] sm:$0xff] }
  0x15   : > { %605 = vmatpush.bf16.msra.mxu0 %v1332_v4  ;;  %v1338_v13 = vld [vmem:[%s1869_s1 + $0x60] sm:$0xff]  ;;  %v1337_v17 = vld [vmem:[%s1869_s1 + $0x58] sm:$0xff]  ;;  %v1336_v21 = vld [vmem:[%s1869_s1 + $0x50] sm:$0xff] }
  0x16   : > { %644 = vmatpush.bf16.msra.mxu1 %v1340_v5  ;;  %v1346_v14 = vld [vmem:[%s1869_s1 + $0xa0] sm:$0xff]  ;;  %v1345_v18 = vld [vmem:[%s1869_s1 + $0x98] sm:$0xff]  ;;  %v1344_v22 = vld [vmem:[%s1869_s1 + $0x90] sm:$0xff] }
  0x17   : > { %683 = vmatpush.bf16.msra.mxu2 %v1348_v6  ;;  %v1354_v15 = vld [vmem:[%s1869_s1 + $0xe0] sm:$0xff]  ;;  %v1353_v19 = vld [vmem:[%s1869_s1 + $0xd8] sm:$0xff]  ;;  %v1352_v23 = vld [vmem:[%s1869_s1 + $0xd0] sm:$0xff] }
  0x18   : > { %722 = vmatpush.bf16.msra.mxu3 %v1356_v7  ;;  %v1327_v24 = vld [vmem:[%s1869_s1 + $0x8] sm:$0xff]  ;;  %v1326_v28 = vld [vmem:[%s1869_s1] sm:$0xff]  ;;  %v1304_v33 = vld [vmem:[%s1679_s10 + $0xc] sm:$0xf0] }
  0x19   : > { %606 = vmatpush.bf16.msra.mxu0 %v1331_v8  ;;  %v1335_v25 = vld [vmem:[%s1869_s1 + $0x48] sm:$0xff]  ;;  %v1334_v29 = vld [vmem:[%s1869_s1 + $0x40] sm:$0xff]  ;;  %v1069_v35 = vld [vmem:[%s1679_s10 + $0x10] sm:$0xf0] }
  0x1a   : > { %645 = vmatpush.bf16.msra.mxu1 %v1339_v9  ;;  %v1343_v26 = vld [vmem:[%s1869_s1 + $0x88] sm:$0xff]  ;;  %v1342_v30 = vld [vmem:[%s1869_s1 + $0x80] sm:$0xff]  ;;  %v1305_v37 = vld [vmem:[%s1679_s10 + $0x14] sm:$0xf0] }
  0x1b   : > { %684 = vmatpush.bf16.msra.mxu2 %v1347_v10  ;;  %v1351_v27 = vld [vmem:[%s1869_s1 + $0xc8] sm:$0xff]  ;;  %v1350_v31 = vld [vmem:[%s1869_s1 + $0xc0] sm:$0xff]  ;;  %v1077_v39 = vld [vmem:[%s1679_s10 + $0x18] sm:$0xf0] }
  0x1c   : > { %723 = vmatpush.bf16.msra.mxu3 %v1355_v11  ;;  %v1067_v32 = vld [vmem:[%s1679_s10] sm:$0xf]  ;;  %v1302_v34 = vld [vmem:[%s1679_s10 + $0x4] sm:$0xf]  ;;  %v1075_v36 = vld [vmem:[%s1679_s10 + $0x8] sm:$0xf] }
  0x1d   : > { %607 = vmatpush.bf16.msra.mxu0 %v1330_v12  ;;  %v1303_v38 = vld [vmem:[%s1679_s10 + $0xc] sm:$0xf]  ;;  %v1068_v40 = vor.u32 %v1304_v33, %v1067_v32  ;;  %v1072_v41 = vor.u32 %v1302_v34, %v1069_v35  ;;  %v1076_v42 = vor.u32 %v1305_v37, %v1075_v36  ;;  %v1083_v44 = vld [vmem:[%s1679_s10 + $0x20] sm:$0xf]  ;;  %v1308_v45 = vld [vmem:[%s1679_s10 + $0x2c] sm:$0xf0] }
  0x1e   : > { %646 = vmatpush.bf16.msra.mxu1 %v1338_v13  ;;  %v1080_v43 = vor.u32 %v1303_v38, %v1077_v39  ;;  %v1306_v46 = vld [vmem:[%s1679_s10 + $0x24] sm:$0xf]  ;;  %v1085_v47 = vld [vmem:[%s1679_s10 + $0x30] sm:$0xf0]  ;;  %v1091_v48 = vld [vmem:[%s1679_s10 + $0x28] sm:$0xf]  ;;  %v1084_v52 = vor.u32 %v1308_v45, %v1083_v44 }
  0x1f   : > { %685 = vmatpush.bf16.msra.mxu2 %v1346_v14  ;;  %v1309_v49 = vld [vmem:[%s1679_s10 + $0x34] sm:$0xf0]  ;;  %v1307_v50 = vld [vmem:[%s1679_s10 + $0x2c] sm:$0xf]  ;;  %v1093_v51 = vld [vmem:[%s1679_s10 + $0x38] sm:$0xf0]  ;;  %v1088_v53 = vor.u32 %v1306_v46, %v1085_v47 }
  0x20   : > { %724 = vmatpush.bf16.msra.mxu3 %v1354_v15  ;;  %v1092_v54 = vor.u32 %v1309_v49, %v1091_v48  ;;  %v1096_v55 = vor.u32 %v1307_v50, %v1093_v51  ;;  %v1099_v56 = vld [vmem:[%s1679_s10 + $0x40] sm:$0xf]  ;;  %v1312_v57 = vld [vmem:[%s1679_s10 + $0x4c] sm:$0xf0]  ;;  %v1310_v58 = vld [vmem:[%s1679_s10 + $0x44] sm:$0xf] }
  0x21   : > { %608 = vmatpush.bf16.msra.mxu0 %v1329_v16  ;;  %v1101_v59 = vld [vmem:[%s1679_s10 + $0x50] sm:$0xf0]  ;;  %v1107_v60 = vld [vmem:[%s1679_s10 + $0x48] sm:$0xf]  ;;  %v1313_v61 = vld [vmem:[%s1679_s10 + $0x54] sm:$0xf0]  ;;  %v1100_v0 = vor.u32 %v1312_v57, %v1099_v56 }
  0x22   : > { %647 = vmatpush.bf16.msra.mxu1 %v1337_v17  ;;  %v1311_v62 = vld [vmem:[%s1679_s10 + $0x4c] sm:$0xf]  ;;  %v1109_v63 = vld [vmem:[%s1679_s10 + $0x58] sm:$0xf0]  ;;  %v1104_v1 = vor.u32 %v1310_v58, %v1101_v59  ;;  %v1108_v2 = vor.u32 %v1313_v61, %v1107_v60  ;;  %v1115_v4 = vld [vmem:[%s1679_s10 + $0x60] sm:$0xf] }
  0x23   : > { %686 = vmatpush.bf16.msra.mxu2 %v1345_v18  ;;  %v1112_v3 = vor.u32 %v1311_v62, %v1109_v63  ;;  %v1316_v5 = vld [vmem:[%s1679_s10 + $0x6c] sm:$0xf0]  ;;  %v1314_v6 = vld [vmem:[%s1679_s10 + $0x64] sm:$0xf]  ;;  %v1117_v7 = vld [vmem:[%s1679_s10 + $0x70] sm:$0xf0] }
  0x24   : > { %725 = vmatpush.bf16.msra.mxu3 %v1353_v19  ;;  %v1123_v8 = vld [vmem:[%s1679_s10 + $0x68] sm:$0xf]  ;;  %v1317_v9 = vld [vmem:[%s1679_s10 + $0x74] sm:$0xf0]  ;;  %v1315_v10 = vld [vmem:[%s1679_s10 + $0x6c] sm:$0xf]  ;;  %v1116_v12 = vor.u32 %v1316_v5, %v1115_v4  ;;  %v1120_v13 = vor.u32 %v1314_v6, %v1117_v7 }
  0x25   : > { %609 = vmatpush.bf16.msra.mxu0 %v1328_v20  ;;  %v1125_v11 = vld [vmem:[%s1679_s10 + $0x78] sm:$0xf0]  ;;  %v1124_v14 = vor.u32 %v1317_v9, %v1123_v8  ;;  %v1131_v16 = vld [vmem:[%s1679_s10 + $0x80] sm:$0xf]  ;;  %v1320_v17 = vld [vmem:[%s1679_s10 + $0x8c] sm:$0xf0] }
  0x26   : > { %648 = vmatpush.bf16.msra.mxu1 %v1336_v21  ;;  %v1128_v15 = vor.u32 %v1315_v10, %v1125_v11  ;;  %v1318_v18 = vld [vmem:[%s1679_s10 + $0x84] sm:$0xf]  ;;  %v1133_v19 = vld [vmem:[%s1679_s10 + $0x90] sm:$0xf0]  ;;  %v1139_v20 = vld [vmem:[%s1679_s10 + $0x88] sm:$0xf] }
  0x27   : > { %687 = vmatpush.bf16.msra.mxu2 %v1344_v22  ;;  %v1321_v21 = vld [vmem:[%s1679_s10 + $0x94] sm:$0xf0]  ;;  %v1319_v22 = vld [vmem:[%s1679_s10 + $0x8c] sm:$0xf]  ;;  %v1155_v32 = vld [vmem:[%s1679_s10 + $0xa8] sm:$0xf] }
  0x28   : > { %726 = vmatpush.bf16.msra.mxu3 %v1352_v23  ;;  %v1141_v23 = vld [vmem:[%s1679_s10 + $0x98] sm:$0xf0]  ;;  %v1325_v33 = vld [vmem:[%s1679_s10 + $0xb4] sm:$0xf0]  ;;  %v1323_v34 = vld [vmem:[%s1679_s10 + $0xac] sm:$0xf] }
  0x29   : > { %610 = vmatpush.bf16.msra.mxu0 %v1327_v24  ;;  %v1132_v24 = vor.u32 %v1320_v17, %v1131_v16  ;;  %v1157_v35 = vld [vmem:[%s1679_s10 + $0xb8] sm:$0xf0]  ;;  %v1156_v38 = vor.u32 %v1325_v33, %v1155_v32 }
  0x2a   : > { %649 = vmatpush.bf16.msra.mxu1 %v1335_v25  ;;  %v1136_v25 = vor.u32 %v1318_v18, %v1133_v19  ;;  %v1160_v39 = vor.u32 %v1323_v34, %v1157_v35 }
  0x2b   : > { %688 = vmatpush.bf16.msra.mxu2 %v1343_v26  ;;  %v1140_v26 = vor.u32 %v1321_v21, %v1139_v20 }
  0x2c   : > { %727 = vmatpush.bf16.msra.mxu3 %v1351_v27  ;;  %v1144_v27 = vor.u32 %v1319_v22, %v1141_v23 }
  0x2d   : > { %611 = vmatpush.bf16.msra.mxu0 %v1326_v28  ;;  %v1147_v28 = vld [vmem:[%s1679_s10 + $0xa0] sm:$0xf] }
  0x2e   : > { %650 = vmatpush.bf16.msra.mxu1 %v1334_v29  ;;  %v1324_v29 = vld [vmem:[%s1679_s10 + $0xac] sm:$0xf0] }
  0x2f   : > { %689 = vmatpush.bf16.msra.mxu2 %v1342_v30  ;;  %v1322_v30 = vld [vmem:[%s1679_s10 + $0xa4] sm:$0xf]  ;;  %v1148_v36 = vor.u32 %v1324_v29, %v1147_v28 }
  0x30   : > { %728 = vmatpush.bf16.msra.mxu3 %v1350_v31  ;;  %612 = vmatmul.bf16.vlgmr.msra.gmra.mxu0 %v1068_v40  ;;  %v1149_v31 = vld [vmem:[%s1679_s10 + $0xb0] sm:$0xf0]  ;;  %v1750_v40 = vld [vmem:[%s1870_s2] ss:$0 sm:$0xff] }
  0x31   : > { %651 = vmatmul.bf16.vlgmr.msra.gmra.mxu1 %v1072_v41  ;;  %v1152_v37 = vor.u32 %v1322_v30, %v1149_v31 }
  0x32   : > { %690 = vmatmul.bf16.vlgmr.msra.gmra.mxu2 %v1076_v42 }
  0x33   : > { %729 = vmatmul.bf16.vlgmr.msra.gmra.mxu3 %v1080_v43 }
  0x40   : > { %617 = vmatmul.bf16.gmra.mxu0 %v1084_v52 }
  0x41   : > { %656 = vmatmul.bf16.gmra.mxu1 %v1088_v53 }
  0x42   : > { %695 = vmatmul.bf16.gmra.mxu2 %v1092_v54 }
  0x43   : > { %734 = vmatmul.bf16.gmra.mxu3 %v1096_v55 }
  0x50   : > { %622 = vmatmul.bf16.gmra.mxu0 %v1100_v0 }
  0x51   : > { %661 = vmatmul.bf16.gmra.mxu1 %v1104_v1 }
  0x52   : > { %700 = vmatmul.bf16.gmra.mxu2 %v1108_v2 }
  0x53   : > { %739 = vmatmul.bf16.gmra.mxu3 %v1112_v3 }
  0x60   : > { %627 = vmatmul.bf16.gmra.mxu0 %v1116_v12 }
  0x61   : > { %666 = vmatmul.bf16.gmra.mxu1 %v1120_v13 }
  0x62   : > { %705 = vmatmul.bf16.gmra.mxu2 %v1124_v14 }
  0x63   : > { %744 = vmatmul.bf16.gmra.mxu3 %v1128_v15 }
  0x70   : > { %632 = vmatmul.bf16.gmra.mxu0 %v1132_v24 }
  0x71   : > { %671 = vmatmul.bf16.gmra.mxu1 %v1136_v25 }
  0x72   : > { %710 = vmatmul.bf16.gmra.mxu2 %v1140_v26 }
  0x73   : > { %749 = vmatmul.bf16.gmra.mxu3 %v1144_v27 }
  0x80   : > { %637 = vmatmul.bf16.gmra.mxu0 %v1148_v36 }
  0x81   : > { %676 = vmatmul.bf16.gmra.mxu1 %v1152_v37 }
  0x82   : > { %715 = vmatmul.bf16.gmra.mxu2 %v1156_v38 }
  0x83   : > { %754 = vmatmul.bf16.gmra.mxu3 %v1160_v39 }
  0xad   : > { %v613_v41 = vpop.f32.mrf.mxu0 }
  0xae   : > { %v652_v42 = vpop.f32.mrf.mxu1  ;;  %v614_v43 = vadd.f32 %v1750_v40, %v613_v41 }
  0xb0   : > { %v653_v44 = vadd.f32 %v652_v42, %v614_v43 }
  0xb5   : > { %v691_v45 = vpop.f32.mrf.mxu2  ;;  %v615_v48 = vpop.f32.mrf.mxu0 }
  0xb6   : > { %v730_v46 = vpop.f32.mrf.mxu3  ;;  %v692_v47 = vadd.f32 %v691_v45, %v653_v44  ;;  %v654_v49 = vpop.f32.mrf.mxu1  ;;  %v616_v51 = vadd.f32 %v1750_v40, %v615_v48 }
  0xb8   : > { %v731_v50 = vadd.f32 %v730_v46, %v692_v47  ;;  %v655_v54 = vadd.f32 %v654_v49, %v616_v51 }
  0xba   : > { %v760_v52 = vmax.f32 %v731_v50, 0.0 }
  0xbc   : > { %v772_v53 = vpack.c.bf16 %v760_v52, %v760_v52 }
  0xbd   : > { %v693_v55 = vpop.f32.mrf.mxu2  ;;  %v618_v58 = vpop.f32.mrf.mxu0 }
  0xbe   : > { %v732_v56 = vpop.f32.mrf.mxu3  ;;  %785 = vst.msk [vmem:[%s1755_s7] sm:$0xf] %vm784_vm0, %v772_v53  ;;  %v694_v57 = vadd.f32 %v693_v55, %v655_v54  ;;  %v657_v59 = vpop.f32.mrf.mxu1  ;;  %v619_v60 = vadd.f32 %v1750_v40, %v618_v58 }
  0xc0   : > { %v733_v61 = vadd.f32 %v732_v56, %v694_v57  ;;  %v658_v63 = vadd.f32 %v657_v59, %v619_v60 }
  0xc2   : > { %v761_v62 = vmax.f32 %v733_v61, 0.0 }
  0xc4   : > { %v773_v0 = vpack.c.bf16 %v761_v62, %v761_v62 }
  0xc5   : > { %v696_v1 = vpop.f32.mrf.mxu2  ;;  %v620_v4 = vpop.f32.mrf.mxu0 }
  0xc6   : > { %v735_v2 = vpop.f32.mrf.mxu3  ;;  %786 = vst.msk [vmem:[%s1755_s7 + $0x4] sm:$0xf] %vm784_vm0, %v773_v0  ;;  %v697_v3 = vadd.f32 %v696_v1, %v658_v63  ;;  %v659_v5 = vpop.f32.mrf.mxu1  ;;  %v621_v7 = vadd.f32 %v1750_v40, %v620_v4 }
  0xc8   : > { %v736_v6 = vadd.f32 %v735_v2, %v697_v3  ;;  %v660_v10 = vadd.f32 %v659_v5, %v621_v7 }
  0xca   : > { %v762_v8 = vmax.f32 %v736_v6, 0.0 }
  0xcc   : > { %v774_v9 = vpack.c.bf16 %v762_v8, %v762_v8 }
  0xcd   : > { %v698_v11 = vpop.f32.mrf.mxu2  ;;  %v623_v14 = vpop.f32.mrf.mxu0 }
  0xce   : > { %v737_v12 = vpop.f32.mrf.mxu3  ;;  %787 = vst.msk [vmem:[%s1755_s7 + $0x8] sm:$0xf] %vm784_vm0, %v774_v9  ;;  %v699_v13 = vadd.f32 %v698_v11, %v660_v10  ;;  %v662_v15 = vpop.f32.mrf.mxu1  ;;  %v624_v16 = vadd.f32 %v1750_v40, %v623_v14 }
  0xd0   : > { %v738_v17 = vadd.f32 %v737_v12, %v699_v13  ;;  %v663_v19 = vadd.f32 %v662_v15, %v624_v16 }
  0xd2   : > { %v763_v18 = vmax.f32 %v738_v17, 0.0 }
  0xd4   : > { %v775_v20 = vpack.c.bf16 %v763_v18, %v763_v18 }
  0xd5   : > { %v701_v21 = vpop.f32.mrf.mxu2  ;;  %v625_v24 = vpop.f32.mrf.mxu0 }
  0xd6   : > { %v740_v22 = vpop.f32.mrf.mxu3  ;;  %788 = vst.msk [vmem:[%s1755_s7 + $0xc] sm:$0xf] %vm784_vm0, %v775_v20  ;;  %v702_v23 = vadd.f32 %v701_v21, %v663_v19  ;;  %v664_v25 = vpop.f32.mrf.mxu1  ;;  %v626_v27 = vadd.f32 %v1750_v40, %v625_v24 }
  0xd8   : > { %v741_v26 = vadd.f32 %v740_v22, %v702_v23  ;;  %v665_v30 = vadd.f32 %v664_v25, %v626_v27 }
  0xda   : > { %v764_v28 = vmax.f32 %v741_v26, 0.0 }
  0xdc   : > { %v776_v29 = vpack.c.bf16 %v764_v28, %v764_v28 }
  0xdd   : > { %v703_v31 = vpop.f32.mrf.mxu2  ;;  %v628_v34 = vpop.f32.mrf.mxu0 }
  0xde   : > { %v742_v32 = vpop.f32.mrf.mxu3  ;;  %789 = vst.msk [vmem:[%s1755_s7 + $0x10] sm:$0xf] %vm784_vm0, %v776_v29  ;;  %v704_v33 = vadd.f32 %v703_v31, %v665_v30  ;;  %v667_v35 = vpop.f32.mrf.mxu1  ;;  %v629_v36 = vadd.f32 %v1750_v40, %v628_v34 }
  0xe0   : > { %v743_v37 = vadd.f32 %v742_v32, %v704_v33  ;;  %v668_v39 = vadd.f32 %v667_v35, %v629_v36 }
  0xe2   : > { %v765_v38 = vmax.f32 %v743_v37, 0.0 }
  0xe4   : > { %v777_v41 = vpack.c.bf16 %v765_v38, %v765_v38 }
  0xe5   : > { %v706_v42 = vpop.f32.mrf.mxu2  ;;  %v630_v45 = vpop.f32.mrf.mxu0 }
  0xe6   : > { %v745_v43 = vpop.f32.mrf.mxu3  ;;  %790 = vst.msk [vmem:[%s1755_s7 + $0x14] sm:$0xf] %vm784_vm0, %v777_v41  ;;  %v707_v44 = vadd.f32 %v706_v42, %v668_v39  ;;  %v669_v46 = vpop.f32.mrf.mxu1  ;;  %v631_v48 = vadd.f32 %v1750_v40, %v630_v45 }
  0xe8   : > { %v746_v47 = vadd.f32 %v745_v43, %v707_v44  ;;  %v670_v51 = vadd.f32 %v669_v46, %v631_v48 }
  0xea   : > { %v766_v49 = vmax.f32 %v746_v47, 0.0 }
  0xec   : > { %v778_v50 = vpack.c.bf16 %v766_v49, %v766_v49 }
  0xed   : > { %v708_v52 = vpop.f32.mrf.mxu2  ;;  %v633_v55 = vpop.f32.mrf.mxu0 }
  0xee   : > { %v747_v53 = vpop.f32.mrf.mxu3  ;;  %791 = vst.msk [vmem:[%s1755_s7 + $0x18] sm:$0xf] %vm784_vm0, %v778_v50  ;;  %v709_v54 = vadd.f32 %v708_v52, %v670_v51  ;;  %v672_v56 = vpop.f32.mrf.mxu1  ;;  %v634_v57 = vadd.f32 %v1750_v40, %v633_v55 }
  0xf0   : > { %v748_v58 = vadd.f32 %v747_v53, %v709_v54  ;;  %v673_v60 = vadd.f32 %v672_v56, %v634_v57 }
  0xf2   : > { %v767_v59 = vmax.f32 %v748_v58, 0.0 }
  0xf4   : > { %v779_v61 = vpack.c.bf16 %v767_v59, %v767_v59 }
  0xf5   : > { %v711_v62 = vpop.f32.mrf.mxu2  ;;  %v635_v1 = vpop.f32.mrf.mxu0 }
  0xf6   : > { %v750_v63 = vpop.f32.mrf.mxu3  ;;  %792 = vst.msk [vmem:[%s1755_s7 + $0x1c] sm:$0xf] %vm784_vm0, %v779_v61  ;;  %v712_v0 = vadd.f32 %v711_v62, %v673_v60  ;;  %v674_v2 = vpop.f32.mrf.mxu1  ;;  %v636_v4 = vadd.f32 %v1750_v40, %v635_v1 }
  0xf8   : > { %v751_v3 = vadd.f32 %v750_v63, %v712_v0  ;;  %v675_v7 = vadd.f32 %v674_v2, %v636_v4 }
  0xfa   : > { %v768_v5 = vmax.f32 %v751_v3, 0.0 }
  0xfc   : > { %v780_v6 = vpack.c.bf16 %v768_v5, %v768_v5 }
  0xfd   : > { %v713_v8 = vpop.f32.mrf.mxu2  ;;  %v638_v11 = vpop.f32.mrf.mxu0 }
  0xfe   : > { %v752_v9 = vpop.f32.mrf.mxu3  ;;  %793 = vst.msk [vmem:[%s1755_s7 + $0x20] sm:$0xf] %vm784_vm0, %v780_v6  ;;  %v714_v10 = vadd.f32 %v713_v8, %v675_v7  ;;  %v639_v12 = vadd.f32 %v1750_v40, %v638_v11  ;;  %v677_v14 = vpop.f32.mrf.mxu1 }
 0x100   : > { %v753_v13 = vadd.f32 %v752_v9, %v714_v10  ;;  %v678_v16 = vadd.f32 %v677_v14, %v639_v12 }
 0x102   : > { %v769_v15 = vmax.f32 %v753_v13, 0.0 }
 0x104   : > { %v781_v17 = vpack.c.bf16 %v769_v15, %v769_v15 }
 0x105   : > { %v716_v18 = vpop.f32.mrf.mxu2  ;;  %v640_v21 = vpop.f32.mrf.mxu0 }
 0x106   : > { %v755_v19 = vpop.f32.mrf.mxu3  ;;  %794 = vst.msk [vmem:[%s1755_s7 + $0x24] sm:$0xf] %vm784_vm0, %v781_v17  ;;  %v717_v20 = vadd.f32 %v716_v18, %v678_v16  ;;  %v641_v23 = vadd.f32 %v1750_v40, %v640_v21  ;;  %v679_v25 = vpop.f32.mrf.mxu1 }
 0x108   : > { %v756_v22 = vadd.f32 %v755_v19, %v717_v20  ;;  %v680_v27 = vadd.f32 %v679_v25, %v641_v23 }
 0x10a   : > { %v770_v24 = vmax.f32 %v756_v22, 0.0 }
 0x10c   : > { %v782_v26 = vpack.c.bf16 %v770_v24, %v770_v24 }
 0x10d   : > { %v718_v28 = vpop.f32.mrf.mxu2 }
 0x10e   : > { %795 = vst.msk [vmem:[%s1755_s7 + $0x28] sm:$0xf] %vm784_vm0, %v782_v26  ;;  %v719_v29 = vadd.f32 %v718_v28, %v680_v27  ;;  %v757_v30 = vpop.f32.mrf.mxu3 }
 0x110   : > { %v758_v31 = vadd.f32 %v757_v30, %v719_v29 }
 0x112   : > { %v771_v32 = vmax.f32 %v758_v31, 0.0  ;;  %803 = sbr.rel (!%p1589_p4) target bundleno = 338 (0x152), region = 36 }
 0x114   : > { %v783_v33 = vpack.c.bf16 %v771_v32, %v771_v32 }
 0x116   : > { %796 = vst.msk [vmem:[%s1755_s7 + $0x2c] sm:$0xf] %vm784_vm0, %v783_v33 }
 0x117   : > { %s1881_s12 = smov (!%p806_p8, %s805_s12), 12 }
 0x118   : > { %s1289_s14 = sshll.u32 %s1881_s12, 2 }
 0x119   : > { %p1292_p9 = scmp.eq.s32.totalorder %s1289_s14, 0 }
 0x11a   : > { %1450 = sdivrem.u32 (!%p1292_p9), %s1881_s12, 12 }
 0x11b   : > { %814 = sbr.rel (%p1292_p9) target bundleno = 338 (0x152), region = 40 }
 0x123   : > { %s1804_s20 = spop.drf %1450 }
 0x124   : > { %s1452_s17 = spop.drf %1450  ;;  %p1293_p10 = scmp.le.s32.totalorder %s1804_s20, 0 }
 0x125   : > { %s1873_s15 = smov (!%p1293_p10), %s1798_s11  ;;  %s1874_s24 = smov (!%p1293_p10), %s1755_s7 }
 0x126   : > { %1015 = sbr.rel (%p1293_p10) target bundleno = 312 (0x138), region = 112  ;;  %s1813_s18 = smov (!%p1293_p10), 0  }
 0x127   : > { %s1815_s21 = smov (!%p1293_p10), 0  }
 0x12b LB: >> { %v832_v40 = vld [vmem:[%s1518_s24] sm:$0xf]  ;;  %v834_v34 = vld [vmem:[%s1518_s24 + $0x4] sm:$0xf]  ;;  %v836_v35 = vld [vmem:[%s1518_s24 + $0x8] sm:$0xf]  ;;  %s1526_s21 = sphi %s1815_s21, %s826_s21   ;;  %s1522_s18 = sphi %s1813_s18, %s1876_s18   ;;  %s1518_s24 = sphi %s1874_s24, %s861_s24   ;;  %s1514_s15 = sphi %s1873_s15, %s1875_s15  }
 0x12c   : >> { %833 = vst [vmem:[%s1514_s15] sm:$0xf] %v832_v40  ;;  %v838_v36 = vld [vmem:[%s1518_s24 + $0xc] sm:$0xf]  ;;  %s856_s22 = sadd.s32 1, %s1522_s18  ;;  %v840_v37 = vld [vmem:[%s1518_s24 + $0x10] sm:$0xf] }
 0x12d   : >> { %835 = vst [vmem:[%s1514_s15 + $0x4] sm:$0xf] %v834_v34  ;;  %p857_p11 = scmp.ge.s32.totalorder %s856_s22, %s1804_s20  ;;  %v842_v38 = vld [vmem:[%s1518_s24 + $0x14] sm:$0xf]  ;;  %v844_v39 = vld [vmem:[%s1518_s24 + $0x18] sm:$0xf] }
 0x12e   : >> { %837 = vst [vmem:[%s1514_s15 + $0x8] sm:$0xf] %v836_v35  ;;  %v846_v41 = vld [vmem:[%s1518_s24 + $0x1c] sm:$0xf]  ;;  %v848_v42 = vld [vmem:[%s1518_s24 + $0x20] sm:$0xf] }
 0x12f   : >> { %839 = vst [vmem:[%s1514_s15 + $0xc] sm:$0xf] %v838_v36  ;;  %s1883_s22 = smov (%p857_p11, %s856_s22), 0  ;;  %v850_v43 = vld [vmem:[%s1518_s24 + $0x24] sm:$0xf]  ;;  %s826_s21 = sadd.s32 1, %s1526_s21  }
 0x130   : >> { %841 = vst [vmem:[%s1514_s15 + $0x10] sm:$0xf] %v840_v37  ;;  %s859_s23 = smul.u32 48, %s1883_s22  ;;  %v852_v44 = vld [vmem:[%s1518_s24 + $0x28] sm:$0xf]  ;;  %p825_p12 = scmp.ge.s32.totalorder %s826_s21, %s1804_s20 }
 0x131   : >> { %843 = vst [vmem:[%s1514_s15 + $0x14] sm:$0xf] %v842_v38  ;;  %v854_v45 = vld [vmem:[%s1518_s24 + $0x2c] sm:$0xf]  ;;  %s1876_s18 = smov %s1883_s22 }
 0x132   : >> { %845 = vst [vmem:[%s1514_s15 + $0x18] sm:$0xf] %v844_v39  ;;  %s861_s24 = scalar_lea.vmem %s1755_s7, %s859_s23 [#allocation2]   ;;  %s862_s25 = scalar_lea.vmem %s1798_s11, %s859_s23  }
 0x133   : >> { %847 = vst [vmem:[%s1514_s15 + $0x1c] sm:$0xf] %v846_v41  ;;  %828 = sbr.rel (!%p825_p12) target bundleno = 299 (0x12b), region = 118 }
 0x134   : >> { %849 = vst [vmem:[%s1514_s15 + $0x20] sm:$0xf] %v848_v42 }
 0x135   : >> { %851 = vst [vmem:[%s1514_s15 + $0x24] sm:$0xf] %v850_v43 }
 0x136   : >> { %853 = vst [vmem:[%s1514_s15 + $0x28] sm:$0xf] %v852_v44 }
 0x137   : >> { %855 = vst [vmem:[%s1514_s15 + $0x2c] sm:$0xf] %v854_v45  ;;  %s1875_s15 = smov %s862_s25 }
 0x138 PF: > { %1453 = sdivrem.u32 %s1881_s12, 12 }
 0x139   : > { %s1294_s26 = smul.u32 48, %s1804_s20 }
 0x13b   : > { %s1853_s27 = scalar_lea.vmem %s1755_s7, %s1294_s26 [#allocation2]   ;;  %s869_s28 = scalar_lea.vmem %s1798_s11, %s1294_s26  }
 0x141   : > { %s1454_s29 = spop.drf %1453 }
 0x142   : > { %s1455_s30 = spop.drf %1453 }
 0x143   : > { %p1296_p13 = scmp.le.s32.totalorder %s1455_s30, 0 }
 0x144   : > { %s1528_s4 = smov (!%p1296_p13), %s869_s28   ;;  %s1532_s5 = smov (!%p1296_p13), %s1853_s27  }
 0x145   : > { %1029 = sbr.rel (%p1296_p13) target bundleno = 338 (0x152), region = 123  ;;  %s1536_s6 = smov (!%p1296_p13), 0  }
 0x146   : > { %s1540_s8 = smov (!%p1296_p13), 0  }
 0x14a LB: >> { %v879_v46 = vld [vmem:[%s1534_s5] sm:$0xf]  ;;  %s881_s7 = sadd.s32 1, %s1538_s6  ;;  %s873_s8 = sadd.s32 1, %s1542_s8   ;;  %s1542_s8 = sphi %s1540_s8, %s873_s8   ;;  %s1538_s6 = sphi %s1536_s6, %s1537_s6   ;;  %s1534_s5 = sphi %s1532_s5, %s886_s5   ;;  %s1530_s4 = sphi %s1528_s4, %s887_s4  }
 0x14b   : >> { %880 = vst [vmem:[%s1530_s4] sm:$0xf] %v879_v46  ;;  %p882_p0 = scmp.ge.s32.totalorder %s881_s7, %s1455_s30  ;;  %p872_p1 = scmp.ge.s32.totalorder %s873_s8, %s1455_s30 }
 0x14d   : >> { %s1885_s7 = smov (%p882_p0, %s881_s7), 0  ;;  %875 = sbr.rel (!%p872_p1) target bundleno = 330 (0x14a), region = 129 }
 0x14e   : >> { %s1297_s12 = sshll.u32 %s1885_s7, 2  ;;  %s1537_s6 = smov %s1885_s7  }
 0x14f   : >> { %s886_s5 = scalar_lea.vmem %s1853_s27, %s1297_s12 [#allocation2]   ;;  %s887_s4 = scalar_lea.vmem %s869_s28, %s1297_s12  }
 0x152 PF: > { %p10_p2 = scmp.ge.s32.totalorder %s1579_s16, 4   ;;  %s1877_s12 = smov %s1506_s13 }
 0x153   : > { %s1878_s13 = smov %s1587_s19  ;;  %s1879_s14 = smov %s1579_s16 }
 0x154   :  { %12 = sbr.rel (!%p10_p2) target bundleno = 2 (0x2), region = 140 }

// kernel: action_network_forward.6
= control target key start
LH: loop header
LB: loop body
LE: loop exit
PB: predicated region body
PF: predicated region fallthrough
CT: control target
= control target key end

     0   :  { %s1569_s12 = smov 0   ;;  %s1571_s13 = smov 0   ;;  %s1859_s0 = inlined_call_operand.vmem [shape: bf16[98,576], index: 0, kind: input, shape index: {}]   ;;  %s1860_s1 = inlined_call_operand.vmem [shape: bf16[576,64], index: 1, kind: input, shape index: {}]   ;;  %s1861_s2 = inlined_call_operand.vmem [shape: f32[1,64], index: 2, kind: input, shape index: {}]   ;;  %s1862_s3 = inlined_call_operand.vmem [shape: bf16[98,64], index: 3, kind: output, shape index: {}]  }
   0x1   :  { %s1573_s14 = smov 0  }
   0x2 LB: > { %s1582_s15 = sadd.s32 4294967295, %s1515_s14   ;;  %s1584_s16 = sadd.s32 1, %s1515_s14   ;;  %s1515_s14 = sphi %s1573_s14, %s1870_s14   ;;  %s1511_s13 = sphi %s1571_s13, %s1869_s13   ;;  %s1507_s12 = sphi %s1569_s12, %s1868_s12  }
   0x3   : > { %s85_s17 = ssub.s32 %s1515_s14, %s1584_s16  ;;  %s88_s18 = sadd.s32 1, %s1511_s13 }
   0x4   : > { %p86_p0 = scmp.eq.s32.totalorder %s85_s17, 0  ;;  %p98_p1 = scmp.ne.s32.totalorder %s1511_s13, %s1507_s12 }
   0x5   : > { %p99_p2 = scmp.eq.s32.totalorder %s1582_s15, 1  ;;  %p1047_p3 = scmp.ge.s32.totalorder %s1515_s14, 1 }
   0x6   : > { %s1592_s19 = scalar_select %p86_p0, %s1511_s13, %s88_s18  }
   0x7   : > { %p1594_p4 = por %p99_p2, %p98_p1  ;;  %p149_p5 = scmp.lt.s32.totalorder %s1515_s14, 3 }
   0x9   : > { %p150_p6 = pnand %p1047_p3, %p149_p5 }
   0xa   : > { %s1614_s4 = sshll.u32 (!%p150_p6), %s1582_s15, 3 }
   0xb   : > { %153 = sbr.rel (%p150_p6) target bundleno = 322 (0x142), region = 32  ;;  %p184_p7 = scmp.lt.s32.totalorder (!%p150_p6), %s1614_s4, 12 }
  0x10   : > { %v1323_v0 = vld [vmem:[%s1860_s1 + $0x38] sm:$0xff]  ;;  %v1322_v1 = vld [vmem:[%s1860_s1 + $0x30] sm:$0xff]  ;;  %v1321_v4 = vld [vmem:[%s1860_s1 + $0x28] sm:$0xff]  ;;  %s185_s17 = scalar_select %p184_p7, %s1614_s4, 12  ;;  %vm617_vm0 = vcmask 523264   ;;  %vm791_vm1 = vcmask 519168  }
  0x11   : > { %1355 = vmatpush.bf16.msra.mxu1 %v1323_v0  ;;  %1356 = vmatpush.bf16.msra.mxu2 %v1323_v0  ;;  %v1347_v2 = vld [vmem:[%s1860_s1 + $0xf8] sm:$0xff]  ;;  %v1346_v3 = vld [vmem:[%s1860_s1 + $0xf0] sm:$0xff]  ;;  %v1345_v5 = vld [vmem:[%s1860_s1 + $0xe8] sm:$0xff] }
  0x12   : > { %630 = vmatpush.bf16.msra.mxu0 %v1323_v0  ;;  %717 = vmatpush.bf16.msra.mxu3 %v1347_v2  ;;  %v1320_v6 = vld [vmem:[%s1860_s1 + $0x20] sm:$0xff]  ;;  %v1319_v8 = vld [vmem:[%s1860_s1 + $0x18] sm:$0xff]  ;;  %v1318_v10 = vld [vmem:[%s1860_s1 + $0x10] sm:$0xff]  ;;  %s1371_s24 = smul.u32 20, %s185_s17 }
  0x13   : > { %v1344_v7 = vld [vmem:[%s1860_s1 + $0xe0] sm:$0xff]  ;;  %v1343_v9 = vld [vmem:[%s1860_s1 + $0xd8] sm:$0xff]  ;;  %v1342_v11 = vld [vmem:[%s1860_s1 + $0xd0] sm:$0xff] }
  0x14   : > { %v1317_v12 = vld [vmem:[%s1860_s1 + $0x8] sm:$0xff]  ;;  %s1645_s5 = scalar_lea.vmem %s1859_s0, %s1371_s24  ;;  %v1316_v14 = vld [vmem:[%s1860_s1] sm:$0xff]  ;;  %v1339_v19 = vld [vmem:[%s1860_s1 + $0xb8] sm:$0xff]  ;;  %s1352_s24 = sshll.u32 (%p1594_p4), %s1582_s15, 5 }
  0x15   : > { %1357 = vmatpush.bf16.msra.mxu1 %v1322_v1  ;;  %1358 = vmatpush.bf16.msra.mxu2 %v1322_v1  ;;  %v1341_v13 = vld [vmem:[%s1860_s1 + $0xc8] sm:$0xff]  ;;  %v1303_v16 = vld [vmem:[%s1645_s5 + $0x38] sm:$0xf0]  ;;  %v1113_v17 = vld [vmem:[%s1645_s5 + $0x78] sm:$0xf]  ;;  %s1805_s27 = scalar_lea.vmem (%p1594_p4), %s1862_s3, %s1352_s24  }
  0x16   : > { %631 = vmatpush.bf16.msra.mxu0 %v1322_v1  ;;  %718 = vmatpush.bf16.msra.mxu3 %v1346_v3  ;;  %v1073_v15 = vld [vmem:[%s1645_s5 + $0x28] sm:$0xf]  ;;  %v1313_v18 = vld [vmem:[%s1645_s5 + $0x88] sm:$0xf0]  ;;  %v1331_v20 = vld [vmem:[%s1860_s1 + $0x78] sm:$0xff] }
  0x17   : > { %v1053_v21 = vld [vmem:[%s1645_s5] sm:$0xf]  ;;  %v1074_v23 = vor.u32 %v1303_v16, %v1073_v15  ;;  %v1114_v24 = vor.u32 %v1313_v18, %v1113_v17  ;;  %v1298_v25 = vld [vmem:[%s1645_s5 + $0x10] sm:$0xf0]  ;;  %v1297_v26 = vld [vmem:[%s1645_s5 + $0xc] sm:$0xf] }
  0x18   : > { %v1340_v22 = vld [vmem:[%s1860_s1 + $0xc0] sm:$0xff]  ;;  %v1351_v28 = vld [vmem:[%s1860_s1 + $0x118] sm:$0xff]  ;;  %v1338_v29 = vld [vmem:[%s1860_s1 + $0xb0] sm:$0xff]  ;;  %v1054_v31 = vor.u32 %v1298_v25, %v1053_v21 }
  0x19   : > { %1359 = vmatpush.bf16.msra.mxu1 %v1321_v4  ;;  %1360 = vmatpush.bf16.msra.mxu2 %v1321_v4  ;;  %v1063_v27 = vld [vmem:[%s1645_s5 + $0x1c] sm:$0xf0]  ;;  %v1330_v30 = vld [vmem:[%s1860_s1 + $0x70] sm:$0xff]  ;;  %v1337_v34 = vld [vmem:[%s1860_s1 + $0xa8] sm:$0xff] }
  0x1a   : > { %632 = vmatpush.bf16.msra.mxu0 %v1321_v4  ;;  %719 = vmatpush.bf16.msra.mxu3 %v1345_v5  ;;  %v1066_v32 = vor.u32 %v1297_v26, %v1063_v27  ;;  %v1350_v33 = vld [vmem:[%s1860_s1 + $0x110] sm:$0xff]  ;;  %v1329_v35 = vld [vmem:[%s1860_s1 + $0x68] sm:$0xff]  ;;  %v1336_v37 = vld [vmem:[%s1860_s1 + $0xa0] sm:$0xff] }
  0x1b   : > { %v1349_v36 = vld [vmem:[%s1860_s1 + $0x108] sm:$0xff]  ;;  %v1328_v38 = vld [vmem:[%s1860_s1 + $0x60] sm:$0xff]  ;;  %v1093_v39 = vld [vmem:[%s1645_s5 + $0x50] sm:$0xf] }
  0x1c   : > { %v1308_v40 = vld [vmem:[%s1645_s5 + $0x60] sm:$0xf0]  ;;  %v1335_v42 = vld [vmem:[%s1860_s1 + $0x98] sm:$0xff]  ;;  %v1069_v44 = vld [vmem:[%s1645_s5 + $0x10] sm:$0xf] }
  0x1d   : > { %1361 = vmatpush.bf16.msra.mxu1 %v1320_v6  ;;  %1362 = vmatpush.bf16.msra.mxu2 %v1320_v6  ;;  %v1348_v41 = vld [vmem:[%s1860_s1 + $0x100] sm:$0xff]  ;;  %v1327_v43 = vld [vmem:[%s1860_s1 + $0x58] sm:$0xff]  ;;  %v1094_v45 = vor.u32 %v1308_v40, %v1093_v39  ;;  %v1302_v47 = vld [vmem:[%s1645_s5 + $0x34] sm:$0xf] }
  0x1e   : > { %633 = vmatpush.bf16.msra.mxu0 %v1320_v6  ;;  %720 = vmatpush.bf16.msra.mxu3 %v1344_v7  ;;  %v1300_v46 = vld [vmem:[%s1645_s5 + $0x20] sm:$0xf0]  ;;  %v1083_v48 = vld [vmem:[%s1645_s5 + $0x44] sm:$0xf0]  ;;  %v1334_v49 = vld [vmem:[%s1860_s1 + $0x90] sm:$0xff] }
  0x1f   : > { %v1326_v50 = vld [vmem:[%s1860_s1 + $0x50] sm:$0xff]  ;;  %v1070_v51 = vor.u32 %v1300_v46, %v1069_v44  ;;  %v1086_v52 = vor.u32 %v1302_v47, %v1083_v48  ;;  %v1333_v53 = vld [vmem:[%s1860_s1 + $0x88] sm:$0xff]  ;;  %v1332_v55 = vld [vmem:[%s1860_s1 + $0x80] sm:$0xff] }
  0x20   : > { %v1325_v54 = vld [vmem:[%s1860_s1 + $0x48] sm:$0xff]  ;;  %v1324_v56 = vld [vmem:[%s1860_s1 + $0x40] sm:$0xff]  ;;  %v1299_v58 = vld [vmem:[%s1645_s5 + $0x18] sm:$0xf0] }
  0x21   : > { %1363 = vmatpush.bf16.msra.mxu1 %v1319_v8  ;;  %1364 = vmatpush.bf16.msra.mxu2 %v1319_v8  ;;  %v1061_v57 = vld [vmem:[%s1645_s5 + $0x8] sm:$0xf]  ;;  %v1296_v60 = vld [vmem:[%s1645_s5 + $0x4] sm:$0xf]  ;;  %v1055_v61 = vld [vmem:[%s1645_s5 + $0x14] sm:$0xf0] }
  0x22   : > { %634 = vmatpush.bf16.msra.mxu0 %v1319_v8  ;;  %721 = vmatpush.bf16.msra.mxu3 %v1343_v9  ;;  %v1062_v59 = vor.u32 %v1299_v58, %v1061_v57  ;;  %v1089_v62 = vld [vmem:[%s1645_s5 + $0x38] sm:$0xf]  ;;  %v1058_v63 = vor.u32 %v1296_v60, %v1055_v61  ;;  %v1305_v0 = vld [vmem:[%s1645_s5 + $0x48] sm:$0xf0]  ;;  %v1307_v1 = vld [vmem:[%s1645_s5 + $0x5c] sm:$0xf] }
  0x23   : > { %v1103_v2 = vld [vmem:[%s1645_s5 + $0x6c] sm:$0xf0]  ;;  %v1090_v3 = vor.u32 %v1305_v0, %v1089_v62  ;;  %v1304_v6 = vld [vmem:[%s1645_s5 + $0x40] sm:$0xf0]  ;;  %v1301_v8 = vld [vmem:[%s1645_s5 + $0x2c] sm:$0xf] }
  0x24   : > { %v1106_v4 = vor.u32 %v1307_v1, %v1103_v2  ;;  %v1081_v5 = vld [vmem:[%s1645_s5 + $0x30] sm:$0xf]  ;;  %v1075_v9 = vld [vmem:[%s1645_s5 + $0x3c] sm:$0xf0]  ;;  %v1101_v17 = vld [vmem:[%s1645_s5 + $0x58] sm:$0xf] }
  0x25   : > { %1365 = vmatpush.bf16.msra.mxu1 %v1318_v10  ;;  %1366 = vmatpush.bf16.msra.mxu2 %v1318_v10  ;;  %v1082_v7 = vor.u32 %v1304_v6, %v1081_v5  ;;  %v1309_v18 = vld [vmem:[%s1645_s5 + $0x68] sm:$0xf0]  ;;  %v1095_v21 = vld [vmem:[%s1645_s5 + $0x64] sm:$0xf0]  ;;  %v1121_v26 = vld [vmem:[%s1645_s5 + $0x80] sm:$0xf] }
  0x26   : > { %635 = vmatpush.bf16.msra.mxu0 %v1318_v10  ;;  %722 = vmatpush.bf16.msra.mxu3 %v1342_v11  ;;  %v1109_v10 = vld [vmem:[%s1645_s5 + $0x60] sm:$0xf]  ;;  %v1078_v11 = vor.u32 %v1301_v8, %v1075_v9  ;;  %v1314_v27 = vld [vmem:[%s1645_s5 + $0x90] sm:$0xf0] }
  0x29   : > { %1367 = vmatpush.bf16.msra.mxu1 %v1317_v12  ;;  %1368 = vmatpush.bf16.msra.mxu2 %v1317_v12 }
  0x2a   : > { %636 = vmatpush.bf16.msra.mxu0 %v1317_v12  ;;  %723 = vmatpush.bf16.msra.mxu3 %v1341_v13  ;;  %v1310_v12 = vld [vmem:[%s1645_s5 + $0x70] sm:$0xf0]  ;;  %v1312_v13 = vld [vmem:[%s1645_s5 + $0x84] sm:$0xf] }
  0x2b   : > { %v1110_v15 = vor.u32 %v1310_v12, %v1109_v10 }
  0x2d   : > { %1369 = vmatpush.bf16.msra.mxu1 %v1316_v14  ;;  %1370 = vmatpush.bf16.msra.mxu2 %v1316_v14 }
  0x2e   : > { %637 = vmatpush.bf16.msra.mxu0 %v1316_v14  ;;  %724 = vmatpush.bf16.msra.mxu3 %v1340_v22  ;;  %v1123_v14 = vld [vmem:[%s1645_s5 + $0x94] sm:$0xf0] }
  0x2f   : > { %v1126_v16 = vor.u32 %v1312_v13, %v1123_v14 }
  0x30   : > { %643 = vmatmul.bf16.vlgmr.msra.gmra.mxu1 %v1074_v23  ;;  %653 = vmatmul.bf16.vlgmr.msra.gmra.mxu2 %v1114_v24  ;;  %v1129_v23 = vld [vmem:[%s1645_s5 + $0x88] sm:$0xf]  ;;  %v1315_v24 = vld [vmem:[%s1645_s5 + $0x98] sm:$0xf0] }
  0x31   : > { %688 = vmatpush.bf16.msrb.mxu2 %v1339_v19  ;;  %659 = vmatpush.bf16.msrb.mxu1 %v1331_v20  ;;  %v1102_v19 = vor.u32 %v1309_v18, %v1101_v17  ;;  %v1306_v20 = vld [vmem:[%s1645_s5 + $0x54] sm:$0xf]  ;;  %v1130_v25 = vor.u32 %v1315_v24, %v1129_v23 }
  0x32   : > { %750 = vmatpush.bf16.msrb.mxu0 %v1351_v28  ;;  %725 = vmatmul.bf16.vlgmr.msra.gmra.mxu3 %v1066_v32  ;;  %v1098_v22 = vor.u32 %v1306_v20, %v1095_v21  ;;  %v1122_v28 = vor.u32 %v1314_v27, %v1121_v26 }
  0x33   : > { %638 = vmatmul.bf16.vlgmr.msra.gmra.mxu0 %v1054_v31 }
  0x35   : > { %689 = vmatpush.bf16.msrb.mxu2 %v1338_v29  ;;  %660 = vmatpush.bf16.msrb.mxu1 %v1330_v30  ;;  %v1311_v29 = vld [vmem:[%s1645_s5 + $0x7c] sm:$0xf]  ;;  %v1115_v30 = vld [vmem:[%s1645_s5 + $0x8c] sm:$0xf0]  ;;  %s175_s5 = sand.u32 1, %s1507_s12   ;;  %s808_s12 = ssub.s32 (%p1594_p4), 13, %s1614_s4 }
  0x36   : > { %751 = vmatpush.bf16.msrb.mxu0 %v1350_v33  ;;  %v1118_v31 = vor.u32 %v1311_v29, %v1115_v30  ;;  %s1048_s22 = sshll.u32 %s175_s5, 5  ;;  %p809_p8 = scmp.lt.s32.totalorder (%p1594_p4), %s808_s12, 8 }
  0x37   : > { %s1772_s23 = scalar_lea.vmem [#allocation2], %s1048_s22  }
  0x39   : > { %690 = vmatpush.bf16.msrb.mxu2 %v1337_v34  ;;  %661 = vmatpush.bf16.msrb.mxu1 %v1329_v35 }
  0x3a   : > { %752 = vmatpush.bf16.msrb.mxu0 %v1349_v36 }
  0x3d   : > { %691 = vmatpush.bf16.msrb.mxu2 %v1336_v37  ;;  %662 = vmatpush.bf16.msrb.mxu1 %v1328_v38 }
  0x3e   : > { %753 = vmatpush.bf16.msrb.mxu0 %v1348_v41 }
  0x40   : > { %648 = vmatmul.bf16.gmra.mxu1 %v1094_v45 }
  0x41   : > { %692 = vmatpush.bf16.msrb.mxu2 %v1335_v42  ;;  %663 = vmatpush.bf16.msrb.mxu1 %v1327_v43  ;;  %v1767_v42 = vld [vmem:[%s1861_s2] ss:$0 sm:$0xff] }
  0x42   : > { %730 = vmatmul.bf16.gmra.mxu3 %v1086_v52 }
  0x43   : > { %1275 = vmatmul.msk.bf16.vlgmr.msrb.gmra.mxu0 %vm617_vm0, %v1070_v51 }
  0x45   : > { %693 = vmatpush.bf16.msrb.mxu2 %v1334_v49  ;;  %664 = vmatpush.bf16.msrb.mxu1 %v1326_v50 }
  0x49   : > { %694 = vmatpush.bf16.msrb.mxu2 %v1333_v53  ;;  %665 = vmatpush.bf16.msrb.mxu1 %v1325_v54 }
  0x4d   : > { %695 = vmatpush.bf16.msrb.mxu2 %v1332_v55  ;;  %666 = vmatpush.bf16.msrb.mxu1 %v1324_v56 }
  0x50   : > { %696 = vmatmul.bf16.vlgmr.msrb.gmra.mxu2 %v1062_v59  ;;  %667 = vmatmul.bf16.vlgmr.msrb.gmra.mxu1 %v1058_v63 }
  0x52   : > { %735 = vmatmul.bf16.gmra.mxu3 %v1106_v4 }
  0x53   : > { %1276 = vmatmul.msk.bf16.gmra.mxu0 %vm617_vm0, %v1090_v3 }
  0x60   : > { %701 = vmatmul.bf16.gmra.mxu2 %v1082_v7  ;;  %672 = vmatmul.bf16.gmra.mxu1 %v1078_v11 }
  0x62   : > { %740 = vmatmul.bf16.gmra.mxu3 %v1126_v16 }
  0x63   : > { %1277 = vmatmul.msk.bf16.gmra.mxu0 %vm617_vm0, %v1110_v15 }
  0x70   : > { %706 = vmatmul.bf16.gmra.mxu2 %v1102_v19  ;;  %677 = vmatmul.bf16.gmra.mxu1 %v1098_v22 }
  0x73   : > { %1278 = vmatmul.msk.bf16.gmra.mxu0 %vm617_vm0, %v1130_v25 }
  0x80   : > { %711 = vmatmul.bf16.gmra.mxu2 %v1122_v28  ;;  %682 = vmatmul.bf16.gmra.mxu1 %v1118_v31 }
  0xad   : > { %v644_v32 = vpop.f32.mrf.mxu1 }
  0xae   : > { %v645_v62 = vadd.f32 %v1767_v42, %v644_v32 }
  0xb0   : > { %v639_v33 = vpop.f32.mrf.mxu0 }
  0xb1   : > { %v640_v43 = vadd.f32 %v1767_v42, %v639_v33 }
  0xb3   : > { %v1760_v37 = vpop.f32.mrf.mxu2 }
  0xb5   : > { %v646_v34 = vpop.f32.mrf.mxu1  ;;  %v726_v38 = vpop.f32.mrf.mxu3 }
  0xb6   : > { %v647_v8 = vadd.f32 %v1767_v42, %v646_v34 }
  0xb8   : > { %v641_v35 = vpop.f32.mrf.mxu0 }
  0xb9   : > { %v642_v51 = vadd.f32 %v1767_v42, %v641_v35 }
  0xbb   : > { %v1762_v41 = vpop.f32.mrf.mxu2 }
  0xbd   : > { %v649_v36 = vpop.f32.mrf.mxu1  ;;  %v728_v46 = vpop.f32.mrf.mxu3 }
  0xbe   : > { %v650_v18 = vadd.f32 %v1767_v42, %v649_v36 }
  0xc0   : > { %v755_v40 = vpop.f32.mrf.mxu0 }
  0xc5   : > { %v651_v39 = vpop.f32.mrf.mxu1  ;;  %v731_v57 = vpop.f32.mrf.mxu3 }
  0xc6   : > { %v652_v29 = vadd.f32 %v1767_v42, %v651_v39 }
  0xc8   : > { %v757_v48 = vpop.f32.mrf.mxu0 }
  0xcd   : > { %v668_v44 = vpop.f32.mrf.mxu1  ;;  %v733_v6 = vpop.f32.mrf.mxu3 }
  0xce   : > { %v669_v45 = vadd.f32 %v668_v44, %v640_v43  ;;  %v655_v44 = vadd.f32 %v1767_v42, %v1760_v37 }
  0xd0   : > { %v760_v60 = vpop.f32.mrf.mxu0 }
  0xd3   : > { %v697_v47 = vpop.f32.mrf.mxu2 }
  0xd4   : > { %v698_v49 = vadd.f32 %v697_v47, %v669_v45 }
  0xd5   : > { %v670_v53 = vpop.f32.mrf.mxu1  ;;  %v736_v19 = vpop.f32.mrf.mxu3 }
  0xd6   : > { %v727_v50 = vadd.f32 %v726_v38, %v698_v49  ;;  %v671_v54 = vadd.f32 %v670_v53, %v642_v51 }
  0xd8   : > { %v756_v52 = vadd.f32 %v755_v40, %v727_v50  ;;  %v762_v9 = vpop.f32.mrf.mxu0 }
  0xda   : > { %v775_v55 = vmax.f32 %v756_v52, 0.0 }
  0xdb   : > { %v699_v56 = vpop.f32.mrf.mxu2 }
  0xdc   : > { %v783_v58 = vpack.c.bf16 %v775_v55, %v775_v55  ;;  %v700_v59 = vadd.f32 %v699_v56, %v671_v54  ;;  %v657_v54 = vadd.f32 %v1767_v42, %v1762_v41 }
  0xdd   : > { %v673_v0 = vpop.f32.mrf.mxu1  ;;  %v738_v32 = vpop.f32.mrf.mxu3 }
  0xde   : > { %792 = vst.msk [vmem:[%s1772_s23] sm:$0xf] %vm791_vm1, %v783_v58  ;;  %v729_v61 = vadd.f32 %v728_v46, %v700_v59  ;;  %v674_v1 = vadd.f32 %v673_v0, %v645_v62 }
  0xe0   : > { %v758_v63 = vadd.f32 %v757_v48, %v729_v61  ;;  %v765_v22 = vpop.f32.mrf.mxu0 }
  0xe2   : > { %v776_v2 = vmax.f32 %v758_v63, 0.0 }
  0xe3   : > { %v702_v3 = vpop.f32.mrf.mxu2 }
  0xe4   : > { %v784_v4 = vpack.c.bf16 %v776_v2, %v776_v2  ;;  %v703_v5 = vadd.f32 %v702_v3, %v674_v1 }
  0xe5   : > { %v675_v11 = vpop.f32.mrf.mxu1  ;;  %v741_v48 = vpop.f32.mrf.mxu3 }
  0xe6   : > { %793 = vst.msk [vmem:[%s1772_s23 + $0x4] sm:$0xf] %vm791_vm1, %v784_v4  ;;  %v732_v7 = vadd.f32 %v731_v57, %v703_v5  ;;  %v676_v12 = vadd.f32 %v675_v11, %v647_v8 }
  0xe8   : > { %v761_v10 = vadd.f32 %v760_v60, %v732_v7  ;;  %v767_v35 = vpop.f32.mrf.mxu0 }
  0xea   : > { %v777_v13 = vmax.f32 %v761_v10, 0.0 }
  0xeb   : > { %v704_v14 = vpop.f32.mrf.mxu2 }
  0xec   : > { %v785_v15 = vpack.c.bf16 %v777_v13, %v777_v13  ;;  %v705_v16 = vadd.f32 %v704_v14, %v676_v12 }
  0xed   : > { %v678_v21 = vpop.f32.mrf.mxu1  ;;  %v743_v61 = vpop.f32.mrf.mxu3 }
  0xee   : > { %794 = vst.msk [vmem:[%s1772_s23 + $0x8] sm:$0xf] %vm791_vm1, %v785_v15  ;;  %v734_v17 = vadd.f32 %v733_v6, %v705_v16  ;;  %v679_v23 = vadd.f32 %v678_v21, %v650_v18 }
  0xf0   : > { %v763_v20 = vadd.f32 %v762_v9, %v734_v17  ;;  %v770_v52 = vpop.f32.mrf.mxu0 }
  0xf2   : > { %v778_v24 = vmax.f32 %v763_v20, 0.0 }
  0xf3   : > { %v707_v25 = vpop.f32.mrf.mxu2 }
  0xf4   : > { %v786_v26 = vpack.c.bf16 %v778_v24, %v778_v24  ;;  %v708_v27 = vadd.f32 %v707_v25, %v679_v23 }
  0xf5   : > { %v680_v31 = vpop.f32.mrf.mxu1 }
  0xf6   : > { %795 = vst.msk [vmem:[%s1772_s23 + $0xc] sm:$0xf] %vm791_vm1, %v786_v26  ;;  %v737_v28 = vadd.f32 %v736_v19, %v708_v27  ;;  %v681_v33 = vadd.f32 %v680_v31, %v652_v29 }
  0xf8   : > { %v766_v30 = vadd.f32 %v765_v22, %v737_v28  ;;  %v772_v63 = vpop.f32.mrf.mxu0 }
  0xfa   : > { %v779_v34 = vmax.f32 %v766_v30, 0.0 }
  0xfb   : > { %v709_v36 = vpop.f32.mrf.mxu2 }
  0xfc   : > { %v787_v38 = vpack.c.bf16 %v779_v34, %v779_v34  ;;  %v710_v40 = vadd.f32 %v709_v36, %v681_v33 }
  0xfd   : > { %v683_v46 = vpop.f32.mrf.mxu1 }
  0xfe   : > { %796 = vst.msk [vmem:[%s1772_s23 + $0x10] sm:$0xf] %vm791_vm1, %v787_v38  ;;  %v739_v43 = vadd.f32 %v738_v32, %v710_v40  ;;  %v684_v47 = vadd.f32 %v683_v46, %v655_v44 }
 0x100   : > { %v768_v45 = vadd.f32 %v767_v35, %v739_v43 }
 0x102   : > { %v780_v39 = vmax.f32 %v768_v45, 0.0 }
 0x103   : > { %v712_v49 = vpop.f32.mrf.mxu2 }
 0x104   : > { %v788_v50 = vpack.c.bf16 %v780_v39, %v780_v39  ;;  %v713_v51 = vadd.f32 %v712_v49, %v684_v47 }
 0x105   : > { %v685_v56 = vpop.f32.mrf.mxu1 }
 0x106   : > { %797 = vst.msk [vmem:[%s1772_s23 + $0x14] sm:$0xf] %vm791_vm1, %v788_v50  ;;  %v742_v53 = vadd.f32 %v741_v48, %v713_v51  ;;  %v686_v37 = vadd.f32 %v685_v56, %v657_v54 }
 0x108   : > { %v771_v55 = vadd.f32 %v770_v52, %v742_v53 }
 0x10a   : > { %v781_v57 = vmax.f32 %v771_v55, 0.0 }
 0x10b   : > { %v714_v58 = vpop.f32.mrf.mxu2 }
 0x10c   : > { %v789_v59 = vpack.c.bf16 %v781_v57, %v781_v57  ;;  %v715_v60 = vadd.f32 %v714_v58, %v686_v37 }
 0x10e   : > { %798 = vst.msk [vmem:[%s1772_s23 + $0x18] sm:$0xf] %vm791_vm1, %v789_v59  ;;  %v744_v62 = vadd.f32 %v743_v61, %v715_v60 }
 0x110   : > { %v773_v0 = vadd.f32 %v772_v63, %v744_v62 }
 0x112   : > { %v782_v1 = vmax.f32 %v773_v0, 0.0  ;;  %806 = sbr.rel (!%p1594_p4) target bundleno = 322 (0x142), region = 36 }
 0x114   : > { %v790_v2 = vpack.c.bf16 %v782_v1, %v782_v1 }
 0x116   : > { %799 = vst.msk [vmem:[%s1772_s23 + $0x1c] sm:$0xf] %vm791_vm1, %v790_v2 }
 0x117   : > { %s1872_s12 = smov (!%p809_p8, %s808_s12), 8 }
 0x118   : > { %s1281_s28 = sshll.u32 %s1872_s12, 2 }
 0x119   : > { %p1284_p9 = scmp.eq.s32.totalorder %s1281_s28, 0 }
 0x11a   : > { %s1811_s29 = sshrl.u32 (!%p1284_p9), %s1872_s12, 3 }
 0x11b   : > { %817 = sbr.rel (%p1284_p9) target bundleno = 322 (0x142), region = 40  ;;  %p1285_p10 = scmp.le.s32.totalorder (!%p1284_p9), %s1811_s29, 0 }
 0x120   : > { %1000 = sbr.rel (%p1285_p10) target bundleno = 305 (0x131), region = 112  ;;  %s1864_s15 = smov (!%p1285_p10), %s1805_s27 }
 0x121   : > { %s1865_s20 = smov (!%p1285_p10), %s1772_s23  ;;  %s1820_s4 = smov (!%p1285_p10), 0  }
 0x122   : > { %s1822_s30 = smov (!%p1285_p10), 0  }
 0x125 LB: >> { %v834_v41 = vld [vmem:[%s1523_s20] sm:$0xf]  ;;  %v836_v42 = vld [vmem:[%s1523_s20 + $0x4] sm:$0xf]  ;;  %v838_v3 = vld [vmem:[%s1523_s20 + $0x8] sm:$0xf]  ;;  %s1531_s30 = sphi %s1822_s30, %s828_s30   ;;  %s1527_s4 = sphi %s1820_s4, %s1867_s4   ;;  %s1523_s20 = sphi %s1865_s20, %s855_s20   ;;  %s1519_s15 = sphi %s1864_s15, %s1866_s15  }
 0x126   : >> { %835 = vst [vmem:[%s1519_s15] sm:$0xf] %v834_v41  ;;  %v840_v4 = vld [vmem:[%s1523_s20 + $0xc] sm:$0xf]  ;;  %s850_s6 = sadd.s32 1, %s1527_s4  ;;  %v842_v5 = vld [vmem:[%s1523_s20 + $0x10] sm:$0xf] }
 0x127   : >> { %837 = vst [vmem:[%s1519_s15 + $0x4] sm:$0xf] %v836_v42  ;;  %p851_p11 = scmp.ge.s32.totalorder %s850_s6, %s1811_s29  ;;  %v844_v6 = vld [vmem:[%s1523_s20 + $0x14] sm:$0xf]  ;;  %v846_v7 = vld [vmem:[%s1523_s20 + $0x18] sm:$0xf] }
 0x128   : >> { %839 = vst [vmem:[%s1519_s15 + $0x8] sm:$0xf] %v838_v3  ;;  %v848_v8 = vld [vmem:[%s1523_s20 + $0x1c] sm:$0xf]  ;;  %s828_s30 = sadd.s32 1, %s1531_s30  }
 0x129   : >> { %841 = vst [vmem:[%s1519_s15 + $0xc] sm:$0xf] %v840_v4  ;;  %s1874_s6 = smov (%p851_p11, %s850_s6), 0  ;;  %p827_p12 = scmp.ge.s32.totalorder %s828_s30, %s1811_s29 }
 0x12a   : >> { %843 = vst [vmem:[%s1519_s15 + $0x10] sm:$0xf] %v842_v5  ;;  %s1286_s7 = sshll.u32 %s1874_s6, 5  ;;  %s1867_s4 = smov %s1874_s6 }
 0x12b   : >> { %845 = vst [vmem:[%s1519_s15 + $0x14] sm:$0xf] %v844_v6  ;;  %s855_s20 = scalar_lea.vmem %s1772_s23, %s1286_s7 [#allocation2]   ;;  %s856_s8 = scalar_lea.vmem %s1805_s27, %s1286_s7  }
 0x12c   : >> { %847 = vst [vmem:[%s1519_s15 + $0x18] sm:$0xf] %v846_v7  ;;  %830 = sbr.rel (!%p827_p12) target bundleno = 293 (0x125), region = 118 }
 0x12d   : >> { %849 = vst [vmem:[%s1519_s15 + $0x1c] sm:$0xf] %v848_v8  ;;  %s1866_s15 = smov %s856_s8 }
 0x131 PF: > { %s1841_s9 = sand.u32 7, %s1872_s12   ;;  %s1353_s10 = sshll.u32 %s1811_s29, 5 }
 0x132   : > { %s861_s11 = scalar_lea.vmem %s1772_s23, %s1353_s10 [#allocation2]   ;;  %s863_s14 = scalar_lea.vmem %s1805_s27, %s1353_s10  }
 0x133   : > { %p1291_p13 = scmp.le.s32.totalorder %s1841_s9, 0 }
 0x134   : > { %s1533_s17 = smov (!%p1291_p13), %s863_s14   ;;  %s1537_s18 = smov (!%p1291_p13), %s861_s11  }
 0x135   : > { %1014 = sbr.rel (%p1291_p13) target bundleno = 322 (0x142), region = 123  ;;  %s1541_s21 = smov (!%p1291_p13), 0  }
 0x136   : > { %s1545_s5 = smov (!%p1291_p13), 0  }
 0x13a LB: >> { %v873_v9 = vld [vmem:[%s1539_s18] sm:$0xf]  ;;  %s875_s22 = sadd.s32 1, %s1543_s21  ;;  %s867_s5 = sadd.s32 1, %s1547_s5   ;;  %s1547_s5 = sphi %s1545_s5, %s867_s5   ;;  %s1543_s21 = sphi %s1541_s21, %s1542_s21   ;;  %s1539_s18 = sphi %s1537_s18, %s880_s18   ;;  %s1535_s17 = sphi %s1533_s17, %s881_s17  }
 0x13b   : >> { %874 = vst [vmem:[%s1535_s17] sm:$0xf] %v873_v9  ;;  %p876_p0 = scmp.ge.s32.totalorder %s875_s22, %s1841_s9  ;;  %p866_p1 = scmp.ge.s32.totalorder %s867_s5, %s1841_s9 }
 0x13d   : >> { %s1876_s22 = smov (%p876_p0, %s875_s22), 0  ;;  %869 = sbr.rel (!%p866_p1) target bundleno = 314 (0x13a), region = 129 }
 0x13e   : >> { %s1292_s23 = sshll.u32 %s1876_s22, 2  ;;  %s1542_s21 = smov %s1876_s22  }
 0x13f   : >> { %s880_s18 = scalar_lea.vmem %s861_s11, %s1292_s23 [#allocation2]   ;;  %s881_s17 = scalar_lea.vmem %s863_s14, %s1292_s23  }
 0x142 PF: > { %p10_p2 = scmp.ge.s32.totalorder %s1584_s16, 4   ;;  %s1868_s12 = smov %s1511_s13 }
 0x143   : > { %s1869_s13 = smov %s1592_s19  ;;  %s1870_s14 = smov %s1584_s16 }
 0x144   :  { %12 = sbr.rel (!%p10_p2) target bundleno = 2 (0x2), region = 140 }

// kernel: action_network_forward.7
= control target key start
LH: loop header
LB: loop body
LE: loop exit
PB: predicated region body
PF: predicated region fallthrough
CT: control target
= control target key end

     0   :  { %vm4798_vm0 = vcmask 523264   ;;  %vm6119_vm1 = vcmask 1041408   ;;  %vm6134_vm2 = vcmask 1024   ;;  %s15052_s1 = inlined_call_operand.vmem [shape: bf16[3136,512], index: 1, kind: input, shape index: {}]   ;;  %s15053_s0 = inlined_call_operand.vmem [shape: bf16[2,3136], index: 0, kind: input, shape index: {}]   ;;  %s15054_s2 = inlined_call_operand.vmem [shape: f32[1,512], index: 2, kind: input, shape index: {}]   ;;  %s15055_s3 = inlined_call_operand.vmem [shape: f32[1,512], index: 3, kind: input, shape index: {}]   ;;  %s15056_s4 = inlined_call_operand.<no memory space> [shape: f32[1,1], index: 4, kind: input, shape index: {}]   ;;  %s15057_s5 = inlined_call_operand.vmem [shape: f32[2,1], index: 5, kind: output, shape index: {}]  }
   0x1   :  { %v6254_v0 = vld [vmem:[%s15052_s1 + $0xe0] sm:$0xf]  ;;  %v9310_v1 = vld [vmem:[%s15052_s1 + $0xec] sm:$0xf0] }
   0x2   :  { %v6382_v2 = vld [vmem:[%s15052_s1 + $0x1e0] sm:$0xf]  ;;  %v6255_v3 = vor.u32 %v9310_v1, %v6254_v0  ;;  %v9342_v4 = vld [vmem:[%s15052_s1 + $0x1ec] sm:$0xf0] }
   0x3   :  { %v6510_v5 = vld [vmem:[%s15052_s1 + $0x2e0] sm:$0xf]  ;;  %v9374_v6 = vld [vmem:[%s15052_s1 + $0x2ec] sm:$0xf0]  ;;  %v6383_v7 = vor.u32 %v9342_v4, %v6382_v2 }
   0x4   :  { %v6511_v8 = vor.u32 %v9374_v6, %v6510_v5  ;;  %v6638_v9 = vld [vmem:[%s15052_s1 + $0x3e0] sm:$0xf]  ;;  %v9406_v10 = vld [vmem:[%s15052_s1 + $0x3ec] sm:$0xf0]  ;;  %4801 = vmatpush.bf16.msra.mxu0 %v6255_v3 }
   0x5   :  { %v6238_v11 = vld [vmem:[%s15052_s1 + $0xc0] sm:$0xf]  ;;  %v6639_v12 = vor.u32 %v9406_v10, %v6638_v9  ;;  %v9306_v13 = vld [vmem:[%s15052_s1 + $0xcc] sm:$0xf0]  ;;  %4814 = vmatpush.bf16.msra.mxu1 %v6383_v7 }
   0x6   :  { %v6366_v14 = vld [vmem:[%s15052_s1 + $0x1c0] sm:$0xf]  ;;  %v9338_v15 = vld [vmem:[%s15052_s1 + $0x1cc] sm:$0xf0]  ;;  %4827 = vmatpush.bf16.msra.mxu2 %v6511_v8  ;;  %v6239_v16 = vor.u32 %v9306_v13, %v6238_v11 }
   0x7   :  { %v6367_v17 = vor.u32 %v9338_v15, %v6366_v14  ;;  %v6494_v18 = vld [vmem:[%s15052_s1 + $0x2c0] sm:$0xf]  ;;  %v9370_v19 = vld [vmem:[%s15052_s1 + $0x2cc] sm:$0xf0]  ;;  %4840 = vmatpush.bf16.msra.mxu3 %v6639_v12 }
   0x8   :  { %v6622_v20 = vld [vmem:[%s15052_s1 + $0x3c0] sm:$0xf]  ;;  %v6495_v21 = vor.u32 %v9370_v19, %v6494_v18  ;;  %v9402_v22 = vld [vmem:[%s15052_s1 + $0x3cc] sm:$0xf0]  ;;  %4802 = vmatpush.bf16.msra.mxu0 %v6239_v16 }
   0x9   :  { %v6222_v23 = vld [vmem:[%s15052_s1 + $0xa0] sm:$0xf]  ;;  %v9302_v24 = vld [vmem:[%s15052_s1 + $0xac] sm:$0xf0]  ;;  %v6623_v25 = vor.u32 %v9402_v22, %v6622_v20  ;;  %4815 = vmatpush.bf16.msra.mxu1 %v6367_v17 }
   0xa   :  { %v6350_v26 = vld [vmem:[%s15052_s1 + $0x1a0] sm:$0xf]  ;;  %v9334_v27 = vld [vmem:[%s15052_s1 + $0x1ac] sm:$0xf0]  ;;  %v6223_v29 = vor.u32 %v9302_v24, %v6222_v23  ;;  %4828 = vmatpush.bf16.msra.mxu2 %v6495_v21 }
   0xb   :  { %v6478_v28 = vld [vmem:[%s15052_s1 + $0x2a0] sm:$0xf]  ;;  %v9366_v30 = vld [vmem:[%s15052_s1 + $0x2ac] sm:$0xf0]  ;;  %v6351_v33 = vor.u32 %v9334_v27, %v6350_v26  ;;  %4841 = vmatpush.bf16.msra.mxu3 %v6623_v25 }
   0xc   :  { %v6606_v31 = vld [vmem:[%s15052_s1 + $0x3a0] sm:$0xf]  ;;  %v9398_v32 = vld [vmem:[%s15052_s1 + $0x3ac] sm:$0xf0]  ;;  %v6479_v34 = vor.u32 %v9366_v30, %v6478_v28  ;;  %4803 = vmatpush.bf16.msra.mxu0 %v6223_v29 }
   0xd   :  { %v6206_v35 = vld [vmem:[%s15052_s1 + $0x80] sm:$0xf]  ;;  %v9298_v36 = vld [vmem:[%s15052_s1 + $0x8c] sm:$0xf0]  ;;  %v6607_v38 = vor.u32 %v9398_v32, %v6606_v31  ;;  %4816 = vmatpush.bf16.msra.mxu1 %v6351_v33 }
   0xe   :  { %v6334_v37 = vld [vmem:[%s15052_s1 + $0x180] sm:$0xf]  ;;  %v9330_v39 = vld [vmem:[%s15052_s1 + $0x18c] sm:$0xf0]  ;;  %v6207_v44 = vor.u32 %v9298_v36, %v6206_v35  ;;  %4829 = vmatpush.bf16.msra.mxu2 %v6479_v34 }
   0xf   :  { %v6462_v40 = vld [vmem:[%s15052_s1 + $0x280] sm:$0xf]  ;;  %v9362_v41 = vld [vmem:[%s15052_s1 + $0x28c] sm:$0xf0]  ;;  %v6335_v45 = vor.u32 %v9330_v39, %v6334_v37  ;;  %4842 = vmatpush.bf16.msra.mxu3 %v6607_v38 }
  0x10   :  { %v6590_v42 = vld [vmem:[%s15052_s1 + $0x380] sm:$0xf]  ;;  %v9394_v43 = vld [vmem:[%s15052_s1 + $0x38c] sm:$0xf0]  ;;  %v6463_v46 = vor.u32 %v9362_v41, %v6462_v40  ;;  %4804 = vmatpush.bf16.msra.mxu0 %v6207_v44 }
  0x11   :  { %v6190_v47 = vld [vmem:[%s15052_s1 + $0x60] sm:$0xf]  ;;  %v9294_v48 = vld [vmem:[%s15052_s1 + $0x6c] sm:$0xf0]  ;;  %v6591_v50 = vor.u32 %v9394_v43, %v6590_v42  ;;  %4817 = vmatpush.bf16.msra.mxu1 %v6335_v45 }
  0x12   :  { %v6318_v49 = vld [vmem:[%s15052_s1 + $0x160] sm:$0xf]  ;;  %v9326_v51 = vld [vmem:[%s15052_s1 + $0x16c] sm:$0xf0]  ;;  %v6191_v56 = vor.u32 %v9294_v48, %v6190_v47  ;;  %4830 = vmatpush.bf16.msra.mxu2 %v6463_v46 }
  0x13   :  { %v6446_v52 = vld [vmem:[%s15052_s1 + $0x260] sm:$0xf]  ;;  %v9358_v53 = vld [vmem:[%s15052_s1 + $0x26c] sm:$0xf0]  ;;  %v6319_v57 = vor.u32 %v9326_v51, %v6318_v49  ;;  %4843 = vmatpush.bf16.msra.mxu3 %v6591_v50 }
  0x14   :  { %v6574_v54 = vld [vmem:[%s15052_s1 + $0x360] sm:$0xf]  ;;  %v9390_v55 = vld [vmem:[%s15052_s1 + $0x36c] sm:$0xf0]  ;;  %v6447_v58 = vor.u32 %v9358_v53, %v6446_v52  ;;  %4805 = vmatpush.bf16.msra.mxu0 %v6191_v56 }
  0x15   :  { %v6174_v59 = vld [vmem:[%s15052_s1 + $0x40] sm:$0xf]  ;;  %v9290_v60 = vld [vmem:[%s15052_s1 + $0x4c] sm:$0xf0]  ;;  %v6575_v62 = vor.u32 %v9390_v55, %v6574_v54  ;;  %4818 = vmatpush.bf16.msra.mxu1 %v6319_v57 }
  0x16   :  { %v6302_v61 = vld [vmem:[%s15052_s1 + $0x140] sm:$0xf]  ;;  %v9322_v63 = vld [vmem:[%s15052_s1 + $0x14c] sm:$0xf0]  ;;  %v6175_v4 = vor.u32 %v9290_v60, %v6174_v59  ;;  %4831 = vmatpush.bf16.msra.mxu2 %v6447_v58 }
  0x17   :  { %v6430_v0 = vld [vmem:[%s15052_s1 + $0x240] sm:$0xf]  ;;  %v9354_v1 = vld [vmem:[%s15052_s1 + $0x24c] sm:$0xf0]  ;;  %v6303_v5 = vor.u32 %v9322_v63, %v6302_v61  ;;  %4844 = vmatpush.bf16.msra.mxu3 %v6575_v62 }
  0x18   :  { %v6558_v2 = vld [vmem:[%s15052_s1 + $0x340] sm:$0xf]  ;;  %v9386_v3 = vld [vmem:[%s15052_s1 + $0x34c] sm:$0xf0]  ;;  %v6431_v6 = vor.u32 %v9354_v1, %v6430_v0  ;;  %4806 = vmatpush.bf16.msra.mxu0 %v6175_v4 }
  0x19   :  { %v6158_v7 = vld [vmem:[%s15052_s1 + $0x20] sm:$0xf]  ;;  %v9286_v8 = vld [vmem:[%s15052_s1 + $0x2c] sm:$0xf0]  ;;  %v6559_v10 = vor.u32 %v9386_v3, %v6558_v2  ;;  %4819 = vmatpush.bf16.msra.mxu1 %v6303_v5 }
  0x1a   :  { %v6286_v9 = vld [vmem:[%s15052_s1 + $0x120] sm:$0xf]  ;;  %v9318_v11 = vld [vmem:[%s15052_s1 + $0x12c] sm:$0xf0]  ;;  %v6159_v16 = vor.u32 %v9286_v8, %v6158_v7  ;;  %4832 = vmatpush.bf16.msra.mxu2 %v6431_v6 }
  0x1b   :  { %v6414_v12 = vld [vmem:[%s15052_s1 + $0x220] sm:$0xf]  ;;  %v9350_v13 = vld [vmem:[%s15052_s1 + $0x22c] sm:$0xf0]  ;;  %v6287_v19 = vor.u32 %v9318_v11, %v6286_v9  ;;  %4845 = vmatpush.bf16.msra.mxu3 %v6559_v10 }
  0x1c   :  { %v6542_v14 = vld [vmem:[%s15052_s1 + $0x320] sm:$0xf]  ;;  %v9382_v15 = vld [vmem:[%s15052_s1 + $0x32c] sm:$0xf0]  ;;  %v6415_v20 = vor.u32 %v9350_v13, %v6414_v12  ;;  %4807 = vmatpush.bf16.msra.mxu0 %v6159_v16 }
  0x1d   :  { %v6142_v17 = vld [vmem:[%s15052_s1] sm:$0xf]  ;;  %v9282_v18 = vld [vmem:[%s15052_s1 + $0xc] sm:$0xf0]  ;;  %v6543_v24 = vor.u32 %v9382_v15, %v6542_v14  ;;  %4820 = vmatpush.bf16.msra.mxu1 %v6287_v19 }
  0x1e   :  { %v6270_v21 = vld [vmem:[%s15052_s1 + $0x100] sm:$0xf]  ;;  %v9314_v22 = vld [vmem:[%s15052_s1 + $0x10c] sm:$0xf0]  ;;  %v6143_v31 = vor.u32 %v9282_v18, %v6142_v17  ;;  %4833 = vmatpush.bf16.msra.mxu2 %v6415_v20 }
  0x1f   :  { %v6398_v23 = vld [vmem:[%s15052_s1 + $0x200] sm:$0xf]  ;;  %v9346_v25 = vld [vmem:[%s15052_s1 + $0x20c] sm:$0xf0]  ;;  %v6271_v35 = vor.u32 %v9314_v22, %v6270_v21  ;;  %4846 = vmatpush.bf16.msra.mxu3 %v6543_v24 }
  0x20   :  { %v6526_v26 = vld [vmem:[%s15052_s1 + $0x300] sm:$0xf]  ;;  %v9378_v27 = vld [vmem:[%s15052_s1 + $0x30c] sm:$0xf0]  ;;  %v6399_v36 = vor.u32 %v9346_v25, %v6398_v23  ;;  %4808 = vmatpush.bf16.msra.mxu0 %v6143_v31 }
  0x21   :  { %v6766_v28 = vld [vmem:[%s15052_s1 + $0x4e0] sm:$0xf]  ;;  %v9438_v29 = vld [vmem:[%s15052_s1 + $0x4ec] sm:$0xf0]  ;;  %v6527_v39 = vor.u32 %v9378_v27, %v6526_v26  ;;  %4821 = vmatpush.bf16.msra.mxu1 %v6271_v35 }
  0x22   :  { %v6894_v30 = vld [vmem:[%s15052_s1 + $0x5e0] sm:$0xf]  ;;  %v9470_v32 = vld [vmem:[%s15052_s1 + $0x5ec] sm:$0xf0]  ;;  %v6767_v40 = vor.u32 %v9438_v29, %v6766_v28  ;;  %4834 = vmatpush.bf16.msra.mxu2 %v6399_v36 }
  0x23   :  { %v7022_v33 = vld [vmem:[%s15052_s1 + $0x6e0] sm:$0xf]  ;;  %v9502_v34 = vld [vmem:[%s15052_s1 + $0x6ec] sm:$0xf0]  ;;  %v6895_v41 = vor.u32 %v9470_v32, %v6894_v30  ;;  %4847 = vmatpush.bf16.msra.mxu3 %v6527_v39 }
  0x24   :  { %v7150_v37 = vld [vmem:[%s15052_s1 + $0x7e0] sm:$0xf]  ;;  %v9534_v38 = vld [vmem:[%s15052_s1 + $0x7ec] sm:$0xf0]  ;;  %v7023_v42 = vor.u32 %v9502_v34, %v7022_v33  ;;  %4853 = vmatpush.bf16.msrb.mxu0 %v6767_v40 }
  0x25   :  { %v6750_v43 = vld [vmem:[%s15052_s1 + $0x4c0] sm:$0xf]  ;;  %v9434_v44 = vld [vmem:[%s15052_s1 + $0x4cc] sm:$0xf0]  ;;  %v7151_v46 = vor.u32 %v9534_v38, %v7150_v37  ;;  %4866 = vmatpush.bf16.msrb.mxu1 %v6895_v41 }
  0x26   :  { %v6878_v45 = vld [vmem:[%s15052_s1 + $0x5c0] sm:$0xf]  ;;  %v9466_v47 = vld [vmem:[%s15052_s1 + $0x5cc] sm:$0xf0]  ;;  %v6751_v52 = vor.u32 %v9434_v44, %v6750_v43  ;;  %4879 = vmatpush.bf16.msrb.mxu2 %v7023_v42  ;;  %v24_v43 = vld [vmem:[%s15053_s0 + $0x8] sm:$0xff] }
  0x27   :  { %v7006_v48 = vld [vmem:[%s15052_s1 + $0x6c0] sm:$0xf]  ;;  %v9498_v49 = vld [vmem:[%s15052_s1 + $0x6cc] sm:$0xf0]  ;;  %v6879_v55 = vor.u32 %v9466_v47, %v6878_v45  ;;  %4892 = vmatpush.bf16.msrb.mxu3 %v7151_v46 }
  0x28   :  { %v7134_v50 = vld [vmem:[%s15052_s1 + $0x7c0] sm:$0xf]  ;;  %v9530_v51 = vld [vmem:[%s15052_s1 + $0x7cc] sm:$0xf0]  ;;  %v7007_v56 = vor.u32 %v9498_v49, %v7006_v48  ;;  %4854 = vmatpush.bf16.msrb.mxu0 %v6751_v52 }
  0x29   :  { %v6734_v53 = vld [vmem:[%s15052_s1 + $0x4a0] sm:$0xf]  ;;  %v9430_v54 = vld [vmem:[%s15052_s1 + $0x4ac] sm:$0xf0]  ;;  %v7135_v60 = vor.u32 %v9530_v51, %v7134_v50  ;;  %4867 = vmatpush.bf16.msrb.mxu1 %v6879_v55 }
  0x2a   :  { %v6862_v57 = vld [vmem:[%s15052_s1 + $0x5a0] sm:$0xf]  ;;  %v9462_v58 = vld [vmem:[%s15052_s1 + $0x5ac] sm:$0xf0]  ;;  %v6735_v1 = vor.u32 %v9430_v54, %v6734_v53  ;;  %4880 = vmatpush.bf16.msrb.mxu2 %v7007_v56 }
  0x2b   :  { %v23_v59 = vld [vmem:[%s15053_s0] sm:$0xff]  ;;  %v9494_v62 = vld [vmem:[%s15052_s1 + $0x6ac] sm:$0xf0]  ;;  %v6863_v2 = vor.u32 %v9462_v58, %v6862_v57  ;;  %4893 = vmatpush.bf16.msrb.mxu3 %v7135_v60 }
  0x2c   :  { %v6990_v61 = vld [vmem:[%s15052_s1 + $0x6a0] sm:$0xf]  ;;  %822 = vst [vmem:[#allocation1] ss:$9 sm:$0xff] %v23_v59  ;;  %v9526_v0 = vld [vmem:[%s15052_s1 + $0x7ac] sm:$0xf0]  ;;  %4855 = vmatpush.bf16.msrb.mxu0 %v6735_v1 }
  0x2d   :  { %v7118_v63 = vld [vmem:[%s15052_s1 + $0x7a0] sm:$0xf]  ;;  %v6991_v3 = vor.u32 %v9494_v62, %v6990_v61  ;;  %v9426_v5 = vld [vmem:[%s15052_s1 + $0x48c] sm:$0xf0]  ;;  %4868 = vmatpush.bf16.msrb.mxu1 %v6863_v2 }
  0x2e   :  { %v6718_v4 = vld [vmem:[%s15052_s1 + $0x480] sm:$0xf]  ;;  %v7119_v7 = vor.u32 %v9526_v0, %v7118_v63  ;;  %v9458_v8 = vld [vmem:[%s15052_s1 + $0x58c] sm:$0xf0] }
  0x2f   :  { %v6846_v6 = vld [vmem:[%s15052_s1 + $0x580] sm:$0xf]  ;;  %v9490_v10 = vld [vmem:[%s15052_s1 + $0x68c] sm:$0xf0]  ;;  %v6719_v14 = vor.u32 %v9426_v5, %v6718_v4  ;;  %4881 = vmatpush.bf16.msrb.mxu2 %v6991_v3 }
  0x30   :  { %v6974_v9 = vld [vmem:[%s15052_s1 + $0x680] sm:$0xf]  ;;  %v9522_v12 = vld [vmem:[%s15052_s1 + $0x78c] sm:$0xf0]  ;;  %v6847_v18 = vor.u32 %v9458_v8, %v6846_v6  ;;  %4894 = vmatpush.bf16.msrb.mxu3 %v7119_v7 }
  0x31   :  { %v7102_v11 = vld [vmem:[%s15052_s1 + $0x780] sm:$0xf]  ;;  %v9422_v15 = vld [vmem:[%s15052_s1 + $0x46c] sm:$0xf0]  ;;  %v6975_v19 = vor.u32 %v9490_v10, %v6974_v9  ;;  %4856 = vmatpush.bf16.msrb.mxu0 %v6719_v14 }
  0x32   :  { %v6702_v13 = vld [vmem:[%s15052_s1 + $0x460] sm:$0xf]  ;;  %v9454_v17 = vld [vmem:[%s15052_s1 + $0x56c] sm:$0xf0]  ;;  %v7103_v23 = vor.u32 %v9522_v12, %v7102_v11  ;;  %4869 = vmatpush.bf16.msrb.mxu1 %v6847_v18 }
  0x33   :  { %v6830_v16 = vld [vmem:[%s15052_s1 + $0x560] sm:$0xf]  ;;  %v10405_v20 = vld [vmem:[#allocation1 + $0x12] sm:$0xff]  ;;  %v10418_v26 = vld [vmem:[#allocation1 + $0x9] sm:$0xff]  ;;  %v6703_v29 = vor.u32 %v9422_v15, %v6702_v13  ;;  %4882 = vmatpush.bf16.msrb.mxu2 %v6975_v19 }
  0x34   :  { %v10407_v21 = vld [vmem:[#allocation1] sm:$0xff]  ;;  %v9486_v25 = vld [vmem:[%s15052_s1 + $0x66c] sm:$0xf0]  ;;  %4835 = vmatmul.bf16.vlgmr.msra.gmra.mxu2 %v10405_v20  ;;  %4822 = vmatmul.bf16.vlgmr.msra.gmra.mxu1 %v10418_v26  ;;  %v6831_v30 = vor.u32 %v9454_v17, %v6830_v16  ;;  %v10498_v61 = vld [vmem:[#allocation1 + $0x36] sm:$0xff] }
  0x35   :  { %v10409_v22 = vld [vmem:[#allocation1 + $0x1b] sm:$0xff]  ;;  %v9518_v28 = vld [vmem:[%s15052_s1 + $0x76c] sm:$0xf0]  ;;  %4809 = vmatmul.bf16.vlgmr.msra.gmra.mxu0 %v10407_v21  ;;  %4895 = vmatpush.bf16.msrb.mxu3 %v7103_v23  ;;  %v10500_v0 = vld [vmem:[#allocation1 + $0x24] sm:$0xff] }
  0x36   :  { %v6958_v24 = vld [vmem:[%s15052_s1 + $0x660] sm:$0xf]  ;;  %4848 = vmatmul.bf16.vlgmr.msra.gmra.mxu3 %v10409_v22  ;;  %v9418_v33 = vld [vmem:[%s15052_s1 + $0x44c] sm:$0xf0]  ;;  %4857 = vmatpush.bf16.msrb.mxu0 %v6703_v29 }
  0x37   :  { %v7086_v27 = vld [vmem:[%s15052_s1 + $0x760] sm:$0xf]  ;;  %v6959_v31 = vor.u32 %v9486_v25, %v6958_v24  ;;  %v9450_v36 = vld [vmem:[%s15052_s1 + $0x54c] sm:$0xf0]  ;;  %4870 = vmatpush.bf16.msrb.mxu1 %v6831_v30 }
  0x38   :  { %v6686_v32 = vld [vmem:[%s15052_s1 + $0x440] sm:$0xf]  ;;  %v7087_v35 = vor.u32 %v9518_v28, %v7086_v27  ;;  %v9482_v38 = vld [vmem:[%s15052_s1 + $0x64c] sm:$0xf0] }
  0x39   :  { %v6814_v34 = vld [vmem:[%s15052_s1 + $0x540] sm:$0xf]  ;;  %v9514_v40 = vld [vmem:[%s15052_s1 + $0x74c] sm:$0xf0]  ;;  %v6687_v41 = vor.u32 %v9418_v33, %v6686_v32  ;;  %4883 = vmatpush.bf16.msrb.mxu2 %v6959_v31 }
  0x3a   :  { %v6942_v37 = vld [vmem:[%s15052_s1 + $0x640] sm:$0xf]  ;;  %v6815_v44 = vor.u32 %v9450_v36, %v6814_v34  ;;  %v9414_v46 = vld [vmem:[%s15052_s1 + $0x42c] sm:$0xf0]  ;;  %4896 = vmatpush.bf16.msrb.mxu3 %v7087_v35 }
  0x3b   :  { %v7070_v39 = vld [vmem:[%s15052_s1 + $0x740] sm:$0xf]  ;;  %v6943_v45 = vor.u32 %v9482_v38, %v6942_v37  ;;  %v9446_v48 = vld [vmem:[%s15052_s1 + $0x52c] sm:$0xf0]  ;;  %4858 = vmatpush.bf16.msrb.mxu0 %v6687_v41 }
  0x3c   :  { %v6670_v42 = vld [vmem:[%s15052_s1 + $0x420] sm:$0xf]  ;;  %v7071_v49 = vor.u32 %v9514_v40, %v7070_v39  ;;  %v9478_v51 = vld [vmem:[%s15052_s1 + $0x62c] sm:$0xf0]  ;;  %4871 = vmatpush.bf16.msrb.mxu1 %v6815_v44 }
  0x3d   :  { %v6798_v47 = vld [vmem:[%s15052_s1 + $0x520] sm:$0xf]  ;;  %v9510_v53 = vld [vmem:[%s15052_s1 + $0x72c] sm:$0xf0]  ;;  %v6671_v56 = vor.u32 %v9414_v46, %v6670_v42  ;;  %4884 = vmatpush.bf16.msrb.mxu2 %v6943_v45 }
  0x3e   :  { %v6926_v50 = vld [vmem:[%s15052_s1 + $0x620] sm:$0xf]  ;;  %v9410_v55 = vld [vmem:[%s15052_s1 + $0x40c] sm:$0xf0]  ;;  %v6799_v62 = vor.u32 %v9446_v48, %v6798_v47  ;;  %4897 = vmatpush.bf16.msrb.mxu3 %v7071_v49 }
  0x3f   :  { %v7054_v52 = vld [vmem:[%s15052_s1 + $0x720] sm:$0xf]  ;;  %v9442_v58 = vld [vmem:[%s15052_s1 + $0x50c] sm:$0xf0]  ;;  %v6927_v63 = vor.u32 %v9478_v51, %v6926_v50  ;;  %4859 = vmatpush.bf16.msrb.mxu0 %v6671_v56 }
  0x40   :  { %v6654_v54 = vld [vmem:[%s15052_s1 + $0x400] sm:$0xf]  ;;  %v9474_v60 = vld [vmem:[%s15052_s1 + $0x60c] sm:$0xf0]  ;;  %v7055_v3 = vor.u32 %v9510_v53, %v7054_v52  ;;  %4872 = vmatpush.bf16.msrb.mxu1 %v6799_v62 }
  0x41   :  { %v6782_v57 = vld [vmem:[%s15052_s1 + $0x500] sm:$0xf]  ;;  %v10504_v2 = vld [vmem:[#allocation1 + $0x2d] sm:$0xff]  ;;  %v6655_v9 = vor.u32 %v9410_v55, %v6654_v54  ;;  %4885 = vmatpush.bf16.msrb.mxu2 %v6927_v63 }
  0x42   :  { %v6910_v59 = vld [vmem:[%s15052_s1 + $0x600] sm:$0xf]  ;;  %v9506_v5 = vld [vmem:[%s15052_s1 + $0x70c] sm:$0xf0]  ;;  %v6783_v13 = vor.u32 %v9442_v58, %v6782_v57  ;;  %4898 = vmatpush.bf16.msrb.mxu3 %v7055_v3 }
  0x43   :  { %v10502_v1 = vld [vmem:[#allocation1 + $0x3f] sm:$0xff]  ;;  %v9566_v7 = vld [vmem:[%s15052_s1 + $0x8ec] sm:$0xf0]  ;;  %v6911_v14 = vor.u32 %v9474_v60, %v6910_v59  ;;  %4860 = vmatpush.bf16.msrb.mxu0 %v6655_v9 }
  0x44   :  { %v7038_v4 = vld [vmem:[%s15052_s1 + $0x700] sm:$0xf]  ;;  %832 = vst [vmem:[#allocation1] ss:$9 sm:$0xff] %v24_v43  ;;  %v9598_v10 = vld [vmem:[%s15052_s1 + $0x9ec] sm:$0xf0]  ;;  %4873 = vmatpush.bf16.msrb.mxu1 %v6783_v13 }
  0x45   :  { %v7278_v6 = vld [vmem:[%s15052_s1 + $0x8e0] sm:$0xf]  ;;  %v9630_v12 = vld [vmem:[%s15052_s1 + $0xaec] sm:$0xf0]  ;;  %v7039_v17 = vor.u32 %v9506_v5, %v7038_v4  ;;  %4886 = vmatpush.bf16.msrb.mxu2 %v6911_v14 }
  0x46   :  { %v7406_v8 = vld [vmem:[%s15052_s1 + $0x9e0] sm:$0xf]  ;;  %v9662_v16 = vld [vmem:[%s15052_s1 + $0xbec] sm:$0xf0]  ;;  %v7279_v18 = vor.u32 %v9566_v7, %v7278_v6  ;;  %4861 = vmatmul.bf16.vlgmr.msrb.gmra.mxu0 %v10500_v0 }
  0x47   :  { %v7534_v11 = vld [vmem:[%s15052_s1 + $0xae0] sm:$0xf]  ;;  %v7407_v19 = vor.u32 %v9598_v10, %v7406_v8  ;;  %v9562_v25 = vld [vmem:[%s15052_s1 + $0x8cc] sm:$0xf0]  ;;  %4899 = vmatpush.bf16.msrb.mxu3 %v7039_v17  ;;  %4874 = vmatmul.bf16.vlgmr.msrb.gmra.mxu1 %v10504_v2 }
  0x48   :  { %v7662_v15 = vld [vmem:[%s15052_s1 + $0xbe0] sm:$0xf]  ;;  %v7535_v23 = vor.u32 %v9630_v12, %v7534_v11  ;;  %v9594_v29 = vld [vmem:[%s15052_s1 + $0x9cc] sm:$0xf0]  ;;  %4905 = vmatpush.bf16.msra.mxu0 %v7279_v18  ;;  %4887 = vmatmul.bf16.vlgmr.msrb.gmra.mxu2 %v10498_v61 }
  0x49   :  { %v7262_v24 = vld [vmem:[%s15052_s1 + $0x8c0] sm:$0xf]  ;;  %v7663_v28 = vor.u32 %v9662_v16, %v7662_v15  ;;  %v9626_v31 = vld [vmem:[%s15052_s1 + $0xacc] sm:$0xf0]  ;;  %4918 = vmatpush.bf16.msra.mxu1 %v7407_v19 }
  0x4a   :  { %v7390_v27 = vld [vmem:[%s15052_s1 + $0x9c0] sm:$0xf]  ;;  %v9658_v33 = vld [vmem:[%s15052_s1 + $0xbcc] sm:$0xf0]  ;;  %v7263_v34 = vor.u32 %v9562_v25, %v7262_v24  ;;  %4931 = vmatpush.bf16.msra.mxu2 %v7535_v23  ;;  %4900 = vmatmul.bf16.vlgmr.msrb.gmra.mxu3 %v10502_v1 }
  0x4b   :  { %v7518_v30 = vld [vmem:[%s15052_s1 + $0xac0] sm:$0xf]  ;;  %v7391_v35 = vor.u32 %v9594_v29, %v7390_v27  ;;  %v9558_v38 = vld [vmem:[%s15052_s1 + $0x8ac] sm:$0xf0]  ;;  %4944 = vmatpush.bf16.msra.mxu3 %v7663_v28 }
  0x4c   :  { %v7646_v32 = vld [vmem:[%s15052_s1 + $0xbc0] sm:$0xf]  ;;  %v7519_v36 = vor.u32 %v9626_v31, %v7518_v30  ;;  %v9590_v41 = vld [vmem:[%s15052_s1 + $0x9ac] sm:$0xf0]  ;;  %4906 = vmatpush.bf16.msra.mxu0 %v7263_v34 }
  0x4d   :  { %v7246_v37 = vld [vmem:[%s15052_s1 + $0x8a0] sm:$0xf]  ;;  %v7647_v40 = vor.u32 %v9658_v33, %v7646_v32  ;;  %v9622_v43 = vld [vmem:[%s15052_s1 + $0xaac] sm:$0xf0]  ;;  %4919 = vmatpush.bf16.msra.mxu1 %v7391_v35 }
  0x4e   :  { %v7374_v39 = vld [vmem:[%s15052_s1 + $0x9a0] sm:$0xf]  ;;  %v9654_v45 = vld [vmem:[%s15052_s1 + $0xbac] sm:$0xf0]  ;;  %v7247_v46 = vor.u32 %v9558_v38, %v7246_v37  ;;  %4932 = vmatpush.bf16.msra.mxu2 %v7519_v36 }
  0x4f   :  { %v7502_v42 = vld [vmem:[%s15052_s1 + $0xaa0] sm:$0xf]  ;;  %v7375_v47 = vor.u32 %v9590_v41, %v7374_v39  ;;  %v9554_v50 = vld [vmem:[%s15052_s1 + $0x88c] sm:$0xf0]  ;;  %4945 = vmatpush.bf16.msra.mxu3 %v7647_v40 }
  0x50   :  { %v7630_v44 = vld [vmem:[%s15052_s1 + $0xba0] sm:$0xf]  ;;  %v7503_v48 = vor.u32 %v9622_v43, %v7502_v42  ;;  %v9586_v53 = vld [vmem:[%s15052_s1 + $0x98c] sm:$0xf0]  ;;  %4907 = vmatpush.bf16.msra.mxu0 %v7247_v46 }
  0x51   :  { %v7230_v49 = vld [vmem:[%s15052_s1 + $0x880] sm:$0xf]  ;;  %v7631_v52 = vor.u32 %v9654_v45, %v7630_v44  ;;  %v9618_v55 = vld [vmem:[%s15052_s1 + $0xa8c] sm:$0xf0]  ;;  %4920 = vmatpush.bf16.msra.mxu1 %v7375_v47 }
  0x52   :  { %v7358_v51 = vld [vmem:[%s15052_s1 + $0x980] sm:$0xf]  ;;  %v9650_v57 = vld [vmem:[%s15052_s1 + $0xb8c] sm:$0xf0]  ;;  %v7231_v58 = vor.u32 %v9554_v50, %v7230_v49  ;;  %4933 = vmatpush.bf16.msra.mxu2 %v7503_v48 }
  0x53   :  { %v7486_v54 = vld [vmem:[%s15052_s1 + $0xa80] sm:$0xf]  ;;  %v7359_v59 = vor.u32 %v9586_v53, %v7358_v51  ;;  %v9550_v63 = vld [vmem:[%s15052_s1 + $0x86c] sm:$0xf0]  ;;  %4946 = vmatpush.bf16.msra.mxu3 %v7631_v52 }
  0x54   :  { %v7614_v56 = vld [vmem:[%s15052_s1 + $0xb80] sm:$0xf]  ;;  %v7487_v60 = vor.u32 %v9618_v55, %v7486_v54  ;;  %v9582_v5 = vld [vmem:[%s15052_s1 + $0x96c] sm:$0xf0]  ;;  %4908 = vmatpush.bf16.msra.mxu0 %v7231_v58 }
  0x55   :  { %v7214_v62 = vld [vmem:[%s15052_s1 + $0x860] sm:$0xf]  ;;  %v7615_v4 = vor.u32 %v9650_v57, %v7614_v56  ;;  %v9614_v7 = vld [vmem:[%s15052_s1 + $0xa6c] sm:$0xf0]  ;;  %4921 = vmatpush.bf16.msra.mxu1 %v7359_v59 }
  0x56   :  { %v7342_v3 = vld [vmem:[%s15052_s1 + $0x960] sm:$0xf]  ;;  %v9646_v9 = vld [vmem:[%s15052_s1 + $0xb6c] sm:$0xf0]  ;;  %v7215_v10 = vor.u32 %v9550_v63, %v7214_v62  ;;  %4934 = vmatpush.bf16.msra.mxu2 %v7487_v60 }
  0x57   :  { %v7470_v6 = vld [vmem:[%s15052_s1 + $0xa60] sm:$0xf]  ;;  %v7343_v11 = vor.u32 %v9582_v5, %v7342_v3  ;;  %v9546_v14 = vld [vmem:[%s15052_s1 + $0x84c] sm:$0xf0]  ;;  %4947 = vmatpush.bf16.msra.mxu3 %v7615_v4 }
  0x58   :  { %v7598_v8 = vld [vmem:[%s15052_s1 + $0xb60] sm:$0xf]  ;;  %v7471_v12 = vor.u32 %v9614_v7, %v7470_v6  ;;  %v9578_v17 = vld [vmem:[%s15052_s1 + $0x94c] sm:$0xf0]  ;;  %4909 = vmatpush.bf16.msra.mxu0 %v7215_v10 }
  0x59   :  { %v7198_v13 = vld [vmem:[%s15052_s1 + $0x840] sm:$0xf]  ;;  %v7599_v16 = vor.u32 %v9646_v9, %v7598_v8  ;;  %v9610_v19 = vld [vmem:[%s15052_s1 + $0xa4c] sm:$0xf0]  ;;  %4922 = vmatpush.bf16.msra.mxu1 %v7343_v11 }
  0x5a   :  { %v7326_v15 = vld [vmem:[%s15052_s1 + $0x940] sm:$0xf]  ;;  %v9642_v24 = vld [vmem:[%s15052_s1 + $0xb4c] sm:$0xf0]  ;;  %v7199_v25 = vor.u32 %v9546_v14, %v7198_v13  ;;  %4935 = vmatpush.bf16.msra.mxu2 %v7471_v12 }
  0x5b   :  { %v7454_v18 = vld [vmem:[%s15052_s1 + $0xa40] sm:$0xf]  ;;  %v7327_v27 = vor.u32 %v9578_v17, %v7326_v15  ;;  %v9542_v30 = vld [vmem:[%s15052_s1 + $0x82c] sm:$0xf0]  ;;  %4948 = vmatpush.bf16.msra.mxu3 %v7599_v16 }
  0x5c   :  { %v7582_v23 = vld [vmem:[%s15052_s1 + $0xb40] sm:$0xf]  ;;  %v7455_v28 = vor.u32 %v9610_v19, %v7454_v18  ;;  %v9574_v33 = vld [vmem:[%s15052_s1 + $0x92c] sm:$0xf0]  ;;  %4910 = vmatpush.bf16.msra.mxu0 %v7199_v25 }
  0x5d   :  { %v7182_v29 = vld [vmem:[%s15052_s1 + $0x820] sm:$0xf]  ;;  %v7583_v32 = vor.u32 %v9642_v24, %v7582_v23  ;;  %v9606_v35 = vld [vmem:[%s15052_s1 + $0xa2c] sm:$0xf0]  ;;  %4923 = vmatpush.bf16.msra.mxu1 %v7327_v27 }
  0x5e   :  { %v7310_v31 = vld [vmem:[%s15052_s1 + $0x920] sm:$0xf]  ;;  %v9638_v37 = vld [vmem:[%s15052_s1 + $0xb2c] sm:$0xf0]  ;;  %v7183_v38 = vor.u32 %v9542_v30, %v7182_v29  ;;  %4936 = vmatpush.bf16.msra.mxu2 %v7455_v28  ;;  %v10779_v28 = vld [vmem:[#allocation1 + $0x24] sm:$0xff] }
  0x5f   :  { %v7438_v34 = vld [vmem:[%s15052_s1 + $0xa20] sm:$0xf]  ;;  %v9538_v40 = vld [vmem:[%s15052_s1 + $0x80c] sm:$0xf0]  ;;  %v7311_v41 = vor.u32 %v9574_v33, %v7310_v31  ;;  %4949 = vmatpush.bf16.msra.mxu3 %v7583_v32  ;;  %v10781_v31 = vld [vmem:[#allocation1 + $0x36] sm:$0xff] }
  0x60   :  { %v7566_v36 = vld [vmem:[%s15052_s1 + $0xb20] sm:$0xf]  ;;  %v7439_v42 = vor.u32 %v9606_v35, %v7438_v34  ;;  %v9570_v44 = vld [vmem:[%s15052_s1 + $0x90c] sm:$0xf0]  ;;  %4911 = vmatpush.bf16.msra.mxu0 %v7183_v38 }
  0x61   :  { %v7166_v39 = vld [vmem:[%s15052_s1 + $0x800] sm:$0xf]  ;;  %v7567_v46 = vor.u32 %v9638_v37, %v7566_v36  ;;  %v9602_v47 = vld [vmem:[%s15052_s1 + $0xa0c] sm:$0xf0]  ;;  %4924 = vmatpush.bf16.msra.mxu1 %v7311_v41 }
  0x62   :  { %v7294_v43 = vld [vmem:[%s15052_s1 + $0x900] sm:$0xf]  ;;  %v9634_v49 = vld [vmem:[%s15052_s1 + $0xb0c] sm:$0xf0]  ;;  %v7167_v53 = vor.u32 %v9538_v40, %v7166_v39  ;;  %4937 = vmatpush.bf16.msra.mxu2 %v7439_v42 }
  0x63   :  { %v7422_v45 = vld [vmem:[%s15052_s1 + $0xa00] sm:$0xf]  ;;  %v9694_v51 = vld [vmem:[%s15052_s1 + $0xcec] sm:$0xf0]  ;;  %v7295_v57 = vor.u32 %v9570_v44, %v7294_v43  ;;  %4950 = vmatpush.bf16.msra.mxu3 %v7567_v46 }
  0x64   :  { %v7550_v48 = vld [vmem:[%s15052_s1 + $0xb00] sm:$0xf]  ;;  %v9726_v54 = vld [vmem:[%s15052_s1 + $0xdec] sm:$0xf0]  ;;  %v7423_v58 = vor.u32 %v9602_v47, %v7422_v45  ;;  %4912 = vmatpush.bf16.msra.mxu0 %v7167_v53 }
  0x65   :  { %v7790_v50 = vld [vmem:[%s15052_s1 + $0xce0] sm:$0xf]  ;;  %v9758_v56 = vld [vmem:[%s15052_s1 + $0xeec] sm:$0xf0]  ;;  %v7551_v62 = vor.u32 %v9634_v49, %v7550_v48  ;;  %4925 = vmatpush.bf16.msra.mxu1 %v7295_v57 }
  0x66   :  { %v7918_v52 = vld [vmem:[%s15052_s1 + $0xde0] sm:$0xf]  ;;  %v9790_v60 = vld [vmem:[%s15052_s1 + $0xfec] sm:$0xf0]  ;;  %v7791_v63 = vor.u32 %v9694_v51, %v7790_v50  ;;  %4938 = vmatpush.bf16.msra.mxu2 %v7423_v58 }
  0x67   :  { %v8046_v55 = vld [vmem:[%s15052_s1 + $0xee0] sm:$0xf]  ;;  %v25_v4 = vld [vmem:[%s15053_s0 + $0x10] sm:$0xff]  ;;  %v7919_v5 = vor.u32 %v9726_v54, %v7918_v52  ;;  %4951 = vmatpush.bf16.msra.mxu3 %v7551_v62 }
  0x68   :  { %v8174_v59 = vld [vmem:[%s15052_s1 + $0xfe0] sm:$0xf]  ;;  %v8047_v6 = vor.u32 %v9758_v56, %v8046_v55  ;;  %v9690_v8 = vld [vmem:[%s15052_s1 + $0xccc] sm:$0xf0]  ;;  %4957 = vmatpush.bf16.msrb.mxu0 %v7791_v63 }
  0x69   :  { %v7774_v3 = vld [vmem:[%s15052_s1 + $0xcc0] sm:$0xf]  ;;  %v9722_v10 = vld [vmem:[%s15052_s1 + $0xdcc] sm:$0xf0]  ;;  %v8175_v11 = vor.u32 %v9790_v60, %v8174_v59  ;;  %4970 = vmatpush.bf16.msrb.mxu1 %v7919_v5 }
  0x6a   :  { %v10738_v7 = vld [vmem:[#allocation1] sm:$0xff]  ;;  %v10749_v12 = vld [vmem:[#allocation1 + $0x12] sm:$0xff]  ;;  %v10751_v13 = vld [vmem:[#allocation1 + $0x9] sm:$0xff]  ;;  %v7775_v24 = vor.u32 %v9690_v8, %v7774_v3  ;;  %4983 = vmatpush.bf16.msrb.mxu2 %v8047_v6 }
  0x6b   :  { %v7902_v9 = vld [vmem:[%s15052_s1 + $0xdc0] sm:$0xf]  ;;  %v9754_v15 = vld [vmem:[%s15052_s1 + $0xecc] sm:$0xf0]  ;;  %4996 = vmatpush.bf16.msrb.mxu3 %v8175_v11  ;;  %4913 = vmatmul.bf16.vlgmr.msra.gmra.mxu0 %v10738_v7 }
  0x6c   :  { %v8030_v14 = vld [vmem:[%s15052_s1 + $0xec0] sm:$0xf]  ;;  %v9786_v18 = vld [vmem:[%s15052_s1 + $0xfcc] sm:$0xf0]  ;;  %v7903_v29 = vor.u32 %v9722_v10, %v7902_v9  ;;  %4939 = vmatmul.bf16.vlgmr.msra.gmra.mxu2 %v10749_v12  ;;  %4926 = vmatmul.bf16.vlgmr.msra.gmra.mxu1 %v10751_v13 }
  0x6d   :  { %v8158_v16 = vld [vmem:[%s15052_s1 + $0xfc0] sm:$0xf]  ;;  %v9686_v23 = vld [vmem:[%s15052_s1 + $0xcac] sm:$0xf0]  ;;  %v8031_v30 = vor.u32 %v9754_v15, %v8030_v14  ;;  %4958 = vmatpush.bf16.msrb.mxu0 %v7775_v24 }
  0x6e   :  { %v10762_v17 = vld [vmem:[#allocation1 + $0x1b] sm:$0xff]  ;;  %v9718_v27 = vld [vmem:[%s15052_s1 + $0xdac] sm:$0xf0]  ;;  %v8159_v34 = vor.u32 %v9786_v18, %v8158_v16  ;;  %4971 = vmatpush.bf16.msrb.mxu1 %v7903_v29 }
  0x6f   :  { %v7758_v19 = vld [vmem:[%s15052_s1 + $0xca0] sm:$0xf]  ;;  %v10783_v32 = vld [vmem:[#allocation1 + $0x2d] sm:$0xff]  ;;  %4952 = vmatmul.bf16.vlgmr.msra.gmra.mxu3 %v10762_v17  ;;  %4984 = vmatpush.bf16.msrb.mxu2 %v8031_v30 }
  0x70   :  { %v7886_v25 = vld [vmem:[%s15052_s1 + $0xda0] sm:$0xf]  ;;  %v9750_v36 = vld [vmem:[%s15052_s1 + $0xeac] sm:$0xf0]  ;;  %v7759_v39 = vor.u32 %v9686_v23, %v7758_v19  ;;  %4997 = vmatpush.bf16.msrb.mxu3 %v8159_v34 }
  0x71   :  { %v10785_v33 = vld [vmem:[#allocation1 + $0x3f] sm:$0xff]  ;;  %v9782_v38 = vld [vmem:[%s15052_s1 + $0xfac] sm:$0xf0]  ;;  %v7887_v40 = vor.u32 %v9718_v27, %v7886_v25 }
  0x72   :  { %v8014_v35 = vld [vmem:[%s15052_s1 + $0xea0] sm:$0xf]  ;;  %842 = vst [vmem:[#allocation1] ss:$9 sm:$0xff] %v25_v4  ;;  %v9682_v43 = vld [vmem:[%s15052_s1 + $0xc8c] sm:$0xf0]  ;;  %4959 = vmatpush.bf16.msrb.mxu0 %v7759_v39 }
  0x73   :  { %v8142_v37 = vld [vmem:[%s15052_s1 + $0xfa0] sm:$0xf]  ;;  %v8015_v41 = vor.u32 %v9750_v36, %v8014_v35  ;;  %v9714_v46 = vld [vmem:[%s15052_s1 + $0xd8c] sm:$0xf0]  ;;  %4972 = vmatpush.bf16.msrb.mxu1 %v7887_v40 }
  0x74   :  { %v7742_v42 = vld [vmem:[%s15052_s1 + $0xc80] sm:$0xf]  ;;  %v8143_v45 = vor.u32 %v9782_v38, %v8142_v37  ;;  %v9746_v48 = vld [vmem:[%s15052_s1 + $0xe8c] sm:$0xf0] }
  0x75   :  { %v7870_v44 = vld [vmem:[%s15052_s1 + $0xd80] sm:$0xf]  ;;  %v9778_v50 = vld [vmem:[%s15052_s1 + $0xf8c] sm:$0xf0]  ;;  %v7743_v51 = vor.u32 %v9682_v43, %v7742_v42  ;;  %4985 = vmatpush.bf16.msrb.mxu2 %v8015_v41 }
  0x76   :  { %v7998_v47 = vld [vmem:[%s15052_s1 + $0xe80] sm:$0xf]  ;;  %v7871_v52 = vor.u32 %v9714_v46, %v7870_v44  ;;  %v9678_v55 = vld [vmem:[%s15052_s1 + $0xc6c] sm:$0xf0]  ;;  %4998 = vmatpush.bf16.msrb.mxu3 %v8143_v45 }
  0x77   :  { %v8126_v49 = vld [vmem:[%s15052_s1 + $0xf80] sm:$0xf]  ;;  %v7999_v53 = vor.u32 %v9746_v48, %v7998_v47  ;;  %v9710_v58 = vld [vmem:[%s15052_s1 + $0xd6c] sm:$0xf0]  ;;  %4960 = vmatpush.bf16.msrb.mxu0 %v7743_v51 }
  0x78   :  { %v7726_v54 = vld [vmem:[%s15052_s1 + $0xc60] sm:$0xf]  ;;  %v8127_v57 = vor.u32 %v9778_v50, %v8126_v49  ;;  %v9742_v60 = vld [vmem:[%s15052_s1 + $0xe6c] sm:$0xf0]  ;;  %4973 = vmatpush.bf16.msrb.mxu1 %v7871_v52 }
  0x79   :  { %v7854_v56 = vld [vmem:[%s15052_s1 + $0xd60] sm:$0xf]  ;;  %v9774_v63 = vld [vmem:[%s15052_s1 + $0xf6c] sm:$0xf0]  ;;  %v7727_v3 = vor.u32 %v9678_v55, %v7726_v54  ;;  %4986 = vmatpush.bf16.msrb.mxu2 %v7999_v53 }
  0x7a   :  { %v7982_v59 = vld [vmem:[%s15052_s1 + $0xe60] sm:$0xf]  ;;  %v7855_v4 = vor.u32 %v9710_v58, %v7854_v56  ;;  %v9674_v8 = vld [vmem:[%s15052_s1 + $0xc4c] sm:$0xf0]  ;;  %4999 = vmatpush.bf16.msrb.mxu3 %v8127_v57 }
  0x7b   :  { %v8110_v62 = vld [vmem:[%s15052_s1 + $0xf60] sm:$0xf]  ;;  %v7983_v5 = vor.u32 %v9742_v60, %v7982_v59  ;;  %v9706_v11 = vld [vmem:[%s15052_s1 + $0xd4c] sm:$0xf0]  ;;  %4961 = vmatpush.bf16.msrb.mxu0 %v7727_v3 }
  0x7c   :  { %v7710_v6 = vld [vmem:[%s15052_s1 + $0xc40] sm:$0xf]  ;;  %v8111_v10 = vor.u32 %v9774_v63, %v8110_v62  ;;  %v9738_v15 = vld [vmem:[%s15052_s1 + $0xe4c] sm:$0xf0]  ;;  %4974 = vmatpush.bf16.msrb.mxu1 %v7855_v4 }
  0x7d   :  { %v7838_v9 = vld [vmem:[%s15052_s1 + $0xd40] sm:$0xf]  ;;  %v9770_v18 = vld [vmem:[%s15052_s1 + $0xf4c] sm:$0xf0]  ;;  %v7711_v19 = vor.u32 %v9674_v8, %v7710_v6  ;;  %4987 = vmatpush.bf16.msrb.mxu2 %v7983_v5 }
  0x7e   :  { %v7966_v14 = vld [vmem:[%s15052_s1 + $0xe40] sm:$0xf]  ;;  %v7839_v23 = vor.u32 %v9706_v11, %v7838_v9  ;;  %v9670_v27 = vld [vmem:[%s15052_s1 + $0xc2c] sm:$0xf0]  ;;  %5000 = vmatpush.bf16.msrb.mxu3 %v8111_v10 }
  0x7f   :  { %v8094_v16 = vld [vmem:[%s15052_s1 + $0xf40] sm:$0xf]  ;;  %v7967_v24 = vor.u32 %v9738_v15, %v7966_v14  ;;  %v9702_v34 = vld [vmem:[%s15052_s1 + $0xd2c] sm:$0xf0]  ;;  %4962 = vmatpush.bf16.msrb.mxu0 %v7711_v19 }
  0x80   :  { %v7694_v25 = vld [vmem:[%s15052_s1 + $0xc20] sm:$0xf]  ;;  %v8095_v30 = vor.u32 %v9770_v18, %v8094_v16  ;;  %v9734_v36 = vld [vmem:[%s15052_s1 + $0xe2c] sm:$0xf0]  ;;  %4975 = vmatpush.bf16.msrb.mxu1 %v7839_v23 }
  0x81   :  { %v7822_v29 = vld [vmem:[%s15052_s1 + $0xd20] sm:$0xf]  ;;  %v9766_v38 = vld [vmem:[%s15052_s1 + $0xf2c] sm:$0xf0]  ;;  %v7695_v39 = vor.u32 %v9670_v27, %v7694_v25  ;;  %4988 = vmatpush.bf16.msrb.mxu2 %v7967_v24 }
  0x82   :  { %v7950_v35 = vld [vmem:[%s15052_s1 + $0xe20] sm:$0xf]  ;;  %v9666_v41 = vld [vmem:[%s15052_s1 + $0xc0c] sm:$0xf0]  ;;  %v7823_v42 = vor.u32 %v9702_v34, %v7822_v29  ;;  %5001 = vmatpush.bf16.msrb.mxu3 %v8095_v30 }
  0x83   :  { %v8078_v37 = vld [vmem:[%s15052_s1 + $0xf20] sm:$0xf]  ;;  %v7951_v43 = vor.u32 %v9734_v36, %v7950_v35  ;;  %v9698_v45 = vld [vmem:[%s15052_s1 + $0xd0c] sm:$0xf0]  ;;  %4963 = vmatpush.bf16.msrb.mxu0 %v7695_v39 }
  0x84   :  { %v7678_v40 = vld [vmem:[%s15052_s1 + $0xc00] sm:$0xf]  ;;  %v8079_v47 = vor.u32 %v9766_v38, %v8078_v37  ;;  %v9730_v48 = vld [vmem:[%s15052_s1 + $0xe0c] sm:$0xf0]  ;;  %4976 = vmatpush.bf16.msrb.mxu1 %v7823_v42 }
  0x85   :  { %v7806_v44 = vld [vmem:[%s15052_s1 + $0xd00] sm:$0xf]  ;;  %v9762_v50 = vld [vmem:[%s15052_s1 + $0xf0c] sm:$0xf0]  ;;  %v7679_v54 = vor.u32 %v9666_v41, %v7678_v40  ;;  %4989 = vmatpush.bf16.msrb.mxu2 %v7951_v43 }
  0x86   :  { %v7934_v46 = vld [vmem:[%s15052_s1 + $0xe00] sm:$0xf]  ;;  %v9822_v52 = vld [vmem:[%s15052_s1 + $0x10ec] sm:$0xf0]  ;;  %v7807_v58 = vor.u32 %v9698_v45, %v7806_v44  ;;  %5002 = vmatpush.bf16.msrb.mxu3 %v8079_v47 }
  0x87   :  { %v8062_v49 = vld [vmem:[%s15052_s1 + $0xf00] sm:$0xf]  ;;  %v9854_v55 = vld [vmem:[%s15052_s1 + $0x11ec] sm:$0xf0]  ;;  %v7935_v59 = vor.u32 %v9730_v48, %v7934_v46  ;;  %4964 = vmatpush.bf16.msrb.mxu0 %v7679_v54 }
  0x88   :  { %v8302_v51 = vld [vmem:[%s15052_s1 + $0x10e0] sm:$0xf]  ;;  %v9886_v57 = vld [vmem:[%s15052_s1 + $0x12ec] sm:$0xf0]  ;;  %v8063_v63 = vor.u32 %v9762_v50, %v8062_v49  ;;  %4977 = vmatpush.bf16.msrb.mxu1 %v7807_v58 }
  0x89   :  { %v8430_v53 = vld [vmem:[%s15052_s1 + $0x11e0] sm:$0xf]  ;;  %v9918_v62 = vld [vmem:[%s15052_s1 + $0x13ec] sm:$0xf0]  ;;  %v8303_v3 = vor.u32 %v9822_v52, %v8302_v51  ;;  %4990 = vmatpush.bf16.msrb.mxu2 %v7935_v59 }
  0x8a   :  { %v8558_v56 = vld [vmem:[%s15052_s1 + $0x12e0] sm:$0xf]  ;;  %v8431_v4 = vor.u32 %v9854_v55, %v8430_v53  ;;  %v9818_v8 = vld [vmem:[%s15052_s1 + $0x10cc] sm:$0xf0]  ;;  %5003 = vmatpush.bf16.msrb.mxu3 %v8063_v63  ;;  %4965 = vmatmul.bf16.vlgmr.msrb.gmra.mxu0 %v10779_v28 }
  0x8b   :  { %v8686_v60 = vld [vmem:[%s15052_s1 + $0x13e0] sm:$0xf]  ;;  %v8559_v5 = vor.u32 %v9886_v57, %v8558_v56  ;;  %v9850_v11 = vld [vmem:[%s15052_s1 + $0x11cc] sm:$0xf0]  ;;  %5009 = vmatpush.bf16.msra.mxu0 %v8303_v3  ;;  %4978 = vmatmul.bf16.vlgmr.msrb.gmra.mxu1 %v10783_v32 }
  0x8c   :  { %v8286_v6 = vld [vmem:[%s15052_s1 + $0x10c0] sm:$0xf]  ;;  %v8687_v10 = vor.u32 %v9918_v62, %v8686_v60  ;;  %v9882_v15 = vld [vmem:[%s15052_s1 + $0x12cc] sm:$0xf0]  ;;  %5022 = vmatpush.bf16.msra.mxu1 %v8431_v4  ;;  %4991 = vmatmul.bf16.vlgmr.msrb.gmra.mxu2 %v10781_v31 }
  0x8d   :  { %v8414_v9 = vld [vmem:[%s15052_s1 + $0x11c0] sm:$0xf]  ;;  %v9914_v18 = vld [vmem:[%s15052_s1 + $0x13cc] sm:$0xf0]  ;;  %v8287_v19 = vor.u32 %v9818_v8, %v8286_v6  ;;  %5035 = vmatpush.bf16.msra.mxu2 %v8559_v5  ;;  %5004 = vmatmul.bf16.vlgmr.msrb.gmra.mxu3 %v10785_v33 }
  0x8e   :  { %v8542_v14 = vld [vmem:[%s15052_s1 + $0x12c0] sm:$0xf]  ;;  %v8415_v23 = vor.u32 %v9850_v11, %v8414_v9  ;;  %v9814_v27 = vld [vmem:[%s15052_s1 + $0x10ac] sm:$0xf0]  ;;  %5048 = vmatpush.bf16.msra.mxu3 %v8687_v10 }
  0x8f   :  { %v8670_v16 = vld [vmem:[%s15052_s1 + $0x13c0] sm:$0xf]  ;;  %v8543_v24 = vor.u32 %v9882_v15, %v8542_v14  ;;  %v9846_v34 = vld [vmem:[%s15052_s1 + $0x11ac] sm:$0xf0]  ;;  %5010 = vmatpush.bf16.msra.mxu0 %v8287_v19 }
  0x90   :  { %v8270_v25 = vld [vmem:[%s15052_s1 + $0x10a0] sm:$0xf]  ;;  %v8671_v30 = vor.u32 %v9914_v18, %v8670_v16  ;;  %v9878_v36 = vld [vmem:[%s15052_s1 + $0x12ac] sm:$0xf0]  ;;  %5023 = vmatpush.bf16.msra.mxu1 %v8415_v23 }
  0x91   :  { %v8398_v29 = vld [vmem:[%s15052_s1 + $0x11a0] sm:$0xf]  ;;  %v9910_v38 = vld [vmem:[%s15052_s1 + $0x13ac] sm:$0xf0]  ;;  %v8271_v39 = vor.u32 %v9814_v27, %v8270_v25  ;;  %5036 = vmatpush.bf16.msra.mxu2 %v8543_v24 }
  0x92   :  { %v8526_v35 = vld [vmem:[%s15052_s1 + $0x12a0] sm:$0xf]  ;;  %v8399_v40 = vor.u32 %v9846_v34, %v8398_v29  ;;  %v9810_v43 = vld [vmem:[%s15052_s1 + $0x108c] sm:$0xf0]  ;;  %5049 = vmatpush.bf16.msra.mxu3 %v8671_v30 }
  0x93   :  { %v8654_v37 = vld [vmem:[%s15052_s1 + $0x13a0] sm:$0xf]  ;;  %v8527_v41 = vor.u32 %v9878_v36, %v8526_v35  ;;  %v9842_v46 = vld [vmem:[%s15052_s1 + $0x118c] sm:$0xf0]  ;;  %5011 = vmatpush.bf16.msra.mxu0 %v8271_v39 }
  0x94   :  { %v8254_v42 = vld [vmem:[%s15052_s1 + $0x1080] sm:$0xf]  ;;  %v8655_v45 = vor.u32 %v9910_v38, %v8654_v37  ;;  %v9874_v48 = vld [vmem:[%s15052_s1 + $0x128c] sm:$0xf0]  ;;  %5024 = vmatpush.bf16.msra.mxu1 %v8399_v40 }
  0x95   :  { %v8382_v44 = vld [vmem:[%s15052_s1 + $0x1180] sm:$0xf]  ;;  %v9906_v50 = vld [vmem:[%s15052_s1 + $0x138c] sm:$0xf0]  ;;  %v8255_v51 = vor.u32 %v9810_v43, %v8254_v42  ;;  %5037 = vmatpush.bf16.msra.mxu2 %v8527_v41 }
  0x96   :  { %v8510_v47 = vld [vmem:[%s15052_s1 + $0x1280] sm:$0xf]  ;;  %v8383_v52 = vor.u32 %v9842_v46, %v8382_v44  ;;  %v9806_v55 = vld [vmem:[%s15052_s1 + $0x106c] sm:$0xf0]  ;;  %5050 = vmatpush.bf16.msra.mxu3 %v8655_v45 }
  0x97   :  { %v8638_v49 = vld [vmem:[%s15052_s1 + $0x1380] sm:$0xf]  ;;  %v8511_v53 = vor.u32 %v9874_v48, %v8510_v47  ;;  %v9838_v58 = vld [vmem:[%s15052_s1 + $0x116c] sm:$0xf0]  ;;  %5012 = vmatpush.bf16.msra.mxu0 %v8255_v51 }
  0x98   :  { %v8238_v54 = vld [vmem:[%s15052_s1 + $0x1060] sm:$0xf]  ;;  %v8639_v57 = vor.u32 %v9906_v50, %v8638_v49  ;;  %v9870_v60 = vld [vmem:[%s15052_s1 + $0x126c] sm:$0xf0]  ;;  %5025 = vmatpush.bf16.msra.mxu1 %v8383_v52 }
  0x99   :  { %v8366_v56 = vld [vmem:[%s15052_s1 + $0x1160] sm:$0xf]  ;;  %v9902_v63 = vld [vmem:[%s15052_s1 + $0x136c] sm:$0xf0]  ;;  %v8239_v3 = vor.u32 %v9806_v55, %v8238_v54  ;;  %5038 = vmatpush.bf16.msra.mxu2 %v8511_v53 }
  0x9a   :  { %v8494_v59 = vld [vmem:[%s15052_s1 + $0x1260] sm:$0xf]  ;;  %v8367_v4 = vor.u32 %v9838_v58, %v8366_v56  ;;  %v9802_v8 = vld [vmem:[%s15052_s1 + $0x104c] sm:$0xf0]  ;;  %5051 = vmatpush.bf16.msra.mxu3 %v8639_v57 }
  0x9b   :  { %v8622_v62 = vld [vmem:[%s15052_s1 + $0x1360] sm:$0xf]  ;;  %v8495_v5 = vor.u32 %v9870_v60, %v8494_v59  ;;  %v9834_v11 = vld [vmem:[%s15052_s1 + $0x114c] sm:$0xf0]  ;;  %5013 = vmatpush.bf16.msra.mxu0 %v8239_v3 }
  0x9c   :  { %v8222_v6 = vld [vmem:[%s15052_s1 + $0x1040] sm:$0xf]  ;;  %v8623_v10 = vor.u32 %v9902_v63, %v8622_v62  ;;  %v9866_v15 = vld [vmem:[%s15052_s1 + $0x124c] sm:$0xf0]  ;;  %5026 = vmatpush.bf16.msra.mxu1 %v8367_v4 }
  0x9d   :  { %v8350_v9 = vld [vmem:[%s15052_s1 + $0x1140] sm:$0xf]  ;;  %v9898_v18 = vld [vmem:[%s15052_s1 + $0x134c] sm:$0xf0]  ;;  %v8223_v19 = vor.u32 %v9802_v8, %v8222_v6  ;;  %5039 = vmatpush.bf16.msra.mxu2 %v8495_v5  ;;  %v26_v5 = vld [vmem:[%s15053_s0 + $0x18] sm:$0x1] }
  0x9e   :  { %v8478_v14 = vld [vmem:[%s15052_s1 + $0x1240] sm:$0xf]  ;;  %v8351_v23 = vor.u32 %v9834_v11, %v8350_v9  ;;  %v9798_v27 = vld [vmem:[%s15052_s1 + $0x102c] sm:$0xf0]  ;;  %5052 = vmatpush.bf16.msra.mxu3 %v8623_v10 }
  0x9f   :  { %v8606_v16 = vld [vmem:[%s15052_s1 + $0x1340] sm:$0xf]  ;;  %v8479_v24 = vor.u32 %v9866_v15, %v8478_v14  ;;  %v9830_v34 = vld [vmem:[%s15052_s1 + $0x112c] sm:$0xf0]  ;;  %5014 = vmatpush.bf16.msra.mxu0 %v8223_v19 }
  0xa0   :  { %v8206_v25 = vld [vmem:[%s15052_s1 + $0x1020] sm:$0xf]  ;;  %v8607_v30 = vor.u32 %v9898_v18, %v8606_v16  ;;  %v9862_v36 = vld [vmem:[%s15052_s1 + $0x122c] sm:$0xf0]  ;;  %5027 = vmatpush.bf16.msra.mxu1 %v8351_v23 }
  0xa1   :  { %v8334_v29 = vld [vmem:[%s15052_s1 + $0x1120] sm:$0xf]  ;;  %v9894_v38 = vld [vmem:[%s15052_s1 + $0x132c] sm:$0xf0]  ;;  %v8207_v39 = vor.u32 %v9798_v27, %v8206_v25  ;;  %5040 = vmatpush.bf16.msra.mxu2 %v8479_v24 }
  0xa2   :  { %v8462_v35 = vld [vmem:[%s15052_s1 + $0x1220] sm:$0xf]  ;;  %v9794_v41 = vld [vmem:[%s15052_s1 + $0x100c] sm:$0xf0]  ;;  %v8335_v42 = vor.u32 %v9830_v34, %v8334_v29  ;;  %5053 = vmatpush.bf16.msra.mxu3 %v8607_v30 }
  0xa3   :  { %v8590_v37 = vld [vmem:[%s15052_s1 + $0x1320] sm:$0xf]  ;;  %v8463_v43 = vor.u32 %v9862_v36, %v8462_v35  ;;  %v9826_v45 = vld [vmem:[%s15052_s1 + $0x110c] sm:$0xf0]  ;;  %5015 = vmatpush.bf16.msra.mxu0 %v8207_v39 }
  0xa4   :  { %v8190_v40 = vld [vmem:[%s15052_s1 + $0x1000] sm:$0xf]  ;;  %v8591_v47 = vor.u32 %v9894_v38, %v8590_v37  ;;  %v9858_v48 = vld [vmem:[%s15052_s1 + $0x120c] sm:$0xf0]  ;;  %5028 = vmatpush.bf16.msra.mxu1 %v8335_v42  ;;  %v11190_v37 = vld [vmem:[#allocation1 + $0x24] sm:$0xff] }
  0xa5   :  { %v8318_v44 = vld [vmem:[%s15052_s1 + $0x1100] sm:$0xf]  ;;  %v9890_v50 = vld [vmem:[%s15052_s1 + $0x130c] sm:$0xf0]  ;;  %v8191_v54 = vor.u32 %v9794_v41, %v8190_v40  ;;  %5041 = vmatpush.bf16.msra.mxu2 %v8463_v43  ;;  %v11192_v40 = vld [vmem:[#allocation1 + $0x36] sm:$0xff] }
  0xa6   :  { %v8446_v46 = vld [vmem:[%s15052_s1 + $0x1200] sm:$0xf]  ;;  %v9950_v52 = vld [vmem:[%s15052_s1 + $0x14ec] sm:$0xf0]  ;;  %v8319_v58 = vor.u32 %v9826_v45, %v8318_v44  ;;  %5054 = vmatpush.bf16.msra.mxu3 %v8591_v47 }
  0xa7   :  { %v8574_v49 = vld [vmem:[%s15052_s1 + $0x1300] sm:$0xf]  ;;  %v9982_v55 = vld [vmem:[%s15052_s1 + $0x15ec] sm:$0xf0]  ;;  %v8447_v59 = vor.u32 %v9858_v48, %v8446_v46  ;;  %5016 = vmatpush.bf16.msra.mxu0 %v8191_v54 }
  0xa8   :  { %v8814_v51 = vld [vmem:[%s15052_s1 + $0x14e0] sm:$0xf]  ;;  %v10014_v57 = vld [vmem:[%s15052_s1 + $0x16ec] sm:$0xf0]  ;;  %v8575_v63 = vor.u32 %v9890_v50, %v8574_v49  ;;  %5029 = vmatpush.bf16.msra.mxu1 %v8319_v58 }
  0xa9   :  { %v8942_v53 = vld [vmem:[%s15052_s1 + $0x15e0] sm:$0xf]  ;;  %v10046_v62 = vld [vmem:[%s15052_s1 + $0x17ec] sm:$0xf0]  ;;  %v8815_v3 = vor.u32 %v9950_v52, %v8814_v51  ;;  %5042 = vmatpush.bf16.msra.mxu2 %v8447_v59 }
  0xaa   :  { %v9070_v56 = vld [vmem:[%s15052_s1 + $0x16e0] sm:$0xf]  ;;  %v8943_v6 = vor.u32 %v9982_v55, %v8942_v53  ;;  %v9946_v10 = vld [vmem:[%s15052_s1 + $0x14cc] sm:$0xf0]  ;;  %5055 = vmatpush.bf16.msra.mxu3 %v8575_v63 }
  0xab   :  { %v9198_v60 = vld [vmem:[%s15052_s1 + $0x17e0] sm:$0xf]  ;;  %v9071_v8 = vor.u32 %v10014_v57, %v9070_v56  ;;  %v9978_v14 = vld [vmem:[%s15052_s1 + $0x15cc] sm:$0xf0]  ;;  %5061 = vmatpush.bf16.msrb.mxu0 %v8815_v3 }
  0xac   :  { %v8798_v4 = vld [vmem:[%s15052_s1 + $0x14c0] sm:$0xf]  ;;  %v9199_v15 = vor.u32 %v10046_v62, %v9198_v60  ;;  %v11160_v16 = vld [vmem:[#allocation1 + $0x12] sm:$0xff]  ;;  %v11162_v18 = vld [vmem:[#allocation1 + $0x9] sm:$0xff]  ;;  %5074 = vmatpush.bf16.msrb.mxu1 %v8943_v6 }
  0xad   :  { %v11149_v9 = vld [vmem:[#allocation1] sm:$0xff]  ;;  %v10010_v23 = vld [vmem:[%s15052_s1 + $0x16cc] sm:$0xf0]  ;;  %v8799_v34 = vor.u32 %v9946_v10, %v8798_v4  ;;  %5087 = vmatpush.bf16.msrb.mxu2 %v9071_v8  ;;  %5030 = vmatmul.bf16.vlgmr.msra.gmra.mxu1 %v11162_v18 }
  0xae   :  { %v8926_v11 = vld [vmem:[%s15052_s1 + $0x15c0] sm:$0xf]  ;;  %v10042_v27 = vld [vmem:[%s15052_s1 + $0x17cc] sm:$0xf0]  ;;  %5100 = vmatpush.bf16.msrb.mxu3 %v9199_v15  ;;  %5017 = vmatmul.bf16.vlgmr.msra.gmra.mxu0 %v11149_v9 }
  0xaf   :  { %v9054_v19 = vld [vmem:[%s15052_s1 + $0x16c0] sm:$0xf]  ;;  %v9942_v30 = vld [vmem:[%s15052_s1 + $0x14ac] sm:$0xf0]  ;;  %v8927_v38 = vor.u32 %v9978_v14, %v8926_v11  ;;  %5043 = vmatmul.bf16.vlgmr.msra.gmra.mxu2 %v11160_v16  ;;  %5062 = vmatpush.bf16.msrb.mxu0 %v8799_v34 }
  0xb0   :  { %v9182_v24 = vld [vmem:[%s15052_s1 + $0x17c0] sm:$0xf]  ;;  %v9974_v36 = vld [vmem:[%s15052_s1 + $0x15ac] sm:$0xf0]  ;;  %v9055_v39 = vor.u32 %v10010_v23, %v9054_v19 }
  0xb1   :  { %v11173_v25 = vld [vmem:[#allocation1 + $0x1b] sm:$0xff]  ;;  %v11194_v41 = vld [vmem:[#allocation1 + $0x2d] sm:$0xff]  ;;  %v9183_v43 = vor.u32 %v10042_v27, %v9182_v24  ;;  %5075 = vmatpush.bf16.msrb.mxu1 %v8927_v38 }
  0xb2   :  { %v8782_v29 = vld [vmem:[%s15052_s1 + $0x14a0] sm:$0xf]  ;;  %v10006_v45 = vld [vmem:[%s15052_s1 + $0x16ac] sm:$0xf0]  ;;  %5056 = vmatmul.bf16.vlgmr.msra.gmra.mxu3 %v11173_v25  ;;  %5088 = vmatpush.bf16.msrb.mxu2 %v9055_v39 }
  0xb3   :  { %v8910_v35 = vld [vmem:[%s15052_s1 + $0x15a0] sm:$0xf]  ;;  %v10038_v47 = vld [vmem:[%s15052_s1 + $0x17ac] sm:$0xf0]  ;;  %v8783_v48 = vor.u32 %v9942_v30, %v8782_v29  ;;  %5101 = vmatpush.bf16.msrb.mxu3 %v9183_v43 }
  0xb4   :  { %v11196_v42 = vld [vmem:[#allocation1 + $0x3f] sm:$0xff]  ;;  %v8911_v49 = vor.u32 %v9974_v36, %v8910_v35  ;;  %v9938_v52 = vld [vmem:[%s15052_s1 + $0x148c] sm:$0xf0] }
  0xb5   :  { %v9038_v44 = vld [vmem:[%s15052_s1 + $0x16a0] sm:$0xf]  ;;  %852 = vst [vmem:[#allocation1] ss:$9 sm:$0xff] %v26_v5  ;;  %v9970_v55 = vld [vmem:[%s15052_s1 + $0x158c] sm:$0xf0]  ;;  %5063 = vmatpush.bf16.msrb.mxu0 %v8783_v48 }
  0xb6   :  { %v9166_v46 = vld [vmem:[%s15052_s1 + $0x17a0] sm:$0xf]  ;;  %v9039_v50 = vor.u32 %v10006_v45, %v9038_v44  ;;  %v10002_v57 = vld [vmem:[%s15052_s1 + $0x168c] sm:$0xf0]  ;;  %5076 = vmatpush.bf16.msrb.mxu1 %v8911_v49 }
  0xb7   :  { %v8766_v51 = vld [vmem:[%s15052_s1 + $0x1480] sm:$0xf]  ;;  %v9167_v54 = vor.u32 %v10038_v47, %v9166_v46  ;;  %v10034_v59 = vld [vmem:[%s15052_s1 + $0x178c] sm:$0xf0]  ;;  %v4810_v47 = vpop.f32.mrf.mxu0 }
  0xb8   :  { %v8894_v53 = vld [vmem:[%s15052_s1 + $0x1580] sm:$0xf]  ;;  %v8767_v60 = vor.u32 %v9938_v52, %v8766_v51  ;;  %5089 = vmatpush.bf16.msrb.mxu2 %v9039_v50  ;;  %v9934_v4 = vld [vmem:[%s15052_s1 + $0x146c] sm:$0xf0] }
  0xb9   :  { %v9022_v56 = vld [vmem:[%s15052_s1 + $0x1680] sm:$0xf]  ;;  %v8895_v63 = vor.u32 %v9970_v55, %v8894_v53  ;;  %v9966_v6 = vld [vmem:[%s15052_s1 + $0x156c] sm:$0xf0]  ;;  %5102 = vmatpush.bf16.msrb.mxu3 %v9167_v54  ;;  %v4823_v54 = vpop.f32.mrf.mxu1 }
  0xba   :  { %v9150_v58 = vld [vmem:[%s15052_s1 + $0x1780] sm:$0xf]  ;;  %v9023_v3 = vor.u32 %v10002_v57, %v9022_v56  ;;  %v9998_v11 = vld [vmem:[%s15052_s1 + $0x166c] sm:$0xf0]  ;;  %5064 = vmatpush.bf16.msrb.mxu0 %v8767_v60 }
  0xbb   :  { %v8750_v62 = vld [vmem:[%s15052_s1 + $0x1460] sm:$0xf]  ;;  %v9151_v8 = vor.u32 %v10034_v59, %v9150_v58  ;;  %v10030_v19 = vld [vmem:[%s15052_s1 + $0x176c] sm:$0xf0]  ;;  %5077 = vmatpush.bf16.msrb.mxu1 %v8895_v63 }
  0xbc   :  { %v8878_v5 = vld [vmem:[%s15052_s1 + $0x1560] sm:$0xf]  ;;  %v8751_v23 = vor.u32 %v9934_v4, %v8750_v62  ;;  %5090 = vmatpush.bf16.msrb.mxu2 %v9023_v3  ;;  %v9930_v30 = vld [vmem:[%s15052_s1 + $0x144c] sm:$0xf0] }
  0xbd   :  { %v9006_v10 = vld [vmem:[%s15052_s1 + $0x1660] sm:$0xf]  ;;  %v8879_v27 = vor.u32 %v9966_v6, %v8878_v5  ;;  %5103 = vmatpush.bf16.msrb.mxu3 %v9151_v8  ;;  %v9962_v38 = vld [vmem:[%s15052_s1 + $0x154c] sm:$0xf0] }
  0xbe   :  { %v811_v14 = vld [vmem:[%s15054_s2] sm:$0xf]  ;;  %v9007_v29 = vor.u32 %v9998_v11, %v9006_v10  ;;  %v9994_v43 = vld [vmem:[%s15052_s1 + $0x164c] sm:$0xf0]  ;;  %5065 = vmatpush.bf16.msrb.mxu0 %v8751_v23 }
  0xbf   :  { %v9134_v15 = vld [vmem:[%s15052_s1 + $0x1760] sm:$0xf]  ;;  %v813_v35 = vperm.slane %v811_v14, 0  ;;  %v10026_v45 = vld [vmem:[%s15052_s1 + $0x174c] sm:$0xf0]  ;;  %5078 = vmatpush.bf16.msrb.mxu1 %v8879_v27  ;;  %v4836_v14 = vpop.f32.mrf.mxu2 }
  0xc0   :  { %v8734_v24 = vld [vmem:[%s15052_s1 + $0x1440] sm:$0xf]  ;;  %v9135_v36 = vor.u32 %v10030_v19, %v9134_v15  ;;  %5091 = vmatpush.bf16.msrb.mxu2 %v9007_v29  ;;  %v9926_v51 = vld [vmem:[%s15052_s1 + $0x142c] sm:$0xf0]  ;;  %v4849_v29 = vpop.f32.mrf.mxu3 }
  0xc1   :  { %v8862_v34 = vld [vmem:[%s15052_s1 + $0x1540] sm:$0xf]  ;;  %v8735_v46 = vor.u32 %v9930_v30, %v8734_v24  ;;  %v4811_v53 = vadd.f32 %v4810_v47, %v813_v35  ;;  %v9958_v56 = vld [vmem:[%s15052_s1 + $0x152c] sm:$0xf0]  ;;  %v9308_v35 = vld [vmem:[%s15052_s1 + $0xe4] sm:$0xf] }
  0xc2   :  { %v8990_v39 = vld [vmem:[%s15052_s1 + $0x1640] sm:$0xf]  ;;  %v8863_v48 = vor.u32 %v9962_v38, %v8862_v34  ;;  %5104 = vmatpush.bf16.msrb.mxu3 %v9135_v36  ;;  %v9990_v58 = vld [vmem:[%s15052_s1 + $0x162c] sm:$0xf0]  ;;  %v6256_v38 = vld [vmem:[%s15052_s1 + $0xf0] sm:$0xf0] }
  0xc3   :  { %v9118_v44 = vld [vmem:[%s15052_s1 + $0x1740] sm:$0xf]  ;;  %v8991_v49 = vor.u32 %v9994_v43, %v8990_v39  ;;  %v10022_v60 = vld [vmem:[%s15052_s1 + $0x172c] sm:$0xf0]  ;;  %v4824_v62 = vadd.f32 %v4823_v54, %v4811_v53  ;;  %5066 = vmatpush.bf16.msrb.mxu0 %v8735_v46  ;;  %v9340_v39 = vld [vmem:[%s15052_s1 + $0x1e4] sm:$0xf]  ;;  %v6259_v53 = vor.u32 %v9308_v35, %v6256_v38 }
  0xc4   :  { %v8718_v50 = vld [vmem:[%s15052_s1 + $0x1420] sm:$0xf]  ;;  %v9119_v55 = vor.u32 %v10026_v45, %v9118_v44  ;;  %v9922_v4 = vld [vmem:[%s15052_s1 + $0x140c] sm:$0xf0]  ;;  %5079 = vmatpush.bf16.msrb.mxu1 %v8863_v48  ;;  %v6384_v43 = vld [vmem:[%s15052_s1 + $0x1f0] sm:$0xf0]  ;;  %v4812_v45 = vpop.f32.mrf.mxu0 }
  0xc5   :  { %v8846_v52 = vld [vmem:[%s15052_s1 + $0x1520] sm:$0xf]  ;;  %v8719_v63 = vor.u32 %v9926_v51, %v8718_v50  ;;  %5092 = vmatpush.bf16.msrb.mxu2 %v8991_v49  ;;  %v9954_v10 = vld [vmem:[%s15052_s1 + $0x150c] sm:$0xf0]  ;;  %v4837_v27 = vadd.f32 %v4836_v14, %v4824_v62  ;;  %v9372_v48 = vld [vmem:[%s15052_s1 + $0x2e4] sm:$0xf]  ;;  %v4825_v50 = vpop.f32.mrf.mxu1  ;;  %v6387_v54 = vor.u32 %v9340_v39, %v6384_v43 }
  0xc6   :  { %v8974_v57 = vld [vmem:[%s15052_s1 + $0x1620] sm:$0xf]  ;;  %v8847_v5 = vor.u32 %v9958_v56, %v8846_v52  ;;  %5105 = vmatpush.bf16.msrb.mxu3 %v9119_v55  ;;  %v9986_v19 = vld [vmem:[%s15052_s1 + $0x160c] sm:$0xf0]  ;;  %v6512_v49 = vld [vmem:[%s15052_s1 + $0x2f0] sm:$0xf0] }
  0xc7   :  { %v9102_v59 = vld [vmem:[%s15052_s1 + $0x1720] sm:$0xf]  ;;  %v8975_v6 = vor.u32 %v9990_v58, %v8974_v57  ;;  %v10018_v24 = vld [vmem:[%s15052_s1 + $0x170c] sm:$0xf0]  ;;  %5067 = vmatpush.bf16.msrb.mxu0 %v8719_v63  ;;  %v11355_v44 = vadd.f32 %v4849_v29, %v4837_v27  ;;  %v9304_v57 = vld [vmem:[%s15052_s1 + $0xc4] sm:$0xf]  ;;  %v6515_v58 = vor.u32 %v9372_v48, %v6512_v49 }
  0xc8   :  { %v8702_v3 = vld [vmem:[%s15052_s1 + $0x1400] sm:$0xf]  ;;  %v9103_v15 = vor.u32 %v10022_v60, %v9102_v59  ;;  %v10062_v34 = vld [vmem:[%s15052_s1 + $0x186c] sm:$0xf0]  ;;  %5080 = vmatpush.bf16.msrb.mxu1 %v8847_v5  ;;  %v6240_v59 = vld [vmem:[%s15052_s1 + $0xd0] sm:$0xf0] }
  0xc9   :  { %v8830_v8 = vld [vmem:[%s15052_s1 + $0x1500] sm:$0xf]  ;;  %v8703_v36 = vor.u32 %v9922_v4, %v8702_v3  ;;  %5093 = vmatpush.bf16.msrb.mxu2 %v8975_v6  ;;  %v10058_v56 = vld [vmem:[%s15052_s1 + $0x184c] sm:$0xf0]  ;;  %v9336_v60 = vld [vmem:[%s15052_s1 + $0x1c4] sm:$0xf]  ;;  %v4838_v4 = vpop.f32.mrf.mxu2  ;;  %v4851_v6 = vpop.f32.mrf.mxu3 }
  0xca   :  { %v8958_v11 = vld [vmem:[%s15052_s1 + $0x1600] sm:$0xf]  ;;  %v8831_v46 = vor.u32 %v9954_v10, %v8830_v8  ;;  %5106 = vmatpush.bf16.msrb.mxu3 %v9103_v15  ;;  %v6368_v62 = vld [vmem:[%s15052_s1 + $0x1d0] sm:$0xf0]  ;;  %v9368_v63 = vld [vmem:[%s15052_s1 + $0x2c4] sm:$0xf]  ;;  %v6243_v8 = vor.u32 %v9304_v57, %v6240_v59 }
  0xcb   :  { %v9086_v23 = vld [vmem:[%s15052_s1 + $0x1700] sm:$0xf]  ;;  %v8959_v47 = vor.u32 %v9986_v19, %v8958_v11  ;;  %5068 = vmatpush.bf16.msrb.mxu0 %v8703_v36  ;;  %v6496_v3 = vld [vmem:[%s15052_s1 + $0x2d0] sm:$0xf0]  ;;  %v6371_v10 = vor.u32 %v9336_v60, %v6368_v62  ;;  %v10054_v14 = vld [vmem:[%s15052_s1 + $0x182c] sm:$0xf0] }
  0xcc   :  { %v9262_v30 = vld [vmem:[%s15052_s1 + $0x1860] sm:$0xf]  ;;  %v9087_v51 = vor.u32 %v10018_v24, %v9086_v23  ;;  %5081 = vmatpush.bf16.msrb.mxu1 %v8831_v46  ;;  %v9300_v15 = vld [vmem:[%s15052_s1 + $0xa4] sm:$0xf]  ;;  %v6499_v19 = vor.u32 %v9368_v63, %v6496_v3  ;;  %v6224_v23 = vld [vmem:[%s15052_s1 + $0xb0] sm:$0xf0] }
  0xcd   :  { %v9263_v52 = vor.u32 %v10062_v34, %v9262_v30  ;;  %v9246_v55 = vld [vmem:[%s15052_s1 + $0x1840] sm:$0xf]  ;;  %5094 = vmatpush.bf16.msrb.mxu2 %v8959_v47  ;;  %v9332_v24 = vld [vmem:[%s15052_s1 + $0x1a4] sm:$0xf]  ;;  %v6352_v27 = vld [vmem:[%s15052_s1 + $0x1b0] sm:$0xf0]  ;;  %v6227_v36 = vor.u32 %v9300_v15, %v6224_v23  ;;  %v4875_v60 = vpop.f32.mrf.mxu1 }
  0xce   :  { %5107 = vmatpush.bf16.msrb.mxu3 %v9087_v51  ;;  %v9247_v5 = vor.u32 %v10058_v56, %v9246_v55  ;;  %v9230_v11 = vld [vmem:[%s15052_s1 + $0x1820] sm:$0xf]  ;;  %5069 = vmatmul.bf16.vlgmr.msrb.gmra.mxu0 %v11190_v37  ;;  %v9364_v29 = vld [vmem:[%s15052_s1 + $0x2a4] sm:$0xf]  ;;  %v6480_v30 = vld [vmem:[%s15052_s1 + $0x2b0] sm:$0xf0]  ;;  %v6355_v38 = vor.u32 %v9332_v24, %v6352_v27 }
  0xcf   :  { %5117 = vmatpush.bf16.msra.mxu0 %v9263_v52  ;;  %5082 = vmatmul.bf16.vlgmr.msrb.gmra.mxu1 %v11194_v41  ;;  %v9231_v34 = vor.u32 %v10054_v14, %v9230_v11  ;;  %v9214_v35 = vld [vmem:[%s15052_s1 + $0x1800] sm:$0xf]  ;;  %v10050_v39 = vld [vmem:[%s15052_s1 + $0x180c] sm:$0xf0]  ;;  %v9296_v43 = vld [vmem:[%s15052_s1 + $0x84] sm:$0xf]  ;;  %v6483_v46 = vor.u32 %v9364_v29, %v6480_v30 }
  0xd0   :  { %5126 = vmatpush.bf16.msra.mxu1 %v6259_v53  ;;  %5095 = vmatmul.bf16.vlgmr.msrb.gmra.mxu2 %v11192_v40  ;;  %v6208_v45 = vld [vmem:[%s15052_s1 + $0x90] sm:$0xf0]  ;;  %v9328_v47 = vld [vmem:[%s15052_s1 + $0x184] sm:$0xf]  ;;  %v9215_v53 = vor.u32 %v10050_v39, %v9214_v35 }
  0xd1   :  { %5139 = vmatpush.bf16.msra.mxu2 %v6387_v54  ;;  %5108 = vmatmul.bf16.vlgmr.msrb.gmra.mxu3 %v11196_v42  ;;  %v6336_v48 = vld [vmem:[%s15052_s1 + $0x190] sm:$0xf0]  ;;  %v9360_v49 = vld [vmem:[%s15052_s1 + $0x284] sm:$0xf]  ;;  %v4862_v54 = vpop.f32.mrf.mxu0  ;;  %v6211_v55 = vor.u32 %v9296_v43, %v6208_v45  ;;  %v4888_v23 = vpop.f32.mrf.mxu2 }
  0xd2   :  { %5152 = vmatpush.bf16.msra.mxu3 %v6515_v58  ;;  %v6464_v50 = vld [vmem:[%s15052_s1 + $0x290] sm:$0xf0]  ;;  %v9404_v51 = vld [vmem:[%s15052_s1 + $0x3e4] sm:$0xf]  ;;  %v6339_v56 = vor.u32 %v9328_v47, %v6336_v48  ;;  %v4863_v59 = vadd.f32 %v4862_v54, %v11355_v44 }
  0xd3   :  { %5118 = vmatpush.bf16.msra.mxu0 %v9247_v5  ;;  %v6640_v52 = vld [vmem:[%s15052_s1 + $0x3f0] sm:$0xf0]  ;;  %v9292_v57 = vld [vmem:[%s15052_s1 + $0x64] sm:$0xf]  ;;  %v6467_v62 = vor.u32 %v9360_v49, %v6464_v50 }
  0xd4   :  { %5127 = vmatpush.bf16.msra.mxu1 %v6243_v8  ;;  %v6192_v58 = vld [vmem:[%s15052_s1 + $0x70] sm:$0xf0]  ;;  %v6643_v63 = vor.u32 %v9404_v51, %v6640_v52  ;;  %v9324_v3 = vld [vmem:[%s15052_s1 + $0x164] sm:$0xf] }
  0xd5   :  { %5140 = vmatpush.bf16.msra.mxu2 %v6371_v10  ;;  %v6320_v4 = vld [vmem:[%s15052_s1 + $0x170] sm:$0xf0]  ;;  %v9356_v5 = vld [vmem:[%s15052_s1 + $0x264] sm:$0xf]  ;;  %v4876_v10 = vadd.f32 %v4875_v60, %v4863_v59  ;;  %v6195_v11 = vor.u32 %v9292_v57, %v6192_v58  ;;  %v4877_v52 = vpop.f32.mrf.mxu1 }
  0xd6   :  { %5153 = vmatpush.bf16.msra.mxu3 %v6499_v19  ;;  %v6448_v44 = vld [vmem:[%s15052_s1 + $0x270] sm:$0xf0]  ;;  %v9400_v6 = vld [vmem:[%s15052_s1 + $0x3c4] sm:$0xf]  ;;  %v6323_v14 = vor.u32 %v9324_v3, %v6320_v4 }
  0xd7   :  { %5119 = vmatpush.bf16.msra.mxu0 %v9231_v34  ;;  %v6624_v8 = vld [vmem:[%s15052_s1 + $0x3d0] sm:$0xf0]  ;;  %v9288_v15 = vld [vmem:[%s15052_s1 + $0x44] sm:$0xf]  ;;  %v6451_v24 = vor.u32 %v9356_v5, %v6448_v44  ;;  %v4889_v35 = vadd.f32 %v4888_v23, %v4876_v10 }
  0xd8   :  { %5128 = vmatpush.bf16.msra.mxu1 %v6227_v36  ;;  %v6176_v19 = vld [vmem:[%s15052_s1 + $0x50] sm:$0xf0]  ;;  %v6627_v27 = vor.u32 %v9400_v6, %v6624_v8  ;;  %v9320_v29 = vld [vmem:[%s15052_s1 + $0x144] sm:$0xf]  ;;  %v4901_v36 = vpop.f32.mrf.mxu3 }
  0xd9   :  { %5141 = vmatpush.bf16.msra.mxu2 %v6355_v38  ;;  %v6304_v30 = vld [vmem:[%s15052_s1 + $0x150] sm:$0xf0]  ;;  %v9352_v34 = vld [vmem:[%s15052_s1 + $0x244] sm:$0xf]  ;;  %v4864_v47 = vpop.f32.mrf.mxu0  ;;  %v6179_v48 = vor.u32 %v9288_v15, %v6176_v19  ;;  %v4890_v44 = vpop.f32.mrf.mxu2 }
  0xda   :  { %5154 = vmatpush.bf16.msra.mxu3 %v6483_v46  ;;  %v6432_v38 = vld [vmem:[%s15052_s1 + $0x250] sm:$0xf0]  ;;  %v9396_v39 = vld [vmem:[%s15052_s1 + $0x3a4] sm:$0xf]  ;;  %v11494_v46 = vadd.f32 %v4901_v36, %v4889_v35  ;;  %v6307_v49 = vor.u32 %v9320_v29, %v6304_v30 }
  0xdb   :  { %5120 = vmatpush.bf16.msra.mxu0 %v9215_v53  ;;  %v6608_v43 = vld [vmem:[%s15052_s1 + $0x3b0] sm:$0xf0]  ;;  %v853_v45 = vld [vmem:[#allocation1] sm:$0xff]  ;;  %v6435_v53 = vor.u32 %v9352_v34, %v6432_v38 }
  0xdc   :  { %5129 = vmatpush.bf16.msra.mxu1 %v6211_v55  ;;  %v9284_v50 = vld [vmem:[%s15052_s1 + $0x24] sm:$0xf]  ;;  %v6160_v51 = vld [vmem:[%s15052_s1 + $0x30] sm:$0xf0]  ;;  %v6611_v54 = vor.u32 %v9396_v39, %v6608_v43 }
  0xdd   :  { %5142 = vmatpush.bf16.msra.mxu2 %v6339_v56  ;;  %v9316_v55 = vld [vmem:[%s15052_s1 + $0x124] sm:$0xf]  ;;  %v6288_v56 = vld [vmem:[%s15052_s1 + $0x130] sm:$0xf0] }
  0xde   :  { %5155 = vmatpush.bf16.msra.mxu3 %v6467_v62  ;;  %v9348_v57 = vld [vmem:[%s15052_s1 + $0x224] sm:$0xf]  ;;  %9276 = vmatmul.msk.bf16.vlgmr.msra.gmra.mxu0 %vm4798_vm0, %v853_v45  ;;  %v6416_v58 = vld [vmem:[%s15052_s1 + $0x230] sm:$0xf0]  ;;  %v6163_v62 = vor.u32 %v9284_v50, %v6160_v51 }
  0xdf   :  { %5165 = vmatpush.bf16.msrb.mxu0 %v6643_v63  ;;  %v9392_v59 = vld [vmem:[%s15052_s1 + $0x384] sm:$0xf]  ;;  %v6592_v60 = vld [vmem:[%s15052_s1 + $0x390] sm:$0xf0]  ;;  %v6291_v63 = vor.u32 %v9316_v55, %v6288_v56  ;;  %v6419_v6 = vor.u32 %v9348_v57, %v6416_v58 }
  0xe0   :  { %5130 = vmatpush.bf16.msra.mxu1 %v6195_v11  ;;  %v9280_v3 = vld [vmem:[%s15052_s1 + $0x4] sm:$0xf]  ;;  %v6144_v4 = vld [vmem:[%s15052_s1 + $0x10] sm:$0xf0]  ;;  %v6595_v8 = vor.u32 %v9392_v59, %v6592_v60  ;;  %v4903_v15 = vpop.f32.mrf.mxu3 }
  0xe1   :  { %5143 = vmatpush.bf16.msra.mxu2 %v6323_v14  ;;  %v9312_v5 = vld [vmem:[%s15052_s1 + $0x104] sm:$0xf]  ;;  %v6272_v10 = vld [vmem:[%s15052_s1 + $0x110] sm:$0xf0]  ;;  %v6147_v34 = vor.u32 %v9280_v3, %v6144_v4 }
  0xe2   :  { %5156 = vmatpush.bf16.msra.mxu3 %v6451_v24  ;;  %v9344_v11 = vld [vmem:[%s15052_s1 + $0x204] sm:$0xf]  ;;  %v6400_v14 = vld [vmem:[%s15052_s1 + $0x210] sm:$0xf0]  ;;  %v6275_v35 = vor.u32 %v9312_v5, %v6272_v10 }
  0xe3   :  { %5166 = vmatpush.bf16.msrb.mxu0 %v6627_v27  ;;  %v9388_v19 = vld [vmem:[%s15052_s1 + $0x364] sm:$0xf]  ;;  %v6576_v23 = vld [vmem:[%s15052_s1 + $0x370] sm:$0xf0]  ;;  %v6403_v39 = vor.u32 %v9344_v11, %v6400_v14 }
  0xe4   :  { %5131 = vmatpush.bf16.msra.mxu1 %v6179_v48  ;;  %v9436_v24 = vld [vmem:[%s15052_s1 + $0x4e4] sm:$0xf]  ;;  %v6768_v27 = vld [vmem:[%s15052_s1 + $0x4f0] sm:$0xf0]  ;;  %v6579_v43 = vor.u32 %v9388_v19, %v6576_v23 }
  0xe5   :  { %5144 = vmatpush.bf16.msra.mxu2 %v6307_v49  ;;  %v9468_v29 = vld [vmem:[%s15052_s1 + $0x5e4] sm:$0xf]  ;;  %v6896_v30 = vld [vmem:[%s15052_s1 + $0x5f0] sm:$0xf0]  ;;  %v6771_v45 = vor.u32 %v9436_v24, %v6768_v27 }
  0xe6   :  { %5157 = vmatpush.bf16.msra.mxu3 %v6435_v53  ;;  %v9500_v36 = vld [vmem:[%s15052_s1 + $0x6e4] sm:$0xf]  ;;  %v7024_v38 = vld [vmem:[%s15052_s1 + $0x6f0] sm:$0xf0]  ;;  %v6899_v47 = vor.u32 %v9468_v29, %v6896_v30 }
  0xe7   :  { %5167 = vmatpush.bf16.msrb.mxu0 %v6611_v54  ;;  %v9384_v48 = vld [vmem:[%s15052_s1 + $0x344] sm:$0xf]  ;;  %v6560_v49 = vld [vmem:[%s15052_s1 + $0x350] sm:$0xf0]  ;;  %v7027_v51 = vor.u32 %v9500_v36, %v7024_v38 }
  0xe8   :  { %5132 = vmatpush.bf16.msra.mxu1 %v6163_v62  ;;  %v9432_v50 = vld [vmem:[%s15052_s1 + $0x4c4] sm:$0xf]  ;;  %v6752_v52 = vld [vmem:[%s15052_s1 + $0x4d0] sm:$0xf0]  ;;  %v6563_v57 = vor.u32 %v9384_v48, %v6560_v49 }
  0xe9   :  { %5145 = vmatpush.bf16.msra.mxu2 %v6291_v63  ;;  %v9464_v53 = vld [vmem:[%s15052_s1 + $0x5c4] sm:$0xf]  ;;  %v6880_v54 = vld [vmem:[%s15052_s1 + $0x5d0] sm:$0xf0]  ;;  %v6755_v58 = vor.u32 %v9432_v50, %v6752_v52 }
  0xea   :  { %5158 = vmatpush.bf16.msra.mxu3 %v6419_v6  ;;  %v9496_v55 = vld [vmem:[%s15052_s1 + $0x6c4] sm:$0xf]  ;;  %v7008_v56 = vld [vmem:[%s15052_s1 + $0x6d0] sm:$0xf0]  ;;  %v6883_v59 = vor.u32 %v9464_v53, %v6880_v54 }
  0xeb   :  { %5168 = vmatpush.bf16.msrb.mxu0 %v6595_v8  ;;  %v9380_v60 = vld [vmem:[%s15052_s1 + $0x324] sm:$0xf]  ;;  %v6544_v62 = vld [vmem:[%s15052_s1 + $0x330] sm:$0xf0]  ;;  %v7011_v3 = vor.u32 %v9496_v55, %v7008_v56 }
  0xec   :  { %5133 = vmatpush.bf16.msra.mxu1 %v6147_v34  ;;  %v9428_v63 = vld [vmem:[%s15052_s1 + $0x4a4] sm:$0xf]  ;;  %v6736_v4 = vld [vmem:[%s15052_s1 + $0x4b0] sm:$0xf0]  ;;  %v6547_v10 = vor.u32 %v9380_v60, %v6544_v62 }
  0xed   :  { %5146 = vmatpush.bf16.msra.mxu2 %v6275_v35  ;;  %v9460_v5 = vld [vmem:[%s15052_s1 + $0x5a4] sm:$0xf]  ;;  %v6864_v44 = vld [vmem:[%s15052_s1 + $0x5b0] sm:$0xf0]  ;;  %v6739_v14 = vor.u32 %v9428_v63, %v6736_v4  ;;  %v4914_v35 = vpop.f32.mrf.mxu0 }
  0xee   :  { %5159 = vmatpush.bf16.msra.mxu3 %v6403_v39  ;;  %v9492_v6 = vld [vmem:[%s15052_s1 + $0x6a4] sm:$0xf]  ;;  %v6992_v8 = vld [vmem:[%s15052_s1 + $0x6b0] sm:$0xf0]  ;;  %v6867_v15 = vor.u32 %v9460_v5, %v6864_v44 }
  0xef   :  { %5169 = vmatpush.bf16.msrb.mxu0 %v6579_v43  ;;  %5134 = vmatmul.bf16.vlgmr.msra.gmra.mxu1 %v10407_v21  ;;  %v9376_v11 = vld [vmem:[%s15052_s1 + $0x304] sm:$0xf]  ;;  %v6528_v19 = vld [vmem:[%s15052_s1 + $0x310] sm:$0xf0]  ;;  %v6995_v27 = vor.u32 %v9492_v6, %v6992_v8  ;;  %v4915_v43 = vadd.f32 %v4914_v35, %v11494_v46  ;;  %v4940_v5 = vpop.f32.mrf.mxu2 }
  0xf0   :  { %5178 = vmatpush.bf16.msrb.mxu1 %v6771_v45  ;;  %5147 = vmatmul.bf16.vlgmr.msra.gmra.mxu2 %v10418_v26  ;;  %v9424_v23 = vld [vmem:[%s15052_s1 + $0x484] sm:$0xf]  ;;  %v6720_v24 = vld [vmem:[%s15052_s1 + $0x490] sm:$0xf0]  ;;  %v6531_v45 = vor.u32 %v9376_v11, %v6528_v19 }
  0xf1   :  { %5191 = vmatpush.bf16.msrb.mxu2 %v6899_v47  ;;  %5160 = vmatmul.bf16.vlgmr.msra.gmra.mxu3 %v10405_v20  ;;  %v9456_v29 = vld [vmem:[%s15052_s1 + $0x584] sm:$0xf]  ;;  %v6848_v30 = vld [vmem:[%s15052_s1 + $0x590] sm:$0xf0]  ;;  %v4927_v47 = vpop.f32.mrf.mxu1  ;;  %v6723_v48 = vor.u32 %v9424_v23, %v6720_v24 }
  0xf2   :  { %5204 = vmatpush.bf16.msrb.mxu3 %v7027_v51  ;;  %v9488_v34 = vld [vmem:[%s15052_s1 + $0x684] sm:$0xf]  ;;  %v6976_v36 = vld [vmem:[%s15052_s1 + $0x690] sm:$0xf0]  ;;  %v6851_v49 = vor.u32 %v9456_v29, %v6848_v30  ;;  %v4928_v53 = vadd.f32 %v4927_v47, %v4915_v43 }
  0xf3   :  { %5170 = vmatpush.bf16.msrb.mxu0 %v6563_v57  ;;  %v9532_v38 = vld [vmem:[%s15052_s1 + $0x7e4] sm:$0xf]  ;;  %v7152_v39 = vld [vmem:[%s15052_s1 + $0x7f0] sm:$0xf0]  ;;  %v6979_v52 = vor.u32 %v9488_v34, %v6976_v36 }
  0xf4   :  { %5179 = vmatpush.bf16.msrb.mxu1 %v6755_v58  ;;  %v9420_v50 = vld [vmem:[%s15052_s1 + $0x464] sm:$0xf]  ;;  %v6704_v51 = vld [vmem:[%s15052_s1 + $0x470] sm:$0xf0]  ;;  %v7155_v54 = vor.u32 %v9532_v38, %v7152_v39  ;;  %v4941_v11 = vadd.f32 %v4940_v5, %v4928_v53 }
  0xf5   :  { %5192 = vmatpush.bf16.msrb.mxu2 %v6883_v59  ;;  %v9452_v46 = vld [vmem:[%s15052_s1 + $0x564] sm:$0xf]  ;;  %v6832_v55 = vld [vmem:[%s15052_s1 + $0x570] sm:$0xf0]  ;;  %v6707_v60 = vor.u32 %v9420_v50, %v6704_v51  ;;  %v4916_v24 = vpop.f32.mrf.mxu0 }
  0xf6   :  { %5205 = vmatpush.bf16.msrb.mxu3 %v7011_v3  ;;  %v9484_v56 = vld [vmem:[%s15052_s1 + $0x664] sm:$0xf]  ;;  %v6960_v57 = vld [vmem:[%s15052_s1 + $0x670] sm:$0xf0]  ;;  %v6835_v62 = vor.u32 %v9452_v46, %v6832_v55 }
  0xf7   :  { %5171 = vmatpush.bf16.msrb.mxu0 %v6547_v10  ;;  %v9528_v58 = vld [vmem:[%s15052_s1 + $0x7c4] sm:$0xf]  ;;  %v7136_v59 = vld [vmem:[%s15052_s1 + $0x7d0] sm:$0xf0]  ;;  %v6963_v4 = vor.u32 %v9484_v56, %v6960_v57 }
  0xf8   :  { %5180 = vmatpush.bf16.msrb.mxu1 %v6739_v14  ;;  %v9416_v63 = vld [vmem:[%s15052_s1 + $0x444] sm:$0xf]  ;;  %v6688_v3 = vld [vmem:[%s15052_s1 + $0x450] sm:$0xf0]  ;;  %v7139_v44 = vor.u32 %v9528_v58, %v7136_v59  ;;  %v4953_v14 = vpop.f32.mrf.mxu3 }
  0xf9   :  { %5193 = vmatpush.bf16.msrb.mxu2 %v6867_v15  ;;  %v9448_v6 = vld [vmem:[%s15052_s1 + $0x544] sm:$0xf]  ;;  %v6816_v8 = vld [vmem:[%s15052_s1 + $0x550] sm:$0xf0]  ;;  %v11694_v29 = vadd.f32 %v4953_v14, %v4941_v11  ;;  %v6691_v30 = vor.u32 %v9416_v63, %v6688_v3 }
  0xfa   :  { %5206 = vmatpush.bf16.msrb.mxu3 %v6995_v27  ;;  %v9480_v10 = vld [vmem:[%s15052_s1 + $0x644] sm:$0xf]  ;;  %v6944_v15 = vld [vmem:[%s15052_s1 + $0x650] sm:$0xf0]  ;;  %v4929_v27 = vpop.f32.mrf.mxu1  ;;  %v6819_v34 = vor.u32 %v9448_v6, %v6816_v8 }
  0xfb   :  { %5172 = vmatpush.bf16.msrb.mxu0 %v6531_v45  ;;  %v9524_v19 = vld [vmem:[%s15052_s1 + $0x7a4] sm:$0xf]  ;;  %v7120_v23 = vld [vmem:[%s15052_s1 + $0x7b0] sm:$0xf0]  ;;  %v6947_v38 = vor.u32 %v9480_v10, %v6944_v15 }
  0xfc   :  { %5181 = vmatpush.bf16.msrb.mxu1 %v6723_v48  ;;  %v9412_v35 = vld [vmem:[%s15052_s1 + $0x424] sm:$0xf]  ;;  %v6672_v36 = vld [vmem:[%s15052_s1 + $0x430] sm:$0xf0]  ;;  %v7123_v39 = vor.u32 %v9524_v19, %v7120_v23 }
  0xfd   :  { %5194 = vmatpush.bf16.msrb.mxu2 %v6851_v49  ;;  %v9444_v43 = vld [vmem:[%s15052_s1 + $0x524] sm:$0xf]  ;;  %v6800_v45 = vld [vmem:[%s15052_s1 + $0x530] sm:$0xf0]  ;;  %v6675_v51 = vor.u32 %v9412_v35, %v6672_v36 }
  0xfe   :  { %5207 = vmatpush.bf16.msrb.mxu3 %v6979_v52  ;;  %5173 = vmatmul.bf16.vlgmr.msrb.gmra.mxu0 %v10409_v22  ;;  %v9476_v47 = vld [vmem:[%s15052_s1 + $0x624] sm:$0xf]  ;;  %v6928_v48 = vld [vmem:[%s15052_s1 + $0x630] sm:$0xf0]  ;;  %v6803_v52 = vor.u32 %v9444_v43, %v6800_v45 }
  0xff   :  { %5217 = vmatpush.bf16.msra.mxu0 %v7155_v54  ;;  %v9520_v49 = vld [vmem:[%s15052_s1 + $0x784] sm:$0xf]  ;;  %v7104_v50 = vld [vmem:[%s15052_s1 + $0x790] sm:$0xf0]  ;;  %v6931_v55 = vor.u32 %v9476_v47, %v6928_v48 }
 0x100   :  { %5182 = vmatpush.bf16.msrb.mxu1 %v6707_v60  ;;  %v9408_v53 = vld [vmem:[%s15052_s1 + $0x404] sm:$0xf]  ;;  %v6656_v54 = vld [vmem:[%s15052_s1 + $0x410] sm:$0xf0]  ;;  %v7107_v56 = vor.u32 %v9520_v49, %v7104_v50  ;;  %v4942_v60 = vpop.f32.mrf.mxu2 }
 0x101   :  { %5195 = vmatpush.bf16.msrb.mxu2 %v6835_v62  ;;  %v9440_v46 = vld [vmem:[%s15052_s1 + $0x504] sm:$0xf]  ;;  %v6784_v57 = vld [vmem:[%s15052_s1 + $0x510] sm:$0xf0]  ;;  %v6659_v8 = vor.u32 %v9408_v53, %v6656_v54 }
 0x102   :  { %5208 = vmatpush.bf16.msrb.mxu3 %v6963_v4  ;;  %v9472_v58 = vld [vmem:[%s15052_s1 + $0x604] sm:$0xf]  ;;  %v6912_v59 = vld [vmem:[%s15052_s1 + $0x610] sm:$0xf0]  ;;  %v4955_v4 = vpop.f32.mrf.mxu3  ;;  %v6787_v10 = vor.u32 %v9440_v46, %v6784_v57 }
 0x103   :  { %5218 = vmatpush.bf16.msra.mxu0 %v7139_v44  ;;  %v9516_v62 = vld [vmem:[%s15052_s1 + $0x764] sm:$0xf]  ;;  %v7088_v63 = vld [vmem:[%s15052_s1 + $0x770] sm:$0xf0]  ;;  %v6915_v15 = vor.u32 %v9472_v58, %v6912_v59 }
 0x104   :  { %5183 = vmatpush.bf16.msrb.mxu1 %v6691_v30  ;;  %v9564_v3 = vld [vmem:[%s15052_s1 + $0x8e4] sm:$0xf]  ;;  %v7280_v5 = vld [vmem:[%s15052_s1 + $0x8f0] sm:$0xf0]  ;;  %v7091_v19 = vor.u32 %v9516_v62, %v7088_v63 }
 0x105   :  { %5196 = vmatpush.bf16.msrb.mxu2 %v6819_v34  ;;  %v9596_v44 = vld [vmem:[%s15052_s1 + $0x9e4] sm:$0xf]  ;;  %v7408_v6 = vld [vmem:[%s15052_s1 + $0x9f0] sm:$0xf0]  ;;  %v7283_v23 = vor.u32 %v9564_v3, %v7280_v5 }
 0x106   :  { %5209 = vmatpush.bf16.msrb.mxu3 %v6947_v38  ;;  %v9628_v11 = vld [vmem:[%s15052_s1 + $0xae4] sm:$0xf]  ;;  %v7536_v14 = vld [vmem:[%s15052_s1 + $0xaf0] sm:$0xf0]  ;;  %v7411_v24 = vor.u32 %v9596_v44, %v7408_v6 }
 0x107   :  { %5219 = vmatpush.bf16.msra.mxu0 %v7123_v39  ;;  %v9512_v27 = vld [vmem:[%s15052_s1 + $0x744] sm:$0xf]  ;;  %v7072_v30 = vld [vmem:[%s15052_s1 + $0x750] sm:$0xf0]  ;;  %v7539_v35 = vor.u32 %v9628_v11, %v7536_v14 }
 0x108   :  { %5184 = vmatpush.bf16.msrb.mxu1 %v6675_v51  ;;  %v9560_v34 = vld [vmem:[%s15052_s1 + $0x8c4] sm:$0xf]  ;;  %v7264_v36 = vld [vmem:[%s15052_s1 + $0x8d0] sm:$0xf0]  ;;  %v7075_v47 = vor.u32 %v9512_v27, %v7072_v30 }
 0x109   :  { %5197 = vmatpush.bf16.msrb.mxu2 %v6803_v52  ;;  %v9592_v38 = vld [vmem:[%s15052_s1 + $0x9c4] sm:$0xf]  ;;  %v7392_v39 = vld [vmem:[%s15052_s1 + $0x9d0] sm:$0xf0]  ;;  %v7267_v48 = vor.u32 %v9560_v34, %v7264_v36 }
 0x10a   :  { %5210 = vmatpush.bf16.msrb.mxu3 %v6931_v55  ;;  %v9624_v43 = vld [vmem:[%s15052_s1 + $0xac4] sm:$0xf]  ;;  %v7520_v45 = vld [vmem:[%s15052_s1 + $0xad0] sm:$0xf0]  ;;  %v7395_v49 = vor.u32 %v9592_v38, %v7392_v39 }
 0x10b   :  { %5220 = vmatpush.bf16.msra.mxu0 %v7107_v56  ;;  %v9508_v50 = vld [vmem:[%s15052_s1 + $0x724] sm:$0xf]  ;;  %v7056_v51 = vld [vmem:[%s15052_s1 + $0x730] sm:$0xf0]  ;;  %v7523_v53 = vor.u32 %v9624_v43, %v7520_v45 }
 0x10c   :  { %5185 = vmatpush.bf16.msrb.mxu1 %v6659_v8  ;;  %v9556_v52 = vld [vmem:[%s15052_s1 + $0x8a4] sm:$0xf]  ;;  %v7248_v54 = vld [vmem:[%s15052_s1 + $0x8b0] sm:$0xf0]  ;;  %v7059_v58 = vor.u32 %v9508_v50, %v7056_v51 }
 0x10d   :  { %5198 = vmatpush.bf16.msrb.mxu2 %v6787_v10  ;;  %v9588_v46 = vld [vmem:[%s15052_s1 + $0x9a4] sm:$0xf]  ;;  %v7376_v55 = vld [vmem:[%s15052_s1 + $0x9b0] sm:$0xf0]  ;;  %v7251_v60 = vor.u32 %v9556_v52, %v7248_v54  ;;  %v4966_v10 = vpop.f32.mrf.mxu0 }
 0x10e   :  { %5211 = vmatpush.bf16.msrb.mxu3 %v6915_v15  ;;  %v9620_v56 = vld [vmem:[%s15052_s1 + $0xaa4] sm:$0xf]  ;;  %v7504_v57 = vld [vmem:[%s15052_s1 + $0xab0] sm:$0xf0]  ;;  %v7379_v62 = vor.u32 %v9588_v46, %v7376_v55 }
 0x10f   :  { %5221 = vmatpush.bf16.msra.mxu0 %v7091_v19  ;;  %5186 = vmatmul.bf16.vlgmr.msrb.gmra.mxu1 %v10500_v0  ;;  %v9504_v59 = vld [vmem:[%s15052_s1 + $0x704] sm:$0xf]  ;;  %v7040_v63 = vld [vmem:[%s15052_s1 + $0x710] sm:$0xf0]  ;;  %v7507_v5 = vor.u32 %v9620_v56, %v7504_v57  ;;  %v4967_v19 = vadd.f32 %v4966_v10, %v11694_v29  ;;  %v4992_v46 = vpop.f32.mrf.mxu2 }
 0x110   :  { %5230 = vmatpush.bf16.msra.mxu1 %v7283_v23  ;;  %5199 = vmatmul.bf16.vlgmr.msrb.gmra.mxu2 %v10504_v2  ;;  %v9552_v3 = vld [vmem:[%s15052_s1 + $0x884] sm:$0xf]  ;;  %v7232_v4 = vld [vmem:[%s15052_s1 + $0x890] sm:$0xf0]  ;;  %v7043_v23 = vor.u32 %v9504_v59, %v7040_v63 }
 0x111   :  { %5243 = vmatpush.bf16.msra.mxu2 %v7411_v24  ;;  %5212 = vmatmul.bf16.vlgmr.msrb.gmra.mxu3 %v10498_v61  ;;  %v9584_v44 = vld [vmem:[%s15052_s1 + $0x984] sm:$0xf]  ;;  %v7360_v6 = vld [vmem:[%s15052_s1 + $0x990] sm:$0xf0]  ;;  %v4979_v24 = vpop.f32.mrf.mxu1  ;;  %v7235_v27 = vor.u32 %v9552_v3, %v7232_v4 }
 0x112   :  { %5256 = vmatpush.bf16.msra.mxu3 %v7539_v35  ;;  %v9616_v8 = vld [vmem:[%s15052_s1 + $0xa84] sm:$0xf]  ;;  %v7488_v11 = vld [vmem:[%s15052_s1 + $0xa90] sm:$0xf0]  ;;  %v7363_v30 = vor.u32 %v9584_v44, %v7360_v6  ;;  %v4980_v38 = vadd.f32 %v4979_v24, %v4967_v19 }
 0x113   :  { %5222 = vmatpush.bf16.msra.mxu0 %v7075_v47  ;;  %v9660_v14 = vld [vmem:[%s15052_s1 + $0xbe4] sm:$0xf]  ;;  %v7664_v15 = vld [vmem:[%s15052_s1 + $0xbf0] sm:$0xf0]  ;;  %v7491_v36 = vor.u32 %v9616_v8, %v7488_v11 }
 0x114   :  { %5231 = vmatpush.bf16.msra.mxu1 %v7267_v48  ;;  %v9548_v34 = vld [vmem:[%s15052_s1 + $0x864] sm:$0xf]  ;;  %v7216_v35 = vld [vmem:[%s15052_s1 + $0x870] sm:$0xf0]  ;;  %v7667_v39 = vor.u32 %v9660_v14, %v7664_v15  ;;  %v4993_v59 = vadd.f32 %v4992_v46, %v4980_v38 }
 0x115   :  { %5244 = vmatpush.bf16.msra.mxu2 %v7395_v49  ;;  %v9580_v29 = vld [vmem:[%s15052_s1 + $0x964] sm:$0xf]  ;;  %v7344_v43 = vld [vmem:[%s15052_s1 + $0x970] sm:$0xf0]  ;;  %v7219_v50 = vor.u32 %v9548_v34, %v7216_v35  ;;  %v4968_v4 = vpop.f32.mrf.mxu0 }
 0x116   :  { %5257 = vmatpush.bf16.msra.mxu3 %v7523_v53  ;;  %v9612_v45 = vld [vmem:[%s15052_s1 + $0xa64] sm:$0xf]  ;;  %v7472_v47 = vld [vmem:[%s15052_s1 + $0xa70] sm:$0xf0]  ;;  %v7347_v51 = vor.u32 %v9580_v29, %v7344_v43 }
 0x117   :  { %5223 = vmatpush.bf16.msra.mxu0 %v7059_v58  ;;  %v9656_v48 = vld [vmem:[%s15052_s1 + $0xbc4] sm:$0xf]  ;;  %v7648_v49 = vld [vmem:[%s15052_s1 + $0xbd0] sm:$0xf0]  ;;  %v7475_v54 = vor.u32 %v9612_v45, %v7472_v47 }
 0x118   :  { %5232 = vmatpush.bf16.msra.mxu1 %v7251_v60  ;;  %v9544_v52 = vld [vmem:[%s15052_s1 + $0x844] sm:$0xf]  ;;  %v7200_v53 = vld [vmem:[%s15052_s1 + $0x850] sm:$0xf0]  ;;  %v7651_v55 = vor.u32 %v9656_v48, %v7648_v49  ;;  %v5005_v60 = vpop.f32.mrf.mxu3 }
 0x119   :  { %5245 = vmatpush.bf16.msra.mxu2 %v7379_v62  ;;  %v9576_v56 = vld [vmem:[%s15052_s1 + $0x944] sm:$0xf]  ;;  %v7328_v57 = vld [vmem:[%s15052_s1 + $0x950] sm:$0xf0]  ;;  %v11893_v44 = vadd.f32 %v5005_v60, %v4993_v59  ;;  %v7203_v6 = vor.u32 %v9544_v52, %v7200_v53 }
 0x11a   :  { %5258 = vmatpush.bf16.msra.mxu3 %v7507_v5  ;;  %v9608_v58 = vld [vmem:[%s15052_s1 + $0xa44] sm:$0xf]  ;;  %v7456_v62 = vld [vmem:[%s15052_s1 + $0xa50] sm:$0xf0]  ;;  %v4981_v5 = vpop.f32.mrf.mxu1  ;;  %v7331_v8 = vor.u32 %v9576_v56, %v7328_v57 }
 0x11b   :  { %5224 = vmatpush.bf16.msra.mxu0 %v7043_v23  ;;  %v9652_v63 = vld [vmem:[%s15052_s1 + $0xba4] sm:$0xf]  ;;  %v7632_v3 = vld [vmem:[%s15052_s1 + $0xbb0] sm:$0xf0]  ;;  %v7459_v14 = vor.u32 %v9608_v58, %v7456_v62 }
 0x11c   :  { %5233 = vmatpush.bf16.msra.mxu1 %v7235_v27  ;;  %v9540_v10 = vld [vmem:[%s15052_s1 + $0x824] sm:$0xf]  ;;  %v7184_v11 = vld [vmem:[%s15052_s1 + $0x830] sm:$0xf0]  ;;  %v7635_v15 = vor.u32 %v9652_v63, %v7632_v3 }
 0x11d   :  { %5246 = vmatpush.bf16.msra.mxu2 %v7363_v30  ;;  %v9572_v19 = vld [vmem:[%s15052_s1 + $0x924] sm:$0xf]  ;;  %v7312_v23 = vld [vmem:[%s15052_s1 + $0x930] sm:$0xf0]  ;;  %v7187_v35 = vor.u32 %v9540_v10, %v7184_v11 }
 0x11e   :  { %5259 = vmatpush.bf16.msra.mxu3 %v7491_v36  ;;  %5225 = vmatmul.bf16.vlgmr.msra.gmra.mxu0 %v10502_v1  ;;  %v9604_v24 = vld [vmem:[%s15052_s1 + $0xa24] sm:$0xf]  ;;  %v7440_v27 = vld [vmem:[%s15052_s1 + $0xa30] sm:$0xf0]  ;;  %v7315_v36 = vor.u32 %v9572_v19, %v7312_v23 }
 0x11f   :  { %5269 = vmatpush.bf16.msrb.mxu0 %v7667_v39  ;;  %v9648_v30 = vld [vmem:[%s15052_s1 + $0xb84] sm:$0xf]  ;;  %v7616_v34 = vld [vmem:[%s15052_s1 + $0xb90] sm:$0xf0]  ;;  %v7443_v43 = vor.u32 %v9604_v24, %v7440_v27 }
 0x120   :  { %5234 = vmatpush.bf16.msra.mxu1 %v7219_v50  ;;  %v9536_v38 = vld [vmem:[%s15052_s1 + $0x804] sm:$0xf]  ;;  %v7168_v39 = vld [vmem:[%s15052_s1 + $0x810] sm:$0xf0]  ;;  %v7619_v45 = vor.u32 %v9648_v30, %v7616_v34  ;;  %v4994_v50 = vpop.f32.mrf.mxu2 }
 0x121   :  { %5247 = vmatpush.bf16.msra.mxu2 %v7347_v51  ;;  %v9568_v29 = vld [vmem:[%s15052_s1 + $0x904] sm:$0xf]  ;;  %v7296_v47 = vld [vmem:[%s15052_s1 + $0x910] sm:$0xf0]  ;;  %v7171_v57 = vor.u32 %v9536_v38, %v7168_v39 }
 0x122   :  { %5260 = vmatpush.bf16.msra.mxu3 %v7475_v54  ;;  %v9600_v48 = vld [vmem:[%s15052_s1 + $0xa04] sm:$0xf]  ;;  %v7424_v49 = vld [vmem:[%s15052_s1 + $0xa10] sm:$0xf0]  ;;  %v5007_v54 = vpop.f32.mrf.mxu3  ;;  %v7299_v58 = vor.u32 %v9568_v29, %v7296_v47 }
 0x123   :  { %5270 = vmatpush.bf16.msrb.mxu0 %v7651_v55  ;;  %v9644_v51 = vld [vmem:[%s15052_s1 + $0xb64] sm:$0xf]  ;;  %v7600_v52 = vld [vmem:[%s15052_s1 + $0xb70] sm:$0xf0]  ;;  %v7427_v62 = vor.u32 %v9600_v48, %v7424_v49 }
 0x124   :  { %5235 = vmatpush.bf16.msra.mxu1 %v7203_v6  ;;  %v9692_v53 = vld [vmem:[%s15052_s1 + $0xce4] sm:$0xf]  ;;  %v7792_v46 = vld [vmem:[%s15052_s1 + $0xcf0] sm:$0xf0]  ;;  %v7603_v63 = vor.u32 %v9644_v51, %v7600_v52 }
 0x125   :  { %5248 = vmatpush.bf16.msra.mxu2 %v7331_v8  ;;  %v9724_v55 = vld [vmem:[%s15052_s1 + $0xde4] sm:$0xf]  ;;  %v7920_v56 = vld [vmem:[%s15052_s1 + $0xdf0] sm:$0xf0]  ;;  %v7795_v3 = vor.u32 %v9692_v53, %v7792_v46 }
 0x126   :  { %5261 = vmatpush.bf16.msra.mxu3 %v7459_v14  ;;  %v9756_v59 = vld [vmem:[%s15052_s1 + $0xee4] sm:$0xf]  ;;  %v8048_v60 = vld [vmem:[%s15052_s1 + $0xef0] sm:$0xf0]  ;;  %v7923_v4 = vor.u32 %v9724_v55, %v7920_v56 }
 0x127   :  { %5271 = vmatpush.bf16.msrb.mxu0 %v7635_v15  ;;  %v9640_v5 = vld [vmem:[%s15052_s1 + $0xb44] sm:$0xf]  ;;  %v7584_v6 = vld [vmem:[%s15052_s1 + $0xb50] sm:$0xf0]  ;;  %v8051_v10 = vor.u32 %v9756_v59, %v8048_v60 }
 0x128   :  { %5236 = vmatpush.bf16.msra.mxu1 %v7187_v35  ;;  %v9688_v8 = vld [vmem:[%s15052_s1 + $0xcc4] sm:$0xf]  ;;  %v7776_v11 = vld [vmem:[%s15052_s1 + $0xcd0] sm:$0xf0]  ;;  %v7587_v24 = vor.u32 %v9640_v5, %v7584_v6 }
 0x129   :  { %5249 = vmatpush.bf16.msra.mxu2 %v7315_v36  ;;  %v9720_v14 = vld [vmem:[%s15052_s1 + $0xdc4] sm:$0xf]  ;;  %v7904_v15 = vld [vmem:[%s15052_s1 + $0xdd0] sm:$0xf0]  ;;  %v7779_v27 = vor.u32 %v9688_v8, %v7776_v11 }
 0x12a   :  { %5262 = vmatpush.bf16.msra.mxu3 %v7443_v43  ;;  %v9752_v19 = vld [vmem:[%s15052_s1 + $0xec4] sm:$0xf]  ;;  %v8032_v23 = vld [vmem:[%s15052_s1 + $0xed0] sm:$0xf0]  ;;  %v7907_v30 = vor.u32 %v9720_v14, %v7904_v15 }
 0x12b   :  { %5272 = vmatpush.bf16.msrb.mxu0 %v7619_v45  ;;  %v9636_v34 = vld [vmem:[%s15052_s1 + $0xb24] sm:$0xf]  ;;  %v7568_v35 = vld [vmem:[%s15052_s1 + $0xb30] sm:$0xf0]  ;;  %v8035_v38 = vor.u32 %v9752_v19, %v8032_v23 }
 0x12c   :  { %5237 = vmatpush.bf16.msra.mxu1 %v7171_v57  ;;  %v9684_v36 = vld [vmem:[%s15052_s1 + $0xca4] sm:$0xf]  ;;  %v7760_v39 = vld [vmem:[%s15052_s1 + $0xcb0] sm:$0xf0]  ;;  %v7571_v48 = vor.u32 %v9636_v34, %v7568_v35 }
 0x12d   :  { %5250 = vmatpush.bf16.msra.mxu2 %v7299_v58  ;;  %v9716_v29 = vld [vmem:[%s15052_s1 + $0xda4] sm:$0xf]  ;;  %v7888_v43 = vld [vmem:[%s15052_s1 + $0xdb0] sm:$0xf0]  ;;  %v7763_v50 = vor.u32 %v9684_v36, %v7760_v39  ;;  %v5018_v58 = vpop.f32.mrf.mxu0 }
 0x12e   :  { %5263 = vmatpush.bf16.msra.mxu3 %v7427_v62  ;;  %v9748_v45 = vld [vmem:[%s15052_s1 + $0xea4] sm:$0xf]  ;;  %v8016_v47 = vld [vmem:[%s15052_s1 + $0xeb0] sm:$0xf0]  ;;  %v7891_v51 = vor.u32 %v9716_v29, %v7888_v43 }
 0x12f   :  { %5273 = vmatpush.bf16.msrb.mxu0 %v7603_v63  ;;  %5238 = vmatmul.bf16.vlgmr.msra.gmra.mxu1 %v10738_v7  ;;  %v9632_v49 = vld [vmem:[%s15052_s1 + $0xb04] sm:$0xf]  ;;  %v7552_v52 = vld [vmem:[%s15052_s1 + $0xb10] sm:$0xf0]  ;;  %v8019_v46 = vor.u32 %v9748_v45, %v8016_v47  ;;  %v5019_v63 = vadd.f32 %v5018_v58, %v11893_v44 }
 0x130   :  { %5282 = vmatpush.bf16.msrb.mxu1 %v7795_v3  ;;  %5251 = vmatmul.bf16.vlgmr.msra.gmra.mxu2 %v10751_v13  ;;  %v9680_v53 = vld [vmem:[%s15052_s1 + $0xc84] sm:$0xf]  ;;  %v7744_v54 = vld [vmem:[%s15052_s1 + $0xc90] sm:$0xf0]  ;;  %v7555_v3 = vor.u32 %v9632_v49, %v7552_v52 }
 0x131   :  { %5295 = vmatpush.bf16.msrb.mxu2 %v7923_v4  ;;  %5264 = vmatmul.bf16.vlgmr.msra.gmra.mxu3 %v10749_v12  ;;  %v9712_v55 = vld [vmem:[%s15052_s1 + $0xd84] sm:$0xf]  ;;  %v7872_v56 = vld [vmem:[%s15052_s1 + $0xd90] sm:$0xf0]  ;;  %v5031_v4 = vpop.f32.mrf.mxu1  ;;  %v7747_v5 = vor.u32 %v9680_v53, %v7744_v54 }
 0x132   :  { %5308 = vmatpush.bf16.msrb.mxu3 %v8051_v10  ;;  %v9744_v57 = vld [vmem:[%s15052_s1 + $0xe84] sm:$0xf]  ;;  %v8000_v59 = vld [vmem:[%s15052_s1 + $0xe90] sm:$0xf0]  ;;  %v7875_v6 = vor.u32 %v9712_v55, %v7872_v56  ;;  %v5032_v14 = vadd.f32 %v5031_v4, %v5019_v63  ;;  %v5044_v29 = vpop.f32.mrf.mxu2 }
 0x133   :  { %5274 = vmatpush.bf16.msrb.mxu0 %v7587_v24  ;;  %v9788_v60 = vld [vmem:[%s15052_s1 + $0xfe4] sm:$0xf]  ;;  %v8176_v62 = vld [vmem:[%s15052_s1 + $0xff0] sm:$0xf0]  ;;  %v8003_v11 = vor.u32 %v9744_v57, %v8000_v59 }
 0x134   :  { %5283 = vmatpush.bf16.msrb.mxu1 %v7779_v27  ;;  %v9676_v8 = vld [vmem:[%s15052_s1 + $0xc64] sm:$0xf]  ;;  %v7728_v10 = vld [vmem:[%s15052_s1 + $0xc70] sm:$0xf0]  ;;  %v8179_v15 = vor.u32 %v9788_v60, %v8176_v62  ;;  %v5045_v49 = vadd.f32 %v5044_v29, %v5032_v14 }
 0x135   :  { %5296 = vmatpush.bf16.msrb.mxu2 %v7907_v30  ;;  %v9708_v44 = vld [vmem:[%s15052_s1 + $0xd64] sm:$0xf]  ;;  %v7856_v19 = vld [vmem:[%s15052_s1 + $0xd70] sm:$0xf0]  ;;  %v7731_v34 = vor.u32 %v9676_v8, %v7728_v10  ;;  %v5020_v54 = vpop.f32.mrf.mxu0 }
 0x136   :  { %5309 = vmatpush.bf16.msrb.mxu3 %v8035_v38  ;;  %v9740_v23 = vld [vmem:[%s15052_s1 + $0xe64] sm:$0xf]  ;;  %v7984_v24 = vld [vmem:[%s15052_s1 + $0xe70] sm:$0xf0]  ;;  %v7859_v35 = vor.u32 %v9708_v44, %v7856_v19 }
 0x137   :  { %5275 = vmatpush.bf16.msrb.mxu0 %v7571_v48  ;;  %v9784_v27 = vld [vmem:[%s15052_s1 + $0xfc4] sm:$0xf]  ;;  %v8160_v30 = vld [vmem:[%s15052_s1 + $0xfd0] sm:$0xf0]  ;;  %v7987_v39 = vor.u32 %v9740_v23, %v7984_v24 }
 0x138   :  { %5284 = vmatpush.bf16.msrb.mxu1 %v7763_v50  ;;  %v9672_v36 = vld [vmem:[%s15052_s1 + $0xc44] sm:$0xf]  ;;  %v7712_v38 = vld [vmem:[%s15052_s1 + $0xc50] sm:$0xf0]  ;;  %v8163_v43 = vor.u32 %v9784_v27, %v8160_v30  ;;  %v5057_v50 = vpop.f32.mrf.mxu3 }
 0x139   :  { %5297 = vmatpush.bf16.msrb.mxu2 %v7891_v51  ;;  %v9704_v45 = vld [vmem:[%s15052_s1 + $0xd44] sm:$0xf]  ;;  %v7840_v47 = vld [vmem:[%s15052_s1 + $0xd50] sm:$0xf0]  ;;  %v12092_v55 = vadd.f32 %v5057_v50, %v5045_v49  ;;  %v7715_v56 = vor.u32 %v9672_v36, %v7712_v38 }
 0x13a   :  { %5310 = vmatpush.bf16.msrb.mxu3 %v8019_v46  ;;  %v9736_v48 = vld [vmem:[%s15052_s1 + $0xe44] sm:$0xf]  ;;  %v7968_v51 = vld [vmem:[%s15052_s1 + $0xe50] sm:$0xf0]  ;;  %v5033_v46 = vpop.f32.mrf.mxu1  ;;  %v7843_v57 = vor.u32 %v9704_v45, %v7840_v47 }
 0x13b   :  { %5276 = vmatpush.bf16.msrb.mxu0 %v7555_v3  ;;  %v9780_v52 = vld [vmem:[%s15052_s1 + $0xfa4] sm:$0xf]  ;;  %v8144_v53 = vld [vmem:[%s15052_s1 + $0xfb0] sm:$0xf0]  ;;  %v7971_v60 = vor.u32 %v9736_v48, %v7968_v51 }
 0x13c   :  { %5285 = vmatpush.bf16.msrb.mxu1 %v7747_v5  ;;  %v9668_v58 = vld [vmem:[%s15052_s1 + $0xc24] sm:$0xf]  ;;  %v7696_v59 = vld [vmem:[%s15052_s1 + $0xc30] sm:$0xf0]  ;;  %v8147_v62 = vor.u32 %v9780_v52, %v8144_v53 }
 0x13d   :  { %5298 = vmatpush.bf16.msrb.mxu2 %v7875_v6  ;;  %v9700_v63 = vld [vmem:[%s15052_s1 + $0xd24] sm:$0xf]  ;;  %v7824_v3 = vld [vmem:[%s15052_s1 + $0xd30] sm:$0xf0]  ;;  %v7699_v10 = vor.u32 %v9668_v58, %v7696_v59 }
 0x13e   :  { %5311 = vmatpush.bf16.msrb.mxu3 %v8003_v11  ;;  %5277 = vmatmul.bf16.vlgmr.msrb.gmra.mxu0 %v10762_v17  ;;  %v9732_v4 = vld [vmem:[%s15052_s1 + $0xe24] sm:$0xf]  ;;  %v7952_v5 = vld [vmem:[%s15052_s1 + $0xe30] sm:$0xf0]  ;;  %v7827_v11 = vor.u32 %v9700_v63, %v7824_v3 }
 0x13f   :  { %5321 = vmatpush.bf16.msra.mxu0 %v8179_v15  ;;  %v9776_v6 = vld [vmem:[%s15052_s1 + $0xf84] sm:$0xf]  ;;  %v8128_v8 = vld [vmem:[%s15052_s1 + $0xf90] sm:$0xf0]  ;;  %v7955_v19 = vor.u32 %v9732_v4, %v7952_v5 }
 0x140   :  { %5286 = vmatpush.bf16.msrb.mxu1 %v7731_v34  ;;  %v9664_v14 = vld [vmem:[%s15052_s1 + $0xc04] sm:$0xf]  ;;  %v7680_v15 = vld [vmem:[%s15052_s1 + $0xc10] sm:$0xf0]  ;;  %v8131_v23 = vor.u32 %v9776_v6, %v8128_v8  ;;  %v5046_v34 = vpop.f32.mrf.mxu2 }
 0x141   :  { %5299 = vmatpush.bf16.msrb.mxu2 %v7859_v35  ;;  %v9696_v44 = vld [vmem:[%s15052_s1 + $0xd04] sm:$0xf]  ;;  %v7808_v24 = vld [vmem:[%s15052_s1 + $0xd10] sm:$0xf0]  ;;  %v7683_v47 = vor.u32 %v9664_v14, %v7680_v15 }
 0x142   :  { %5312 = vmatpush.bf16.msrb.mxu3 %v7987_v39  ;;  %v9728_v27 = vld [vmem:[%s15052_s1 + $0xe04] sm:$0xf]  ;;  %v7936_v30 = vld [vmem:[%s15052_s1 + $0xe10] sm:$0xf0]  ;;  %v5059_v39 = vpop.f32.mrf.mxu3  ;;  %v7811_v48 = vor.u32 %v9696_v44, %v7808_v24 }
 0x143   :  { %5322 = vmatpush.bf16.msra.mxu0 %v8163_v43  ;;  %v9772_v35 = vld [vmem:[%s15052_s1 + $0xf64] sm:$0xf]  ;;  %v8112_v36 = vld [vmem:[%s15052_s1 + $0xf70] sm:$0xf0]  ;;  %v7939_v51 = vor.u32 %v9728_v27, %v7936_v30 }
 0x144   :  { %5287 = vmatpush.bf16.msrb.mxu1 %v7715_v56  ;;  %v9820_v38 = vld [vmem:[%s15052_s1 + $0x10e4] sm:$0xf]  ;;  %v8304_v29 = vld [vmem:[%s15052_s1 + $0x10f0] sm:$0xf0]  ;;  %v8115_v52 = vor.u32 %v9772_v35, %v8112_v36 }
 0x145   :  { %5300 = vmatpush.bf16.msrb.mxu2 %v7843_v57  ;;  %v9852_v43 = vld [vmem:[%s15052_s1 + $0x11e4] sm:$0xf]  ;;  %v8432_v45 = vld [vmem:[%s15052_s1 + $0x11f0] sm:$0xf0]  ;;  %v8307_v53 = vor.u32 %v9820_v38, %v8304_v29 }
 0x146   :  { %5313 = vmatpush.bf16.msrb.mxu3 %v7971_v60  ;;  %v9884_v49 = vld [vmem:[%s15052_s1 + $0x12e4] sm:$0xf]  ;;  %v8560_v50 = vld [vmem:[%s15052_s1 + $0x12f0] sm:$0xf0]  ;;  %v8435_v54 = vor.u32 %v9852_v43, %v8432_v45 }
 0x147   :  { %5323 = vmatpush.bf16.msra.mxu0 %v8147_v62  ;;  %v9768_v46 = vld [vmem:[%s15052_s1 + $0xf44] sm:$0xf]  ;;  %v8096_v56 = vld [vmem:[%s15052_s1 + $0xf50] sm:$0xf0]  ;;  %v8563_v58 = vor.u32 %v9884_v49, %v8560_v50 }
 0x148   :  { %5288 = vmatpush.bf16.msrb.mxu1 %v7699_v10  ;;  %v9816_v57 = vld [vmem:[%s15052_s1 + $0x10c4] sm:$0xf]  ;;  %v8288_v59 = vld [vmem:[%s15052_s1 + $0x10d0] sm:$0xf0]  ;;  %v8099_v4 = vor.u32 %v9768_v46, %v8096_v56 }
 0x149   :  { %5301 = vmatpush.bf16.msrb.mxu2 %v7827_v11  ;;  %v9848_v60 = vld [vmem:[%s15052_s1 + $0x11c4] sm:$0xf]  ;;  %v8416_v62 = vld [vmem:[%s15052_s1 + $0x11d0] sm:$0xf0]  ;;  %v8291_v5 = vor.u32 %v9816_v57, %v8288_v59 }
 0x14a   :  { %5314 = vmatpush.bf16.msrb.mxu3 %v7955_v19  ;;  %v9880_v63 = vld [vmem:[%s15052_s1 + $0x12c4] sm:$0xf]  ;;  %v8544_v3 = vld [vmem:[%s15052_s1 + $0x12d0] sm:$0xf0]  ;;  %v8419_v6 = vor.u32 %v9848_v60, %v8416_v62 }
 0x14b   :  { %5324 = vmatpush.bf16.msra.mxu0 %v8131_v23  ;;  %v9764_v8 = vld [vmem:[%s15052_s1 + $0xf24] sm:$0xf]  ;;  %v8080_v10 = vld [vmem:[%s15052_s1 + $0xf30] sm:$0xf0]  ;;  %v8547_v14 = vor.u32 %v9880_v63, %v8544_v3 }
 0x14c   :  { %5289 = vmatpush.bf16.msrb.mxu1 %v7683_v47  ;;  %v9812_v11 = vld [vmem:[%s15052_s1 + $0x10a4] sm:$0xf]  ;;  %v8272_v15 = vld [vmem:[%s15052_s1 + $0x10b0] sm:$0xf0]  ;;  %v8083_v27 = vor.u32 %v9764_v8, %v8080_v10 }
 0x14d   :  { %5302 = vmatpush.bf16.msrb.mxu2 %v7811_v48  ;;  %v9844_v44 = vld [vmem:[%s15052_s1 + $0x11a4] sm:$0xf]  ;;  %v8400_v19 = vld [vmem:[%s15052_s1 + $0x11b0] sm:$0xf0]  ;;  %v8275_v34 = vor.u32 %v9812_v11, %v8272_v15  ;;  %v5070_v48 = vpop.f32.mrf.mxu0 }
 0x14e   :  { %5315 = vmatpush.bf16.msrb.mxu3 %v7939_v51  ;;  %v9876_v23 = vld [vmem:[%s15052_s1 + $0x12a4] sm:$0xf]  ;;  %v8528_v24 = vld [vmem:[%s15052_s1 + $0x12b0] sm:$0xf0]  ;;  %v8403_v35 = vor.u32 %v9844_v44, %v8400_v19 }
 0x14f   :  { %5325 = vmatpush.bf16.msra.mxu0 %v8115_v52  ;;  %5290 = vmatmul.bf16.vlgmr.msrb.gmra.mxu1 %v10779_v28  ;;  %v9760_v30 = vld [vmem:[%s15052_s1 + $0xf04] sm:$0xf]  ;;  %v8064_v36 = vld [vmem:[%s15052_s1 + $0xf10] sm:$0xf0]  ;;  %v8531_v29 = vor.u32 %v9876_v23, %v8528_v24  ;;  %v5071_v52 = vadd.f32 %v5070_v48, %v12092_v55 }
 0x150   :  { %5334 = vmatpush.bf16.msra.mxu1 %v8307_v53  ;;  %5303 = vmatmul.bf16.vlgmr.msrb.gmra.mxu2 %v10783_v32  ;;  %v9808_v38 = vld [vmem:[%s15052_s1 + $0x1084] sm:$0xf]  ;;  %v8256_v39 = vld [vmem:[%s15052_s1 + $0x1090] sm:$0xf0]  ;;  %v8067_v53 = vor.u32 %v9760_v30, %v8064_v36 }
 0x151   :  { %5347 = vmatpush.bf16.msra.mxu2 %v8435_v54  ;;  %5316 = vmatmul.bf16.vlgmr.msrb.gmra.mxu3 %v10781_v31  ;;  %v9840_v43 = vld [vmem:[%s15052_s1 + $0x1184] sm:$0xf]  ;;  %v8384_v45 = vld [vmem:[%s15052_s1 + $0x1190] sm:$0xf0]  ;;  %v5083_v54 = vpop.f32.mrf.mxu1  ;;  %v8259_v46 = vor.u32 %v9808_v38, %v8256_v39 }
 0x152   :  { %5360 = vmatpush.bf16.msra.mxu3 %v8563_v58  ;;  %v9872_v47 = vld [vmem:[%s15052_s1 + $0x1284] sm:$0xf]  ;;  %v8512_v49 = vld [vmem:[%s15052_s1 + $0x1290] sm:$0xf0]  ;;  %v8387_v56 = vor.u32 %v9840_v43, %v8384_v45  ;;  %v5084_v60 = vadd.f32 %v5083_v54, %v5071_v52 }
 0x153   :  { %5326 = vmatpush.bf16.msra.mxu0 %v8099_v4  ;;  %v9916_v50 = vld [vmem:[%s15052_s1 + $0x13e4] sm:$0xf]  ;;  %v8688_v51 = vld [vmem:[%s15052_s1 + $0x13f0] sm:$0xf0]  ;;  %v8515_v59 = vor.u32 %v9872_v47, %v8512_v49  ;;  %v5096_v44 = vpop.f32.mrf.mxu2 }
 0x154   :  { %5335 = vmatpush.bf16.msra.mxu1 %v8291_v5  ;;  %v9804_v57 = vld [vmem:[%s15052_s1 + $0x1064] sm:$0xf]  ;;  %v8240_v58 = vld [vmem:[%s15052_s1 + $0x1070] sm:$0xf0]  ;;  %v8691_v62 = vor.u32 %v9916_v50, %v8688_v51  ;;  %v5097_v30 = vadd.f32 %v5096_v44, %v5084_v60 }
 0x155   :  { %5348 = vmatpush.bf16.msra.mxu2 %v8419_v6  ;;  %v9836_v55 = vld [vmem:[%s15052_s1 + $0x1164] sm:$0xf]  ;;  %v8368_v63 = vld [vmem:[%s15052_s1 + $0x1170] sm:$0xf0]  ;;  %v8243_v8 = vor.u32 %v9804_v57, %v8240_v58 }
 0x156   :  { %5361 = vmatpush.bf16.msra.mxu3 %v8547_v14  ;;  %v9868_v3 = vld [vmem:[%s15052_s1 + $0x1264] sm:$0xf]  ;;  %v8496_v4 = vld [vmem:[%s15052_s1 + $0x1270] sm:$0xf0]  ;;  %v8371_v10 = vor.u32 %v9836_v55, %v8368_v63 }
 0x157   :  { %5327 = vmatpush.bf16.msra.mxu0 %v8083_v27  ;;  %v9912_v5 = vld [vmem:[%s15052_s1 + $0x13c4] sm:$0xf]  ;;  %v8672_v6 = vld [vmem:[%s15052_s1 + $0x13d0] sm:$0xf0]  ;;  %v8499_v15 = vor.u32 %v9868_v3, %v8496_v4 }
 0x158   :  { %5336 = vmatpush.bf16.msra.mxu1 %v8275_v34  ;;  %v9800_v11 = vld [vmem:[%s15052_s1 + $0x1044] sm:$0xf]  ;;  %v8224_v14 = vld [vmem:[%s15052_s1 + $0x1050] sm:$0xf0]  ;;  %v8675_v19 = vor.u32 %v9912_v5, %v8672_v6  ;;  %v5072_v34 = vpop.f32.mrf.mxu0 }
 0x159   :  { %5349 = vmatpush.bf16.msra.mxu2 %v8403_v35  ;;  %v9832_v23 = vld [vmem:[%s15052_s1 + $0x1144] sm:$0xf]  ;;  %v8352_v24 = vld [vmem:[%s15052_s1 + $0x1150] sm:$0xf0]  ;;  %v5109_v35 = vpop.f32.mrf.mxu3  ;;  %v8227_v45 = vor.u32 %v9800_v11, %v8224_v14 }
 0x15a   :  { %5362 = vmatpush.bf16.msra.mxu3 %v8531_v29  ;;  %v9864_v27 = vld [vmem:[%s15052_s1 + $0x1244] sm:$0xf]  ;;  %v8480_v36 = vld [vmem:[%s15052_s1 + $0x1250] sm:$0xf0]  ;;  %v5085_v29 = vpop.f32.mrf.mxu1  ;;  %v5110_v43 = vadd.f32 %v5109_v35, %v5097_v30  ;;  %v8355_v47 = vor.u32 %v9832_v23, %v8352_v24 }
 0x15b   :  { %5328 = vmatpush.bf16.msra.mxu0 %v8067_v53  ;;  %v9908_v38 = vld [vmem:[%s15052_s1 + $0x13a4] sm:$0xf]  ;;  %v8656_v39 = vld [vmem:[%s15052_s1 + $0x13b0] sm:$0xf0]  ;;  %v8483_v50 = vor.u32 %v9864_v27, %v8480_v36 }
 0x15c   :  { %5337 = vmatpush.bf16.msra.mxu1 %v8259_v46  ;;  %v9796_v48 = vld [vmem:[%s15052_s1 + $0x1024] sm:$0xf]  ;;  %v8208_v49 = vld [vmem:[%s15052_s1 + $0x1030] sm:$0xf0]  ;;  %v8659_v51 = vor.u32 %v9908_v38, %v8656_v39 }
 0x15d   :  { %5350 = vmatpush.bf16.msra.mxu2 %v8387_v56  ;;  %v9828_v52 = vld [vmem:[%s15052_s1 + $0x1124] sm:$0xf]  ;;  %v8336_v53 = vld [vmem:[%s15052_s1 + $0x1130] sm:$0xf0]  ;;  %v8211_v58 = vor.u32 %v9796_v48, %v8208_v49 }
 0x15e   :  { %5363 = vmatpush.bf16.msra.mxu3 %v8515_v59  ;;  %5329 = vmatmul.bf16.vlgmr.msra.gmra.mxu0 %v10785_v33  ;;  %v9860_v54 = vld [vmem:[%s15052_s1 + $0x1224] sm:$0xf]  ;;  %v8464_v46 = vld [vmem:[%s15052_s1 + $0x1230] sm:$0xf0]  ;;  %v8339_v59 = vor.u32 %v9828_v52, %v8336_v53 }
 0x15f   :  { %5373 = vmatpush.bf16.msrb.mxu0 %v8691_v62  ;;  %v9904_v56 = vld [vmem:[%s15052_s1 + $0x1384] sm:$0xf]  ;;  %v8640_v57 = vld [vmem:[%s15052_s1 + $0x1390] sm:$0xf0]  ;;  %v8467_v63 = vor.u32 %v9860_v54, %v8464_v46 }
 0x160   :  { %5338 = vmatpush.bf16.msra.mxu1 %v8243_v8  ;;  %v9792_v60 = vld [vmem:[%s15052_s1 + $0x1004] sm:$0xf]  ;;  %v8192_v62 = vld [vmem:[%s15052_s1 + $0x1010] sm:$0xf0]  ;;  %v8643_v3 = vor.u32 %v9904_v56, %v8640_v57  ;;  %v5098_v8 = vpop.f32.mrf.mxu2  ;;  %v5122_v44 = vpop.f32.mrf.mxu0 }
 0x161   :  { %5351 = vmatpush.bf16.msra.mxu2 %v8371_v10  ;;  %v9824_v55 = vld [vmem:[%s15052_s1 + $0x1104] sm:$0xf]  ;;  %v8320_v4 = vld [vmem:[%s15052_s1 + $0x1110] sm:$0xf0]  ;;  %v12351_v27 = vadd.f32 %v5122_v44, %v5110_v43  ;;  %v8195_v30 = vor.u32 %v9792_v60, %v8192_v62 }
 0x162   :  { %5364 = vmatpush.bf16.msra.mxu3 %v8499_v15  ;;  %v9856_v5 = vld [vmem:[%s15052_s1 + $0x1204] sm:$0xf]  ;;  %v8448_v6 = vld [vmem:[%s15052_s1 + $0x1210] sm:$0xf0]  ;;  %v5111_v15 = vpop.f32.mrf.mxu3  ;;  %v8323_v34 = vor.u32 %v9824_v55, %v8320_v4 }
 0x163   :  { %5374 = vmatpush.bf16.msrb.mxu0 %v8675_v19  ;;  %v9900_v10 = vld [vmem:[%s15052_s1 + $0x1364] sm:$0xf]  ;;  %v8624_v11 = vld [vmem:[%s15052_s1 + $0x1370] sm:$0xf0]  ;;  %v8451_v38 = vor.u32 %v9856_v5, %v8448_v6 }
 0x164   :  { %5339 = vmatpush.bf16.msra.mxu1 %v8227_v45  ;;  %v9948_v14 = vld [vmem:[%s15052_s1 + $0x14e4] sm:$0xf]  ;;  %v8816_v19 = vld [vmem:[%s15052_s1 + $0x14f0] sm:$0xf0]  ;;  %v8627_v39 = vor.u32 %v9900_v10, %v8624_v11 }
 0x165   :  { %5352 = vmatpush.bf16.msra.mxu2 %v8355_v47  ;;  %v9980_v23 = vld [vmem:[%s15052_s1 + $0x15e4] sm:$0xf]  ;;  %v8944_v24 = vld [vmem:[%s15052_s1 + $0x15f0] sm:$0xf0]  ;;  %v8819_v29 = vor.u32 %v9948_v14, %v8816_v19 }
 0x166   :  { %5365 = vmatpush.bf16.msra.mxu3 %v8483_v50  ;;  %v10012_v35 = vld [vmem:[%s15052_s1 + $0x16e4] sm:$0xf]  ;;  %v9072_v36 = vld [vmem:[%s15052_s1 + $0x16f0] sm:$0xf0]  ;;  %v8947_v45 = vor.u32 %v9980_v23, %v8944_v24 }
 0x167   :  { %5375 = vmatpush.bf16.msrb.mxu0 %v8659_v51  ;;  %v9896_v43 = vld [vmem:[%s15052_s1 + $0x1344] sm:$0xf]  ;;  %v8608_v47 = vld [vmem:[%s15052_s1 + $0x1350] sm:$0xf0]  ;;  %v9075_v49 = vor.u32 %v10012_v35, %v9072_v36  ;;  %v10065_v35 = vld [vmem:[%s15054_s2] sm:$0xf] }
 0x168   :  { %5340 = vmatpush.bf16.msra.mxu1 %v8211_v58  ;;  %v9944_v48 = vld [vmem:[%s15052_s1 + $0x14c4] sm:$0xf]  ;;  %v8800_v50 = vld [vmem:[%s15052_s1 + $0x14d0] sm:$0xf0]  ;;  %v8611_v46 = vor.u32 %v9896_v43, %v8608_v47  ;;  %v5124_v4 = vpop.f32.mrf.mxu0  ;;  %v814_v36 = vperm.slane %v10065_v35, 1 }
 0x169   :  { %5353 = vmatpush.bf16.msra.mxu2 %v8339_v59  ;;  %v9976_v51 = vld [vmem:[%s15052_s1 + $0x15c4] sm:$0xf]  ;;  %v8928_v52 = vld [vmem:[%s15052_s1 + $0x15d0] sm:$0xf0]  ;;  %v8803_v56 = vor.u32 %v9944_v48, %v8800_v50 }
 0x16a   :  { %5366 = vmatpush.bf16.msra.mxu3 %v8467_v63  ;;  %v10008_v53 = vld [vmem:[%s15052_s1 + $0x16c4] sm:$0xf]  ;;  %v9056_v54 = vld [vmem:[%s15052_s1 + $0x16d0] sm:$0xf0]  ;;  %v8931_v57 = vor.u32 %v9976_v51, %v8928_v52 }
 0x16b   :  { %5376 = vmatpush.bf16.msrb.mxu0 %v8643_v3  ;;  %v9892_v58 = vld [vmem:[%s15052_s1 + $0x1324] sm:$0xf]  ;;  %v8592_v59 = vld [vmem:[%s15052_s1 + $0x1330] sm:$0xf0]  ;;  %v9059_v62 = vor.u32 %v10008_v53, %v9056_v54 }
 0x16c   :  { %5341 = vmatpush.bf16.msra.mxu1 %v8195_v30  ;;  %v9940_v60 = vld [vmem:[%s15052_s1 + $0x14a4] sm:$0xf]  ;;  %v8784_v55 = vld [vmem:[%s15052_s1 + $0x14b0] sm:$0xf0]  ;;  %v8595_v8 = vor.u32 %v9892_v58, %v8592_v59  ;;  %v5135_v43 = vpop.f32.mrf.mxu1 }
 0x16d   :  { %5354 = vmatpush.bf16.msra.mxu2 %v8323_v34  ;;  %v9972_v63 = vld [vmem:[%s15052_s1 + $0x15a4] sm:$0xf]  ;;  %v8912_v3 = vld [vmem:[%s15052_s1 + $0x15b0] sm:$0xf0]  ;;  %v8787_v14 = vor.u32 %v9940_v60, %v8784_v55 }
 0x16e   :  { %5367 = vmatpush.bf16.msra.mxu3 %v8451_v38  ;;  %v10004_v5 = vld [vmem:[%s15052_s1 + $0x16a4] sm:$0xf]  ;;  %v9040_v6 = vld [vmem:[%s15052_s1 + $0x16b0] sm:$0xf0]  ;;  %v8915_v15 = vor.u32 %v9972_v63, %v8912_v3 }
 0x16f   :  { %5377 = vmatpush.bf16.msrb.mxu0 %v8627_v39  ;;  %5342 = vmatmul.bf16.vlgmr.msra.gmra.mxu1 %v11149_v9  ;;  %v9888_v10 = vld [vmem:[%s15052_s1 + $0x1304] sm:$0xf]  ;;  %v8576_v11 = vld [vmem:[%s15052_s1 + $0x1310] sm:$0xf0]  ;;  %v9043_v24 = vor.u32 %v10004_v5, %v9040_v6 }
 0x170   :  { %5386 = vmatpush.bf16.msrb.mxu1 %v8819_v29  ;;  %5355 = vmatmul.bf16.vlgmr.msra.gmra.mxu2 %v11162_v18  ;;  %v9936_v44 = vld [vmem:[%s15052_s1 + $0x1484] sm:$0xf]  ;;  %v8768_v19 = vld [vmem:[%s15052_s1 + $0x1490] sm:$0xf0] }
 0x171   :  { %5399 = vmatpush.bf16.msrb.mxu2 %v8947_v45  ;;  %5368 = vmatmul.bf16.vlgmr.msra.gmra.mxu3 %v11160_v16  ;;  %v9968_v23 = vld [vmem:[%s15052_s1 + $0x1584] sm:$0xf]  ;;  %v8896_v30 = vld [vmem:[%s15052_s1 + $0x1590] sm:$0xf0]  ;;  %v8579_v45 = vor.u32 %v9888_v10, %v8576_v11  ;;  %v8771_v47 = vor.u32 %v9936_v44, %v8768_v19 }
 0x172   :  { %5412 = vmatpush.bf16.msrb.mxu3 %v9075_v49  ;;  %v10000_v34 = vld [vmem:[%s15052_s1 + $0x1684] sm:$0xf]  ;;  %v9024_v38 = vld [vmem:[%s15052_s1 + $0x1690] sm:$0xf0]  ;;  %v8899_v48 = vor.u32 %v9968_v23, %v8896_v30 }
 0x173   :  { %5378 = vmatpush.bf16.msrb.mxu0 %v8611_v46  ;;  %v10044_v39 = vld [vmem:[%s15052_s1 + $0x17e4] sm:$0xf]  ;;  %v9200_v29 = vld [vmem:[%s15052_s1 + $0x17f0] sm:$0xf0]  ;;  %v9027_v51 = vor.u32 %v10000_v34, %v9024_v38  ;;  %v5148_v3 = vpop.f32.mrf.mxu2 }
 0x174   :  { %5387 = vmatpush.bf16.msrb.mxu1 %v8803_v56  ;;  %v9932_v49 = vld [vmem:[%s15052_s1 + $0x1464] sm:$0xf]  ;;  %v8752_v50 = vld [vmem:[%s15052_s1 + $0x1470] sm:$0xf0]  ;;  %v9203_v52 = vor.u32 %v10044_v39, %v9200_v29  ;;  %v5136_v56 = vadd.f32 %v5135_v43, %v814_v36 }
 0x175   :  { %5400 = vmatpush.bf16.msrb.mxu2 %v8931_v57  ;;  %v9964_v53 = vld [vmem:[%s15052_s1 + $0x1564] sm:$0xf]  ;;  %v8880_v54 = vld [vmem:[%s15052_s1 + $0x1570] sm:$0xf0]  ;;  %v8755_v60 = vor.u32 %v9932_v49, %v8752_v50 }
 0x176   :  { %5413 = vmatpush.bf16.msrb.mxu3 %v9059_v62  ;;  %v9996_v46 = vld [vmem:[%s15052_s1 + $0x1664] sm:$0xf]  ;;  %v9008_v57 = vld [vmem:[%s15052_s1 + $0x1670] sm:$0xf0]  ;;  %v8883_v62 = vor.u32 %v9964_v53, %v8880_v54  ;;  %v5149_v11 = vadd.f32 %v5148_v3, %v5136_v56 }
 0x177   :  { %5379 = vmatpush.bf16.msrb.mxu0 %v8595_v8  ;;  %v10040_v58 = vld [vmem:[%s15052_s1 + $0x17c4] sm:$0xf]  ;;  %v9184_v59 = vld [vmem:[%s15052_s1 + $0x17d0] sm:$0xf0]  ;;  %v9011_v4 = vor.u32 %v9996_v46, %v9008_v57 }
 0x178   :  { %5388 = vmatpush.bf16.msrb.mxu1 %v8787_v14  ;;  %v9928_v55 = vld [vmem:[%s15052_s1 + $0x1444] sm:$0xf]  ;;  %v8736_v63 = vld [vmem:[%s15052_s1 + $0x1450] sm:$0xf0]  ;;  %v9187_v5 = vor.u32 %v10040_v58, %v9184_v59  ;;  %v5161_v14 = vpop.f32.mrf.mxu3 }
 0x179   :  { %5401 = vmatpush.bf16.msrb.mxu2 %v8915_v15  ;;  %v9960_v6 = vld [vmem:[%s15052_s1 + $0x1544] sm:$0xf]  ;;  %v8864_v8 = vld [vmem:[%s15052_s1 + $0x1550] sm:$0xf0]  ;;  %v5162_v23 = vadd.f32 %v5161_v14, %v5149_v11  ;;  %v8739_v30 = vor.u32 %v9928_v55, %v8736_v63 }
 0x17a   :  { %5414 = vmatpush.bf16.msrb.mxu3 %v9043_v24  ;;  %v9992_v10 = vld [vmem:[%s15052_s1 + $0x1644] sm:$0xf]  ;;  %v8992_v15 = vld [vmem:[%s15052_s1 + $0x1650] sm:$0xf0]  ;;  %v5137_v24 = vpop.f32.mrf.mxu1  ;;  %v8867_v34 = vor.u32 %v9960_v6, %v8864_v8  ;;  %v6262_v8 = vld [vmem:[%s15052_s1 + $0xe8] sm:$0xf] }
 0x17b   :  { %5380 = vmatpush.bf16.msrb.mxu0 %v8579_v45  ;;  %v10036_v44 = vld [vmem:[%s15052_s1 + $0x17a4] sm:$0xf]  ;;  %v9168_v19 = vld [vmem:[%s15052_s1 + $0x17b0] sm:$0xf0]  ;;  %v8995_v38 = vor.u32 %v9992_v10, %v8992_v15  ;;  %v5174_v50 = vpop.f32.mrf.mxu0  ;;  %v5150_v57 = vpop.f32.mrf.mxu2  ;;  %v9311_v10 = vld [vmem:[%s15052_s1 + $0xf4] sm:$0xf0] }
 0x17c   :  { %5389 = vmatpush.bf16.msrb.mxu1 %v8771_v47  ;;  %v9924_v35 = vld [vmem:[%s15052_s1 + $0x1424] sm:$0xf]  ;;  %v8720_v36 = vld [vmem:[%s15052_s1 + $0x1430] sm:$0xf0]  ;;  %v9171_v39 = vor.u32 %v10036_v44, %v9168_v19  ;;  %v12525_v56 = vadd.f32 %v5174_v50, %v5162_v23  ;;  %v6390_v15 = vld [vmem:[%s15052_s1 + $0x1e8] sm:$0xf] }
 0x17d   :  { %5402 = vmatpush.bf16.msrb.mxu2 %v8899_v48  ;;  %v9956_v29 = vld [vmem:[%s15052_s1 + $0x1524] sm:$0xf]  ;;  %v8848_v45 = vld [vmem:[%s15052_s1 + $0x1530] sm:$0xf0]  ;;  %v9343_v44 = vld [vmem:[%s15052_s1 + $0x1f4] sm:$0xf0] }
 0x17e   :  { %5415 = vmatpush.bf16.msrb.mxu3 %v9027_v51  ;;  %5381 = vmatmul.bf16.vlgmr.msrb.gmra.mxu0 %v11173_v25  ;;  %v9988_v43 = vld [vmem:[%s15052_s1 + $0x1624] sm:$0xf]  ;;  %v8976_v47 = vld [vmem:[%s15052_s1 + $0x1630] sm:$0xf0]  ;;  %v8723_v51 = vor.u32 %v9924_v35, %v8720_v36 }
 0x17f   :  { %5425 = vmatpush.bf16.msra.mxu0 %v9203_v52  ;;  %v10032_v48 = vld [vmem:[%s15052_s1 + $0x1784] sm:$0xf]  ;;  %v9152_v49 = vld [vmem:[%s15052_s1 + $0x1790] sm:$0xf0]  ;;  %v8851_v52 = vor.u32 %v9956_v29, %v8848_v45  ;;  %v8979_v58 = vor.u32 %v9988_v43, %v8976_v47  ;;  %v6246_v29 = vld [vmem:[%s15052_s1 + $0xc8] sm:$0xf] }
 0x180   :  { %5390 = vmatpush.bf16.msrb.mxu1 %v8755_v60  ;;  %v9920_v53 = vld [vmem:[%s15052_s1 + $0x1404] sm:$0xf]  ;;  %v8704_v54 = vld [vmem:[%s15052_s1 + $0x1410] sm:$0xf0]  ;;  %v9155_v59 = vor.u32 %v10032_v48, %v9152_v49  ;;  %v5163_v63 = vpop.f32.mrf.mxu3  ;;  %v9307_v45 = vld [vmem:[%s15052_s1 + $0xd4] sm:$0xf0] }
 0x181   :  { %5403 = vmatpush.bf16.msrb.mxu2 %v8883_v62  ;;  %v9952_v46 = vld [vmem:[%s15052_s1 + $0x1504] sm:$0xf]  ;;  %v8832_v60 = vld [vmem:[%s15052_s1 + $0x1510] sm:$0xf0]  ;;  %v8707_v11 = vor.u32 %v9920_v53, %v8704_v54  ;;  %v6374_v47 = vld [vmem:[%s15052_s1 + $0x1c8] sm:$0xf] }
 0x182   :  { %5416 = vmatpush.bf16.msrb.mxu3 %v9011_v4  ;;  %v9984_v62 = vld [vmem:[%s15052_s1 + $0x1604] sm:$0xf]  ;;  %v8960_v55 = vld [vmem:[%s15052_s1 + $0x1610] sm:$0xf0]  ;;  %v8835_v14 = vor.u32 %v9952_v46, %v8832_v60  ;;  %v9339_v48 = vld [vmem:[%s15052_s1 + $0x1d4] sm:$0xf0] }
 0x183   :  { %5426 = vmatpush.bf16.msra.mxu0 %v9187_v5  ;;  %v10028_v3 = vld [vmem:[%s15052_s1 + $0x1764] sm:$0xf]  ;;  %v9136_v4 = vld [vmem:[%s15052_s1 + $0x1770] sm:$0xf0]  ;;  %v8963_v19 = vor.u32 %v9984_v62, %v8960_v55  ;;  %v5176_v43 = vpop.f32.mrf.mxu0  ;;  %v6375_v46 = vor.u32 %v9339_v48, %v6374_v47  ;;  %v6358_v60 = vld [vmem:[%s15052_s1 + $0x1a8] sm:$0xf] }
 0x184   :  { %5391 = vmatpush.bf16.msrb.mxu1 %v8739_v30  ;;  %v10060_v5 = vld [vmem:[%s15052_s1 + $0x1864] sm:$0xf]  ;;  %v9264_v6 = vld [vmem:[%s15052_s1 + $0x1870] sm:$0xf0]  ;;  %v9139_v23 = vor.u32 %v10028_v3, %v9136_v4  ;;  %v6263_v30 = vor.u32 %v9311_v10, %v6262_v8  ;;  %v9335_v62 = vld [vmem:[%s15052_s1 + $0x1b4] sm:$0xf0] }
 0x185   :  { %5404 = vmatpush.bf16.msrb.mxu2 %v8867_v34  ;;  %v9267_v24 = vor.u32 %v10060_v5, %v9264_v6  ;;  %v10024_v34 = vld [vmem:[%s15052_s1 + $0x1744] sm:$0xf]  ;;  %v9120_v35 = vld [vmem:[%s15052_s1 + $0x1750] sm:$0xf0]  ;;  %v6359_v10 = vor.u32 %v9335_v62, %v6358_v60  ;;  %v6198_v43 = vld [vmem:[%s15052_s1 + $0x68] sm:$0xf] }
 0x186   :  { %5417 = vmatpush.bf16.msrb.mxu3 %v8995_v38  ;;  %v10056_v36 = vld [vmem:[%s15052_s1 + $0x1844] sm:$0xf]  ;;  %v6391_v38 = vor.u32 %v9343_v44, %v6390_v15  ;;  %v9123_v49 = vor.u32 %v10024_v34, %v9120_v35  ;;  %v9104_v53 = vld [vmem:[%s15052_s1 + $0x1730] sm:$0xf0]  ;;  %v6342_v15 = vld [vmem:[%s15052_s1 + $0x188] sm:$0xf] }
 0x187   :  { %5427 = vmatpush.bf16.msra.mxu0 %v9171_v39  ;;  %v9248_v39 = vld [vmem:[%s15052_s1 + $0x1850] sm:$0xf0]  ;;  %v10052_v54 = vld [vmem:[%s15052_s1 + $0x1824] sm:$0xf]  ;;  %v9331_v44 = vld [vmem:[%s15052_s1 + $0x194] sm:$0xf0] }
 0x188   :  { %5392 = vmatpush.bf16.msrb.mxu1 %v8723_v51  ;;  %v9251_v50 = vor.u32 %v10056_v36, %v9248_v39  ;;  %v6247_v51 = vor.u32 %v9307_v45, %v6246_v29  ;;  %v9232_v57 = vld [vmem:[%s15052_s1 + $0x1830] sm:$0xf0]  ;;  %v10016_v63 = vld [vmem:[%s15052_s1 + $0x1704] sm:$0xf]  ;;  %v9407_v34 = vld [vmem:[%s15052_s1 + $0x3f4] sm:$0xf0]  ;;  %v6343_v29 = vor.u32 %v9331_v44, %v6342_v15 }
 0x189   :  { %5405 = vmatpush.bf16.msrb.mxu2 %v8851_v52  ;;  %v10020_v52 = vld [vmem:[%s15052_s1 + $0x1724] sm:$0xf]  ;;  %v9235_v3 = vor.u32 %v10052_v54, %v9232_v57  ;;  %v9088_v5 = vld [vmem:[%s15052_s1 + $0x1710] sm:$0xf0]  ;;  %v9295_v47 = vld [vmem:[%s15052_s1 + $0x74] sm:$0xf0] }
 0x18a   :  { %5418 = vmatpush.bf16.msrb.mxu3 %v8979_v58  ;;  %v6230_v58 = vld [vmem:[%s15052_s1 + $0xa8] sm:$0xf]  ;;  %v9107_v55 = vor.u32 %v10020_v52, %v9104_v53  ;;  %v10048_v6 = vld [vmem:[%s15052_s1 + $0x1804] sm:$0xf]  ;;  %v9216_v8 = vld [vmem:[%s15052_s1 + $0x1810] sm:$0xf0]  ;;  %v6199_v54 = vor.u32 %v9295_v47, %v6198_v43 }
 0x18b   :  { %5428 = vmatpush.bf16.msra.mxu0 %v9155_v59  ;;  %v9303_v59 = vld [vmem:[%s15052_s1 + $0xb4] sm:$0xf0]  ;;  %v9219_v36 = vor.u32 %v10048_v6, %v9216_v8  ;;  %v6326_v48 = vld [vmem:[%s15052_s1 + $0x168] sm:$0xf] }
 0x18c   :  { %5393 = vmatpush.bf16.msrb.mxu1 %v8707_v11  ;;  %v6231_v4 = vor.u32 %v9303_v59, %v6230_v58  ;;  %v6214_v11 = vld [vmem:[%s15052_s1 + $0x88] sm:$0xf]  ;;  %v5187_v35 = vpop.f32.mrf.mxu1  ;;  %v9403_v53 = vld [vmem:[%s15052_s1 + $0x3d4] sm:$0xf0] }
 0x18d   :  { %5406 = vmatpush.bf16.msrb.mxu2 %v8835_v14  ;;  %v9299_v14 = vld [vmem:[%s15052_s1 + $0x94] sm:$0xf0]  ;;  %v5188_v39 = vadd.f32 %v5187_v35, %v12525_v56  ;;  %v6630_v52 = vld [vmem:[%s15052_s1 + $0x3c8] sm:$0xf] }
 0x18e   :  { %5419 = vmatpush.bf16.msrb.mxu3 %v8963_v19  ;;  %v6518_v19 = vld [vmem:[%s15052_s1 + $0x2e8] sm:$0xf]  ;;  %v9327_v56 = vld [vmem:[%s15052_s1 + $0x174] sm:$0xf0] }
 0x18f   :  { %5429 = vmatpush.bf16.msra.mxu0 %v9139_v23  ;;  %5394 = vmatmul.bf16.vlgmr.msrb.gmra.mxu1 %v11190_v37  ;;  %v9375_v23 = vld [vmem:[%s15052_s1 + $0x2f4] sm:$0xf0]  ;;  %v6327_v57 = vor.u32 %v9327_v56, %v6326_v48  ;;  %v6182_v59 = vld [vmem:[%s15052_s1 + $0x48] sm:$0xf] }
 0x190   :  { %5442 = vmatpush.bf16.msra.mxu1 %v9267_v24  ;;  %5407 = vmatmul.bf16.vlgmr.msrb.gmra.mxu2 %v11194_v41  ;;  %v9091_v24 = vor.u32 %v10016_v63, %v9088_v5  ;;  %v6519_v45 = vor.u32 %v9375_v23, %v6518_v19  ;;  %v9291_v60 = vld [vmem:[%s15052_s1 + $0x54] sm:$0xf0]  ;;  %v6310_v62 = vld [vmem:[%s15052_s1 + $0x148] sm:$0xf] }
 0x191   :  { %5451 = vmatpush.bf16.msra.mxu2 %v6263_v30  ;;  %5420 = vmatmul.bf16.vlgmr.msrb.gmra.mxu3 %v11192_v40  ;;  %v6646_v30 = vld [vmem:[%s15052_s1 + $0x3e8] sm:$0xf]  ;;  %v9367_v6 = vld [vmem:[%s15052_s1 + $0x2b4] sm:$0xf0]  ;;  %v6183_v15 = vor.u32 %v9291_v60, %v6182_v59 }
 0x192   :  { %5464 = vmatpush.bf16.msra.mxu3 %v6391_v38  ;;  %v6215_v38 = vor.u32 %v9299_v14, %v6214_v11  ;;  %v6486_v5 = vld [vmem:[%s15052_s1 + $0x2a8] sm:$0xf]  ;;  %v9319_v35 = vld [vmem:[%s15052_s1 + $0x134] sm:$0xf0] }
 0x193   :  { %5430 = vmatpush.bf16.msra.mxu0 %v9123_v49  ;;  %v6647_v49 = vor.u32 %v9407_v34, %v6646_v30  ;;  %v6614_v8 = vld [vmem:[%s15052_s1 + $0x3a8] sm:$0xf]  ;;  %v6487_v19 = vor.u32 %v9367_v6, %v6486_v5  ;;  %v9395_v43 = vld [vmem:[%s15052_s1 + $0x394] sm:$0xf0] }
 0x194   :  { %5443 = vmatpush.bf16.msra.mxu1 %v9251_v50  ;;  %v6502_v50 = vld [vmem:[%s15052_s1 + $0x2c8] sm:$0xf]  ;;  %v5213_v63 = vpop.f32.mrf.mxu3  ;;  %v5189_v14 = vpop.f32.mrf.mxu1  ;;  %v9359_v59 = vld [vmem:[%s15052_s1 + $0x274] sm:$0xf0] }
 0x195   :  { %5452 = vmatpush.bf16.msra.mxu2 %v6247_v51  ;;  %v9371_v51 = vld [vmem:[%s15052_s1 + $0x2d4] sm:$0xf0]  ;;  %v6166_v23 = vld [vmem:[%s15052_s1 + $0x28] sm:$0xf] }
 0x196   :  { %5465 = vmatpush.bf16.msra.mxu3 %v6375_v46  ;;  %v5200_v46 = vpop.f32.mrf.mxu2  ;;  %v6503_v58 = vor.u32 %v9371_v51, %v6502_v50  ;;  %v6294_v30 = vld [vmem:[%s15052_s1 + $0x128] sm:$0xf]  ;;  %v9471_v5 = vld [vmem:[%s15052_s1 + $0x5f4] sm:$0xf0] }
 0x197   :  { %5431 = vmatpush.bf16.msra.mxu0 %v9107_v55  ;;  %v5201_v55 = vadd.f32 %v5200_v46, %v5188_v39  ;;  %v10066_v39 = vld [vmem:[#allocation1] sm:$0xff]  ;;  %v6295_v50 = vor.u32 %v9319_v35, %v6294_v30  ;;  %v6582_v60 = vld [vmem:[%s15052_s1 + $0x368] sm:$0xf]  ;;  %v9435_v30 = vld [vmem:[%s15052_s1 + $0x4d4] sm:$0xf0] }
 0x198   :  { %5444 = vmatpush.bf16.msra.mxu1 %v9235_v3  ;;  %v6631_v3 = vor.u32 %v9403_v53, %v6630_v52  ;;  %v9283_v52 = vld [vmem:[%s15052_s1 + $0x14] sm:$0xf0]  ;;  %v6278_v53 = vld [vmem:[%s15052_s1 + $0x108] sm:$0xf] }
 0x199   :  { %5453 = vmatpush.bf16.msra.mxu2 %v6231_v4  ;;  %v9323_v4 = vld [vmem:[%s15052_s1 + $0x154] sm:$0xf0]  ;;  %v5214_v11 = vadd.f32 %v5213_v63, %v5201_v55  ;;  %v6774_v55 = vld [vmem:[%s15052_s1 + $0x4e8] sm:$0xf] }
 0x19a   :  { %5466 = vmatpush.bf16.msra.mxu3 %v6359_v10  ;;  %v9399_v10 = vld [vmem:[%s15052_s1 + $0x3b4] sm:$0xf0]  ;;  %v6311_v44 = vor.u32 %v9323_v4, %v6310_v62  ;;  %v6902_v4 = vld [vmem:[%s15052_s1 + $0x5e8] sm:$0xf] }
 0x19b   :  { %5432 = vmatpush.bf16.msra.mxu0 %v9091_v24  ;;  %v9287_v24 = vld [vmem:[%s15052_s1 + $0x34] sm:$0xf0]  ;;  %v6615_v34 = vor.u32 %v9399_v10, %v6614_v8  ;;  %v6438_v14 = vld [vmem:[%s15052_s1 + $0x248] sm:$0xf] }
 0x19c   :  { %5445 = vmatpush.bf16.msra.mxu1 %v9219_v36  ;;  %v6470_v36 = vld [vmem:[%s15052_s1 + $0x288] sm:$0xf]  ;;  %v6167_v47 = vor.u32 %v9287_v24, %v6166_v23  ;;  %v5215_v46 = vpop.f32.mrf.mxu3  ;;  %v9391_v62 = vld [vmem:[%s15052_s1 + $0x374] sm:$0xf0] }
 0x19d   :  { %5454 = vmatpush.bf16.msra.mxu2 %v6215_v38  ;;  %v9363_v38 = vld [vmem:[%s15052_s1 + $0x294] sm:$0xf0]  ;;  %v6583_v10 = vor.u32 %v9391_v62, %v6582_v60  ;;  %v6758_v24 = vld [vmem:[%s15052_s1 + $0x4c8] sm:$0xf] }
 0x19e   :  { %5467 = vmatpush.bf16.msra.mxu3 %v6343_v29  ;;  %5433 = vmatmul.bf16.vlgmr.msra.gmra.mxu0 %v11196_v42  ;;  %v5226_v29 = vpop.f32.mrf.mxu0  ;;  %v5202_v56 = vpop.f32.mrf.mxu2  ;;  %v6471_v51 = vor.u32 %v9363_v38, %v6470_v36  ;;  %v9439_v63 = vld [vmem:[%s15052_s1 + $0x4f4] sm:$0xf0]  ;;  %v6886_v35 = vld [vmem:[%s15052_s1 + $0x5c8] sm:$0xf] }
 0x19f   :  { %5477 = vmatpush.bf16.msrb.mxu0 %v6519_v45  ;;  %9277 = vmatmul.msk.bf16.vlgmr.msra.gmra.mxu1 %vm4798_vm0, %v10066_v39  ;;  %v6598_v45 = vld [vmem:[%s15052_s1 + $0x388] sm:$0xf]  ;;  %v12722_v48 = vadd.f32 %v5226_v29, %v5214_v11  ;;  %v6775_v11 = vor.u32 %v9439_v63, %v6774_v55  ;;  %v9387_v23 = vld [vmem:[%s15052_s1 + $0x354] sm:$0xf0]  ;;  %v6759_v29 = vor.u32 %v9435_v30, %v6758_v24 }
 0x1a0   :  { %5490 = vmatpush.bf16.msrb.mxu1 %v6647_v49  ;;  %v6150_v49 = vld [vmem:[%s15052_s1 + $0x8] sm:$0xf]  ;;  %v9467_v36 = vld [vmem:[%s15052_s1 + $0x5d4] sm:$0xf0] }
 0x1a1   :  { %5455 = vmatpush.bf16.msra.mxu2 %v6199_v54  ;;  %v9315_v54 = vld [vmem:[%s15052_s1 + $0x114] sm:$0xf0]  ;;  %v6406_v46 = vld [vmem:[%s15052_s1 + $0x208] sm:$0xf] }
 0x1a2   :  { %5468 = vmatpush.bf16.msra.mxu3 %v6327_v57  ;;  %v6599_v57 = vor.u32 %v9395_v43, %v6598_v45  ;;  %v6279_v6 = vor.u32 %v9315_v54, %v6278_v53  ;;  %v6422_v45 = vld [vmem:[%s15052_s1 + $0x228] sm:$0xf]  ;;  %v9351_v43 = vld [vmem:[%s15052_s1 + $0x234] sm:$0xf0] }
 0x1a3   :  { %5478 = vmatpush.bf16.msrb.mxu0 %v6503_v58  ;;  %v6454_v58 = vld [vmem:[%s15052_s1 + $0x268] sm:$0xf]  ;;  %v9383_v56 = vld [vmem:[%s15052_s1 + $0x334] sm:$0xf0]  ;;  %v6423_v54 = vor.u32 %v9351_v43, %v6422_v45 }
 0x1a4   :  { %5491 = vmatpush.bf16.msrb.mxu1 %v6631_v3  ;;  %v6151_v3 = vor.u32 %v9283_v52, %v6150_v49  ;;  %v6455_v8 = vor.u32 %v9359_v59, %v6454_v58  ;;  %v6887_v49 = vor.u32 %v9467_v36, %v6886_v35  ;;  %v6870_v52 = vld [vmem:[%s15052_s1 + $0x5a8] sm:$0xf]  ;;  %v9463_v53 = vld [vmem:[%s15052_s1 + $0x5b4] sm:$0xf0] }
 0x1a5   :  { %5456 = vmatpush.bf16.msra.mxu2 %v6183_v15  ;;  %v9355_v15 = vld [vmem:[%s15052_s1 + $0x254] sm:$0xf0]  ;;  %v6534_v60 = vld [vmem:[%s15052_s1 + $0x308] sm:$0xf]  ;;  %v6871_v55 = vor.u32 %v9463_v53, %v6870_v52 }
 0x1a6   :  { %5469 = vmatpush.bf16.msra.mxu3 %v6311_v44  ;;  %v6566_v44 = vld [vmem:[%s15052_s1 + $0x348] sm:$0xf]  ;;  %v6439_v38 = vor.u32 %v9355_v15, %v6438_v14  ;;  %v9347_v59 = vld [vmem:[%s15052_s1 + $0x214] sm:$0xf0] }
 0x1a7   :  { %5479 = vmatpush.bf16.msrb.mxu0 %v6487_v19  ;;  %v6903_v19 = vor.u32 %v9471_v5, %v6902_v4  ;;  %v6567_v39 = vor.u32 %v9387_v23, %v6566_v44  ;;  %v9379_v62 = vld [vmem:[%s15052_s1 + $0x314] sm:$0xf0]  ;;  %v6726_v63 = vld [vmem:[%s15052_s1 + $0x488] sm:$0xf]  ;;  %v6407_v14 = vor.u32 %v9347_v59, %v6406_v46 }
 0x1a8   :  { %5492 = vmatpush.bf16.msrb.mxu1 %v6615_v34  ;;  %v5228_v34 = vpop.f32.mrf.mxu0  ;;  %v6854_v4 = vld [vmem:[%s15052_s1 + $0x588] sm:$0xf]  ;;  %v9535_v44 = vld [vmem:[%s15052_s1 + $0x7f4] sm:$0xf0] }
 0x1a9   :  { %5457 = vmatpush.bf16.msra.mxu2 %v6167_v47  ;;  %v6550_v47 = vld [vmem:[%s15052_s1 + $0x328] sm:$0xf]  ;;  %v9423_v34 = vld [vmem:[%s15052_s1 + $0x474] sm:$0xf0] }
 0x1aa   :  { %5470 = vmatpush.bf16.msra.mxu3 %v6295_v50  ;;  %v6742_v50 = vld [vmem:[%s15052_s1 + $0x4a8] sm:$0xf]  ;;  %v9531_v43 = vld [vmem:[%s15052_s1 + $0x7d4] sm:$0xf0] }
 0x1ab   :  { %5480 = vmatpush.bf16.msrb.mxu0 %v6471_v51  ;;  %v9431_v51 = vld [vmem:[%s15052_s1 + $0x4b4] sm:$0xf0]  ;;  %v7158_v15 = vld [vmem:[%s15052_s1 + $0x7e8] sm:$0xf] }
 0x1ac   :  { %5493 = vmatpush.bf16.msrb.mxu1 %v6599_v57  ;;  %v6551_v57 = vor.u32 %v9383_v56, %v6550_v47  ;;  %v6743_v58 = vor.u32 %v9431_v51, %v6742_v50  ;;  %v5239_v5 = vpop.f32.mrf.mxu1  ;;  %v6838_v35 = vld [vmem:[%s15052_s1 + $0x568] sm:$0xf]  ;;  %v7159_v36 = vor.u32 %v9535_v44, %v7158_v15  ;;  %v9419_v53 = vld [vmem:[%s15052_s1 + $0x454] sm:$0xf0] }
 0x1ad   :  { %5458 = vmatpush.bf16.msra.mxu2 %v6151_v3  ;;  %v9427_v3 = vld [vmem:[%s15052_s1 + $0x494] sm:$0xf0]  ;;  %v7142_v45 = vld [vmem:[%s15052_s1 + $0x7c8] sm:$0xf] }
 0x1ae   :  { %5471 = vmatpush.bf16.msra.mxu3 %v6279_v6  ;;  %v9459_v6 = vld [vmem:[%s15052_s1 + $0x594] sm:$0xf0]  ;;  %v6727_v23 = vor.u32 %v9427_v3, %v6726_v63  ;;  %v6694_v52 = vld [vmem:[%s15052_s1 + $0x448] sm:$0xf] }
 0x1af   :  { %5481 = vmatpush.bf16.msrb.mxu0 %v6455_v8  ;;  %v7030_v8 = vld [vmem:[%s15052_s1 + $0x6e8] sm:$0xf]  ;;  %v6855_v24 = vor.u32 %v9459_v6, %v6854_v4  ;;  %v9527_v63 = vld [vmem:[%s15052_s1 + $0x7b4] sm:$0xf0]  ;;  %v6695_v4 = vor.u32 %v9419_v53, %v6694_v52 }
 0x1b0   :  { %5494 = vmatpush.bf16.msrb.mxu1 %v6583_v10  ;;  %5459 = vmatmul.bf16.vlgmr.msra.gmra.mxu2 %v10407_v21  ;;  %v9503_v10 = vld [vmem:[%s15052_s1 + $0x6f4] sm:$0xf0]  ;;  %v6998_v59 = vld [vmem:[%s15052_s1 + $0x6a8] sm:$0xf] }
 0x1b1   :  { %5503 = vmatpush.bf16.msrb.mxu2 %v6775_v11  ;;  %5472 = vmatmul.bf16.vlgmr.msra.gmra.mxu3 %v10418_v26  ;;  %v5240_v11 = vadd.f32 %v5239_v5, %v12722_v48  ;;  %v7031_v30 = vor.u32 %v9503_v10, %v7030_v8  ;;  %v6710_v48 = vld [vmem:[%s15052_s1 + $0x468] sm:$0xf]  ;;  %v9415_v10 = vld [vmem:[%s15052_s1 + $0x434] sm:$0xf0] }
 0x1b2   :  { %5516 = vmatpush.bf16.msrb.mxu3 %v6903_v19  ;;  %v6535_v19 = vor.u32 %v9379_v62, %v6534_v60  ;;  %v6711_v47 = vor.u32 %v9423_v34, %v6710_v48  ;;  %v9495_v60 = vld [vmem:[%s15052_s1 + $0x6b4] sm:$0xf0]  ;;  %v6678_v8 = vld [vmem:[%s15052_s1 + $0x428] sm:$0xf] }
 0x1b3   :  { %5482 = vmatpush.bf16.msrb.mxu0 %v6439_v38  ;;  %v9455_v38 = vld [vmem:[%s15052_s1 + $0x574] sm:$0xf0]  ;;  %v5252_v56 = vpop.f32.mrf.mxu2  ;;  %v6999_v6 = vor.u32 %v9495_v60, %v6998_v59  ;;  %v6982_v44 = vld [vmem:[%s15052_s1 + $0x688] sm:$0xf]  ;;  %v6679_v34 = vor.u32 %v9415_v10, %v6678_v8 }
 0x1b4   :  { %5495 = vmatpush.bf16.msrb.mxu1 %v6567_v39  ;;  %v7014_v39 = vld [vmem:[%s15052_s1 + $0x6c8] sm:$0xf]  ;;  %v5265_v51 = vpop.f32.mrf.mxu3  ;;  %v5253_v46 = vadd.f32 %v5252_v56, %v5240_v11  ;;  %v5241_v62 = vpop.f32.mrf.mxu1  ;;  %v9447_v15 = vld [vmem:[%s15052_s1 + $0x534] sm:$0xf0] }
 0x1b5   :  { %5504 = vmatpush.bf16.msrb.mxu2 %v6759_v29  ;;  %v9499_v29 = vld [vmem:[%s15052_s1 + $0x6d4] sm:$0xf0]  ;;  %v6806_v11 = vld [vmem:[%s15052_s1 + $0x528] sm:$0xf] }
 0x1b6   :  { %5517 = vmatpush.bf16.msrb.mxu3 %v6887_v49  ;;  %v6839_v49 = vor.u32 %v9455_v38, %v6838_v35  ;;  %v7015_v50 = vor.u32 %v9499_v29, %v7014_v39  ;;  %v5266_v3 = vadd.f32 %v5265_v51, %v5253_v46  ;;  %v6662_v35 = vld [vmem:[%s15052_s1 + $0x408] sm:$0xf]  ;;  %v9411_v39 = vld [vmem:[%s15052_s1 + $0x414] sm:$0xf0] }
 0x1b7   :  { %5483 = vmatpush.bf16.msrb.mxu0 %v6423_v54  ;;  %v6822_v54 = vld [vmem:[%s15052_s1 + $0x548] sm:$0xf]  ;;  %v9519_v52 = vld [vmem:[%s15052_s1 + $0x774] sm:$0xf0]  ;;  %v6663_v46 = vor.u32 %v9411_v39, %v6662_v35 }
 0x1b8   :  { %5496 = vmatpush.bf16.msrb.mxu1 %v6551_v57  ;;  %v7143_v57 = vor.u32 %v9531_v43, %v7142_v45  ;;  %v6790_v29 = vld [vmem:[%s15052_s1 + $0x508] sm:$0xf]  ;;  %v9443_v45 = vld [vmem:[%s15052_s1 + $0x514] sm:$0xf0] }
 0x1b9   :  { %5505 = vmatpush.bf16.msrb.mxu2 %v6743_v58  ;;  %v9451_v58 = vld [vmem:[%s15052_s1 + $0x554] sm:$0xf0]  ;;  %v6966_v56 = vld [vmem:[%s15052_s1 + $0x668] sm:$0xf]  ;;  %v6791_v59 = vor.u32 %v9443_v45, %v6790_v29 }
 0x1ba   :  { %5518 = vmatpush.bf16.msrb.mxu3 %v6871_v55  ;;  %v7126_v55 = vld [vmem:[%s15052_s1 + $0x7a8] sm:$0xf]  ;;  %v6823_v5 = vor.u32 %v9451_v58, %v6822_v54  ;;  %v9567_v54 = vld [vmem:[%s15052_s1 + $0x8f4] sm:$0xf0] }
 0x1bb   :  { %5484 = vmatpush.bf16.msrb.mxu0 %v6407_v14  ;;  %v7127_v14 = vor.u32 %v9527_v63, %v7126_v55  ;;  %v5254_v43 = vpop.f32.mrf.mxu2  ;;  %v7094_v51 = vld [vmem:[%s15052_s1 + $0x768] sm:$0xf]  ;;  %v9599_v58 = vld [vmem:[%s15052_s1 + $0x9f4] sm:$0xf0] }
 0x1bc   :  { %5497 = vmatpush.bf16.msrb.mxu1 %v6535_v19  ;;  %v9491_v19 = vld [vmem:[%s15052_s1 + $0x694] sm:$0xf0]  ;;  %v7286_v53 = vld [vmem:[%s15052_s1 + $0x8e8] sm:$0xf]  ;;  %v7095_v62 = vor.u32 %v9519_v52, %v7094_v51 }
 0x1bd   :  { %5506 = vmatpush.bf16.msrb.mxu2 %v6727_v23  ;;  %v5278_v23 = vpop.f32.mrf.mxu0  ;;  %v6983_v38 = vor.u32 %v9491_v19, %v6982_v44  ;;  %v7287_v55 = vor.u32 %v9567_v54, %v7286_v53  ;;  %v6950_v63 = vld [vmem:[%s15052_s1 + $0x648] sm:$0xf]  ;;  %v9563_v10 = vld [vmem:[%s15052_s1 + $0x8d4] sm:$0xf0] }
 0x1be   :  { %5519 = vmatpush.bf16.msrb.mxu3 %v6855_v24  ;;  %5485 = vmatmul.bf16.vlgmr.msrb.gmra.mxu0 %v10405_v20  ;;  %v7110_v24 = vld [vmem:[%s15052_s1 + $0x788] sm:$0xf]  ;;  %v12921_v48 = vadd.f32 %v5278_v23, %v5266_v3  ;;  %v9483_v3 = vld [vmem:[%s15052_s1 + $0x654] sm:$0xf0] }
 0x1bf   :  { %5529 = vmatpush.bf16.msra.mxu0 %v7031_v30  ;;  %5498 = vmatmul.bf16.vlgmr.msrb.gmra.mxu1 %v10409_v22  ;;  %v9523_v30 = vld [vmem:[%s15052_s1 + $0x794] sm:$0xf0]  ;;  %v7270_v8 = vld [vmem:[%s15052_s1 + $0x8c8] sm:$0xf]  ;;  %v6951_v44 = vor.u32 %v9483_v3, %v6950_v63 }
 0x1c0   :  { %5542 = vmatpush.bf16.msra.mxu1 %v7159_v36  ;;  %v6807_v36 = vor.u32 %v9447_v15, %v6806_v11  ;;  %v9595_v15 = vld [vmem:[%s15052_s1 + $0x9d4] sm:$0xf0]  ;;  %v7271_v23 = vor.u32 %v9563_v10, %v7270_v8  ;;  %v7382_v29 = vld [vmem:[%s15052_s1 + $0x9a8] sm:$0xf] }
 0x1c1   :  { %5507 = vmatpush.bf16.msrb.mxu2 %v6711_v47  ;;  %v5267_v47 = vpop.f32.mrf.mxu3  ;;  %v9559_v39 = vld [vmem:[%s15052_s1 + $0x8b4] sm:$0xf0]  ;;  %v7046_v51 = vld [vmem:[%s15052_s1 + $0x708] sm:$0xf] }
 0x1c2   :  { %5520 = vmatpush.bf16.msrb.mxu3 %v6839_v49  ;;  %v7111_v49 = vor.u32 %v9523_v30, %v7110_v24  ;;  %v6934_v24 = vld [vmem:[%s15052_s1 + $0x628] sm:$0xf]  ;;  %v9479_v30 = vld [vmem:[%s15052_s1 + $0x634] sm:$0xf0] }
 0x1c3   :  { %5530 = vmatpush.bf16.msra.mxu0 %v7015_v50  ;;  %v9487_v50 = vld [vmem:[%s15052_s1 + $0x674] sm:$0xf0]  ;;  %v6935_v43 = vor.u32 %v9479_v30, %v6934_v24  ;;  %v6918_v47 = vld [vmem:[%s15052_s1 + $0x608] sm:$0xf] }
 0x1c4   :  { %5543 = vmatpush.bf16.msra.mxu1 %v7143_v57  ;;  %v7414_v57 = vld [vmem:[%s15052_s1 + $0x9e8] sm:$0xf]  ;;  %v6967_v60 = vor.u32 %v9487_v50, %v6966_v56  ;;  %v9591_v45 = vld [vmem:[%s15052_s1 + $0x9b4] sm:$0xf0] }
 0x1c5   :  { %5508 = vmatpush.bf16.msrb.mxu2 %v6695_v4  ;;  %v7078_v4 = vld [vmem:[%s15052_s1 + $0x748] sm:$0xf]  ;;  %v5280_v11 = vpop.f32.mrf.mxu0  ;;  %v9475_v50 = vld [vmem:[%s15052_s1 + $0x614] sm:$0xf0]  ;;  %v7383_v53 = vor.u32 %v9591_v45, %v7382_v29 }
 0x1c6   :  { %5521 = vmatpush.bf16.msrb.mxu3 %v6823_v5  ;;  %v7415_v5 = vor.u32 %v9599_v58, %v7414_v57  ;;  %v9507_v52 = vld [vmem:[%s15052_s1 + $0x714] sm:$0xf0]  ;;  %v7238_v54 = vld [vmem:[%s15052_s1 + $0x888] sm:$0xf]  ;;  %v6919_v63 = vor.u32 %v9475_v50, %v6918_v47 }
 0x1c7   :  { %5531 = vmatpush.bf16.msra.mxu0 %v6999_v6  ;;  %v9515_v6 = vld [vmem:[%s15052_s1 + $0x754] sm:$0xf0]  ;;  %v7366_v57 = vld [vmem:[%s15052_s1 + $0x988] sm:$0xf] }
 0x1c8   :  { %5544 = vmatpush.bf16.msra.mxu1 %v7127_v14  ;;  %v7398_v14 = vld [vmem:[%s15052_s1 + $0x9c8] sm:$0xf]  ;;  %v7079_v19 = vor.u32 %v9515_v6, %v7078_v4  ;;  %v9663_v4 = vld [vmem:[%s15052_s1 + $0xbf4] sm:$0xf0] }
 0x1c9   :  { %5509 = vmatpush.bf16.msrb.mxu2 %v6679_v34  ;;  %v7062_v34 = vld [vmem:[%s15052_s1 + $0x728] sm:$0xf]  ;;  %v7399_v35 = vor.u32 %v9595_v15, %v7398_v14  ;;  %v9551_v11 = vld [vmem:[%s15052_s1 + $0x874] sm:$0xf0] }
 0x1ca   :  { %5522 = vmatpush.bf16.msrb.mxu3 %v6807_v36  ;;  %v9511_v36 = vld [vmem:[%s15052_s1 + $0x734] sm:$0xf0]  ;;  %v7670_v3 = vld [vmem:[%s15052_s1 + $0xbe8] sm:$0xf] }
 0x1cb   :  { %5532 = vmatpush.bf16.msra.mxu0 %v6983_v38  ;;  %v7254_v38 = vld [vmem:[%s15052_s1 + $0x8a8] sm:$0xf]  ;;  %v7671_v15 = vor.u32 %v9663_v4, %v7670_v3  ;;  %v9659_v30 = vld [vmem:[%s15052_s1 + $0xbd4] sm:$0xf0] }
 0x1cc   :  { %5545 = vmatpush.bf16.msra.mxu1 %v7111_v49  ;;  %v7063_v49 = vor.u32 %v9511_v36, %v7062_v34  ;;  %v7255_v56 = vor.u32 %v9559_v39, %v7254_v38  ;;  %v5291_v58 = vpop.f32.mrf.mxu1  ;;  %v7350_v14 = vld [vmem:[%s15052_s1 + $0x968] sm:$0xf]  ;;  %v9547_v45 = vld [vmem:[%s15052_s1 + $0x854] sm:$0xf0] }
 0x1cd   :  { %5510 = vmatpush.bf16.msrb.mxu2 %v6663_v46  ;;  %v9555_v46 = vld [vmem:[%s15052_s1 + $0x894] sm:$0xf0]  ;;  %v7654_v24 = vld [vmem:[%s15052_s1 + $0xbc8] sm:$0xf] }
 0x1ce   :  { %5523 = vmatpush.bf16.msrb.mxu3 %v6791_v59  ;;  %v9587_v59 = vld [vmem:[%s15052_s1 + $0x994] sm:$0xf0]  ;;  %v7239_v6 = vor.u32 %v9555_v46, %v7238_v54  ;;  %v7206_v29 = vld [vmem:[%s15052_s1 + $0x848] sm:$0xf] }
 0x1cf   :  { %5533 = vmatpush.bf16.msra.mxu0 %v6967_v60  ;;  %v7542_v60 = vld [vmem:[%s15052_s1 + $0xae8] sm:$0xf]  ;;  %v7367_v8 = vor.u32 %v9587_v59, %v7366_v57  ;;  %v9655_v54 = vld [vmem:[%s15052_s1 + $0xbb4] sm:$0xf0]  ;;  %v7207_v57 = vor.u32 %v9547_v45, %v7206_v29 }
 0x1d0   :  { %5546 = vmatpush.bf16.msra.mxu1 %v7095_v62  ;;  %5511 = vmatmul.bf16.vlgmr.msrb.gmra.mxu2 %v10500_v0  ;;  %v9631_v62 = vld [vmem:[%s15052_s1 + $0xaf4] sm:$0xf0]  ;;  %v7510_v50 = vld [vmem:[%s15052_s1 + $0xaa8] sm:$0xf] }
 0x1d1   :  { %5555 = vmatpush.bf16.msra.mxu2 %v7287_v55  ;;  %5524 = vmatmul.bf16.vlgmr.msrb.gmra.mxu3 %v10504_v2  ;;  %v5292_v55 = vadd.f32 %v5291_v58, %v12921_v48  ;;  %v7543_v10 = vor.u32 %v9631_v62, %v7542_v60  ;;  %v7222_v48 = vld [vmem:[%s15052_s1 + $0x868] sm:$0xf]  ;;  %v9543_v62 = vld [vmem:[%s15052_s1 + $0x834] sm:$0xf0] }
 0x1d2   :  { %5568 = vmatpush.bf16.msra.mxu3 %v7415_v5  ;;  %v7047_v5 = vor.u32 %v9507_v52, %v7046_v51  ;;  %v7223_v34 = vor.u32 %v9551_v11, %v7222_v48  ;;  %v9623_v51 = vld [vmem:[%s15052_s1 + $0xab4] sm:$0xf0]  ;;  %v7190_v60 = vld [vmem:[%s15052_s1 + $0x828] sm:$0xf] }
 0x1d3   :  { %5534 = vmatpush.bf16.msra.mxu0 %v6951_v44  ;;  %v9583_v44 = vld [vmem:[%s15052_s1 + $0x974] sm:$0xf0]  ;;  %v5304_v36 = vpop.f32.mrf.mxu2  ;;  %v7511_v59 = vor.u32 %v9623_v51, %v7510_v50  ;;  %v7494_v4 = vld [vmem:[%s15052_s1 + $0xa88] sm:$0xf]  ;;  %v7191_v11 = vor.u32 %v9543_v62, %v7190_v60 }
 0x1d4   :  { %5547 = vmatpush.bf16.msra.mxu1 %v7079_v19  ;;  %v7526_v19 = vld [vmem:[%s15052_s1 + $0xac8] sm:$0xf]  ;;  %v5317_v39 = vpop.f32.mrf.mxu3  ;;  %v5305_v47 = vadd.f32 %v5304_v36, %v5292_v55  ;;  %v5293_v52 = vpop.f32.mrf.mxu1  ;;  %v9575_v3 = vld [vmem:[%s15052_s1 + $0x934] sm:$0xf0] }
 0x1d5   :  { %5556 = vmatpush.bf16.msra.mxu2 %v7271_v23  ;;  %v9627_v23 = vld [vmem:[%s15052_s1 + $0xad4] sm:$0xf0]  ;;  %v7318_v55 = vld [vmem:[%s15052_s1 + $0x928] sm:$0xf] }
 0x1d6   :  { %5569 = vmatpush.bf16.msra.mxu3 %v7399_v35  ;;  %v7351_v35 = vor.u32 %v9583_v44, %v7350_v14  ;;  %v7527_v38 = vor.u32 %v9627_v23, %v7526_v19  ;;  %v5318_v46 = vadd.f32 %v5317_v39, %v5305_v47  ;;  %v7174_v14 = vld [vmem:[%s15052_s1 + $0x808] sm:$0xf]  ;;  %v9539_v19 = vld [vmem:[%s15052_s1 + $0x814] sm:$0xf0] }
 0x1d7   :  { %5535 = vmatpush.bf16.msra.mxu0 %v6935_v43  ;;  %v7334_v43 = vld [vmem:[%s15052_s1 + $0x948] sm:$0xf]  ;;  %v9647_v29 = vld [vmem:[%s15052_s1 + $0xb74] sm:$0xf0]  ;;  %v7175_v47 = vor.u32 %v9539_v19, %v7174_v14 }
 0x1d8   :  { %5548 = vmatpush.bf16.msra.mxu1 %v7063_v49  ;;  %v7655_v49 = vor.u32 %v9659_v30, %v7654_v24  ;;  %v7302_v23 = vld [vmem:[%s15052_s1 + $0x908] sm:$0xf]  ;;  %v9571_v24 = vld [vmem:[%s15052_s1 + $0x914] sm:$0xf0] }
 0x1d9   :  { %5557 = vmatpush.bf16.msra.mxu2 %v7255_v56  ;;  %v9579_v56 = vld [vmem:[%s15052_s1 + $0x954] sm:$0xf0]  ;;  %v7478_v36 = vld [vmem:[%s15052_s1 + $0xa68] sm:$0xf]  ;;  %v7303_v50 = vor.u32 %v9571_v24, %v7302_v23 }
 0x1da   :  { %5570 = vmatpush.bf16.msra.mxu3 %v7383_v53  ;;  %v7638_v53 = vld [vmem:[%s15052_s1 + $0xba8] sm:$0xf]  ;;  %v7335_v58 = vor.u32 %v9579_v56, %v7334_v43  ;;  %v9695_v43 = vld [vmem:[%s15052_s1 + $0xcf4] sm:$0xf0] }
 0x1db   :  { %5536 = vmatpush.bf16.msra.mxu0 %v6919_v63  ;;  %v7639_v63 = vor.u32 %v9655_v54, %v7638_v53  ;;  %v5306_v30 = vpop.f32.mrf.mxu2  ;;  %v7606_v39 = vld [vmem:[%s15052_s1 + $0xb68] sm:$0xf]  ;;  %v9727_v56 = vld [vmem:[%s15052_s1 + $0xdf4] sm:$0xf0] }
 0x1dc   :  { %5549 = vmatpush.bf16.msra.mxu1 %v7047_v5  ;;  %v9619_v5 = vld [vmem:[%s15052_s1 + $0xa94] sm:$0xf0]  ;;  %v7798_v45 = vld [vmem:[%s15052_s1 + $0xce8] sm:$0xf]  ;;  %v7607_v52 = vor.u32 %v9647_v29, %v7606_v39 }
 0x1dd   :  { %5558 = vmatpush.bf16.msra.mxu2 %v7239_v6  ;;  %v5330_v6 = vpop.f32.mrf.mxu0  ;;  %v7495_v44 = vor.u32 %v9619_v5, %v7494_v4  ;;  %v7799_v53 = vor.u32 %v9695_v43, %v7798_v45  ;;  %v7462_v54 = vld [vmem:[%s15052_s1 + $0xa48] sm:$0xf]  ;;  %v9691_v62 = vld [vmem:[%s15052_s1 + $0xcd4] sm:$0xf0] }
 0x1de   :  { %5571 = vmatpush.bf16.msra.mxu3 %v7367_v8  ;;  %5537 = vmatmul.bf16.vlgmr.msra.gmra.mxu0 %v10498_v61  ;;  %v7622_v8 = vld [vmem:[%s15052_s1 + $0xb88] sm:$0xf]  ;;  %v13120_v48 = vadd.f32 %v5330_v6, %v5318_v46  ;;  %v9611_v46 = vld [vmem:[%s15052_s1 + $0xa54] sm:$0xf0] }
 0x1df   :  { %5581 = vmatpush.bf16.msrb.mxu0 %v7543_v10  ;;  %5550 = vmatmul.bf16.vlgmr.msra.gmra.mxu1 %v10502_v1  ;;  %v9651_v10 = vld [vmem:[%s15052_s1 + $0xb94] sm:$0xf0]  ;;  %v7782_v60 = vld [vmem:[%s15052_s1 + $0xcc8] sm:$0xf]  ;;  %v7463_v4 = vor.u32 %v9611_v46, %v7462_v54 }
 0x1e0   :  { %5594 = vmatpush.bf16.msrb.mxu1 %v7671_v15  ;;  %v7319_v15 = vor.u32 %v9575_v3, %v7318_v55  ;;  %v9723_v3 = vld [vmem:[%s15052_s1 + $0xdd4] sm:$0xf0]  ;;  %v7783_v6 = vor.u32 %v9691_v62, %v7782_v60  ;;  %v7894_v23 = vld [vmem:[%s15052_s1 + $0xda8] sm:$0xf] }
 0x1e1   :  { %5559 = vmatpush.bf16.msra.mxu2 %v7223_v34  ;;  %v5319_v34 = vpop.f32.mrf.mxu3  ;;  %v9687_v19 = vld [vmem:[%s15052_s1 + $0xcb4] sm:$0xf0]  ;;  %v7558_v39 = vld [vmem:[%s15052_s1 + $0xb08] sm:$0xf] }
 0x1e2   :  { %5572 = vmatpush.bf16.msra.mxu3 %v7351_v35  ;;  %v7623_v35 = vor.u32 %v9651_v10, %v7622_v8  ;;  %v7446_v8 = vld [vmem:[%s15052_s1 + $0xa28] sm:$0xf]  ;;  %v9607_v10 = vld [vmem:[%s15052_s1 + $0xa34] sm:$0xf0] }
 0x1e3   :  { %5582 = vmatpush.bf16.msrb.mxu0 %v7527_v38  ;;  %v9615_v38 = vld [vmem:[%s15052_s1 + $0xa74] sm:$0xf0]  ;;  %v7447_v30 = vor.u32 %v9607_v10, %v7446_v8  ;;  %v7430_v34 = vld [vmem:[%s15052_s1 + $0xa08] sm:$0xf] }
 0x1e4   :  { %5595 = vmatpush.bf16.msrb.mxu1 %v7655_v49  ;;  %v7926_v49 = vld [vmem:[%s15052_s1 + $0xde8] sm:$0xf]  ;;  %v7479_v51 = vor.u32 %v9615_v38, %v7478_v36  ;;  %v9719_v24 = vld [vmem:[%s15052_s1 + $0xdb4] sm:$0xf0] }
 0x1e5   :  { %5560 = vmatpush.bf16.msra.mxu2 %v7207_v57  ;;  %v7590_v57 = vld [vmem:[%s15052_s1 + $0xb48] sm:$0xf]  ;;  %v5332_v55 = vpop.f32.mrf.mxu0  ;;  %v9603_v38 = vld [vmem:[%s15052_s1 + $0xa14] sm:$0xf0]  ;;  %v7895_v45 = vor.u32 %v9719_v24, %v7894_v23 }
 0x1e6   :  { %5573 = vmatpush.bf16.msra.mxu3 %v7335_v58  ;;  %v7927_v58 = vor.u32 %v9727_v56, %v7926_v49  ;;  %v9635_v29 = vld [vmem:[%s15052_s1 + $0xb14] sm:$0xf0]  ;;  %v7750_v43 = vld [vmem:[%s15052_s1 + $0xc88] sm:$0xf]  ;;  %v7431_v54 = vor.u32 %v9603_v38, %v7430_v34 }
 0x1e7   :  { %5583 = vmatpush.bf16.msrb.mxu0 %v7511_v59  ;;  %v9643_v59 = vld [vmem:[%s15052_s1 + $0xb54] sm:$0xf0]  ;;  %v7878_v49 = vld [vmem:[%s15052_s1 + $0xd88] sm:$0xf] }
 0x1e8   :  { %5596 = vmatpush.bf16.msrb.mxu1 %v7639_v63  ;;  %v7910_v63 = vld [vmem:[%s15052_s1 + $0xdc8] sm:$0xf]  ;;  %v7591_v5 = vor.u32 %v9643_v59, %v7590_v57  ;;  %v9791_v57 = vld [vmem:[%s15052_s1 + $0xff4] sm:$0xf0] }
 0x1e9   :  { %5561 = vmatpush.bf16.msra.mxu2 %v7191_v11  ;;  %v7574_v11 = vld [vmem:[%s15052_s1 + $0xb28] sm:$0xf]  ;;  %v7911_v14 = vor.u32 %v9723_v3, %v7910_v63  ;;  %v9679_v55 = vld [vmem:[%s15052_s1 + $0xc74] sm:$0xf0] }
 0x1ea   :  { %5574 = vmatpush.bf16.msra.mxu3 %v7319_v15  ;;  %v9639_v15 = vld [vmem:[%s15052_s1 + $0xb34] sm:$0xf0]  ;;  %v8182_v46 = vld [vmem:[%s15052_s1 + $0xfe8] sm:$0xf] }
 0x1eb   :  { %5584 = vmatpush.bf16.msrb.mxu0 %v7495_v44  ;;  %v7766_v44 = vld [vmem:[%s15052_s1 + $0xca8] sm:$0xf]  ;;  %v8183_v3 = vor.u32 %v9791_v57, %v8182_v46  ;;  %v9787_v10 = vld [vmem:[%s15052_s1 + $0xfd4] sm:$0xf0] }
 0x1ec   :  { %5597 = vmatpush.bf16.msrb.mxu1 %v7623_v35  ;;  %v7575_v35 = vor.u32 %v9639_v15, %v7574_v11  ;;  %v7767_v36 = vor.u32 %v9687_v19, %v7766_v44  ;;  %v5343_v56 = vpop.f32.mrf.mxu1  ;;  %v7862_v63 = vld [vmem:[%s15052_s1 + $0xd68] sm:$0xf]  ;;  %v9675_v24 = vld [vmem:[%s15052_s1 + $0xc54] sm:$0xf0] }
 0x1ed   :  { %5562 = vmatpush.bf16.msra.mxu2 %v7175_v47  ;;  %v9683_v47 = vld [vmem:[%s15052_s1 + $0xc94] sm:$0xf0]  ;;  %v8166_v8 = vld [vmem:[%s15052_s1 + $0xfc8] sm:$0xf] }
 0x1ee   :  { %5575 = vmatpush.bf16.msra.mxu3 %v7303_v50  ;;  %v9715_v50 = vld [vmem:[%s15052_s1 + $0xd94] sm:$0xf0]  ;;  %v7751_v59 = vor.u32 %v9683_v47, %v7750_v43  ;;  %v7718_v23 = vld [vmem:[%s15052_s1 + $0xc48] sm:$0xf] }
 0x1ef   :  { %5585 = vmatpush.bf16.msrb.mxu0 %v7479_v51  ;;  %v8054_v51 = vld [vmem:[%s15052_s1 + $0xee8] sm:$0xf]  ;;  %v7879_v60 = vor.u32 %v9715_v50, %v7878_v49  ;;  %v9783_v43 = vld [vmem:[%s15052_s1 + $0xfb4] sm:$0xf0]  ;;  %v7719_v49 = vor.u32 %v9675_v24, %v7718_v23 }
 0x1f0   :  { %5598 = vmatpush.bf16.msrb.mxu1 %v7607_v52  ;;  %5563 = vmatmul.bf16.vlgmr.msra.gmra.mxu2 %v10738_v7  ;;  %v9759_v52 = vld [vmem:[%s15052_s1 + $0xef4] sm:$0xf0]  ;;  %v8022_v38 = vld [vmem:[%s15052_s1 + $0xea8] sm:$0xf] }
 0x1f1   :  { %5607 = vmatpush.bf16.msrb.mxu2 %v7799_v53  ;;  %5576 = vmatmul.bf16.vlgmr.msra.gmra.mxu3 %v10751_v13  ;;  %v5344_v53 = vadd.f32 %v5343_v56, %v13120_v48  ;;  %v8055_v62 = vor.u32 %v9759_v52, %v8054_v51  ;;  %v7734_v48 = vld [vmem:[%s15052_s1 + $0xc68] sm:$0xf]  ;;  %v9671_v52 = vld [vmem:[%s15052_s1 + $0xc34] sm:$0xf0] }
 0x1f2   :  { %5620 = vmatpush.bf16.msrb.mxu3 %v7927_v58  ;;  %v7559_v58 = vor.u32 %v9635_v29, %v7558_v39  ;;  %v7735_v11 = vor.u32 %v9679_v55, %v7734_v48  ;;  %v9751_v39 = vld [vmem:[%s15052_s1 + $0xeb4] sm:$0xf0]  ;;  %v7702_v51 = vld [vmem:[%s15052_s1 + $0xc28] sm:$0xf] }
 0x1f3   :  { %5586 = vmatpush.bf16.msrb.mxu0 %v7463_v4  ;;  %v9711_v4 = vld [vmem:[%s15052_s1 + $0xd74] sm:$0xf0]  ;;  %v5356_v15 = vpop.f32.mrf.mxu2  ;;  %v8023_v50 = vor.u32 %v9751_v39, %v8022_v38  ;;  %v8006_v57 = vld [vmem:[%s15052_s1 + $0xe88] sm:$0xf]  ;;  %v7703_v55 = vor.u32 %v9671_v52, %v7702_v51 }
 0x1f4   :  { %5599 = vmatpush.bf16.msrb.mxu1 %v7591_v5  ;;  %v8038_v5 = vld [vmem:[%s15052_s1 + $0xec8] sm:$0xf]  ;;  %v5369_v19 = vpop.f32.mrf.mxu3  ;;  %v5357_v34 = vadd.f32 %v5356_v15, %v5344_v53  ;;  %v5345_v29 = vpop.f32.mrf.mxu1  ;;  %v9703_v46 = vld [vmem:[%s15052_s1 + $0xd34] sm:$0xf0] }
 0x1f5   :  { %5608 = vmatpush.bf16.msrb.mxu2 %v7783_v6  ;;  %v9755_v6 = vld [vmem:[%s15052_s1 + $0xed4] sm:$0xf0]  ;;  %v7830_v53 = vld [vmem:[%s15052_s1 + $0xd28] sm:$0xf] }
 0x1f6   :  { %5621 = vmatpush.bf16.msrb.mxu3 %v7911_v14  ;;  %v7863_v14 = vor.u32 %v9711_v4, %v7862_v63  ;;  %v8039_v44 = vor.u32 %v9755_v6, %v8038_v5  ;;  %v5370_v47 = vadd.f32 %v5369_v19, %v5357_v34  ;;  %v7686_v63 = vld [vmem:[%s15052_s1 + $0xc08] sm:$0xf]  ;;  %v9667_v5 = vld [vmem:[%s15052_s1 + $0xc14] sm:$0xf0] }
 0x1f7   :  { %5587 = vmatpush.bf16.msrb.mxu0 %v7447_v30  ;;  %v7846_v30 = vld [vmem:[%s15052_s1 + $0xd48] sm:$0xf]  ;;  %v9775_v23 = vld [vmem:[%s15052_s1 + $0xf74] sm:$0xf0]  ;;  %v7687_v34 = vor.u32 %v9667_v5, %v7686_v63 }
 0x1f8   :  { %5600 = vmatpush.bf16.msrb.mxu1 %v7575_v35  ;;  %v8167_v35 = vor.u32 %v9787_v10, %v8166_v8  ;;  %v7814_v6 = vld [vmem:[%s15052_s1 + $0xd08] sm:$0xf]  ;;  %v9699_v8 = vld [vmem:[%s15052_s1 + $0xd14] sm:$0xf0] }
 0x1f9   :  { %5609 = vmatpush.bf16.msrb.mxu2 %v7767_v36  ;;  %v9707_v36 = vld [vmem:[%s15052_s1 + $0xd54] sm:$0xf0]  ;;  %v7990_v15 = vld [vmem:[%s15052_s1 + $0xe68] sm:$0xf]  ;;  %v7815_v38 = vor.u32 %v9699_v8, %v7814_v6 }
 0x1fa   :  { %5622 = vmatpush.bf16.msrb.mxu3 %v7895_v45  ;;  %v8150_v45 = vld [vmem:[%s15052_s1 + $0xfa8] sm:$0xf]  ;;  %v7847_v56 = vor.u32 %v9707_v36, %v7846_v30  ;;  %v9823_v30 = vld [vmem:[%s15052_s1 + $0x10f4] sm:$0xf0] }
 0x1fb   :  { %5588 = vmatpush.bf16.msrb.mxu0 %v7431_v54  ;;  %v8151_v54 = vor.u32 %v9783_v43, %v8150_v45  ;;  %v5358_v10 = vpop.f32.mrf.mxu2  ;;  %v8118_v19 = vld [vmem:[%s15052_s1 + $0xf68] sm:$0xf]  ;;  %v9855_v36 = vld [vmem:[%s15052_s1 + $0x11f4] sm:$0xf0] }
 0x1fc   :  { %5601 = vmatpush.bf16.msrb.mxu1 %v7559_v58  ;;  %v9747_v58 = vld [vmem:[%s15052_s1 + $0xe94] sm:$0xf0]  ;;  %v8310_v24 = vld [vmem:[%s15052_s1 + $0x10e8] sm:$0xf]  ;;  %v8119_v29 = vor.u32 %v9775_v23, %v8118_v19 }
 0x1fd   :  { %5610 = vmatpush.bf16.msrb.mxu2 %v7751_v59  ;;  %v5382_v59 = vpop.f32.mrf.mxu0  ;;  %v8007_v4 = vor.u32 %v9747_v58, %v8006_v57  ;;  %v8311_v45 = vor.u32 %v9823_v30, %v8310_v24  ;;  %v7974_v43 = vld [vmem:[%s15052_s1 + $0xe48] sm:$0xf]  ;;  %v9819_v52 = vld [vmem:[%s15052_s1 + $0x10d4] sm:$0xf0] }
 0x1fe   :  { %5623 = vmatpush.bf16.msrb.mxu3 %v7879_v60  ;;  %5589 = vmatmul.bf16.vlgmr.msrb.gmra.mxu0 %v10749_v12  ;;  %v8134_v60 = vld [vmem:[%s15052_s1 + $0xf88] sm:$0xf]  ;;  %v13319_v48 = vadd.f32 %v5382_v59, %v5370_v47  ;;  %v9739_v47 = vld [vmem:[%s15052_s1 + $0xe54] sm:$0xf0] }
 0x1ff   :  { %5633 = vmatpush.bf16.msra.mxu0 %v8055_v62  ;;  %5602 = vmatmul.bf16.vlgmr.msrb.gmra.mxu1 %v10762_v17  ;;  %v9779_v62 = vld [vmem:[%s15052_s1 + $0xf94] sm:$0xf0]  ;;  %v8294_v51 = vld [vmem:[%s15052_s1 + $0x10c8] sm:$0xf]  ;;  %v7975_v57 = vor.u32 %v9739_v47, %v7974_v43 }
 0x200   :  { %5646 = vmatpush.bf16.msra.mxu1 %v8183_v3  ;;  %v7831_v3 = vor.u32 %v9703_v46, %v7830_v53  ;;  %v9851_v46 = vld [vmem:[%s15052_s1 + $0x11d4] sm:$0xf0]  ;;  %v8295_v59 = vor.u32 %v9819_v52, %v8294_v51  ;;  %v8406_v6 = vld [vmem:[%s15052_s1 + $0x11a8] sm:$0xf] }
 0x201   :  { %5611 = vmatpush.bf16.msrb.mxu2 %v7735_v11  ;;  %v5371_v11 = vpop.f32.mrf.mxu3  ;;  %v9815_v5 = vld [vmem:[%s15052_s1 + $0x10b4] sm:$0xf0]  ;;  %v8070_v19 = vld [vmem:[%s15052_s1 + $0xf08] sm:$0xf] }
 0x202   :  { %5624 = vmatpush.bf16.msrb.mxu3 %v7863_v14  ;;  %v8135_v14 = vor.u32 %v9779_v62, %v8134_v60  ;;  %v7958_v60 = vld [vmem:[%s15052_s1 + $0xe28] sm:$0xf]  ;;  %v9735_v62 = vld [vmem:[%s15052_s1 + $0xe34] sm:$0xf0] }
 0x203   :  { %5634 = vmatpush.bf16.msra.mxu0 %v8039_v44  ;;  %v9743_v44 = vld [vmem:[%s15052_s1 + $0xe74] sm:$0xf0]  ;;  %v7959_v10 = vor.u32 %v9735_v62, %v7958_v60  ;;  %v7942_v11 = vld [vmem:[%s15052_s1 + $0xe08] sm:$0xf] }
 0x204   :  { %5647 = vmatpush.bf16.msra.mxu1 %v8167_v35  ;;  %v8438_v35 = vld [vmem:[%s15052_s1 + $0x11e8] sm:$0xf]  ;;  %v7991_v39 = vor.u32 %v9743_v44, %v7990_v15  ;;  %v9847_v8 = vld [vmem:[%s15052_s1 + $0x11b4] sm:$0xf0] }
 0x205   :  { %5612 = vmatpush.bf16.msrb.mxu2 %v7719_v49  ;;  %v8102_v49 = vld [vmem:[%s15052_s1 + $0xf48] sm:$0xf]  ;;  %v5384_v53 = vpop.f32.mrf.mxu0  ;;  %v9731_v44 = vld [vmem:[%s15052_s1 + $0xe14] sm:$0xf0]  ;;  %v8407_v24 = vor.u32 %v9847_v8, %v8406_v6 }
 0x206   :  { %5625 = vmatpush.bf16.msrb.mxu3 %v7847_v56  ;;  %v8439_v56 = vor.u32 %v9855_v36, %v8438_v35  ;;  %v9763_v23 = vld [vmem:[%s15052_s1 + $0xf14] sm:$0xf0]  ;;  %v8262_v30 = vld [vmem:[%s15052_s1 + $0x1088] sm:$0xf]  ;;  %v7943_v43 = vor.u32 %v9731_v44, %v7942_v11 }
 0x207   :  { %5635 = vmatpush.bf16.msra.mxu0 %v8023_v50  ;;  %v9771_v50 = vld [vmem:[%s15052_s1 + $0xf54] sm:$0xf0]  ;;  %v8390_v35 = vld [vmem:[%s15052_s1 + $0x1188] sm:$0xf] }
 0x208   :  { %5648 = vmatpush.bf16.msra.mxu1 %v8151_v54  ;;  %v8422_v54 = vld [vmem:[%s15052_s1 + $0x11c8] sm:$0xf]  ;;  %v8103_v58 = vor.u32 %v9771_v50, %v8102_v49  ;;  %v9919_v49 = vld [vmem:[%s15052_s1 + $0x13f4] sm:$0xf0] }
 0x209   :  { %5613 = vmatpush.bf16.msrb.mxu2 %v7703_v55  ;;  %v8086_v55 = vld [vmem:[%s15052_s1 + $0xf28] sm:$0xf]  ;;  %v8423_v63 = vor.u32 %v9851_v46, %v8422_v54  ;;  %v9807_v53 = vld [vmem:[%s15052_s1 + $0x1074] sm:$0xf0] }
 0x20a   :  { %5626 = vmatpush.bf16.msrb.mxu3 %v7831_v3  ;;  %v9767_v3 = vld [vmem:[%s15052_s1 + $0xf34] sm:$0xf0]  ;;  %v8694_v47 = vld [vmem:[%s15052_s1 + $0x13e8] sm:$0xf] }
 0x20b   :  { %5636 = vmatpush.bf16.msra.mxu0 %v8007_v4  ;;  %v8278_v4 = vld [vmem:[%s15052_s1 + $0x10a8] sm:$0xf]  ;;  %v8695_v46 = vor.u32 %v9919_v49, %v8694_v47  ;;  %v9915_v62 = vld [vmem:[%s15052_s1 + $0x13d4] sm:$0xf0] }
 0x20c   :  { %5649 = vmatpush.bf16.msra.mxu1 %v8135_v14  ;;  %v8087_v14 = vor.u32 %v9767_v3, %v8086_v55  ;;  %v8279_v15 = vor.u32 %v9815_v5, %v8278_v4  ;;  %v5395_v36 = vpop.f32.mrf.mxu1  ;;  %v8374_v54 = vld [vmem:[%s15052_s1 + $0x1168] sm:$0xf]  ;;  %v9803_v8 = vld [vmem:[%s15052_s1 + $0x1054] sm:$0xf0] }
 0x20d   :  { %5614 = vmatpush.bf16.msrb.mxu2 %v7687_v34  ;;  %v9811_v34 = vld [vmem:[%s15052_s1 + $0x1094] sm:$0xf0]  ;;  %v8678_v60 = vld [vmem:[%s15052_s1 + $0x13c8] sm:$0xf] }
 0x20e   :  { %5627 = vmatpush.bf16.msrb.mxu3 %v7815_v38  ;;  %v9843_v38 = vld [vmem:[%s15052_s1 + $0x1194] sm:$0xf0]  ;;  %v8263_v50 = vor.u32 %v9811_v34, %v8262_v30  ;;  %v8230_v6 = vld [vmem:[%s15052_s1 + $0x1048] sm:$0xf] }
 0x20f   :  { %5637 = vmatpush.bf16.msra.mxu0 %v7991_v39  ;;  %v8566_v39 = vld [vmem:[%s15052_s1 + $0x12e8] sm:$0xf]  ;;  %v8391_v51 = vor.u32 %v9843_v38, %v8390_v35  ;;  %v9835_v44 = vld [vmem:[%s15052_s1 + $0x1154] sm:$0xf0]  ;;  %v8231_v35 = vor.u32 %v9803_v8, %v8230_v6 }
 0x210   :  { %5650 = vmatpush.bf16.msra.mxu1 %v8119_v29  ;;  %5615 = vmatmul.bf16.vlgmr.msrb.gmra.mxu2 %v10779_v28  ;;  %v9887_v29 = vld [vmem:[%s15052_s1 + $0x12f4] sm:$0xf0]  ;;  %v8518_v49 = vld [vmem:[%s15052_s1 + $0x1288] sm:$0xf] }
 0x211   :  { %5659 = vmatpush.bf16.msra.mxu2 %v8311_v45  ;;  %5628 = vmatmul.bf16.vlgmr.msrb.gmra.mxu3 %v10783_v32  ;;  %v5396_v45 = vadd.f32 %v5395_v36, %v13319_v48  ;;  %v8567_v52 = vor.u32 %v9887_v29, %v8566_v39  ;;  %v8246_v48 = vld [vmem:[%s15052_s1 + $0x1068] sm:$0xf]  ;;  %v9911_v30 = vld [vmem:[%s15052_s1 + $0x13b4] sm:$0xf0] }
 0x212   :  { %5672 = vmatpush.bf16.msra.mxu3 %v8439_v56  ;;  %v8071_v56 = vor.u32 %v9763_v23, %v8070_v19  ;;  %v8247_v55 = vor.u32 %v9807_v53, %v8246_v48  ;;  %v8534_v19 = vld [vmem:[%s15052_s1 + $0x12a8] sm:$0xf]  ;;  %v9879_v23 = vld [vmem:[%s15052_s1 + $0x12b4] sm:$0xf0]  ;;  %v6105_v48 = vld [vmem:[%s15055_s3] sm:$0xf] }
 0x213   :  { %5638 = vmatpush.bf16.msra.mxu0 %v7975_v57  ;;  %v9839_v57 = vld [vmem:[%s15052_s1 + $0x1174] sm:$0xf0]  ;;  %v5408_v3 = vpop.f32.mrf.mxu2  ;;  %v8535_v38 = vor.u32 %v9879_v23, %v8534_v19  ;;  %v8214_v39 = vld [vmem:[%s15052_s1 + $0x1028] sm:$0xf] }
 0x214   :  { %5651 = vmatpush.bf16.msra.mxu1 %v8103_v58  ;;  %v8550_v58 = vld [vmem:[%s15052_s1 + $0x12c8] sm:$0xf]  ;;  %v5421_v5 = vpop.f32.mrf.mxu3  ;;  %v5409_v11 = vadd.f32 %v5408_v3, %v5396_v45  ;;  %v9799_v29 = vld [vmem:[%s15052_s1 + $0x1034] sm:$0xf0] }
 0x215   :  { %5660 = vmatpush.bf16.msra.mxu2 %v8295_v59  ;;  %v9883_v59 = vld [vmem:[%s15052_s1 + $0x12d4] sm:$0xf0]  ;;  %v8342_v45 = vld [vmem:[%s15052_s1 + $0x1128] sm:$0xf] }
 0x216   :  { %5673 = vmatpush.bf16.msra.mxu3 %v8423_v63  ;;  %v8375_v63 = vor.u32 %v9839_v57, %v8374_v54  ;;  %v8551_v4 = vor.u32 %v9883_v59, %v8550_v58  ;;  %v5422_v34 = vadd.f32 %v5421_v5, %v5409_v11  ;;  %v9831_v47 = vld [vmem:[%s15052_s1 + $0x1134] sm:$0xf0]  ;;  %v8215_v54 = vor.u32 %v9799_v29, %v8214_v39  ;;  %v8630_v6 = vld [vmem:[%s15052_s1 + $0x1368] sm:$0xf] }
 0x217   :  { %5639 = vmatpush.bf16.msra.mxu0 %v7959_v10  ;;  %v8358_v10 = vld [vmem:[%s15052_s1 + $0x1148] sm:$0xf]  ;;  %v8343_v57 = vor.u32 %v9831_v47, %v8342_v45  ;;  %v9795_v59 = vld [vmem:[%s15052_s1 + $0x1014] sm:$0xf0] }
 0x218   :  { %5652 = vmatpush.bf16.msra.mxu1 %v8087_v14  ;;  %v8679_v14 = vor.u32 %v9915_v62, %v8678_v60  ;;  %v8359_v36 = vor.u32 %v9835_v44, %v8358_v10  ;;  %v8326_v60 = vld [vmem:[%s15052_s1 + $0x1108] sm:$0xf]  ;;  %v9827_v62 = vld [vmem:[%s15052_s1 + $0x1114] sm:$0xf0] }
 0x219   :  { %5661 = vmatpush.bf16.msra.mxu2 %v8279_v15  ;;  %v5397_v15 = vpop.f32.mrf.mxu1  ;;  %v9871_v5 = vld [vmem:[%s15052_s1 + $0x1274] sm:$0xf0]  ;;  %v8822_v10 = vld [vmem:[%s15052_s1 + $0x14e8] sm:$0xf] }
 0x21a   :  { %5674 = vmatpush.bf16.msra.mxu3 %v8407_v24  ;;  %v8662_v24 = vld [vmem:[%s15052_s1 + $0x13a8] sm:$0xf]  ;;  %v9903_v8 = vld [vmem:[%s15052_s1 + $0x1374] sm:$0xf0]  ;;  %v6107_v15 = vperm.slane %v6105_v48, 0 }
 0x21b   :  { %5640 = vmatpush.bf16.msra.mxu0 %v7943_v43  ;;  %v8663_v43 = vor.u32 %v9911_v30, %v8662_v24  ;;  %v9951_v11 = vld [vmem:[%s15052_s1 + $0x14f4] sm:$0xf0]  ;;  %v8950_v23 = vld [vmem:[%s15052_s1 + $0x15e8] sm:$0xf] }
 0x21c   :  { %5653 = vmatpush.bf16.msra.mxu1 %v8071_v56  ;;  %v9875_v56 = vld [vmem:[%s15052_s1 + $0x1294] sm:$0xf0]  ;;  %v8823_v39 = vor.u32 %v9951_v11, %v8822_v10  ;;  %v8614_v45 = vld [vmem:[%s15052_s1 + $0x1348] sm:$0xf] }
 0x21d   :  { %5662 = vmatpush.bf16.msra.mxu2 %v8263_v50  ;;  %v5434_v50 = vpop.f32.mrf.mxu0  ;;  %v8519_v58 = vor.u32 %v9875_v56, %v8518_v49  ;;  %v9983_v24 = vld [vmem:[%s15052_s1 + $0x15f4] sm:$0xf0]  ;;  %v8806_v56 = vld [vmem:[%s15052_s1 + $0x14c8] sm:$0xf] }
 0x21e   :  { %5675 = vmatpush.bf16.msra.mxu3 %v8391_v51  ;;  %5641 = vmatmul.bf16.vlgmr.msra.gmra.mxu0 %v10781_v31  ;;  %v8646_v51 = vld [vmem:[%s15052_s1 + $0x1388] sm:$0xf]  ;;  %v5435_v53 = vadd.f32 %v5434_v50, %v5422_v34  ;;  %v6108_v34 = vperm.slane %v6105_v48, 1  ;;  %v9867_v29 = vld [vmem:[%s15052_s1 + $0x1254] sm:$0xf0]  ;;  %v8951_v49 = vor.u32 %v9983_v24, %v8950_v23 }
 0x21f   :  { %5685 = vmatpush.bf16.msrb.mxu0 %v8567_v52  ;;  %5654 = vmatmul.bf16.vlgmr.msra.gmra.mxu1 %v10785_v33  ;;  %v9907_v52 = vld [vmem:[%s15052_s1 + $0x1394] sm:$0xf0]  ;;  %v8934_v48 = vld [vmem:[%s15052_s1 + $0x15c8] sm:$0xf] }
 0x220   :  { %5698 = vmatpush.bf16.msrb.mxu1 %v8695_v46  ;;  %v8198_v46 = vld [vmem:[%s15052_s1 + $0x1008] sm:$0xf]  ;;  %v8647_v3 = vor.u32 %v9907_v52, %v8646_v51  ;;  %v9947_v50 = vld [vmem:[%s15052_s1 + $0x14d4] sm:$0xf0] }
 0x221   :  { %5663 = vmatpush.bf16.msra.mxu2 %v8247_v55  ;;  %v5423_v55 = vpop.f32.mrf.mxu3  ;;  %v5447_v44 = vpop.f32.mrf.mxu1  ;;  %v8199_v19 = vor.u32 %v9795_v59, %v8198_v46  ;;  %v8470_v59 = vld [vmem:[%s15052_s1 + $0x1228] sm:$0xf]  ;;  %v9859_v24 = vld [vmem:[%s15052_s1 + $0x1214] sm:$0xf0] }
 0x222   :  { %5676 = vmatpush.bf16.msra.mxu3 %v8375_v63  ;;  %v5410_v63 = vpop.f32.mrf.mxu2  ;;  %v5448_v30 = vadd.f32 %v5447_v44, %v5435_v53  ;;  %v9979_v53 = vld [vmem:[%s15052_s1 + $0x15d4] sm:$0xf0] }
 0x223   :  { %5686 = vmatpush.bf16.msrb.mxu0 %v8551_v4  ;;  %v8502_v4 = vld [vmem:[%s15052_s1 + $0x1268] sm:$0xf]  ;;  %v8935_v55 = vor.u32 %v9979_v53, %v8934_v48  ;;  %v9895_v63 = vld [vmem:[%s15052_s1 + $0x1334] sm:$0xf0] }
 0x224   :  { %5699 = vmatpush.bf16.msrb.mxu1 %v8679_v14  ;;  %v6101_v14 = vmax.f32 %v12351_v27, 0.0  ;;  %v8486_v27 = vld [vmem:[%s15052_s1 + $0x1248] sm:$0xf]  ;;  %v6102_v47 = vmax.f32 %v5448_v30, 0.0  ;;  %v9935_v53 = vld [vmem:[%s15052_s1 + $0x1474] sm:$0xf0] }
 0x225   :  { %5664 = vmatpush.bf16.msra.mxu2 %v8231_v35  ;;  %v8327_v35 = vor.u32 %v9827_v62, %v8326_v60  ;;  %v5436_v51 = vpop.f32.mrf.mxu0  ;;  %v8487_v46 = vor.u32 %v9867_v29, %v8486_v27  ;;  %v9863_v60 = vld [vmem:[%s15052_s1 + $0x1234] sm:$0xf0]  ;;  %v8598_v62 = vld [vmem:[%s15052_s1 + $0x1328] sm:$0xf] }
 0x226   :  { %5677 = vmatpush.bf16.msra.mxu3 %v8359_v36  ;;  %v8503_v36 = vor.u32 %v9871_v5, %v8502_v4  ;;  %v6115_v52 = vmul.f32 %v6107_v15, %v6101_v14  ;;  %v9943_v4 = vld [vmem:[%s15052_s1 + $0x14b4] sm:$0xf0]  ;;  %v8918_v5 = vld [vmem:[%s15052_s1 + $0x15a8] sm:$0xf]  ;;  %v8471_v14 = vor.u32 %v9863_v60, %v8470_v59 }
 0x227   :  { %5687 = vmatpush.bf16.msrb.mxu0 %v8535_v38  ;;  %v8631_v38 = vor.u32 %v9903_v8, %v8630_v6  ;;  %v9975_v6 = vld [vmem:[%s15052_s1 + $0x15b4] sm:$0xf0]  ;;  %v8454_v15 = vld [vmem:[%s15052_s1 + $0x1208] sm:$0xf] }
 0x228   :  { %5700 = vmatpush.bf16.msrb.mxu1 %v8663_v43  ;;  %v9899_v43 = vld [vmem:[%s15052_s1 + $0x1354] sm:$0xf0]  ;;  %v6120_v10 = vsel %vm6119_vm1, %v6115_v52, 0.0  ;;  %v8582_v30 = vld [vmem:[%s15052_s1 + $0x1308] sm:$0xf] }
 0x229   :  { %5665 = vmatpush.bf16.msra.mxu2 %v8215_v54  ;;  %v6116_v54 = vmul.f32 %v6108_v34, %v6102_v47  ;;  %v5449_v8 = vpop.f32.mrf.mxu1  ;;  %v9891_v34 = vld [vmem:[%s15052_s1 + $0x1314] sm:$0xf0]  ;;  %v9078_v29 = vld [vmem:[%s15052_s1 + $0x16e8] sm:$0xf] }
 0x22a   :  { %5678 = vmatpush.bf16.msra.mxu3 %v8343_v57  ;;  %v8615_v57 = vor.u32 %v9899_v43, %v8614_v45  ;;  %v9939_v27 = vld [vmem:[%s15052_s1 + $0x1494] sm:$0xf0]  ;;  %v8455_v43 = vor.u32 %v9859_v24, %v8454_v15  ;;  %v9206_v47 = vld [vmem:[%s15052_s1 + $0x17e8] sm:$0xf] }
 0x22b   :  { %5688 = vmatpush.bf16.msrb.mxu0 %v8519_v58  ;;  %v8807_v58 = vor.u32 %v9947_v50, %v8806_v56  ;;  %v6121_v11 = vsel %vm6119_vm1, %v6116_v54, 0.0  ;;  %v10015_v45 = vld [vmem:[%s15052_s1 + $0x16f4] sm:$0xf0]  ;;  %v8583_v56 = vor.u32 %v9891_v34, %v8582_v30  ;;  %v8758_v51 = vld [vmem:[%s15052_s1 + $0x1468] sm:$0xf] }
 0x22c   :  { %5701 = vmatpush.bf16.msrb.mxu1 %v8647_v3  ;;  %v8790_v3 = vld [vmem:[%s15052_s1 + $0x14a8] sm:$0xf]  ;;  %v13613_v44 = vadd.f32 %v6121_v11, %v6120_v10  ;;  %v9079_v48 = vor.u32 %v10015_v45, %v9078_v29  ;;  %v9967_v59 = vld [vmem:[%s15052_s1 + $0x1574] sm:$0xf0] }
 0x22d   :  { %5666 = vmatpush.bf16.msra.mxu2 %v8199_v19  ;;  %v8599_v19 = vor.u32 %v9895_v63, %v8598_v62  ;;  %v8791_v23 = vor.u32 %v9943_v4, %v8790_v3  ;;  %v8886_v54 = vld [vmem:[%s15052_s1 + $0x1568] sm:$0xf]  ;;  %v10011_v62 = vld [vmem:[%s15052_s1 + $0x16d4] sm:$0xf0]  ;;  %v8759_v3 = vor.u32 %v9935_v53, %v8758_v51 }
 0x22e   :  { %5679 = vmatpush.bf16.msra.mxu3 %v8327_v35  ;;  %v8919_v35 = vor.u32 %v9975_v6, %v8918_v5  ;;  %v9062_v60 = vld [vmem:[%s15052_s1 + $0x16c8] sm:$0xf]  ;;  %v10043_v63 = vld [vmem:[%s15052_s1 + $0x17d4] sm:$0xf0]  ;;  %v8887_v5 = vor.u32 %v9967_v59, %v8886_v54 }
 0x22f   :  { %5689 = vmatpush.bf16.msrb.mxu0 %v8503_v36  ;;  %v8774_v36 = vld [vmem:[%s15052_s1 + $0x1488] sm:$0xf]  ;;  %v9063_v6 = vor.u32 %v10011_v62, %v9062_v60  ;;  %v9931_v10 = vld [vmem:[%s15052_s1 + $0x1454] sm:$0xf0] }
 0x230   :  { %5702 = vmatpush.bf16.msrb.mxu1 %v8631_v38  ;;  %5667 = vmatmul.bf16.vlgmr.msra.gmra.mxu2 %v11149_v9  ;;  %v8902_v38 = vld [vmem:[%s15052_s1 + $0x1588] sm:$0xf]  ;;  %v8775_v50 = vor.u32 %v9939_v27, %v8774_v36  ;;  %v10007_v30 = vld [vmem:[%s15052_s1 + $0x16b4] sm:$0xf0] }
 0x231   :  { %5711 = vmatpush.bf16.msrb.mxu2 %v8823_v39  ;;  %5680 = vmatmul.bf16.vlgmr.msra.gmra.mxu3 %v11162_v18  ;;  %v9971_v39 = vld [vmem:[%s15052_s1 + $0x1594] sm:$0xf0]  ;;  %v8742_v8 = vld [vmem:[%s15052_s1 + $0x1448] sm:$0xf] }
 0x232   :  { %5724 = vmatpush.bf16.msrb.mxu3 %v8951_v49  ;;  %v10047_v49 = vld [vmem:[%s15052_s1 + $0x17f4] sm:$0xf0]  ;;  %v8903_v52 = vor.u32 %v9971_v39, %v8902_v38  ;;  %v8870_v11 = vld [vmem:[%s15052_s1 + $0x1548] sm:$0xf]  ;;  %v8743_v27 = vor.u32 %v9931_v10, %v8742_v8 }
 0x233   :  { %5690 = vmatpush.bf16.msrb.mxu0 %v8487_v46  ;;  %v10067_v46 = vld [vmem:[%s15054_s2] sm:$0xf]  ;;  %v5460_v4 = vpop.f32.mrf.mxu2  ;;  %v9046_v24 = vld [vmem:[%s15052_s1 + $0x16a8] sm:$0xf]  ;;  %v9927_v45 = vld [vmem:[%s15052_s1 + $0x1434] sm:$0xf0] }
 0x234   :  { %5703 = vmatpush.bf16.msrb.mxu1 %v8615_v57  ;;  %v815_v57 = vperm.slane %v10067_v46, 2  ;;  %v5473_v15 = vpop.f32.mrf.mxu3  ;;  %v9174_v34 = vld [vmem:[%s15052_s1 + $0x17a8] sm:$0xf]  ;;  %v9047_v39 = vor.u32 %v10007_v30, %v9046_v24  ;;  %v9923_v62 = vld [vmem:[%s15052_s1 + $0x1414] sm:$0xf0] }
 0x235   :  { %5712 = vmatpush.bf16.msrb.mxu2 %v8807_v58  ;;  %v9207_v58 = vor.u32 %v10047_v49, %v9206_v47  ;;  %v8726_v29 = vld [vmem:[%s15052_s1 + $0x1428] sm:$0xf]  ;;  %v9959_v49 = vld [vmem:[%s15052_s1 + $0x1534] sm:$0xf0]  ;;  %v6264_v24 = vld [vmem:[%s15052_s1 + $0xf8] sm:$0xf0] }
 0x236   :  { %5725 = vmatpush.bf16.msrb.mxu3 %v8935_v55  ;;  %v9190_v55 = vld [vmem:[%s15052_s1 + $0x17c8] sm:$0xf]  ;;  %v8727_v53 = vor.u32 %v9927_v45, %v8726_v29  ;;  %v10027_v45 = vld [vmem:[%s15052_s1 + $0x1754] sm:$0xf0] }
 0x237   :  { %5691 = vmatpush.bf16.msrb.mxu0 %v8471_v14  ;;  %v5461_v14 = vadd.f32 %v5460_v4, %v815_v57  ;;  %v9158_v51 = vld [vmem:[%s15052_s1 + $0x1788] sm:$0xf] }
 0x238   :  { %5704 = vmatpush.bf16.msrb.mxu1 %v8599_v19  ;;  %v9191_v19 = vor.u32 %v10043_v63, %v9190_v55  ;;  %v8710_v54 = vld [vmem:[%s15052_s1 + $0x1408] sm:$0xf]  ;;  %v9955_v63 = vld [vmem:[%s15052_s1 + $0x1514] sm:$0xf0] }
 0x239   :  { %5713 = vmatpush.bf16.msrb.mxu2 %v8791_v23  ;;  %v9963_v23 = vld [vmem:[%s15052_s1 + $0x1554] sm:$0xf0]  ;;  %v5474_v36 = vadd.f32 %v5473_v15, %v5461_v14  ;;  %v8838_v55 = vld [vmem:[%s15052_s1 + $0x1508] sm:$0xf] }
 0x23a   :  { %5726 = vmatpush.bf16.msrb.mxu3 %v8919_v35  ;;  %v10039_v35 = vld [vmem:[%s15052_s1 + $0x17b4] sm:$0xf0]  ;;  %v8871_v38 = vor.u32 %v9963_v23, %v8870_v11  ;;  %v9142_v8 = vld [vmem:[%s15052_s1 + $0x1768] sm:$0xf]  ;;  %v9309_v23 = vld [vmem:[%s15052_s1 + $0xec] sm:$0xf]  ;;  %v8839_v30 = vor.u32 %v9955_v63, %v8838_v55 }
 0x23b   :  { %5692 = vmatpush.bf16.msrb.mxu0 %v8455_v43  ;;  %v8854_v43 = vld [vmem:[%s15052_s1 + $0x1528] sm:$0xf]  ;;  %v9175_v47 = vor.u32 %v10039_v35, %v9174_v34  ;;  %v10031_v11 = vld [vmem:[%s15052_s1 + $0x1774] sm:$0xf0]  ;;  %v6267_v29 = vor.u32 %v9309_v23, %v6264_v24  ;;  %v9301_v55 = vld [vmem:[%s15052_s1 + $0xac] sm:$0xf] }
 0x23c   :  { %5705 = vmatpush.bf16.msrb.mxu1 %v8583_v56  ;;  %v9030_v56 = vld [vmem:[%s15052_s1 + $0x1688] sm:$0xf]  ;;  %v5499_v57 = vpop.f32.mrf.mxu1  ;;  %v8855_v59 = vor.u32 %v9959_v49, %v8854_v43  ;;  %v10063_v15 = vld [vmem:[%s15052_s1 + $0x1874] sm:$0xf0]  ;;  %v9143_v35 = vor.u32 %v10031_v11, %v9142_v8  ;;  %v6232_v63 = vld [vmem:[%s15052_s1 + $0xb8] sm:$0xf0] }
 0x23d   :  { %5714 = vmatpush.bf16.msrb.mxu2 %v8775_v50  ;;  %v10003_v50 = vld [vmem:[%s15052_s1 + $0x1694] sm:$0xf0]  ;;  %v9270_v14 = vld [vmem:[%s15052_s1 + $0x1868] sm:$0xf]  ;;  %v9297_v24 = vld [vmem:[%s15052_s1 + $0x8c] sm:$0xf] }
 0x23e   :  { %5727 = vmatpush.bf16.msrb.mxu3 %v8903_v52  ;;  %5693 = vmatmul.bf16.vlgmr.msrb.gmra.mxu0 %v11160_v16  ;;  %v10035_v52 = vld [vmem:[%s15052_s1 + $0x1794] sm:$0xf0]  ;;  %v9031_v60 = vor.u32 %v10003_v50, %v9030_v56  ;;  %v9254_v43 = vld [vmem:[%s15052_s1 + $0x1848] sm:$0xf]  ;;  %v9305_v56 = vld [vmem:[%s15052_s1 + $0xcc] sm:$0xf] }
 0x23f   :  { %5737 = vmatpush.bf16.msra.mxu0 %v9079_v48  ;;  %5706 = vmatmul.bf16.vlgmr.msrb.gmra.mxu1 %v11173_v25  ;;  %v5486_v48 = vpop.f32.mrf.mxu0  ;;  %v9159_v4 = vor.u32 %v10035_v52, %v9158_v51  ;;  %v6248_v50 = vld [vmem:[%s15052_s1 + $0xd8] sm:$0xf0]  ;;  %v9094_v11 = vld [vmem:[%s15052_s1 + $0x1708] sm:$0xf]  ;;  %v10051_v23 = vld [vmem:[%s15052_s1 + $0x1814] sm:$0xf0] }
 0x240   :  { %5750 = vmatpush.bf16.msra.mxu1 %v9207_v58  ;;  %v5487_v46 = vadd.f32 %v5486_v48, %v5474_v36  ;;  %v5462_v58 = vpop.f32.mrf.mxu2  ;;  %v9271_v36 = vor.u32 %v10063_v15, %v9270_v14  ;;  %v10019_v14 = vld [vmem:[%s15052_s1 + $0x1714] sm:$0xf0]  ;;  %v9222_v15 = vld [vmem:[%s15052_s1 + $0x1808] sm:$0xf] }
 0x241   :  { %5715 = vmatpush.bf16.msrb.mxu2 %v8759_v3  ;;  %v5475_v3 = vpop.f32.mrf.mxu3  ;;  %v6251_v58 = vor.u32 %v9305_v56, %v6248_v50  ;;  %v9293_v56 = vld [vmem:[%s15052_s1 + $0x6c] sm:$0xf]  ;;  %v6200_v50 = vld [vmem:[%s15052_s1 + $0x78] sm:$0xf0] }
 0x242   :  { %5728 = vmatpush.bf16.msrb.mxu3 %v8887_v5  ;;  %v9014_v5 = vld [vmem:[%s15052_s1 + $0x1668] sm:$0xf]  ;;  %v13746_v10 = vadd.f32 %v5499_v57, %v5487_v46  ;;  %v9991_v46 = vld [vmem:[%s15052_s1 + $0x1634] sm:$0xf0] }
 0x243   :  { %5738 = vmatpush.bf16.msra.mxu0 %v9063_v6  ;;  %v9999_v6 = vld [vmem:[%s15052_s1 + $0x1674] sm:$0xf0]  ;;  %v9110_v57 = vld [vmem:[%s15052_s1 + $0x1728] sm:$0xf] }
 0x244   :  { %5751 = vmatpush.bf16.msra.mxu1 %v9191_v19  ;;  %v8711_v19 = vor.u32 %v9923_v62, %v8710_v54  ;;  %v9015_v34 = vor.u32 %v9999_v6, %v9014_v5  ;;  %v5501_v51 = vpop.f32.mrf.mxu1  ;;  %v8982_v54 = vld [vmem:[%s15052_s1 + $0x1628] sm:$0xf]  ;;  %v10055_v62 = vld [vmem:[%s15052_s1 + $0x1834] sm:$0xf0] }
 0x245   :  { %5716 = vmatpush.bf16.msrb.mxu2 %v8743_v27  ;;  %v8998_v27 = vld [vmem:[%s15052_s1 + $0x1648] sm:$0xf]  ;;  %v8983_v3 = vor.u32 %v9991_v46, %v8982_v54  ;;  %v9987_v5 = vld [vmem:[%s15052_s1 + $0x1614] sm:$0xf0]  ;;  %v9369_v54 = vld [vmem:[%s15052_s1 + $0x2cc] sm:$0xf] }
 0x246   :  { %5729 = vmatpush.bf16.msrb.mxu3 %v8871_v38  ;;  %v9995_v38 = vld [vmem:[%s15052_s1 + $0x1654] sm:$0xf0]  ;;  %v6504_v46 = vld [vmem:[%s15052_s1 + $0x2d8] sm:$0xf0] }
 0x247   :  { %5739 = vmatpush.bf16.msra.mxu0 %v9047_v39  ;;  %v9126_v39 = vld [vmem:[%s15052_s1 + $0x1748] sm:$0xf]  ;;  %v5488_v49 = vpop.f32.mrf.mxu0  ;;  %v8999_v52 = vor.u32 %v9995_v38, %v8998_v27  ;;  %v6520_v38 = vld [vmem:[%s15052_s1 + $0x2f8] sm:$0xf0] }
 0x248   :  { %5752 = vmatpush.bf16.msra.mxu1 %v9175_v47  ;;  %v10059_v47 = vld [vmem:[%s15052_s1 + $0x1854] sm:$0xf0]  ;;  %v9127_v48 = vor.u32 %v10027_v45, %v9126_v39  ;;  %v9405_v39 = vld [vmem:[%s15052_s1 + $0x3ec] sm:$0xf]  ;;  %v9095_v45 = vor.u32 %v10019_v14, %v9094_v11  ;;  %v6360_v11 = vld [vmem:[%s15052_s1 + $0x1b8] sm:$0xf0] }
 0x249   :  { %5717 = vmatpush.bf16.msrb.mxu2 %v8727_v53  ;;  %v9255_v53 = vor.u32 %v10059_v47, %v9254_v43  ;;  %v9223_v43 = vor.u32 %v10051_v23, %v9222_v15  ;;  %v9365_v14 = vld [vmem:[%s15052_s1 + $0x2ac] sm:$0xf] }
 0x24a   :  { %5730 = vmatpush.bf16.msrb.mxu3 %v8855_v59  ;;  %v10023_v59 = vld [vmem:[%s15052_s1 + $0x1734] sm:$0xf0]  ;;  %v9397_v15 = vld [vmem:[%s15052_s1 + $0x3ac] sm:$0xf] }
 0x24b   :  { %5740 = vmatpush.bf16.msra.mxu0 %v9031_v60  ;;  %v9238_v60 = vld [vmem:[%s15052_s1 + $0x1828] sm:$0xf]  ;;  %v9111_v6 = vor.u32 %v10023_v59, %v9110_v57  ;;  %v9401_v57 = vld [vmem:[%s15052_s1 + $0x3cc] sm:$0xf] }
 0x24c   :  { %5753 = vmatpush.bf16.msra.mxu1 %v9159_v4  ;;  %v8966_v4 = vld [vmem:[%s15052_s1 + $0x1608] sm:$0xf]  ;;  %v9239_v8 = vor.u32 %v10055_v62, %v9238_v60  ;;  %v6203_v60 = vor.u32 %v9293_v56, %v6200_v50  ;;  %v6600_v56 = vld [vmem:[%s15052_s1 + $0x398] sm:$0xf0] }
 0x24d   :  { %5718 = vmatpush.bf16.msrb.mxu2 %v8711_v19  ;;  %v6235_v19 = vor.u32 %v9301_v55, %v6232_v63  ;;  %v8967_v27 = vor.u32 %v9987_v5, %v8966_v4  ;;  %v9289_v55 = vld [vmem:[%s15052_s1 + $0x4c] sm:$0xf]  ;;  %v6184_v63 = vld [vmem:[%s15052_s1 + $0x58] sm:$0xf0]  ;;  %v6507_v5 = vor.u32 %v9369_v54, %v6504_v46 }
 0x24e   :  { %5731 = vmatpush.bf16.msrb.mxu3 %v8839_v30  ;;  %v6216_v30 = vld [vmem:[%s15052_s1 + $0x98] sm:$0xf0]  ;;  %v9281_v54 = vld [vmem:[%s15052_s1 + $0xc] sm:$0xf] }
 0x24f   :  { %5741 = vmatpush.bf16.msra.mxu0 %v9015_v34  ;;  %v9341_v34 = vld [vmem:[%s15052_s1 + $0x1ec] sm:$0xf]  ;;  %v6219_v47 = vor.u32 %v9297_v24, %v6216_v30  ;;  %v6187_v24 = vor.u32 %v9289_v55, %v6184_v63  ;;  %v6152_v46 = vld [vmem:[%s15052_s1 + $0x18] sm:$0xf0] }
 0x250   :  { %5754 = vmatpush.bf16.msra.mxu1 %v9143_v35  ;;  %5719 = vmatmul.bf16.vlgmr.msrb.gmra.mxu2 %v11190_v37  ;;  %v6392_v35 = vld [vmem:[%s15052_s1 + $0x1f8] sm:$0xf0]  ;;  %v9357_v63 = vld [vmem:[%s15052_s1 + $0x26c] sm:$0xf] }
 0x251   :  { %5767 = vmatpush.bf16.msra.mxu2 %v9271_v36  ;;  %5732 = vmatmul.bf16.vlgmr.msrb.gmra.mxu3 %v11194_v41  ;;  %v9373_v36 = vld [vmem:[%s15052_s1 + $0x2ec] sm:$0xf]  ;;  %v6395_v49 = vor.u32 %v9341_v34, %v6392_v35  ;;  %v6168_v35 = vld [vmem:[%s15052_s1 + $0x38] sm:$0xf0] }
 0x252   :  { %5776 = vmatpush.bf16.msra.mxu3 %v6267_v29  ;;  %v6648_v29 = vld [vmem:[%s15052_s1 + $0x3f8] sm:$0xf0]  ;;  %v6523_v51 = vor.u32 %v9373_v36, %v6520_v38  ;;  %v9285_v34 = vld [vmem:[%s15052_s1 + $0x2c] sm:$0xf] }
 0x253   :  { %5742 = vmatpush.bf16.msra.mxu0 %v8999_v52  ;;  %v6651_v52 = vor.u32 %v9405_v39, %v6648_v29  ;;  %v5512_v59 = vpop.f32.mrf.mxu2  ;;  %v9329_v38 = vld [vmem:[%s15052_s1 + $0x18c] sm:$0xf]  ;;  %v6344_v39 = vld [vmem:[%s15052_s1 + $0x198] sm:$0xf0] }
 0x254   :  { %5755 = vmatpush.bf16.msra.mxu1 %v9127_v48  ;;  %v9337_v48 = vld [vmem:[%s15052_s1 + $0x1cc] sm:$0xf]  ;;  %v5525_v4 = vpop.f32.mrf.mxu3  ;;  %v6328_v55 = vld [vmem:[%s15052_s1 + $0x178] sm:$0xf0] }
 0x255   :  { %5768 = vmatpush.bf16.msra.mxu2 %v9255_v53  ;;  %v6376_v53 = vld [vmem:[%s15052_s1 + $0x1d8] sm:$0xf0]  ;;  %v9361_v29 = vld [vmem:[%s15052_s1 + $0x28c] sm:$0xf] }
 0x256   :  { %5777 = vmatpush.bf16.msra.mxu3 %v6251_v58  ;;  %v6632_v58 = vld [vmem:[%s15052_s1 + $0x3d8] sm:$0xf0]  ;;  %v6379_v62 = vor.u32 %v9337_v48, %v6376_v53  ;;  %v6171_v48 = vor.u32 %v9285_v34, %v6168_v35  ;;  %v6347_v53 = vor.u32 %v9329_v38, %v6344_v39  ;;  %v9385_v35 = vld [vmem:[%s15052_s1 + $0x34c] sm:$0xf] }
 0x257   :  { %5743 = vmatpush.bf16.msra.mxu0 %v8983_v3  ;;  %v5513_v3 = vadd.f32 %v5512_v59, %v13746_v10  ;;  %v6488_v10 = vld [vmem:[%s15052_s1 + $0x2b8] sm:$0xf0]  ;;  %v9433_v38 = vld [vmem:[%s15052_s1 + $0x4cc] sm:$0xf] }
 0x258   :  { %5756 = vmatpush.bf16.msra.mxu1 %v9111_v6  ;;  %v6635_v6 = vor.u32 %v9401_v57, %v6632_v58  ;;  %v6491_v36 = vor.u32 %v9365_v14, %v6488_v10  ;;  %v6440_v34 = vld [vmem:[%s15052_s1 + $0x258] sm:$0xf0] }
 0x259   :  { %5769 = vmatpush.bf16.msra.mxu2 %v9239_v8  ;;  %v9333_v8 = vld [vmem:[%s15052_s1 + $0x1ac] sm:$0xf]  ;;  %v5526_v23 = vadd.f32 %v5525_v4, %v5513_v3  ;;  %v6456_v3 = vld [vmem:[%s15052_s1 + $0x278] sm:$0xf0] }
 0x25a   :  { %5778 = vmatpush.bf16.msra.mxu3 %v6235_v19  ;;  %v6616_v19 = vld [vmem:[%s15052_s1 + $0x3b8] sm:$0xf0]  ;;  %v6363_v30 = vor.u32 %v9333_v8, %v6360_v11  ;;  %v9389_v4 = vld [vmem:[%s15052_s1 + $0x36c] sm:$0xf]  ;;  %v6155_v11 = vor.u32 %v9281_v54, %v6152_v46  ;;  %v6459_v10 = vor.u32 %v9357_v63, %v6456_v3 }
 0x25b   :  { %5744 = vmatpush.bf16.msra.mxu0 %v8967_v27  ;;  %v6619_v27 = vor.u32 %v9397_v15, %v6616_v19  ;;  %v6776_v8 = vld [vmem:[%s15052_s1 + $0x4f8] sm:$0xf0]  ;;  %v9321_v19 = vld [vmem:[%s15052_s1 + $0x14c] sm:$0xf] }
 0x25c   :  { %5757 = vmatpush.bf16.msra.mxu1 %v9095_v45  ;;  %v10068_v45 = vld [vmem:[#allocation1] sm:$0xff]  ;;  %v5527_v57 = vpop.f32.mrf.mxu3  ;;  %v6760_v39 = vld [vmem:[%s15052_s1 + $0x4d8] sm:$0xf0]  ;;  %v9429_v54 = vld [vmem:[%s15052_s1 + $0x4ac] sm:$0xf] }
 0x25d   :  { %5770 = vmatpush.bf16.msra.mxu2 %v9223_v43  ;;  %v5538_v43 = vpop.f32.mrf.mxu0  ;;  %v6744_v46 = vld [vmem:[%s15052_s1 + $0x4b8] sm:$0xf0]  ;;  %v9345_v63 = vld [vmem:[%s15052_s1 + $0x20c] sm:$0xf] }
 0x25e   :  { %5779 = vmatpush.bf16.msra.mxu3 %v6219_v47  ;;  %5745 = vmatmul.bf16.vlgmr.msra.gmra.mxu0 %v11192_v40  ;;  %v6472_v47 = vld [vmem:[%s15052_s1 + $0x298] sm:$0xf0]  ;;  %v5539_v50 = vadd.f32 %v5538_v43, %v5526_v23  ;;  %v9377_v3 = vld [vmem:[%s15052_s1 + $0x30c] sm:$0xf] }
 0x25f   :  { %5789 = vmatpush.bf16.msrb.mxu0 %v6395_v49  ;;  %5758 = vmatmul.bf16.vlgmr.msra.gmra.mxu1 %v11196_v42  ;;  %v9393_v49 = vld [vmem:[%s15052_s1 + $0x38c] sm:$0xf]  ;;  %v6475_v58 = vor.u32 %v9361_v29, %v6472_v47  ;;  %v6312_v23 = vld [vmem:[%s15052_s1 + $0x158] sm:$0xf0] }
 0x260   :  { %5802 = vmatpush.bf16.msrb.mxu1 %v6523_v51  ;;  %9278 = vmatmul.msk.bf16.vlgmr.msra.gmra.mxu2 %vm4798_vm0, %v10068_v45  ;;  %v5551_v51 = vpop.f32.mrf.mxu1  ;;  %v6603_v59 = vor.u32 %v9393_v49, %v6600_v56  ;;  %v6315_v45 = vor.u32 %v9321_v19, %v6312_v23  ;;  %v9317_v49 = vld [vmem:[%s15052_s1 + $0x12c] sm:$0xf]  ;;  %v6296_v56 = vld [vmem:[%s15052_s1 + $0x138] sm:$0xf0] }
 0x261   :  { %5815 = vmatpush.bf16.msrb.mxu2 %v6651_v52  ;;  %v5514_v52 = vpop.f32.mrf.mxu2  ;;  %v6299_v57 = vor.u32 %v9317_v49, %v6296_v56  ;;  %v7032_v19 = vld [vmem:[%s15052_s1 + $0x6f8] sm:$0xf0]  ;;  %v9533_v23 = vld [vmem:[%s15052_s1 + $0x7ec] sm:$0xf] }
 0x262   :  { %5780 = vmatpush.bf16.msra.mxu3 %v6203_v60  ;;  %v13937_v60 = vadd.f32 %v5551_v51, %v5539_v50  ;;  %v9349_v50 = vld [vmem:[%s15052_s1 + $0x22c] sm:$0xf]  ;;  %v6763_v51 = vor.u32 %v9433_v38, %v6760_v39  ;;  %v6424_v52 = vld [vmem:[%s15052_s1 + $0x238] sm:$0xf0] }
 0x263   :  { %5790 = vmatpush.bf16.msrb.mxu0 %v6379_v62  ;;  %v9325_v62 = vld [vmem:[%s15052_s1 + $0x16c] sm:$0xf]  ;;  %v6712_v38 = vld [vmem:[%s15052_s1 + $0x478] sm:$0xf0] }
 0x264   :  { %5803 = vmatpush.bf16.msrb.mxu1 %v6507_v5  ;;  %v6584_v5 = vld [vmem:[%s15052_s1 + $0x378] sm:$0xf0]  ;;  %v6331_v14 = vor.u32 %v9325_v62, %v6328_v55  ;;  %v6427_v62 = vor.u32 %v9349_v50, %v6424_v52  ;;  %v9529_v56 = vld [vmem:[%s15052_s1 + $0x7cc] sm:$0xf] }
 0x265   :  { %5816 = vmatpush.bf16.msrb.mxu2 %v6635_v6  ;;  %v9437_v6 = vld [vmem:[%s15052_s1 + $0x4ec] sm:$0xf]  ;;  %v6587_v15 = vor.u32 %v9389_v4, %v6584_v5  ;;  %v6747_v4 = vor.u32 %v9429_v54, %v6744_v46  ;;  %v6536_v5 = vld [vmem:[%s15052_s1 + $0x318] sm:$0xf0] }
 0x266   :  { %5781 = vmatpush.bf16.msra.mxu3 %v6187_v24  ;;  %v9353_v24 = vld [vmem:[%s15052_s1 + $0x24c] sm:$0xf]  ;;  %v7016_v49 = vld [vmem:[%s15052_s1 + $0x6d8] sm:$0xf0] }
 0x267   :  { %5791 = vmatpush.bf16.msrb.mxu0 %v6363_v30  ;;  %v6779_v30 = vor.u32 %v9437_v6, %v6776_v8  ;;  %v6443_v43 = vor.u32 %v9353_v24, %v6440_v34  ;;  %v9425_v6 = vld [vmem:[%s15052_s1 + $0x48c] sm:$0xf]  ;;  %v6728_v8 = vld [vmem:[%s15052_s1 + $0x498] sm:$0xf0]  ;;  %v6539_v34 = vor.u32 %v9377_v3, %v6536_v5 }
 0x268   :  { %5804 = vmatpush.bf16.msrb.mxu1 %v6491_v36  ;;  %v6568_v36 = vld [vmem:[%s15052_s1 + $0x358] sm:$0xf0]  ;;  %v5553_v29 = vpop.f32.mrf.mxu1  ;;  %v9417_v46 = vld [vmem:[%s15052_s1 + $0x44c] sm:$0xf] }
 0x269   :  { %5817 = vmatpush.bf16.msrb.mxu2 %v6619_v27  ;;  %v5540_v27 = vpop.f32.mrf.mxu0  ;;  %v6571_v47 = vor.u32 %v9385_v35, %v6568_v36  ;;  %v7160_v24 = vld [vmem:[%s15052_s1 + $0x7f8] sm:$0xf0]  ;;  %v6731_v35 = vor.u32 %v9425_v6, %v6728_v8  ;;  %v9525_v3 = vld [vmem:[%s15052_s1 + $0x7ac] sm:$0xf] }
 0x26a   :  { %5782 = vmatpush.bf16.msra.mxu3 %v6171_v48  ;;  %v9381_v48 = vld [vmem:[%s15052_s1 + $0x32c] sm:$0xf]  ;;  %v7163_v29 = vor.u32 %v9533_v23, %v7160_v24  ;;  %v7144_v50 = vld [vmem:[%s15052_s1 + $0x7d8] sm:$0xf0] }
 0x26b   :  { %5792 = vmatpush.bf16.msrb.mxu0 %v6347_v53  ;;  %v6552_v53 = vld [vmem:[%s15052_s1 + $0x338] sm:$0xf0]  ;;  %v9421_v27 = vld [vmem:[%s15052_s1 + $0x46c] sm:$0xf] }
 0x26c   :  { %5805 = vmatpush.bf16.msrb.mxu1 %v6475_v58  ;;  %v9313_v58 = vld [vmem:[%s15052_s1 + $0x10c] sm:$0xf]  ;;  %v6555_v55 = vor.u32 %v9381_v48, %v6552_v53  ;;  %v6715_v52 = vor.u32 %v9421_v27, %v6712_v38  ;;  %v7112_v24 = vld [vmem:[%s15052_s1 + $0x798] sm:$0xf0] }
 0x26d   :  { %5818 = vmatpush.bf16.msrb.mxu2 %v6603_v59  ;;  %v6280_v59 = vld [vmem:[%s15052_s1 + $0x118] sm:$0xf0]  ;;  %v9413_v8 = vld [vmem:[%s15052_s1 + $0x42c] sm:$0xf] }
 0x26e   :  { %5783 = vmatpush.bf16.msra.mxu3 %v6155_v11  ;;  %v9469_v11 = vld [vmem:[%s15052_s1 + $0x5ec] sm:$0xf] }
 0x26f   :  { %5793 = vmatpush.bf16.msrb.mxu0 %v6331_v14  ;;  %v6904_v14 = vld [vmem:[%s15052_s1 + $0x5f8] sm:$0xf0]  ;;  %v9521_v23 = vld [vmem:[%s15052_s1 + $0x78c] sm:$0xf] }
 0x270   :  { %5806 = vmatpush.bf16.msrb.mxu1 %v6459_v10  ;;  %v9501_v10 = vld [vmem:[%s15052_s1 + $0x6ec] sm:$0xf]  ;;  %v6907_v36 = vor.u32 %v9469_v11, %v6904_v14  ;;  %v6680_v11 = vld [vmem:[%s15052_s1 + $0x438] sm:$0xf0] }
 0x271   :  { %5819 = vmatpush.bf16.msrb.mxu2 %v6587_v15  ;;  %5784 = vmatmul.bf16.vlgmr.msra.gmra.mxu3 %v10407_v21  ;;  %v6408_v21 = vld [vmem:[%s15052_s1 + $0x218] sm:$0xf0]  ;;  %v6283_v15 = vor.u32 %v9313_v58, %v6280_v59  ;;  %v7035_v39 = vor.u32 %v9501_v10, %v7032_v19  ;;  %v7147_v59 = vor.u32 %v9529_v56, %v7144_v50  ;;  %v9489_v10 = vld [vmem:[%s15052_s1 + $0x68c] sm:$0xf] }
 0x272   :  { %5828 = vmatpush.bf16.msrb.mxu3 %v6779_v30  ;;  %v6411_v30 = vor.u32 %v9345_v63, %v6408_v21  ;;  %v7000_v21 = vld [vmem:[%s15052_s1 + $0x6b8] sm:$0xf0]  ;;  %v9409_v38 = vld [vmem:[%s15052_s1 + $0x40c] sm:$0xf] }
 0x273   :  { %5794 = vmatpush.bf16.msrb.mxu0 %v6315_v45  ;;  %v9465_v45 = vld [vmem:[%s15052_s1 + $0x5cc] sm:$0xf]  ;;  %v6984_v19 = vld [vmem:[%s15052_s1 + $0x698] sm:$0xf0] }
 0x274   :  { %5807 = vmatpush.bf16.msrb.mxu1 %v6443_v43  ;;  %v6888_v43 = vld [vmem:[%s15052_s1 + $0x5d8] sm:$0xf0]  ;;  %v5577_v54 = vpop.f32.mrf.mxu3  ;;  %v9485_v50 = vld [vmem:[%s15052_s1 + $0x66c] sm:$0xf] }
 0x275   :  { %5820 = vmatpush.bf16.msrb.mxu2 %v6571_v47  ;;  %v9497_v47 = vld [vmem:[%s15052_s1 + $0x6cc] sm:$0xf]  ;;  %v6891_v53 = vor.u32 %v9465_v45, %v6888_v43  ;;  %v6987_v45 = vor.u32 %v9489_v10, %v6984_v19  ;;  %v7115_v43 = vor.u32 %v9521_v23, %v7112_v24  ;;  %v6840_v56 = vld [vmem:[%s15052_s1 + $0x578] sm:$0xf0] }
 0x276   :  { %5829 = vmatpush.bf16.msrb.mxu3 %v6763_v51  ;;  %v5564_v51 = vpop.f32.mrf.mxu2  ;;  %v7019_v58 = vor.u32 %v9497_v47, %v7016_v49  ;;  %v9453_v49 = vld [vmem:[%s15052_s1 + $0x56c] sm:$0xf]  ;;  %v6808_v10 = vld [vmem:[%s15052_s1 + $0x538] sm:$0xf0] }
 0x277   :  { %5795 = vmatpush.bf16.msrb.mxu0 %v6299_v57  ;;  %v5565_v48 = vadd.f32 %v5564_v51, %v13937_v60  ;;  %v6696_v57 = vld [vmem:[%s15052_s1 + $0x458] sm:$0xf0]  ;;  %v9509_v24 = vld [vmem:[%s15052_s1 + $0x72c] sm:$0xf] }
 0x278   :  { %5808 = vmatpush.bf16.msrb.mxu1 %v6427_v62  ;;  %v9461_v62 = vld [vmem:[%s15052_s1 + $0x5ac] sm:$0xf]  ;;  %v6872_v60 = vld [vmem:[%s15052_s1 + $0x5b8] sm:$0xf0]  ;;  %v6699_v5 = vor.u32 %v9417_v46, %v6696_v57  ;;  %v6843_v57 = vor.u32 %v9453_v49, %v6840_v56 }
 0x279   :  { %5821 = vmatpush.bf16.msrb.mxu2 %v6555_v55  ;;  %v9493_v55 = vld [vmem:[%s15052_s1 + $0x6ac] sm:$0xf]  ;;  %v5578_v63 = vadd.f32 %v5577_v54, %v5565_v48  ;;  %v6875_v6 = vor.u32 %v9461_v62, %v6872_v60  ;;  %v6968_v51 = vld [vmem:[%s15052_s1 + $0x678] sm:$0xf0] }
 0x27a   :  { %5830 = vmatpush.bf16.msrb.mxu3 %v6747_v4  ;;  %v7128_v4 = vld [vmem:[%s15052_s1 + $0x7b8] sm:$0xf0]  ;;  %v7003_v14 = vor.u32 %v9493_v55, %v7000_v21  ;;  %v9449_v62 = vld [vmem:[%s15052_s1 + $0x54c] sm:$0xf] }
 0x27b   :  { %5796 = vmatpush.bf16.msrb.mxu0 %v6283_v15  ;;  %v5590_v15 = vpop.f32.mrf.mxu0  ;;  %v7096_v48 = vld [vmem:[%s15052_s1 + $0x778] sm:$0xf0]  ;;  %v9481_v55 = vld [vmem:[%s15052_s1 + $0x64c] sm:$0xf] }
 0x27c   :  { %5809 = vmatpush.bf16.msrb.mxu1 %v6411_v30  ;;  %v5591_v30 = vadd.f32 %v5590_v15, %v5578_v63  ;;  %v7288_v54 = vld [vmem:[%s15052_s1 + $0x8f8] sm:$0xf0]  ;;  %v9477_v15 = vld [vmem:[%s15052_s1 + $0x62c] sm:$0xf] }
 0x27d   :  { %5822 = vmatpush.bf16.msrb.mxu2 %v6539_v34  ;;  %v5603_v34 = vpop.f32.mrf.mxu1  ;;  %v6824_v60 = vld [vmem:[%s15052_s1 + $0x558] sm:$0xf0] }
 0x27e   :  { %5831 = vmatpush.bf16.msrb.mxu3 %v6731_v35  ;;  %5797 = vmatmul.bf16.vlgmr.msrb.gmra.mxu0 %v10418_v26  ;;  %v6856_v26 = vld [vmem:[%s15052_s1 + $0x598] sm:$0xf0]  ;;  %v5566_v35 = vpop.f32.mrf.mxu2  ;;  %v14136_v47 = vadd.f32 %v5603_v34, %v5591_v30  ;;  %v9557_v34 = vld [vmem:[%s15052_s1 + $0x8ac] sm:$0xf] }
 0x27f   :  { %5841 = vmatpush.bf16.msra.mxu0 %v6907_v36  ;;  %5810 = vmatmul.bf16.vlgmr.msrb.gmra.mxu1 %v10405_v20  ;;  %v9457_v20 = vld [vmem:[%s15052_s1 + $0x58c] sm:$0xf]  ;;  %v6683_v36 = vor.u32 %v9413_v8, %v6680_v11  ;;  %v6952_v21 = vld [vmem:[%s15052_s1 + $0x658] sm:$0xf0] }
 0x280   :  { %5854 = vmatpush.bf16.msra.mxu1 %v7035_v39  ;;  %5823 = vmatmul.bf16.vlgmr.msrb.gmra.mxu2 %v10409_v22  ;;  %v7131_v22 = vor.u32 %v9525_v3, %v7128_v4  ;;  %v6859_v27 = vor.u32 %v9457_v20, %v6856_v26  ;;  %v6664_v39 = vld [vmem:[%s15052_s1 + $0x418] sm:$0xf0]  ;;  %v9513_v3 = vld [vmem:[%s15052_s1 + $0x74c] sm:$0xf] }
 0x281   :  { %5867 = vmatpush.bf16.msra.mxu2 %v7163_v29  ;;  %v5579_v29 = vpop.f32.mrf.mxu3  ;;  %v6667_v46 = vor.u32 %v9409_v38, %v6664_v39  ;;  %v7080_v4 = vld [vmem:[%s15052_s1 + $0x758] sm:$0xf0]  ;;  %v9445_v26 = vld [vmem:[%s15052_s1 + $0x52c] sm:$0xf] }
 0x282   :  { %5832 = vmatpush.bf16.msrb.mxu3 %v6715_v52  ;;  %v9517_v52 = vld [vmem:[%s15052_s1 + $0x76c] sm:$0xf]  ;;  %v7272_v8 = vld [vmem:[%s15052_s1 + $0x8d8] sm:$0xf0]  ;;  %v7083_v20 = vor.u32 %v9513_v3, %v7080_v4 }
 0x283   :  { %5842 = vmatpush.bf16.msra.mxu0 %v6891_v53  ;;  %v9565_v53 = vld [vmem:[%s15052_s1 + $0x8ec] sm:$0xf]  ;;  %v6936_v23 = vld [vmem:[%s15052_s1 + $0x638] sm:$0xf0] }
 0x284   :  { %5855 = vmatpush.bf16.msra.mxu1 %v7019_v58  ;;  %v6971_v58 = vor.u32 %v9485_v50, %v6968_v51  ;;  %v7291_v63 = vor.u32 %v9565_v53, %v7288_v54  ;;  %v7064_v30 = vld [vmem:[%s15052_s1 + $0x738] sm:$0xf0]  ;;  %v9473_v29 = vld [vmem:[%s15052_s1 + $0x60c] sm:$0xf] }
 0x285   :  { %5868 = vmatpush.bf16.msra.mxu2 %v7147_v59  ;;  %v7099_v59 = vor.u32 %v9517_v52, %v7096_v48  ;;  %v5605_v11 = vpop.f32.mrf.mxu1  ;;  %v7256_v35 = vld [vmem:[%s15052_s1 + $0x8b8] sm:$0xf0]  ;;  %v7067_v39 = vor.u32 %v9509_v24, %v7064_v30  ;;  %v9553_v50 = vld [vmem:[%s15052_s1 + $0x88c] sm:$0xf] }
 0x286   :  { %5833 = vmatpush.bf16.msrb.mxu3 %v6699_v5  ;;  %v5592_v5 = vpop.f32.mrf.mxu0  ;;  %v6792_v38 = vld [vmem:[%s15052_s1 + $0x518] sm:$0xf0]  ;;  %v7259_v49 = vor.u32 %v9557_v34, %v7256_v35  ;;  %v9597_v52 = vld [vmem:[%s15052_s1 + $0x9ec] sm:$0xf] }
 0x287   :  { %5843 = vmatpush.bf16.msra.mxu0 %v6875_v6  ;;  %v9561_v6 = vld [vmem:[%s15052_s1 + $0x8cc] sm:$0xf]  ;;  %v7048_v56 = vld [vmem:[%s15052_s1 + $0x718] sm:$0xf0] }
 0x288   :  { %5856 = vmatpush.bf16.msra.mxu1 %v7003_v14  ;;  %v6827_v14 = vor.u32 %v9449_v62, %v6824_v60  ;;  %v7275_v19 = vor.u32 %v9561_v6, %v7272_v8  ;;  %v7240_v51 = vld [vmem:[%s15052_s1 + $0x898] sm:$0xf0]  ;;  %v9629_v53 = vld [vmem:[%s15052_s1 + $0xaec] sm:$0xf] }
 0x289   :  { %5869 = vmatpush.bf16.msra.mxu2 %v7131_v22  ;;  %v6955_v22 = vor.u32 %v9481_v55, %v6952_v21  ;;  %v7416_v48 = vld [vmem:[%s15052_s1 + $0x9f8] sm:$0xf0]  ;;  %v7243_v60 = vor.u32 %v9553_v50, %v7240_v51  ;;  %v9593_v5 = vld [vmem:[%s15052_s1 + $0x9cc] sm:$0xf] }
 0x28a   :  { %5834 = vmatpush.bf16.msrb.mxu3 %v6683_v36  ;;  %v6811_v36 = vor.u32 %v9445_v26, %v6808_v10  ;;  %v7419_v55 = vor.u32 %v9597_v52, %v7416_v48  ;;  %v7224_v21 = vld [vmem:[%s15052_s1 + $0x878] sm:$0xf0]  ;;  %v9625_v8 = vld [vmem:[%s15052_s1 + $0xacc] sm:$0xf] }
 0x28b   :  { %5844 = vmatpush.bf16.msra.mxu0 %v6859_v27  ;;  %v9441_v27 = vld [vmem:[%s15052_s1 + $0x50c] sm:$0xf]  ;;  %v7400_v6 = vld [vmem:[%s15052_s1 + $0x9d8] sm:$0xf0] }
 0x28c   :  { %5857 = vmatpush.bf16.msra.mxu1 %v6987_v45  ;;  %v6920_v45 = vld [vmem:[%s15052_s1 + $0x618] sm:$0xf0]  ;;  %v6795_v54 = vor.u32 %v9441_v27, %v6792_v38  ;;  %v9589_v35 = vld [vmem:[%s15052_s1 + $0x9ac] sm:$0xf] }
 0x28d   :  { %5870 = vmatpush.bf16.msra.mxu2 %v7115_v43  ;;  %v9505_v43 = vld [vmem:[%s15052_s1 + $0x70c] sm:$0xf]  ;;  %v7528_v11 = vld [vmem:[%s15052_s1 + $0xad8] sm:$0xf0] }
 0x28e   :  { %5835 = vmatpush.bf16.msrb.mxu3 %v6667_v46  ;;  %v7544_v46 = vld [vmem:[%s15052_s1 + $0xaf8] sm:$0xf0]  ;;  %v7051_v62 = vor.u32 %v9505_v43, %v7048_v56  ;;  %v7531_v30 = vor.u32 %v9625_v8, %v7528_v11  ;;  %v9617_v50 = vld [vmem:[%s15052_s1 + $0xa8c] sm:$0xf] }
 0x28f   :  { %5845 = vmatpush.bf16.msra.mxu0 %v6843_v57  ;;  %v9661_v57 = vld [vmem:[%s15052_s1 + $0xbec] sm:$0xf]  ;;  %v7547_v3 = vor.u32 %v9629_v53, %v7544_v46  ;;  %v7208_v24 = vld [vmem:[%s15052_s1 + $0x858] sm:$0xf0] }
 0x290   :  { %5858 = vmatpush.bf16.msra.mxu1 %v6971_v58  ;;  %v7672_v58 = vld [vmem:[%s15052_s1 + $0xbf8] sm:$0xf0]  ;;  %v9649_v48 = vld [vmem:[%s15052_s1 + $0xb8c] sm:$0xf] }
 0x291   :  { %5871 = vmatpush.bf16.msra.mxu2 %v7099_v59  ;;  %5836 = vmatmul.bf16.vlgmr.msrb.gmra.mxu3 %v10500_v0  ;;  %v6939_v0 = vor.u32 %v9477_v15, %v6936_v23  ;;  %v6923_v59 = vor.u32 %v9473_v29, %v6920_v45  ;;  %v7675_v4 = vor.u32 %v9661_v57, %v7672_v58  ;;  %v9545_v23 = vld [vmem:[%s15052_s1 + $0x84c] sm:$0xf]  ;;  %v7512_v38 = vld [vmem:[%s15052_s1 + $0xab8] sm:$0xf0] }
 0x292   :  { %5880 = vmatpush.bf16.msra.mxu3 %v7291_v63  ;;  %v9549_v63 = vld [vmem:[%s15052_s1 + $0x86c] sm:$0xf]  ;;  %v7403_v15 = vor.u32 %v9593_v5, %v7400_v6  ;;  %v7192_v45 = vld [vmem:[%s15052_s1 + $0x838] sm:$0xf0] }
 0x293   :  { %5846 = vmatpush.bf16.msra.mxu0 %v6827_v14  ;;  %v9657_v14 = vld [vmem:[%s15052_s1 + $0xbcc] sm:$0xf]  ;;  %v7227_v26 = vor.u32 %v9549_v63, %v7224_v21  ;;  %v7368_v56 = vld [vmem:[%s15052_s1 + $0x998] sm:$0xf0] }
 0x294   :  { %5859 = vmatpush.bf16.msra.mxu1 %v6955_v22  ;;  %v7656_v22 = vld [vmem:[%s15052_s1 + $0xbd8] sm:$0xf0]  ;;  %v9613_v6 = vld [vmem:[%s15052_s1 + $0xa6c] sm:$0xf] }
 0x295   :  { %5872 = vmatpush.bf16.msra.mxu2 %v7083_v20  ;;  %v5616_v20 = vpop.f32.mrf.mxu2  ;;  %v7659_v34 = vor.u32 %v9657_v14, %v7656_v22  ;;  %v7496_v52 = vld [vmem:[%s15052_s1 + $0xa98] sm:$0xf0]  ;;  %v9645_v11 = vld [vmem:[%s15052_s1 + $0xb6c] sm:$0xf] }
 0x296   :  { %5881 = vmatpush.bf16.msra.mxu3 %v7275_v19  ;;  %v5617_v10 = vadd.f32 %v5616_v20, %v14136_v47  ;;  %v5629_v19 = vpop.f32.mrf.mxu3  ;;  %v7384_v47 = vld [vmem:[%s15052_s1 + $0x9b8] sm:$0xf0]  ;;  %v7499_v63 = vor.u32 %v9617_v50, %v7496_v52  ;;  %v9693_v22 = vld [vmem:[%s15052_s1 + $0xcec] sm:$0xf] }
 0x297   :  { %5847 = vmatpush.bf16.msra.mxu0 %v6811_v36  ;;  %v9621_v36 = vld [vmem:[%s15052_s1 + $0xaac] sm:$0xf]  ;;  %v7387_v29 = vor.u32 %v9589_v35, %v7384_v47  ;;  %v7624_v53 = vld [vmem:[%s15052_s1 + $0xb98] sm:$0xf0] }
 0x298   :  { %5860 = vmatpush.bf16.msra.mxu1 %v6939_v0  ;;  %v5630_v27 = vadd.f32 %v5629_v19, %v5617_v10  ;;  %v9653_v0 = vld [vmem:[%s15052_s1 + $0xbac] sm:$0xf]  ;;  %v7515_v43 = vor.u32 %v9621_v36, %v7512_v38  ;;  %v7627_v21 = vor.u32 %v9649_v48, %v7624_v53  ;;  %v7352_v5 = vld [vmem:[%s15052_s1 + $0x978] sm:$0xf0] }
 0x299   :  { %5873 = vmatpush.bf16.msra.mxu2 %v7067_v39  ;;  %v7640_v39 = vld [vmem:[%s15052_s1 + $0xbb8] sm:$0xf0]  ;;  %v9641_v47 = vld [vmem:[%s15052_s1 + $0xb4c] sm:$0xf] }
 0x29a   :  { %5882 = vmatpush.bf16.msra.mxu3 %v7259_v49  ;;  %v7643_v49 = vor.u32 %v9653_v0, %v7640_v39  ;;  %v7480_v8 = vld [vmem:[%s15052_s1 + $0xa78] sm:$0xf0]  ;;  %v9689_v38 = vld [vmem:[%s15052_s1 + $0xccc] sm:$0xf] }
 0x29b   :  { %5848 = vmatpush.bf16.msra.mxu0 %v6795_v54  ;;  %v5642_v51 = vpop.f32.mrf.mxu0  ;;  %v7608_v14 = vld [vmem:[%s15052_s1 + $0xb78] sm:$0xf0]  ;;  %v9637_v50 = vld [vmem:[%s15052_s1 + $0xb2c] sm:$0xf] }
 0x29c   :  { %5861 = vmatpush.bf16.msra.mxu1 %v6923_v59  ;;  %v5643_v54 = vadd.f32 %v5642_v51, %v5630_v27  ;;  %v5655_v46 = vpop.f32.mrf.mxu1  ;;  %v7800_v20 = vld [vmem:[%s15052_s1 + $0xcf8] sm:$0xf0]  ;;  %v7611_v19 = vor.u32 %v9645_v11, %v7608_v14  ;;  %v9685_v52 = vld [vmem:[%s15052_s1 + $0xcac] sm:$0xf] }
 0x29d   :  { %5874 = vmatpush.bf16.msra.mxu2 %v7051_v62  ;;  %v5618_v57 = vpop.f32.mrf.mxu2  ;;  %v9537_v62 = vld [vmem:[%s15052_s1 + $0x80c] sm:$0xf]  ;;  %v7464_v35 = vld [vmem:[%s15052_s1 + $0xa58] sm:$0xf0] }
 0x29e   :  { %5883 = vmatpush.bf16.msra.mxu3 %v7243_v60  ;;  %5849 = vmatmul.bf16.vlgmr.msra.gmra.mxu0 %v10504_v2  ;;  %v9541_v2 = vld [vmem:[%s15052_s1 + $0x82c] sm:$0xf]  ;;  %v7176_v60 = vld [vmem:[%s15052_s1 + $0x818] sm:$0xf0] }
 0x29f   :  { %5893 = vmatpush.bf16.msrb.mxu0 %v7419_v55  ;;  %5862 = vmatmul.bf16.vlgmr.msra.gmra.mxu1 %v10498_v61  ;;  %v9585_v61 = vld [vmem:[%s15052_s1 + $0x98c] sm:$0xf]  ;;  %v7195_v58 = vor.u32 %v9541_v2, %v7192_v45  ;;  %v5631_v55 = vpop.f32.mrf.mxu3  ;;  %v7592_v36 = vld [vmem:[%s15052_s1 + $0xb58] sm:$0xf0] }
 0x2a0   :  { %5906 = vmatpush.bf16.msrb.mxu1 %v7547_v3  ;;  %5875 = vmatmul.bf16.vlgmr.msra.gmra.mxu2 %v10502_v1  ;;  %v7211_v1 = vor.u32 %v9545_v23, %v7208_v24  ;;  %v7371_v59 = vor.u32 %v9585_v61, %v7368_v56  ;;  %v14335_v3 = vadd.f32 %v5655_v46, %v5643_v54  ;;  %v9577_v23 = vld [vmem:[%s15052_s1 + $0x94c] sm:$0xf]  ;;  %v7336_v24 = vld [vmem:[%s15052_s1 + $0x958] sm:$0xf0] }
 0x2a1   :  { %5919 = vmatpush.bf16.msrb.mxu2 %v7675_v4  ;;  %v9581_v4 = vld [vmem:[%s15052_s1 + $0x96c] sm:$0xf]  ;;  %v7784_v0 = vld [vmem:[%s15052_s1 + $0xcd8] sm:$0xf0]  ;;  %v7595_v2 = vor.u32 %v9641_v47, %v7592_v36 }
 0x2a2   :  { %5884 = vmatpush.bf16.msra.mxu3 %v7227_v26  ;;  %v7179_v26 = vor.u32 %v9537_v62, %v7176_v60  ;;  %v7355_v10 = vor.u32 %v9581_v4, %v7352_v5  ;;  %v9573_v45 = vld [vmem:[%s15052_s1 + $0x92c] sm:$0xf]  ;;  %v7787_v61 = vor.u32 %v9689_v38, %v7784_v0  ;;  %v7448_v56 = vld [vmem:[%s15052_s1 + $0xa38] sm:$0xf0] }
 0x2a3   :  { %5894 = vmatpush.bf16.msrb.mxu0 %v7403_v15  ;;  %v7483_v15 = vor.u32 %v9613_v6, %v7480_v8  ;;  %v5644_v27 = vpop.f32.mrf.mxu0  ;;  %v7576_v51 = vld [vmem:[%s15052_s1 + $0xb38] sm:$0xf0]  ;;  %v9569_v54 = vld [vmem:[%s15052_s1 + $0x90c] sm:$0xf] }
 0x2a4   :  { %5907 = vmatpush.bf16.msrb.mxu1 %v7531_v30  ;;  %v9609_v30 = vld [vmem:[%s15052_s1 + $0xa4c] sm:$0xf]  ;;  %v5657_v39 = vpop.f32.mrf.mxu1  ;;  %v7768_v48 = vld [vmem:[%s15052_s1 + $0xcb8] sm:$0xf0]  ;;  %v7579_v57 = vor.u32 %v9637_v50, %v7576_v51 }
 0x2a5   :  { %5920 = vmatpush.bf16.msrb.mxu2 %v7659_v34  ;;  %v7803_v34 = vor.u32 %v9693_v22, %v7800_v20  ;;  %v7304_v46 = vld [vmem:[%s15052_s1 + $0x918] sm:$0xf0]  ;;  %v9633_v62 = vld [vmem:[%s15052_s1 + $0xb0c] sm:$0xf]  ;;  %v7771_v60 = vor.u32 %v9685_v52, %v7768_v48 }
 0x2a6   :  { %5885 = vmatpush.bf16.msra.mxu3 %v7211_v1  ;;  %v7339_v1 = vor.u32 %v9577_v23, %v7336_v24  ;;  %v7560_v55 = vld [vmem:[%s15052_s1 + $0xb18] sm:$0xf0]  ;;  %v9725_v4 = vld [vmem:[%s15052_s1 + $0xdec] sm:$0xf]  ;;  %v7307_v8 = vor.u32 %v9569_v54, %v7304_v46 }
 0x2a7   :  { %5895 = vmatpush.bf16.msrb.mxu0 %v7387_v29  ;;  %v7467_v29 = vor.u32 %v9609_v30, %v7464_v35  ;;  %v7928_v5 = vld [vmem:[%s15052_s1 + $0xdf8] sm:$0xf0]  ;;  %v9757_v6 = vld [vmem:[%s15052_s1 + $0xeec] sm:$0xf] }
 0x2a8   :  { %5908 = vmatpush.bf16.msrb.mxu1 %v7515_v43  ;;  %v7320_v43 = vld [vmem:[%s15052_s1 + $0x938] sm:$0xf0]  ;;  %v9789_v14 = vld [vmem:[%s15052_s1 + $0xfec] sm:$0xf] }
 0x2a9   :  { %5921 = vmatpush.bf16.msrb.mxu2 %v7643_v49  ;;  %v9605_v49 = vld [vmem:[%s15052_s1 + $0xa2c] sm:$0xf]  ;;  %v7323_v53 = vor.u32 %v9573_v45, %v7320_v43  ;;  %v8056_v11 = vld [vmem:[%s15052_s1 + $0xef8] sm:$0xf0] }
 0x2aa   :  { %5886 = vmatpush.bf16.msra.mxu3 %v7195_v58  ;;  %v9601_v58 = vld [vmem:[%s15052_s1 + $0xa0c] sm:$0xf]  ;;  %v8184_v22 = vld [vmem:[%s15052_s1 + $0xff8] sm:$0xf0]  ;;  %v8059_v24 = vor.u32 %v9757_v6, %v8056_v11 }
 0x2ab   :  { %5896 = vmatpush.bf16.msrb.mxu0 %v7371_v59  ;;  %v7432_v59 = vld [vmem:[%s15052_s1 + $0xa18] sm:$0xf0]  ;;  %v8187_v30 = vor.u32 %v9789_v14, %v8184_v22  ;;  %v9753_v47 = vld [vmem:[%s15052_s1 + $0xecc] sm:$0xf] }
 0x2ac   :  { %5909 = vmatpush.bf16.msrb.mxu1 %v7499_v63  ;;  %v9681_v63 = vld [vmem:[%s15052_s1 + $0xc8c] sm:$0xf]  ;;  %v7435_v20 = vor.u32 %v9601_v58, %v7432_v59  ;;  %v7736_v23 = vld [vmem:[%s15052_s1 + $0xc78] sm:$0xf0] }
 0x2ad   :  { %5922 = vmatpush.bf16.msrb.mxu2 %v7627_v21  ;;  %v7752_v21 = vld [vmem:[%s15052_s1 + $0xc98] sm:$0xf0]  ;;  %v9785_v27 = vld [vmem:[%s15052_s1 + $0xfcc] sm:$0xf] }
 0x2ae   :  { %5887 = vmatpush.bf16.msra.mxu3 %v7179_v26  ;;  %v7563_v26 = vor.u32 %v9633_v62, %v7560_v55  ;;  %v7912_v35 = vld [vmem:[%s15052_s1 + $0xdd8] sm:$0xf0]  ;;  %v9673_v45 = vld [vmem:[%s15052_s1 + $0xc4c] sm:$0xf] }
 0x2af   :  { %5897 = vmatpush.bf16.msrb.mxu0 %v7355_v10  ;;  %v7755_v10 = vor.u32 %v9681_v63, %v7752_v21  ;;  %v8040_v36 = vld [vmem:[%s15052_s1 + $0xed8] sm:$0xf0]  ;;  %v9749_v50 = vld [vmem:[%s15052_s1 + $0xeac] sm:$0xf] }
 0x2b0   :  { %5910 = vmatpush.bf16.msrb.mxu1 %v7483_v15  ;;  %v7931_v15 = vor.u32 %v9725_v4, %v7928_v5  ;;  %v8168_v38 = vld [vmem:[%s15052_s1 + $0xfd8] sm:$0xf0]  ;;  %v9781_v48 = vld [vmem:[%s15052_s1 + $0xfac] sm:$0xf] }
 0x2b1   :  { %5923 = vmatpush.bf16.msrb.mxu2 %v7611_v19  ;;  %5888 = vmatmul.bf16.vlgmr.msra.gmra.mxu3 %v10738_v7  ;;  %v7451_v7 = vor.u32 %v9605_v49, %v7448_v56  ;;  %v9677_v19 = vld [vmem:[%s15052_s1 + $0xc6c] sm:$0xf]  ;;  %v7720_v43 = vld [vmem:[%s15052_s1 + $0xc58] sm:$0xf0]  ;;  %v8043_v49 = vor.u32 %v9753_v47, %v8040_v36 }
 0x2b2   :  { %5932 = vmatpush.bf16.msrb.mxu3 %v7803_v34  ;;  %v9721_v34 = vld [vmem:[%s15052_s1 + $0xdcc] sm:$0xf]  ;;  %v7739_v39 = vor.u32 %v9677_v19, %v7736_v23  ;;  %v8024_v52 = vld [vmem:[%s15052_s1 + $0xeb8] sm:$0xf0] }
 0x2b3   :  { %5898 = vmatpush.bf16.msrb.mxu0 %v7339_v1  ;;  %v5668_v0 = vpop.f32.mrf.mxu2  ;;  %v9717_v56 = vld [vmem:[%s15052_s1 + $0xdac] sm:$0xf]  ;;  %v7704_v46 = vld [vmem:[%s15052_s1 + $0xc38] sm:$0xf0] }
 0x2b4   :  { %5911 = vmatpush.bf16.msrb.mxu1 %v7467_v29  ;;  %v5669_v1 = vadd.f32 %v5668_v0, %v14335_v3  ;;  %v7915_v29 = vor.u32 %v9721_v34, %v7912_v35  ;;  %v7896_v3 = vld [vmem:[%s15052_s1 + $0xdb8] sm:$0xf0]  ;;  %v9745_v59 = vld [vmem:[%s15052_s1 + $0xe8c] sm:$0xf] }
 0x2b5   :  { %5924 = vmatpush.bf16.msrb.mxu2 %v7595_v2  ;;  %v5681_v2 = vpop.f32.mrf.mxu3  ;;  %v7899_v54 = vor.u32 %v9717_v56, %v7896_v3  ;;  %v7880_v58 = vld [vmem:[%s15052_s1 + $0xd98] sm:$0xf0]  ;;  %v9777_v55 = vld [vmem:[%s15052_s1 + $0xf8c] sm:$0xf] }
 0x2b6   :  { %5933 = vmatpush.bf16.msrb.mxu3 %v7787_v61  ;;  %v8171_v61 = vor.u32 %v9785_v27, %v8168_v38  ;;  %v5682_v51 = vadd.f32 %v5681_v2, %v5669_v1  ;;  %v8136_v63 = vld [vmem:[%s15052_s1 + $0xf98] sm:$0xf0]  ;;  %v9665_v11 = vld [vmem:[%s15052_s1 + $0xc0c] sm:$0xf] }
 0x2b7   :  { %5899 = vmatpush.bf16.msrb.mxu0 %v7323_v53  ;;  %v8152_v53 = vld [vmem:[%s15052_s1 + $0xfb8] sm:$0xf0]  ;;  %v9741_v23 = vld [vmem:[%s15052_s1 + $0xe6c] sm:$0xf] }
 0x2b8   :  { %5912 = vmatpush.bf16.msrb.mxu1 %v7451_v7  ;;  %v8027_v7 = vor.u32 %v9749_v50, %v8024_v52  ;;  %v7688_v14 = vld [vmem:[%s15052_s1 + $0xc18] sm:$0xf0]  ;;  %v9821_v35 = vld [vmem:[%s15052_s1 + $0x10ec] sm:$0xf] }
 0x2b9   :  { %5925 = vmatpush.bf16.msrb.mxu2 %v7579_v57  ;;  %v8155_v57 = vor.u32 %v9781_v48, %v8152_v53  ;;  %v7864_v19 = vld [vmem:[%s15052_s1 + $0xd78] sm:$0xf0]  ;;  %v7691_v36 = vor.u32 %v9665_v11, %v7688_v14  ;;  %v9817_v56 = vld [vmem:[%s15052_s1 + $0x10cc] sm:$0xf] }
 0x2ba   :  { %5934 = vmatpush.bf16.msrb.mxu3 %v7771_v60  ;;  %v8008_v60 = vld [vmem:[%s15052_s1 + $0xe98] sm:$0xf0]  ;;  %v9701_v53 = vld [vmem:[%s15052_s1 + $0xd2c] sm:$0xf] }
 0x2bb   :  { %5900 = vmatpush.bf16.msrb.mxu0 %v7307_v8  ;;  %v5694_v62 = vpop.f32.mrf.mxu0  ;;  %v5670_v5 = vpop.f32.mrf.mxu2  ;;  %v8120_v34 = vld [vmem:[%s15052_s1 + $0xf78] sm:$0xf0]  ;;  %v9853_v14 = vld [vmem:[%s15052_s1 + $0x11ec] sm:$0xf] }
 0x2bc   :  { %5913 = vmatpush.bf16.msrb.mxu1 %v7435_v20  ;;  %v5695_v21 = vadd.f32 %v5694_v62, %v5682_v51  ;;  %v5707_v4 = vpop.f32.mrf.mxu1  ;;  %v8011_v20 = vor.u32 %v9745_v59, %v8008_v60  ;;  %v8312_v47 = vld [vmem:[%s15052_s1 + $0x10f8] sm:$0xf0]  ;;  %v9697_v62 = vld [vmem:[%s15052_s1 + $0xd0c] sm:$0xf] }
 0x2bd   :  { %5926 = vmatpush.bf16.msrb.mxu2 %v7563_v26  ;;  %v5683_v22 = vpop.f32.mrf.mxu3  ;;  %v8139_v26 = vor.u32 %v9777_v55, %v8136_v63  ;;  %v7848_v1 = vld [vmem:[%s15052_s1 + $0xd58] sm:$0xf0]  ;;  %v8315_v2 = vor.u32 %v9821_v35, %v8312_v47  ;;  %v9729_v63 = vld [vmem:[%s15052_s1 + $0xe0c] sm:$0xf] }
 0x2be   :  { %5935 = vmatpush.bf16.msrb.mxu3 %v7755_v10  ;;  %5901 = vmatmul.bf16.vlgmr.msrb.gmra.mxu0 %v10751_v13  ;;  %v7723_v13 = vor.u32 %v9673_v45, %v7720_v43  ;;  %v14534_v10 = vadd.f32 %v5707_v4, %v5695_v21  ;;  %v7976_v45 = vld [vmem:[%s15052_s1 + $0xe58] sm:$0xf0]  ;;  %v9769_v43 = vld [vmem:[%s15052_s1 + $0xf4c] sm:$0xf] }
 0x2bf   :  { %5945 = vmatpush.bf16.msra.mxu0 %v7931_v15  ;;  %5914 = vmatmul.bf16.vlgmr.msrb.gmra.mxu1 %v10749_v12  ;;  %v9713_v12 = vld [vmem:[%s15052_s1 + $0xd8c] sm:$0xf]  ;;  %v8296_v3 = vld [vmem:[%s15052_s1 + $0x10d8] sm:$0xf0] }
 0x2c0   :  { %5958 = vmatpush.bf16.msra.mxu1 %v8059_v24  ;;  %5927 = vmatmul.bf16.vlgmr.msrb.gmra.mxu2 %v10762_v17  ;;  %v9669_v17 = vld [vmem:[%s15052_s1 + $0xc2c] sm:$0xf]  ;;  %v7883_v8 = vor.u32 %v9713_v12, %v7880_v58  ;;  %v7992_v24 = vld [vmem:[%s15052_s1 + $0xe78] sm:$0xf0] }
 0x2c1   :  { %5971 = vmatpush.bf16.msra.mxu2 %v8187_v30  ;;  %v7707_v6 = vor.u32 %v9669_v17, %v7704_v46  ;;  %v9709_v15 = vld [vmem:[%s15052_s1 + $0xd6c] sm:$0xf]  ;;  %v7995_v38 = vor.u32 %v9741_v23, %v7992_v24  ;;  %v8299_v17 = vor.u32 %v9817_v56, %v8296_v3  ;;  %v7960_v46 = vld [vmem:[%s15052_s1 + $0xe38] sm:$0xf0] }
 0x2c2   :  { %5936 = vmatpush.bf16.msrb.mxu3 %v7739_v39  ;;  %v9773_v30 = vld [vmem:[%s15052_s1 + $0xf6c] sm:$0xf]  ;;  %v7867_v27 = vor.u32 %v9709_v15, %v7864_v19  ;;  %v8280_v58 = vld [vmem:[%s15052_s1 + $0x10b8] sm:$0xf0] }
 0x2c3   :  { %5946 = vmatpush.bf16.msra.mxu0 %v7915_v29  ;;  %v8123_v0 = vor.u32 %v9773_v30, %v8120_v34  ;;  %v9705_v39 = vld [vmem:[%s15052_s1 + $0xd4c] sm:$0xf]  ;;  %v7816_v60 = vld [vmem:[%s15052_s1 + $0xd18] sm:$0xf0] }
 0x2c4   :  { %5959 = vmatpush.bf16.msra.mxu1 %v8043_v49  ;;  %v9737_v29 = vld [vmem:[%s15052_s1 + $0xe4c] sm:$0xf]  ;;  %v8104_v49 = vld [vmem:[%s15052_s1 + $0xf58] sm:$0xf0]  ;;  %v5709_v50 = vpop.f32.mrf.mxu1  ;;  %v7851_v51 = vor.u32 %v9705_v39, %v7848_v1 }
 0x2c5   :  { %5972 = vmatpush.bf16.msra.mxu2 %v8171_v61  ;;  %v5696_v61 = vpop.f32.mrf.mxu0  ;;  %v7979_v52 = vor.u32 %v9737_v29, %v7976_v45  ;;  %v8107_v48 = vor.u32 %v9769_v43, %v8104_v49  ;;  %v9813_v12 = vld [vmem:[%s15052_s1 + $0x10ac] sm:$0xf]  ;;  %v7944_v21 = vld [vmem:[%s15052_s1 + $0xe18] sm:$0xf0] }
 0x2c6   :  { %5937 = vmatpush.bf16.msrb.mxu3 %v7723_v13  ;;  %v7832_v13 = vld [vmem:[%s15052_s1 + $0xd38] sm:$0xf0]  ;;  %v9761_v4 = vld [vmem:[%s15052_s1 + $0xf0c] sm:$0xf]  ;;  %v8283_v5 = vor.u32 %v9813_v12, %v8280_v58  ;;  %v7947_v24 = vor.u32 %v9729_v63, %v7944_v21 }
 0x2c7   :  { %5947 = vmatpush.bf16.msra.mxu0 %v7899_v54  ;;  %v9733_v54 = vld [vmem:[%s15052_s1 + $0xe2c] sm:$0xf]  ;;  %v7835_v59 = vor.u32 %v9701_v53, %v7832_v13  ;;  %v8264_v11 = vld [vmem:[%s15052_s1 + $0x1098] sm:$0xf0] }
 0x2c8   :  { %5960 = vmatpush.bf16.msra.mxu1 %v8027_v7  ;;  %v9765_v7 = vld [vmem:[%s15052_s1 + $0xf2c] sm:$0xf]  ;;  %v8440_v22 = vld [vmem:[%s15052_s1 + $0x11f8] sm:$0xf0] }
 0x2c9   :  { %5973 = vmatpush.bf16.msra.mxu2 %v8155_v57  ;;  %v8088_v57 = vld [vmem:[%s15052_s1 + $0xf38] sm:$0xf0]  ;;  %v9917_v19 = vld [vmem:[%s15052_s1 + $0x13ec] sm:$0xf]  ;;  %v8443_v35 = vor.u32 %v9853_v14, %v8440_v22 }
 0x2ca   :  { %5938 = vmatpush.bf16.msrb.mxu3 %v7707_v6  ;;  %v8091_v55 = vor.u32 %v9765_v7, %v8088_v57  ;;  %v8072_v6 = vld [vmem:[%s15052_s1 + $0xf18] sm:$0xf0]  ;;  %v9805_v47 = vld [vmem:[%s15052_s1 + $0x106c] sm:$0xf] }
 0x2cb   :  { %5948 = vmatpush.bf16.msra.mxu0 %v7883_v8  ;;  %v9809_v8 = vld [vmem:[%s15052_s1 + $0x108c] sm:$0xf]  ;;  %v8568_v15 = vld [vmem:[%s15052_s1 + $0x12f8] sm:$0xf0]  ;;  %v8075_v30 = vor.u32 %v9761_v4, %v8072_v6 }
 0x2cc   :  { %5961 = vmatpush.bf16.msra.mxu1 %v8011_v20  ;;  %v9885_v20 = vld [vmem:[%s15052_s1 + $0x12ec] sm:$0xf]  ;;  %v8696_v23 = vld [vmem:[%s15052_s1 + $0x13f8] sm:$0xf0]  ;;  %v8267_v34 = vor.u32 %v9809_v8, %v8264_v11 }
 0x2cd   :  { %5974 = vmatpush.bf16.msra.mxu2 %v8139_v26  ;;  %v7819_v26 = vor.u32 %v9697_v62, %v7816_v60  ;;  %v8424_v39 = vld [vmem:[%s15052_s1 + $0x11d8] sm:$0xf0]  ;;  %v9881_v1 = vld [vmem:[%s15052_s1 + $0x12cc] sm:$0xf] }
 0x2ce   :  { %5939 = vmatpush.bf16.msrb.mxu3 %v7691_v36  ;;  %v8248_v36 = vld [vmem:[%s15052_s1 + $0x1078] sm:$0xf0]  ;;  %v9801_v50 = vld [vmem:[%s15052_s1 + $0x104c] sm:$0xf] }
 0x2cf   :  { %5949 = vmatpush.bf16.msra.mxu0 %v7867_v27  ;;  %v8571_v27 = vor.u32 %v9885_v20, %v8568_v15  ;;  %v8552_v29 = vld [vmem:[%s15052_s1 + $0x12d8] sm:$0xf0]  ;;  %v8251_v49 = vor.u32 %v9805_v47, %v8248_v36  ;;  %v9845_v53 = vld [vmem:[%s15052_s1 + $0x11ac] sm:$0xf] }
 0x2d0   :  { %5962 = vmatpush.bf16.msra.mxu1 %v7995_v38  ;;  %v8699_v38 = vor.u32 %v9917_v19, %v8696_v23  ;;  %v8680_v45 = vld [vmem:[%s15052_s1 + $0x13d8] sm:$0xf0]  ;;  %v9877_v13 = vld [vmem:[%s15052_s1 + $0x12ac] sm:$0xf] }
 0x2d1   :  { %5975 = vmatpush.bf16.msra.mxu2 %v8123_v0  ;;  %5940 = vmatmul.bf16.vlgmr.msrb.gmra.mxu3 %v10779_v28  ;;  %v7963_v28 = vor.u32 %v9733_v54, %v7960_v46  ;;  %v9849_v0 = vld [vmem:[%s15052_s1 + $0x11cc] sm:$0xf]  ;;  %v8664_v7 = vld [vmem:[%s15052_s1 + $0x13b8] sm:$0xf0] }
 0x2d2   :  { %5984 = vmatpush.bf16.msra.mxu3 %v8315_v2  ;;  %v9913_v2 = vld [vmem:[%s15052_s1 + $0x13cc] sm:$0xf]  ;;  %v8427_v56 = vor.u32 %v9849_v0, %v8424_v39  ;;  %v8216_v12 = vld [vmem:[%s15052_s1 + $0x1038] sm:$0xf0] }
 0x2d3   :  { %5950 = vmatpush.bf16.msra.mxu0 %v7851_v51  ;;  %v5720_v43 = vpop.f32.mrf.mxu2  ;;  %v8232_v51 = vld [vmem:[%s15052_s1 + $0x1058] sm:$0xf0]  ;;  %v9909_v46 = vld [vmem:[%s15052_s1 + $0x13ac] sm:$0xf] }
 0x2d4   :  { %5963 = vmatpush.bf16.msra.mxu1 %v7979_v52  ;;  %v5721_v61 = vadd.f32 %v5720_v43, %v14534_v10  ;;  %v5733_v3 = vpop.f32.mrf.mxu3  ;;  %v8555_v52 = vor.u32 %v9881_v1, %v8552_v29  ;;  %v8408_v10 = vld [vmem:[%s15052_s1 + $0x11b8] sm:$0xf0]  ;;  %v9873_v60 = vld [vmem:[%s15052_s1 + $0x128c] sm:$0xf] }
 0x2d5   :  { %5976 = vmatpush.bf16.msra.mxu2 %v8107_v48  ;;  %v8683_v48 = vor.u32 %v9913_v2, %v8680_v45  ;;  %v8411_v57 = vor.u32 %v9845_v53, %v8408_v10  ;;  %v8392_v62 = vld [vmem:[%s15052_s1 + $0x1198] sm:$0xf0]  ;;  %v9793_v14 = vld [vmem:[%s15052_s1 + $0x100c] sm:$0xf] }
 0x2d6   :  { %5985 = vmatpush.bf16.msra.mxu3 %v8299_v17  ;;  %v5734_v54 = vadd.f32 %v5733_v3, %v5721_v61  ;;  %v8536_v17 = vld [vmem:[%s15052_s1 + $0x12b8] sm:$0xf0]  ;;  %v9837_v19 = vld [vmem:[%s15052_s1 + $0x116c] sm:$0xf] }
 0x2d7   :  { %5951 = vmatpush.bf16.msra.mxu0 %v7835_v59  ;;  %v8539_v58 = vor.u32 %v9877_v13, %v8536_v17  ;;  %v8667_v59 = vor.u32 %v9909_v46, %v8664_v7  ;;  %v8648_v63 = vld [vmem:[%s15052_s1 + $0x1398] sm:$0xf0]  ;;  %v9949_v36 = vld [vmem:[%s15052_s1 + $0x14ec] sm:$0xf] }
 0x2d8   :  { %5964 = vmatpush.bf16.msra.mxu1 %v7963_v28  ;;  %v8520_v28 = vld [vmem:[%s15052_s1 + $0x1298] sm:$0xf0]  ;;  %v9833_v29 = vld [vmem:[%s15052_s1 + $0x114c] sm:$0xf] }
 0x2d9   :  { %5977 = vmatpush.bf16.msra.mxu2 %v8091_v55  ;;  %v9905_v55 = vld [vmem:[%s15052_s1 + $0x138c] sm:$0xf]  ;;  %v8200_v22 = vld [vmem:[%s15052_s1 + $0x1018] sm:$0xf0] }
 0x2da   :  { %5986 = vmatpush.bf16.msra.mxu3 %v8283_v5  ;;  %v8651_v15 = vor.u32 %v9905_v55, %v8648_v63  ;;  %v8376_v23 = vld [vmem:[%s15052_s1 + $0x1178] sm:$0xf0]  ;;  %v9865_v45 = vld [vmem:[%s15052_s1 + $0x124c] sm:$0xf] }
 0x2db   :  { %5952 = vmatpush.bf16.msra.mxu0 %v7819_v26  ;;  %v5746_v21 = vpop.f32.mrf.mxu0  ;;  %v5722_v4 = vpop.f32.mrf.mxu2  ;;  %v8523_v26 = vor.u32 %v9873_v60, %v8520_v28  ;;  %v8632_v47 = vld [vmem:[%s15052_s1 + $0x1378] sm:$0xf0]  ;;  %v8379_v0 = vor.u32 %v9837_v19, %v8376_v23  ;;  %v9897_v61 = vld [vmem:[%s15052_s1 + $0x134c] sm:$0xf] }
 0x2dc   :  { %5965 = vmatpush.bf16.msra.mxu1 %v7947_v24  ;;  %v5747_v5 = vadd.f32 %v5746_v21, %v5734_v54  ;;  %v5759_v11 = vpop.f32.mrf.mxu1  ;;  %v5735_v20 = vpop.f32.mrf.mxu3  ;;  %v9869_v24 = vld [vmem:[%s15052_s1 + $0x126c] sm:$0xf]  ;;  %v8360_v2 = vld [vmem:[%s15052_s1 + $0x1158] sm:$0xf0] }
 0x2dd   :  { %5978 = vmatpush.bf16.msra.mxu2 %v8075_v30  ;;  %v9945_v3 = vld [vmem:[%s15052_s1 + $0x14cc] sm:$0xf]  ;;  %v8363_v53 = vor.u32 %v9833_v29, %v8360_v2  ;;  %v8344_v7 = vld [vmem:[%s15052_s1 + $0x1138] sm:$0xf0] }
 0x2de   :  { %5987 = vmatpush.bf16.msra.mxu3 %v8267_v34  ;;  %5953 = vmatmul.bf16.vlgmr.msra.gmra.mxu0 %v10783_v32  ;;  %v8235_v32 = vor.u32 %v9801_v50, %v8232_v51  ;;  %v5760_v30 = vadd.f32 %v5759_v11, %v5747_v5  ;;  %v8504_v34 = vld [vmem:[%s15052_s1 + $0x1278] sm:$0xf0]  ;;  %v9829_v46 = vld [vmem:[%s15052_s1 + $0x112c] sm:$0xf] }
 0x2df   :  { %5997 = vmatpush.bf16.msrb.mxu0 %v8443_v35  ;;  %5966 = vmatmul.bf16.vlgmr.msra.gmra.mxu1 %v10781_v31  ;;  %v9841_v31 = vld [vmem:[%s15052_s1 + $0x118c] sm:$0xf]  ;;  %v8507_v39 = vor.u32 %v9869_v24, %v8504_v34  ;;  %v8808_v50 = vld [vmem:[%s15052_s1 + $0x14d8] sm:$0xf0]  ;;  %v8347_v28 = vor.u32 %v9829_v46, %v8344_v7 }
 0x2e0   :  { %6010 = vmatpush.bf16.msrb.mxu1 %v8571_v27  ;;  %5979 = vmatmul.bf16.vlgmr.msra.gmra.mxu2 %v10785_v33  ;;  %v9797_v33 = vld [vmem:[%s15052_s1 + $0x102c] sm:$0xf]  ;;  %v8395_v8 = vor.u32 %v9841_v31, %v8392_v62  ;;  %v8824_v27 = vld [vmem:[%s15052_s1 + $0x14f8] sm:$0xf0] }
 0x2e1   :  { %6023 = vmatpush.bf16.msrb.mxu2 %v8699_v38  ;;  %v8219_v6 = vor.u32 %v9797_v33, %v8216_v12  ;;  %v9901_v35 = vld [vmem:[%s15052_s1 + $0x136c] sm:$0xf]  ;;  %v8203_v38 = vor.u32 %v9793_v14, %v8200_v22  ;;  %v8827_v43 = vor.u32 %v9949_v36, %v8824_v27  ;;  %v8811_v33 = vor.u32 %v9945_v3, %v8808_v50  ;;  %v8472_v12 = vld [vmem:[%s15052_s1 + $0x1238] sm:$0xf0] }
 0x2e2   :  { %5988 = vmatpush.bf16.msra.mxu3 %v8251_v49  ;;  %v8635_v1 = vor.u32 %v9901_v35, %v8632_v47  ;;  %v8488_v49 = vld [vmem:[%s15052_s1 + $0x1258] sm:$0xf0]  ;;  %v9941_v31 = vld [vmem:[%s15052_s1 + $0x14ac] sm:$0xf] }
 0x2e3   :  { %5998 = vmatpush.bf16.msrb.mxu0 %v8427_v56  ;;  %v8616_v56 = vld [vmem:[%s15052_s1 + $0x1358] sm:$0xf0]  ;;  %v5748_v51 = vpop.f32.mrf.mxu0  ;;  %v5772_v13 = vpop.f32.mrf.mxu2  ;;  %v8491_v54 = vor.u32 %v9865_v45, %v8488_v49  ;;  %v9825_v55 = vld [vmem:[%s15052_s1 + $0x110c] sm:$0xf] }
 0x2e4   :  { %6011 = vmatpush.bf16.msrb.mxu1 %v8555_v52  ;;  %v14784_v52 = vld [vmem:[%s15055_s3] sm:$0xf]  ;;  %v5761_v10 = vpop.f32.mrf.mxu1  ;;  %v8619_v17 = vor.u32 %v9897_v61, %v8616_v56  ;;  %v8792_v62 = vld [vmem:[%s15052_s1 + $0x14b8] sm:$0xf0]  ;;  %v9857_v4 = vld [vmem:[%s15052_s1 + $0x120c] sm:$0xf] }
 0x2e5   :  { %6024 = vmatpush.bf16.msrb.mxu2 %v8683_v48  ;;  %v6109_v48 = vperm.slane %v14784_v52, 2  ;;  %v8328_v63 = vld [vmem:[%s15052_s1 + $0x1118] sm:$0xf0]  ;;  %v8795_v11 = vor.u32 %v9941_v31, %v8792_v62  ;;  %v9937_v22 = vld [vmem:[%s15052_s1 + $0x148c] sm:$0xf] }
 0x2e6   :  { %5989 = vmatpush.bf16.msra.mxu3 %v8235_v32  ;;  %v9861_v32 = vld [vmem:[%s15052_s1 + $0x122c] sm:$0xf]  ;;  %v8456_v5 = vld [vmem:[%s15052_s1 + $0x1218] sm:$0xf0]  ;;  %v8331_v23 = vor.u32 %v9825_v55, %v8328_v63  ;;  %v10070_v10 = vld [vmem:[%s15054_s2] sm:$0xf] }
 0x2e7   :  { %5999 = vmatpush.bf16.msrb.mxu0 %v8411_v57  ;;  %v5773_v57 = vadd.f32 %v5772_v13, %v5760_v30  ;;  %v8584_v14 = vld [vmem:[%s15052_s1 + $0x1318] sm:$0xf0]  ;;  %v10013_v19 = vld [vmem:[%s15052_s1 + $0x16ec] sm:$0xf]  ;;  %v8459_v35 = vor.u32 %v9857_v4, %v8456_v5  ;;  %v816_v13 = vperm.slane %v10070_v10, 3 }
 0x2e8   :  { %6012 = vmatpush.bf16.msrb.mxu1 %v8539_v58  ;;  %v9893_v58 = vld [vmem:[%s15052_s1 + $0x132c] sm:$0xf]  ;;  %v8776_v20 = vld [vmem:[%s15052_s1 + $0x1498] sm:$0xf0] }
 0x2e9   :  { %6025 = vmatpush.bf16.msrb.mxu2 %v8667_v59  ;;  %v8600_v59 = vld [vmem:[%s15052_s1 + $0x1338] sm:$0xf0]  ;;  %v6103_v60 = vmax.f32 %v5773_v57, 0.0  ;;  %v10045_v30 = vld [vmem:[%s15052_s1 + $0x17ec] sm:$0xf]  ;;  %v8779_v27 = vor.u32 %v9937_v22, %v8776_v20 }
 0x2ea   :  { %5990 = vmatpush.bf16.msra.mxu3 %v8219_v6  ;;  %v8603_v21 = vor.u32 %v9893_v58, %v8600_v59  ;;  %v9889_v6 = vld [vmem:[%s15052_s1 + $0x130c] sm:$0xf]  ;;  %v9080_v24 = vld [vmem:[%s15052_s1 + $0x16f8] sm:$0xf0] }
 0x2eb   :  { %6000 = vmatpush.bf16.msrb.mxu0 %v8395_v8  ;;  %v6117_v8 = vmul.f32 %v6109_v48, %v6103_v60  ;;  %v9208_v34 = vld [vmem:[%s15052_s1 + $0x17f8] sm:$0xf0]  ;;  %v8587_v47 = vor.u32 %v9889_v6, %v8584_v14  ;;  %v5774_v36 = vpop.f32.mrf.mxu2  ;;  %v9083_v29 = vor.u32 %v10013_v19, %v9080_v24  ;;  %v9977_v45 = vld [vmem:[%s15052_s1 + $0x15cc] sm:$0xf] }
 0x2ec   :  { %6013 = vmatpush.bf16.msrb.mxu1 %v8523_v26  ;;  %v9981_v26 = vld [vmem:[%s15052_s1 + $0x15ec] sm:$0xf]  ;;  %v9211_v2 = vor.u32 %v10045_v30, %v9208_v34  ;;  %v9064_v56 = vld [vmem:[%s15052_s1 + $0x16d8] sm:$0xf0] }
 0x2ed   :  { %6026 = vmatpush.bf16.msrb.mxu2 %v8651_v15  ;;  %v8952_v15 = vld [vmem:[%s15052_s1 + $0x15f8] sm:$0xf0]  ;;  %v10009_v49 = vld [vmem:[%s15052_s1 + $0x16cc] sm:$0xf] }
 0x2ee   :  { %5991 = vmatpush.bf16.msra.mxu3 %v8203_v38  ;;  %v8955_v38 = vor.u32 %v9981_v26, %v8952_v15  ;;  %v10041_v3 = vld [vmem:[%s15052_s1 + $0x17cc] sm:$0xf]  ;;  %v9192_v50 = vld [vmem:[%s15052_s1 + $0x17d8] sm:$0xf0] }
 0x2ef   :  { %6001 = vmatpush.bf16.msrb.mxu0 %v8379_v0  ;;  %v9933_v0 = vld [vmem:[%s15052_s1 + $0x146c] sm:$0xf]  ;;  %v9195_v46 = vor.u32 %v10041_v3, %v9192_v50  ;;  %v9176_v58 = vld [vmem:[%s15052_s1 + $0x17b8] sm:$0xf0] }
 0x2f0   :  { %6014 = vmatpush.bf16.msrb.mxu1 %v8507_v39  ;;  %v8760_v39 = vld [vmem:[%s15052_s1 + $0x1478] sm:$0xf0]  ;;  %v9929_v48 = vld [vmem:[%s15052_s1 + $0x144c] sm:$0xf] }
 0x2f1   :  { %6027 = vmatpush.bf16.msrb.mxu2 %v8635_v1  ;;  %5992 = vmatmul.bf16.vlgmr.msra.gmra.mxu3 %v11149_v9  ;;  %v8475_v9 = vor.u32 %v9861_v32, %v8472_v12  ;;  %v6123_v1 = vsel %vm6119_vm1, %v6117_v8, 0.0  ;;  %v8763_v51 = vor.u32 %v9933_v0, %v8760_v39  ;;  %v9973_v7 = vld [vmem:[%s15052_s1 + $0x15ac] sm:$0xf]  ;;  %v8920_v32 = vld [vmem:[%s15052_s1 + $0x15b8] sm:$0xf0] }
 0x2f2   :  { %6036 = vmatpush.bf16.msrb.mxu3 %v8827_v43  ;;  %v8936_v43 = vld [vmem:[%s15052_s1 + $0x15d8] sm:$0xf0]  ;;  %v14871_v61 = vadd.f32 %v6123_v1, %v13613_v44  ;;  %v10005_v57 = vld [vmem:[%s15052_s1 + $0x16ac] sm:$0xf] }
 0x2f3   :  { %6002 = vmatpush.bf16.msrb.mxu0 %v8363_v53  ;;  %v8939_v44 = vor.u32 %v9977_v45, %v8936_v43  ;;  %v8744_v53 = vld [vmem:[%s15052_s1 + $0x1458] sm:$0xf0]  ;;  %v10037_v12 = vld [vmem:[%s15052_s1 + $0x17ac] sm:$0xf] }
 0x2f4   :  { %6015 = vmatpush.bf16.msrb.mxu1 %v8491_v54  ;;  %v5785_v54 = vpop.f32.mrf.mxu3  ;;  %v8747_v59 = vor.u32 %v9929_v48, %v8744_v53  ;;  %v8728_v31 = vld [vmem:[%s15052_s1 + $0x1438] sm:$0xf0]  ;;  %v10001_v63 = vld [vmem:[%s15052_s1 + $0x168c] sm:$0xf] }
 0x2f5   :  { %6028 = vmatpush.bf16.msrb.mxu2 %v8619_v17  ;;  %v9067_v17 = vor.u32 %v10009_v49, %v9064_v56  ;;  %v5786_v62 = vadd.f32 %v5785_v54, %v816_v13  ;;  %v8904_v55 = vld [vmem:[%s15052_s1 + $0x1598] sm:$0xf0]  ;;  %v9997_v30 = vld [vmem:[%s15052_s1 + $0x166c] sm:$0xf] }
 0x2f6   :  { %6037 = vmatpush.bf16.msrb.mxu3 %v8811_v33  ;;  %v9048_v33 = vld [vmem:[%s15052_s1 + $0x16b8] sm:$0xf0]  ;;  %v9993_v43 = vld [vmem:[%s15052_s1 + $0x164c] sm:$0xf] }
 0x2f7   :  { %6003 = vmatpush.bf16.msrb.mxu0 %v8347_v28  ;;  %v9051_v60 = vor.u32 %v10005_v57, %v9048_v33  ;;  %v9179_v28 = vor.u32 %v10037_v12, %v9176_v58  ;;  %v9160_v4 = vld [vmem:[%s15052_s1 + $0x1798] sm:$0xf0]  ;;  %v10025_v50 = vld [vmem:[%s15052_s1 + $0x174c] sm:$0xf] }
 0x2f8   :  { %6016 = vmatpush.bf16.msrb.mxu1 %v8475_v9  ;;  %v9032_v9 = vld [vmem:[%s15052_s1 + $0x1698] sm:$0xf0]  ;;  %v10057_v48 = vld [vmem:[%s15052_s1 + $0x184c] sm:$0xf] }
 0x2f9   :  { %6029 = vmatpush.bf16.msrb.mxu2 %v8603_v21  ;;  %v10033_v21 = vld [vmem:[%s15052_s1 + $0x178c] sm:$0xf]  ;;  %v8712_v14 = vld [vmem:[%s15052_s1 + $0x1418] sm:$0xf0]  ;;  %v9035_v15 = vor.u32 %v10001_v63, %v9032_v9 }
 0x2fa   :  { %6038 = vmatpush.bf16.msrb.mxu3 %v8795_v11  ;;  %v9921_v11 = vld [vmem:[%s15052_s1 + $0x140c] sm:$0xf]  ;;  %v9163_v19 = vor.u32 %v10033_v21, %v9160_v4  ;;  %v8888_v24 = vld [vmem:[%s15052_s1 + $0x1578] sm:$0xf0] }
 0x2fb   :  { %6004 = vmatpush.bf16.msrb.mxu0 %v8331_v23  ;;  %v5798_v5 = vpop.f32.mrf.mxu0  ;;  %v9965_v23 = vld [vmem:[%s15052_s1 + $0x156c] sm:$0xf]  ;;  %v9016_v34 = vld [vmem:[%s15052_s1 + $0x1678] sm:$0xf0]  ;;  %v8715_v0 = vor.u32 %v9921_v11, %v8712_v14 }
 0x2fc   :  { %6017 = vmatpush.bf16.msrb.mxu1 %v8459_v35  ;;  %v5799_v22 = vadd.f32 %v5798_v5, %v5786_v62  ;;  %v5811_v20 = vpop.f32.mrf.mxu1  ;;  %v5787_v26 = vpop.f32.mrf.mxu3  ;;  %v10029_v35 = vld [vmem:[%s15052_s1 + $0x176c] sm:$0xf]  ;;  %v8891_v39 = vor.u32 %v9965_v23, %v8888_v24  ;;  %v9019_v1 = vor.u32 %v9997_v30, %v9016_v34  ;;  %v8872_v45 = vld [vmem:[%s15052_s1 + $0x1558] sm:$0xf0] }
 0x2fd   :  { %6030 = vmatpush.bf16.msrb.mxu2 %v8587_v47  ;;  %v9144_v47 = vld [vmem:[%s15052_s1 + $0x1778] sm:$0xf0]  ;;  %v9989_v57 = vld [vmem:[%s15052_s1 + $0x162c] sm:$0xf] }
 0x2fe   :  { %6039 = vmatpush.bf16.msrb.mxu3 %v8779_v27  ;;  %6005 = vmatmul.bf16.vlgmr.msrb.gmra.mxu0 %v11162_v18  ;;  %v8923_v18 = vor.u32 %v9973_v7, %v8920_v32  ;;  %v5812_v36 = vadd.f32 %v5811_v20, %v5799_v22  ;;  %v10061_v27 = vld [vmem:[%s15052_s1 + $0x186c] sm:$0xf]  ;;  %v9000_v3 = vld [vmem:[%s15052_s1 + $0x1658] sm:$0xf0] }
 0x2ff   :  { %6049 = vmatpush.bf16.msra.mxu0 %v8955_v38  ;;  %6018 = vmatmul.bf16.vlgmr.msrb.gmra.mxu1 %v11160_v16  ;;  %v9969_v16 = vld [vmem:[%s15052_s1 + $0x158c] sm:$0xf]  ;;  %v9272_v38 = vld [vmem:[%s15052_s1 + $0x1878] sm:$0xf0] }
 0x300   :  { %6062 = vmatpush.bf16.msra.mxu1 %v9083_v29  ;;  %6031 = vmatmul.bf16.vlgmr.msrb.gmra.mxu2 %v11173_v25  ;;  %v9925_v25 = vld [vmem:[%s15052_s1 + $0x142c] sm:$0xf]  ;;  %v8907_v8 = vor.u32 %v9969_v16, %v8904_v55  ;;  %v9147_v29 = vor.u32 %v10029_v35, %v9144_v47  ;;  %v9275_v56 = vor.u32 %v10061_v27, %v9272_v38  ;;  %v9256_v53 = vld [vmem:[%s15052_s1 + $0x1858] sm:$0xf0] }
 0x301   :  { %6075 = vmatpush.bf16.msra.mxu2 %v9211_v2  ;;  %v8731_v6 = vor.u32 %v9925_v25, %v8728_v31  ;;  %v9961_v2 = vld [vmem:[%s15052_s1 + $0x154c] sm:$0xf]  ;;  %v8856_v32 = vld [vmem:[%s15052_s1 + $0x1538] sm:$0xf0]  ;;  %v9259_v33 = vor.u32 %v10057_v48, %v9256_v53 }
 0x302   :  { %6040 = vmatpush.bf16.msrb.mxu3 %v8763_v51  ;;  %v9128_v51 = vld [vmem:[%s15052_s1 + $0x1758] sm:$0xf0]  ;;  %v8875_v13 = vor.u32 %v9961_v2, %v8872_v45  ;;  %v9957_v7 = vld [vmem:[%s15052_s1 + $0x152c] sm:$0xf] }
 0x303   :  { %6050 = vmatpush.bf16.msra.mxu0 %v8939_v44  ;;  %v5824_v49 = vpop.f32.mrf.mxu2  ;;  %v5800_v10 = vpop.f32.mrf.mxu0  ;;  %v8984_v12 = vld [vmem:[%s15052_s1 + $0x1638] sm:$0xf0]  ;;  %v10021_v58 = vld [vmem:[%s15052_s1 + $0x172c] sm:$0xf]  ;;  %v8859_v31 = vor.u32 %v9957_v7, %v8856_v32 }
 0x304   :  { %6063 = vmatpush.bf16.msra.mxu1 %v9067_v17  ;;  %v5825_v44 = vadd.f32 %v5824_v49, %v5812_v36  ;;  %v5813_v54 = vpop.f32.mrf.mxu1  ;;  %v9003_v17 = vor.u32 %v9993_v43, %v9000_v3  ;;  %v9240_v25 = vld [vmem:[%s15052_s1 + $0x1838] sm:$0xf0]  ;;  %v8987_v62 = vor.u32 %v9989_v57, %v8984_v12  ;;  %v9985_v16 = vld [vmem:[%s15052_s1 + $0x160c] sm:$0xf] }
 0x305   :  { %6076 = vmatpush.bf16.msra.mxu2 %v9195_v46  ;;  %v9131_v46 = vor.u32 %v10025_v50, %v9128_v51  ;;  %v8968_v9 = vld [vmem:[%s15052_s1 + $0x1618] sm:$0xf0]  ;;  %v10017_v21 = vld [vmem:[%s15052_s1 + $0x170c] sm:$0xf] }
 0x306   :  { %6041 = vmatpush.bf16.msrb.mxu3 %v8747_v59  ;;  %v9112_v59 = vld [vmem:[%s15052_s1 + $0x1738] sm:$0xf0]  ;;  %v10049_v5 = vld [vmem:[%s15052_s1 + $0x180c] sm:$0xf]  ;;  %v8971_v11 = vor.u32 %v9985_v16, %v8968_v9 }
 0x307   :  { %6051 = vmatpush.bf16.msra.mxu0 %v8923_v18  ;;  %v10053_v18 = vld [vmem:[%s15052_s1 + $0x182c] sm:$0xf]  ;;  %v9096_v4 = vld [vmem:[%s15052_s1 + $0x1718] sm:$0xf0] }
 0x308   :  { %6064 = vmatpush.bf16.msra.mxu1 %v9051_v60  ;;  %v9115_v60 = vor.u32 %v10021_v58, %v9112_v59  ;;  %v9243_v63 = vor.u32 %v10053_v18, %v9240_v25  ;;  %v9099_v14 = vor.u32 %v10017_v21, %v9096_v4 }
 0x309   :  { %6077 = vmatpush.bf16.msra.mxu2 %v9179_v28  ;;  %v9953_v28 = vld [vmem:[%s15052_s1 + $0x150c] sm:$0xf] }
 0x30a   :  { %6042 = vmatpush.bf16.msrb.mxu3 %v8731_v6  ;;  %v9224_v6 = vld [vmem:[%s15052_s1 + $0x1818] sm:$0xf0] }
 0x30b   :  { %6052 = vmatpush.bf16.msra.mxu0 %v8907_v8  ;;  %v5826_v55 = vpop.f32.mrf.mxu2  ;;  %v9227_v22 = vor.u32 %v10049_v5, %v9224_v6 }
 0x30c   :  { %6065 = vmatpush.bf16.msra.mxu1 %v9035_v15  ;;  %v10071_v15 = vld [vmem:[#allocation1] sm:$0xff] }
 0x30d   :  { %6078 = vmatpush.bf16.msra.mxu2 %v9163_v19 }
 0x30e   :  { %6043 = vmatpush.bf16.msrb.mxu3 %v8715_v0 }
 0x30f   :  { %6053 = vmatpush.bf16.msra.mxu0 %v8891_v39 }
 0x310   :  { %6066 = vmatpush.bf16.msra.mxu1 %v9019_v1 }
 0x311   :  { %6079 = vmatpush.bf16.msra.mxu2 %v9147_v29  ;;  %6044 = vmatmul.bf16.vlgmr.msrb.gmra.mxu3 %v11190_v37  ;;  %v8840_v37 = vld [vmem:[%s15052_s1 + $0x1518] sm:$0xf0] }
 0x312   :  { %6092 = vmatpush.bf16.msra.mxu3 %v9275_v56  ;;  %v8843_v8 = vor.u32 %v9953_v28, %v8840_v37 }
 0x313   :  { %6054 = vmatpush.bf16.msra.mxu0 %v8875_v13 }
 0x314   :  { %6067 = vmatpush.bf16.msra.mxu1 %v9003_v17  ;;  %v5837_v20 = vpop.f32.mrf.mxu3 }
 0x315   :  { %6080 = vmatpush.bf16.msra.mxu2 %v9131_v46  ;;  %v5838_v26 = vadd.f32 %v5837_v20, %v5825_v44 }
 0x316   :  { %6093 = vmatpush.bf16.msra.mxu3 %v9259_v33 }
 0x317   :  { %6055 = vmatpush.bf16.msra.mxu0 %v8859_v31  ;;  %v10_v31 = vstv %s15056_s4 }
 0x318   :  { %6068 = vmatpush.bf16.msra.mxu1 %v8987_v62  ;;  %11 = vst [vmem:[#allocation2] sm:$0x1] %v10_v31 }
 0x319   :  { %6081 = vmatpush.bf16.msra.mxu2 %v9115_v60 }
 0x31a   :  { %6094 = vmatpush.bf16.msra.mxu3 %v9243_v63 }
 0x31b   :  { %6056 = vmatpush.bf16.msra.mxu0 %v8843_v8  ;;  %v5850_v19 = vpop.f32.mrf.mxu0 }
 0x31c   :  { %6069 = vmatpush.bf16.msra.mxu1 %v8971_v11  ;;  %v5851_v23 = vadd.f32 %v5850_v19, %v5838_v26  ;;  %v5863_v24 = vpop.f32.mrf.mxu1  ;;  %v5839_v30 = vpop.f32.mrf.mxu3  ;;  %v6110_v26 = vperm.slane %v14784_v52, 3 }
 0x31d   :  { %6082 = vmatpush.bf16.msra.mxu2 %v9099_v14 }
 0x31e   :  { %6095 = vmatpush.bf16.msra.mxu3 %v9227_v22  ;;  %6057 = vmatmul.bf16.vlgmr.msra.gmra.mxu0 %v11194_v41  ;;  %v5864_v34 = vadd.f32 %v5863_v24, %v5851_v23 }
 0x31f   :  { %6070 = vmatmul.bf16.vlgmr.msra.gmra.mxu1 %v11192_v40 }
 0x320   :  { %6083 = vmatmul.bf16.vlgmr.msra.gmra.mxu2 %v11196_v42 }
 0x321   :  { %9279 = vmatmul.msk.bf16.vlgmr.msra.gmra.mxu3 %vm4798_vm0, %v10071_v15 }
 0x323   :  { %v5876_v35 = vpop.f32.mrf.mxu2  ;;  %v5852_v36 = vpop.f32.mrf.mxu0 }
 0x324   :  { %v5877_v47 = vadd.f32 %v5876_v35, %v5864_v34  ;;  %v5865_v27 = vpop.f32.mrf.mxu1  ;;  %v10064_v35 = vld [vmem:[#allocation2] ss:$0 sm:$0xff] }
 0x32b   :  { %v5878_v38 = vpop.f32.mrf.mxu2 }
 0x334   :  { %v5889_v0 = vpop.f32.mrf.mxu3 }
 0x335   :  { %v5890_v41 = vadd.f32 %v5889_v0, %v5877_v47 }
 0x33b   :  { %v5902_v39 = vpop.f32.mrf.mxu0 }
 0x33c   :  { %v5903_v1 = vadd.f32 %v5902_v39, %v5890_v41  ;;  %v5915_v40 = vpop.f32.mrf.mxu1  ;;  %v5891_v29 = vpop.f32.mrf.mxu3 }
 0x33e   :  { %v5916_v42 = vadd.f32 %v5915_v40, %v5903_v1 }
 0x343   :  { %v5928_v2 = vpop.f32.mrf.mxu2  ;;  %v5904_v43 = vpop.f32.mrf.mxu0 }
 0x344   :  { %v5929_v45 = vadd.f32 %v5928_v2, %v5916_v42  ;;  %v5917_v49 = vpop.f32.mrf.mxu1 }
 0x34b   :  { %v5930_v56 = vpop.f32.mrf.mxu2 }
 0x354   :  { %v5941_v3 = vpop.f32.mrf.mxu3 }
 0x355   :  { %v5942_v33 = vadd.f32 %v5941_v3, %v5929_v45 }
 0x35b   :  { %v5954_v50 = vpop.f32.mrf.mxu0 }
 0x35c   :  { %v5967_v51 = vpop.f32.mrf.mxu1  ;;  %v5943_v44 = vpop.f32.mrf.mxu3  ;;  %v5955_v58 = vadd.f32 %v5954_v50, %v5942_v33 }
 0x35e   :  { %v5968_v18 = vadd.f32 %v5967_v51, %v5955_v58 }
 0x363   :  { %v5980_v48 = vpop.f32.mrf.mxu2  ;;  %v5956_v53 = vpop.f32.mrf.mxu0 }
 0x364   :  { %v5969_v10 = vpop.f32.mrf.mxu1  ;;  %v5981_v25 = vadd.f32 %v5980_v48, %v5968_v18 }
 0x36b   :  { %v5982_v13 = vpop.f32.mrf.mxu2 }
 0x374   :  { %v5993_v54 = vpop.f32.mrf.mxu3 }
 0x375   :  { %v5994_v62 = vadd.f32 %v5993_v54, %v5981_v25 }
 0x37b   :  { %v6006_v17 = vpop.f32.mrf.mxu0 }
 0x37c   :  { %v6019_v46 = vpop.f32.mrf.mxu1  ;;  %v5995_v7 = vpop.f32.mrf.mxu3  ;;  %v6007_v60 = vadd.f32 %v6006_v17, %v5994_v62 }
 0x37e   :  { %v6020_v37 = vadd.f32 %v6019_v46, %v6007_v60 }
 0x383   :  { %v6032_v32 = vpop.f32.mrf.mxu2  ;;  %v6008_v57 = vpop.f32.mrf.mxu0 }
 0x384   :  { %v6021_v12 = vpop.f32.mrf.mxu1  ;;  %v6033_v16 = vadd.f32 %v6032_v32, %v6020_v37 }
 0x38b   :  { %v6034_v59 = vpop.f32.mrf.mxu2 }
 0x394   :  { %v6045_v28 = vpop.f32.mrf.mxu3 }
 0x395   :  { %v6046_v55 = vadd.f32 %v6045_v28, %v6033_v16 }
 0x39b   :  { %v6058_v63 = vpop.f32.mrf.mxu0 }
 0x39c   :  { %v6071_v9 = vpop.f32.mrf.mxu1  ;;  %v6059_v21 = vadd.f32 %v6058_v63, %v6046_v55  ;;  %v6047_v4 = vpop.f32.mrf.mxu3 }
 0x39e   :  { %v6072_v5 = vadd.f32 %v6071_v9, %v6059_v21 }
 0x3a3   :  { %v6084_v6 = vpop.f32.mrf.mxu2  ;;  %v6060_v11 = vpop.f32.mrf.mxu0 }
 0x3a4   :  { %v6085_v8 = vadd.f32 %v6084_v6, %v6072_v5  ;;  %v6073_v14 = vpop.f32.mrf.mxu1  ;;  %v6097_v22 = vpop.f32.mrf.mxu3 }
 0x3a6   :  { %v6098_v20 = vadd.f32 %v6097_v22, %v6085_v8 }
 0x3a8   :  { %v6104_v15 = vmax.f32 %v6098_v20, 0.0 }
 0x3aa   :  { %v6118_v23 = vmul.f32 %v6110_v26, %v6104_v15 }
 0x3ab   :  { %v6086_v19 = vpop.f32.mrf.mxu2 }
 0x3ac   :  { %v6125_v24 = vsel %vm6119_vm1, %v6118_v23, 0.0  ;;  %v6099_v30 = vpop.f32.mrf.mxu3 }
 0x3ad   :  { %v6126_v34 = vadd.f32 %v6125_v24, %v14871_v61 }
 0x3af   :  { %6127 = vadd.xlane.f32.xlu0 %v6126_v34 }
 0x422   :  { %v6128_v47 = vpop.xlane.xlu0 %6127 }
 0x423   :  { %v6133_v36 = vadd.f32 %v10064_v35, %v6128_v47 }
 0x425   :  { %6135 = vst.msk [vmem:[%s15057_s5] sm:$0x3] %vm6134_vm2, %v6133_v36 }

</bundles_post_ra>
